<compile_context>
chip_gen: v7x
topology: tpu7x:2x2x1
jax: 0.10.0
libtpu: 0.0.40
codegen_flags: <defaults>
</compile_context>

<pallas_src>
import math

import jax
import jax.numpy as jnp
import numpy as np
from jax.experimental import pallas as pl
from jax.experimental.pallas import tpu as pltpu
from jax.scipy.special import digamma, gammaln

_LANES = 128
_SUBLANES = 8


def _round_up(x, m):
    return ((x + m - 1) // m) * m


# ----------------------------------------------------------------------------
# Pallas kernel: per-tile (TN rows) computation of r and log_Z.
#   logit[n,k]  = x_n . m_k + c_k              (c_k folds the Gaussian constant
#                                               and E[log pi_k])
#   r[n,:]      = softmax_k(logit[n,:])        (single exp, exact divide)
#   log_Z[n]    = logsumexp_k(logit[n,:]) - 0.5*||x_n||^2
# ----------------------------------------------------------------------------
def _dpmm_kernel(x_ref, m_ref, c_ref, r_ref, logz_ref):
    x = x_ref[...]          # (TN, D) bf16 (streamed narrow)
    m = m_ref[...]          # (K, D)  bf16 (resident across the grid)
    c = c_ref[...]          # (1, K)  f32 fused per-component constant + E[log pi]

    # x @ m^T on the MXU, f32 accumulation.
    xm = jax.lax.dot_general(
        x, m, (((1,), (1,)), ((), ())), preferred_element_type=jnp.float32
    )                                                               # (TN, K) f32
    logit = xm + c                                                  # (TN, K)

    # Stable softmax with a single exp over the (TN, K) tile.
    mmax = jnp.max(logit, axis=-1, keepdims=True)                   # (TN, 1)
    p = jnp.exp(logit - mmax)                                       # (TN, K)
    s = jnp.sum(p, axis=-1, keepdims=True)                          # (TN, 1)
    r_ref[...] = p / s                                              # exact rows-sum-to-1

    # Per-row -0.5*||x||^2 only enters log_Z (it cancels in the softmax).
    # Upcast to f32 before squaring: x itself streams as bf16.
    xf = x.astype(jnp.float32)
    xsq = jnp.sum(xf * xf, axis=-1, keepdims=True)                  # (TN, 1)
    logz_ref[...] = mmax + jnp.log(s) - 0.5 * xsq                   # (TN, 1)


# ----------------------------------------------------------------------------
# VMEM budget / tile selection (per-generation).
# ----------------------------------------------------------------------------
def _vmem_budget_bytes():
    try:
        kind = jax.devices()[0].device_kind.lower()
    except Exception:
        kind = ""
    if "v7" in kind or "7x" in kind:
        return 40 << 20          # v7x: only 64 MiB physical per TensorCore
    return 64 << 20              # v5e / v6e: 128 MiB physical, 16/32 MiB scoped default


def _choose_tile(N, D, K, x_itemsize, budget_bytes):
    # Double-buffered per-row VMEM cost with correct lane padding:
    #   x tile  : round_up(D,128) * itemsize
    #   r tile  : round_up(K,128) * 4   (f32, lane-padded)
    #   logZ    : 128 * 4               (width-1 column lane-padded)
    per_row = (2 * _round_up(D, _LANES) * x_itemsize
               + 2 * _round_up(K, _LANES) * 4
               + 2 * _LANES * 4)
    usable = int(budget_bytes * 0.85) - (2 << 20)    # resident m/c + slack
    tn = max(per_row, usable) // per_row
    tn = min(int(tn), 32768, _round_up(N, _SUBLANES))
    tn = max(_SUBLANES, (tn // _SUBLANES) * _SUBLANES)
    return int(tn)


def _dpmm_pallas_call(x, m, c, *, tn, vmem_limit):
    N, D = x.shape
    K = m.shape[0]
    grid = (pl.cdiv(N, tn),)     # partial last block is masked by Pallas

    return pl.pallas_call(
        _dpmm_kernel,
        out_shape=(
            jax.ShapeDtypeStruct((N, K), jnp.float32),   # r
            jax.ShapeDtypeStruct((N, 1), jnp.float32),   # log_Z
        ),
        grid_spec=pltpu.PrefetchScalarGridSpec(
            num_scalar_prefetch=0,
            grid=grid,
            in_specs=[
                pl.BlockSpec((tn, D), lambda i: (i, 0)),   # x tile (bf16 stream)
                pl.BlockSpec((K, D), lambda i: (0, 0)),    # component means (resident)
                pl.BlockSpec((1, K), lambda i: (0, 0)),    # fused per-component constant
            ],
            out_specs=(
                pl.BlockSpec((tn, K), lambda i: (i, 0)),
                pl.BlockSpec((tn, 1), lambda i: (i, 0)),
            ),
        ),
        compiler_params=pltpu.CompilerParams(
            dimension_semantics=("parallel",),
            vmem_limit_bytes=int(vmem_limit),
        ),
    )(x, m, c)


# ----------------------------------------------------------------------------
# Plain-JAX glue: SBP expected log weights, Beta KL, Gaussian KL, final ELBO.
# ----------------------------------------------------------------------------
def _sbp_expected_log_pi(u, w):
    # E[log v_k] + sum_{j<k} E[log(1-v_j)], v_k ~ Beta(u_k, w_k)
    e_log_v = digamma(u) - digamma(u + w)
    e_log_1mv = digamma(w) - digamma(u + w)
    cum = jnp.concatenate([jnp.zeros((1,), e_log_1mv.dtype), jnp.cumsum(e_log_1mv)[:-1]])
    return e_log_v + cum


def _beta_kl(uq, wq, up, wp):
    lnB = lambda a, b: gammaln(a) + gammaln(b) - gammaln(a + b)
    return (lnB(up, wp) - lnB(uq, wq)
            + (uq - up) * digamma(uq)
            + (wq - wp) * digamma(wq)
            + (up - uq + wp - wq) * digamma(uq + wq))


def _gauss_mean_kl(mq, lamq, mp, lamp):
    # KL( N(mq, 1/lamq I) || N(mp, 1/lamp I) ), per component
    D = mq.shape[-1]
    diff2 = jnp.sum((mq - mp) ** 2, axis=-1)
    return 0.5 * (D * lamp / lamq + lamp * diff2 - D + D * jnp.log(lamq / lamp))


def dpmm_forward(x, mix_var_eta, mix_prior_eta, em_var_eta, em_prior_eta,
                 *, tn=None, stream_dtype=jnp.bfloat16):
    """Returns (r, loss, log_Z) matching DPMMFunction.forward.

    mix_*_eta  = [u, w]         Beta stick concentrations, each (K,)
    em_*_eta   = [lam*m, lam]   natural params of the Gaussian mean posterior,
                                 shapes (K, D) and (K,)
    """
    N, D = x.shape
    u_q, w_q = mix_var_eta
    u_p, w_p = mix_prior_eta
    K = u_q.shape[0]

    # emission natural -> common
    lam_q = em_var_eta[1]
    m_q = em_var_eta[0] / lam_q[:, None]
    lam_p = em_prior_eta[1]
    m_p = em_prior_eta[0] / lam_p[:, None]

    # pi_contribution = CategoricalSBP.expected_log_params(...)[0]
    pi_contribution = _sbp_expected_log_pi(u_q, w_q)                          # (K,)

    # Fused per-component constant: Gaussian E[log N] constant + E[log pi_k].
    # Kept in f32 (only the x.m_k dot runs in bf16 on the MXU).
    c = (pi_contribution
         - 0.5 * jnp.sum(m_q * m_q, axis=-1)
         - 0.5 * D / lam_q
         - 0.5 * D * math.log(2.0 * math.pi))                                 # (K,)

    x_in = x.astype(stream_dtype)
    m_in = m_q.astype(stream_dtype)

    budget = _vmem_budget_bytes()
    if tn is None:
        tn = _choose_tile(N, D, K, jnp.dtype(stream_dtype).itemsize, budget)

    r, log_z = _dpmm_pallas_call(
        x_in, m_in, c.reshape(1, K).astype(jnp.float32),
        tn=tn, vmem_limit=budget)
    log_z = log_z[:, 0]

    kl_sbp = jnp.sum(_beta_kl(u_q, w_q, u_p, w_p))
    kl_em = jnp.sum(_gauss_mean_kl(m_q, lam_q, m_p, lam_p))

    # sum_k r*(dc + pi - log_r) == log_Z per row  =>  data term is sum(log_Z).
    elbo = jnp.sum(log_z) - kl_sbp - kl_em
    loss = -elbo / (N * D)                 # -elbo / numel(data)
    return r, loss, log_z


# ----------------------------------------------------------------------------
# Pure-JAX reference (mirrors DPMMFunction.forward) for a correctness check.
# ----------------------------------------------------------------------------
def dpmm_forward_ref(x, mix_var_eta, mix_prior_eta, em_var_eta, em_prior_eta):
    N, D = x.shape
    u_q, w_q = mix_var_eta
    u_p, w_p = mix_prior_eta
    lam_q = em_var_eta[1]
    m_q = em_var_eta[0] / lam_q[:, None]
    lam_p = em_prior_eta[1]
    m_p = em_prior_eta[0] / lam_p[:, None]

    pi = _sbp_expected_log_pi(u_q, w_q)
    dc = (x @ m_q.T
          - 0.5 * jnp.sum(x * x, -1, keepdims=True)
          - 0.5 * jnp.sum(m_q * m_q, -1)[None, :]
          - 0.5 * D / lam_q[None, :]
          - 0.5 * D * math.log(2.0 * math.pi))
    logit = pi[None, :] + dc
    log_z = jax.scipy.special.logsumexp(logit, axis=-1)
    log_r = logit - log_z[:, None]
    r = jnp.exp(log_r)
    elbo = (jnp.sum(r * dc)
            - jnp.sum(_beta_kl(u_q, w_q, u_p, w_p))
            - jnp.sum(_gauss_mean_kl(m_q, lam_q, m_p, lam_p))
            + jnp.sum(r.sum(0) * pi)
            - jnp.sum(r * log_r))
    return r, -elbo / (N * D), log_z


if __name__ == "__main__":
    # Small, DPMM-shaped problem: N data points (deliberately NOT a tile
    # multiple, to exercise the ragged last block), D features, K components.
    N, D, K = 1000, 32, 16
    alphaDP = 1.0

    key = jax.random.PRNGKey(0)
    k_data, k_means = jax.random.split(key)

    x = jax.random.normal(k_data, (N, D), dtype=jnp.float32)

    # Mixture-weight (stick-breaking Beta) params.
    mix_prior_eta = [jnp.ones((K,), jnp.float32), alphaDP * jnp.ones((K,), jnp.float32)]
    mix_var_eta = [1.5 * jnp.ones((K,), jnp.float32), 1.2 * alphaDP * jnp.ones((K,), jnp.float32)]

    # Emission (unit-variance Gaussian, Gaussian posterior on the mean).
    lam_p = jnp.ones((K,), jnp.float32)
    mu_p = jnp.zeros((K, D), jnp.float32)
    em_prior_eta = [lam_p[:, None] * mu_p, lam_p]

    lam_q = 2.0 * jnp.ones((K,), jnp.float32)
    mu_q = 0.5 * jax.random.normal(k_means, (K, D), dtype=jnp.float32)
    em_var_eta = [lam_q[:, None] * mu_q, lam_q]

    r, loss, log_z = dpmm_forward(x, mix_var_eta, mix_prior_eta, em_var_eta, em_prior_eta)
    jax.block_until_ready((r, loss, log_z))

    # Correctness check against the pure-JAX f32 reference of the PyTorch
    # forward (tolerance accounts for bf16 streaming of x and m).
    r_ref, loss_ref, log_z_ref = dpmm_forward_ref(
        x, mix_var_eta, mix_prior_eta, em_var_eta, em_prior_eta)
    np.testing.assert_allclose(np.asarray(r), np.asarray(r_ref), rtol=5e-3, atol=5e-3)
    np.testing.assert_allclose(np.asarray(log_z), np.asarray(log_z_ref), rtol=5e-3, atol=5e-3)
    np.testing.assert_allclose(np.asarray(loss), np.asarray(loss_ref), rtol=5e-3, atol=5e-3)

    print("KERNEL_OK")
</pallas_src>

<mosaic_0001>
module attributes {stable_mosaic.version = 11 : i64} {
  func.func @_dpmm_kernel(%arg0: i32, %arg1: memref<1000x32xbf16, #tpu.memory_space<vmem>>, %arg2: memref<16x32xbf16, #tpu.memory_space<vmem>>, %arg3: memref<1x16xf32, #tpu.memory_space<vmem>>, %arg4: memref<1000x16xf32, #tpu.memory_space<vmem>>, %arg5: memref<1000x1xf32, #tpu.memory_space<vmem>>) attributes {dimension_semantics = [#tpu.dimension_semantics<parallel>], iteration_bounds = array<i64: 1>, scalar_prefetch = 0 : i64, scratch_operands = 0 : i64, tpu.core_type = #tpu.core_type<tc>, window_params = [{transform_indices = @transform_0, window_bounds = array<i64: 1000, 32>}, {pipeline_mode = #tpu.pipeline_mode<synchronous>, transform_indices = @transform_1, window_bounds = array<i64: 16, 32>}, {pipeline_mode = #tpu.pipeline_mode<synchronous>, transform_indices = @transform_2, window_bounds = array<i64: 1, 16>}, {transform_indices = @transform_3, window_bounds = array<i64: 1000, 16>}, {transform_indices = @transform_4, window_bounds = array<i64: 1000, 1>}]} {
    %c0 = arith.constant 0 : index
    %c0_0 = arith.constant 0 : index
    %0 = vector.load %arg1[%c0, %c0_0] : memref<1000x32xbf16, #tpu.memory_space<vmem>>, vector<1000x32xbf16>
    %c0_1 = arith.constant 0 : index
    %c0_2 = arith.constant 0 : index
    %1 = vector.load %arg2[%c0_1, %c0_2] : memref<16x32xbf16, #tpu.memory_space<vmem>>, vector<16x32xbf16>
    %c0_3 = arith.constant 0 : index
    %c0_4 = arith.constant 0 : index
    %2 = vector.load %arg3[%c0_3, %c0_4] : memref<1x16xf32, #tpu.memory_space<vmem>>, vector<1x16xf32>
    %cst = arith.constant dense<0.000000e+00> : vector<1000x16xf32>
    %3 = tpu.matmul %0, %1, %cst {dimension_numbers = #tpu.dot_dimension_numbers<[1], [1], [0], [0], [0, 0, 1, 0], [], []>} : vector<1000x32xbf16>, vector<16x32xbf16>, vector<1000x16xf32> -> vector<1000x16xf32>
    %4 = vector.broadcast %2 : vector<1x16xf32> to vector<1000x16xf32>
    %5 = arith.addf %3, %4 : vector<1000x16xf32>
    %cst_5 = arith.constant dense<0xFF800000> : vector<1000xf32>
    %6 = vector.multi_reduction <maximumf>, %5, %cst_5 [1] : vector<1000x16xf32> to vector<1000xf32>
    %7 = vector.shape_cast %6 : vector<1000xf32> to vector<1000x1xf32>
    %8 = vector.broadcast %7 : vector<1000x1xf32> to vector<1000x16xf32>
    %9 = arith.subf %5, %8 : vector<1000x16xf32>
    %10 = math.exp %9 : vector<1000x16xf32>
    %cst_6 = arith.constant dense<0.000000e+00> : vector<1000xf32>
    %11 = vector.multi_reduction <add>, %10, %cst_6 [1] : vector<1000x16xf32> to vector<1000xf32>
    %12 = vector.shape_cast %11 : vector<1000xf32> to vector<1000x1xf32>
    %13 = vector.broadcast %12 : vector<1000x1xf32> to vector<1000x16xf32>
    %14 = arith.divf %10, %13 : vector<1000x16xf32>
    %c0_7 = arith.constant 0 : index
    %c0_8 = arith.constant 0 : index
    %15 = vector.load %arg4[%c0_7, %c0_8] : memref<1000x16xf32, #tpu.memory_space<vmem>>, vector<1000x16xf32>
    tpu.vector_store %arg4[%c0_7, %c0_8], %14 {strides = array<i32>} : memref<1000x16xf32, #tpu.memory_space<vmem>>, vector<1000x16xf32>,
    %16 = arith.extf %0 : vector<1000x32xbf16> to vector<1000x32xf32>
    %17 = arith.mulf %16, %16 : vector<1000x32xf32>
    %cst_9 = arith.constant dense<0.000000e+00> : vector<1000xf32>
    %18 = vector.multi_reduction <add>, %17, %cst_9 [1] : vector<1000x32xf32> to vector<1000xf32>
    %19 = vector.shape_cast %18 : vector<1000xf32> to vector<1000x1xf32>
    %20 = math.log %12 : vector<1000x1xf32>
    %21 = arith.addf %7, %20 : vector<1000x1xf32>
    %cst_10 = arith.constant 5.000000e-01 : f32
    %22 = vector.broadcast %cst_10 : f32 to vector<1000x1xf32>
    %23 = arith.mulf %22, %19 : vector<1000x1xf32>
    %24 = arith.subf %21, %23 : vector<1000x1xf32>
    %c0_11 = arith.constant 0 : index
    %c0_12 = arith.constant 0 : index
    %25 = vector.load %arg5[%c0_11, %c0_12] : memref<1000x1xf32, #tpu.memory_space<vmem>>, vector<1000x1xf32>
    tpu.vector_store %arg5[%c0_11, %c0_12], %24 {strides = array<i32>} : memref<1000x1xf32, #tpu.memory_space<vmem>>, vector<1000x1xf32>,
    return
  }
  func.func @transform_0(%arg0: i32) -> (i32, i32) {
    %c0_i32 = arith.constant 0 : i32
    %c0_i32_0 = arith.constant 0 : i32
    return %arg0, %c0_i32 : i32, i32
  }
  func.func @transform_1(%arg0: i32) -> (i32, i32) {
    %c0_i32 = arith.constant 0 : i32
    %c0_i32_0 = arith.constant 0 : i32
    %c0_i32_1 = arith.constant 0 : i32
    return %c0_i32, %c0_i32_0 : i32, i32
  }
  func.func @transform_2(%arg0: i32) -> (i32, i32) {
    %c0_i32 = arith.constant 0 : i32
    %c0_i32_0 = arith.constant 0 : i32
    %c0_i32_1 = arith.constant 0 : i32
    return %c0_i32, %c0_i32_0 : i32, i32
  }
  func.func @transform_3(%arg0: i32) -> (i32, i32) {
    %c0_i32 = arith.constant 0 : i32
    %c0_i32_0 = arith.constant 0 : i32
    return %arg0, %c0_i32 : i32, i32
  }
  func.func @transform_4(%arg0: i32) -> (i32, i32) {
    %c0_i32 = arith.constant 0 : i32
    %c0_i32_0 = arith.constant 0 : i32
    return %arg0, %c0_i32 : i32, i32
  }
}

</mosaic_0001>

<bundles_post_ra>
// kernel: tpu_custom_call.1
= control target key start
LH: loop header
LB: loop body
LE: loop exit
PB: predicated region body
PF: predicated region fallthrough
CT: control target
= control target key end

     0   :  { %10 = vsyncpa [#allocation3], 0  ;;  %s8945_s0 = inlined_call_operand.hbm [shape: bf16[1000,32], index: 0, kind: input, shape index: {}]   ;;  %s8946_s1 = inlined_call_operand.hbm [shape: bf16[16,32], index: 1, kind: input, shape index: {}]   ;;  %s8947_s2 = inlined_call_operand.hbm [shape: f32[1,16], index: 2, kind: input, shape index: {}]   ;;  %s8948_s3 = inlined_call_operand.hbm [shape: f32[1000,16], index: 3, kind: output, shape index: {0}]   ;;  %s8949_s4 = inlined_call_operand.hbm [shape: f32[1000,1], index: 4, kind: output, shape index: {1}]  }
   0x1   :  { %11 = vsyncpa [#allocation6], 0 }
   0x2   :  { %12 = vsyncpa [#allocation4], 0 }
   0x3   :  { %13 = vsyncpa [#allocation10], 0  ;;  %s5634_s15 = smov [#allocation5]   ;;  %s5635_s17 = smov [#allocation2]  }
   0x4   :  { %s31_s16 = sshll.u32 %s5634_s15, 4  ;;  %s19_s18 = sshll.u32 %s5635_s17, 4  ;;  %s32_s16 = int_to_ptr.vmem [resolvable:$true] %s31_s16  ;;  %s5670_s18 = int_to_ptr.vmem [resolvable:$true] %s19_s18 }
   0x5   :  { %s5516_s21 = scalar_lea.hbm %s8946_s1, 128 }
   0x6   :  { %p5517_p0 = scmp.ne.s32.totalorder %s8946_s1, %s5516_s21  ;;  %p5520_p1 = scmp.lt.u32.totalorder %s5516_s21, %s8946_s1 }
   0x8   :  { %p5522_p2 = pnand %p5520_p1, %p5517_p0 }
   0xa   :  { %5525 = shalt.err (!%p5522_p2)
}
   0xb   :  { %s5526_s26 = scalar_lea.vmem %s32_s16, 128  ;;  %p5531_p4 = scmp.lt.s32.totalorder %s32_s16, %s32_s16 }
   0xc   :  { %p5527_p3 = scmp.ne.s32.totalorder %s32_s16, %s5526_s26  ;;  %p5532_p5 = scmp.lt.s32.totalorder %s5526_s26, %s5526_s26 }
   0xe   :  { %p5533_p6 = por %p5532_p5, %p5531_p4 }
  0x10   :  { %p5534_p7 = pnand %p5533_p6, %p5527_p3 }
  0x12   :  { %5537 = shalt.err (!%p5534_p7)
}
  0x13   :  { %s5636_s27 = smov 64   ;;  %s5637_s28 = smov 4  }
  0x14   :  { %37 = dma.hbm_to_vmem [thread:$0]  %s8946_s1, 128, %s32_s16, [#allocation6], %s5636_s27, %s5636_s27, %s5637_s28  }
  0x15   :  { %s5538_s7 = scalar_lea.hbm %s8945_s0, 8000 }
  0x16   :  { %p5539_p8 = scmp.ne.s32.totalorder %s8945_s0, %s5538_s7  ;;  %p5542_p9 = scmp.lt.u32.totalorder %s5538_s7, %s8945_s0 }
  0x18   :  { %p5544_p10 = pnand %p5542_p9, %p5539_p8 }
  0x1a   :  { %5547 = shalt.err (!%p5544_p10)
}
  0x1b   :  { %s5548_s12 = scalar_lea.vmem %s5670_s18, 8000  ;;  %p5553_p12 = scmp.lt.s32.totalorder %s5670_s18, %s5670_s18 }
  0x1c   :  { %p5549_p11 = scmp.ne.s32.totalorder %s5670_s18, %s5548_s12  ;;  %p5554_p13 = scmp.lt.s32.totalorder %s5548_s12, %s5548_s12 }
  0x1e   :  { %p5555_p0 = por %p5554_p13, %p5553_p12 }
  0x20   :  { %p5556_p1 = pnand %p5555_p0, %p5549_p11 }
  0x22   :  { %5559 = shalt.err (!%p5556_p1)
}
  0x23   :  { %25 = dma.hbm_to_vmem [thread:$0]  %s8945_s0, 8000, %s5670_s18, [#allocation3], %s5636_s27, %s5636_s27, %s5637_s28  }
  0x24   :  { %s5638_s14 = smov [#allocation7]   ;;  %s5560_s19 = scalar_lea.hbm %s8947_s2, 16 }
  0x25   :  { %s44_s15 = sshll.u32 %s5638_s14, 4  ;;  %p5561_p2 = scmp.ne.s32.totalorder %s8947_s2, %s5560_s19  ;;  %s45_s15 = int_to_ptr.vmem [resolvable:$true] %s44_s15 }
  0x26   :  { %p5564_p3 = scmp.lt.u32.totalorder %s5560_s19, %s8947_s2 }
  0x28   :  { %p5566_p4 = pnand %p5564_p3, %p5561_p2 }
  0x2a   :  { %5569 = shalt.err (!%p5566_p4)
}
  0x2b   :  { %s5570_s24 = scalar_lea.vmem %s45_s15, 16  ;;  %s5574_s0 = scalar_lea.vmem %s45_s15, 32 }
  0x2c   :  { %p5571_p5 = scmp.ne.s32.totalorder %s45_s15, %s5570_s24  ;;  %p5575_p6 = scmp.lt.s32.totalorder %s45_s15, %s45_s15 }
  0x2d   :  { %p5576_p7 = scmp.lt.s32.totalorder %s5574_s0, %s5570_s24 }
  0x2f   :  { %p5577_p8 = por %p5576_p7, %p5575_p6 }
  0x31   :  { %p5578_p9 = pnand %p5577_p8, %p5571_p5 }
  0x33   :  { %5581 = shalt.err (!%p5578_p9)
}
  0x34   :  { %47 = dma.hbm_to_vmem [thread:$0]  %s8947_s2, 16, %s45_s15, [#allocation6]  }
  0x35   :  { %5626 = dma.done.wait [#allocation3], 8000  }
  0x36   :  { %5627 = vsyncadd [#allocation3], 4294959296 }
  0x37   :  { %5628 = dma.done.wait [#allocation6], 144  }
  0x38   :  { %5629 = vsyncadd [#allocation6], 4294967152  ;;  %v8950_v0 = vmov 0.0   ;;  %vm5640_vm0 = vmmov 0   ;;  %vm510_vm1 = vcmask 261120   ;;  %v4609_v1 = vld [vmem:[#allocation5] sm:$0xff]  }
  0x39   :  { %4342 = vmatprep.subr.bf16.mxu0 %v8950_v0  ;;  %4596 = vmatprep.subr.bf16.mxu1 %v8950_v0  ;;  %v701_v2 = vsel %vm510_vm1, %v4609_v1, 0  ;;  %v58_v3 = vld [vmem:[#allocation2] sm:$0xff]   ;;  %v60_v10 = vld [vmem:[#allocation2 + $0x8] sm:$0xff]   ;;  %v62_v11 = vld [vmem:[#allocation2 + $0x10] sm:$0xff]   ;;  %vm1239_vm2 = vcmask 130048   ;;  %vm3990_vm3 = vcmask 7168  }
  0x3a   :  { %4344 = vmatprep.mubr.msk.bf16.mxu0 %vm5640_vm0, %v8950_v0  ;;  %4472 = vmatprep.mubr.msk.bf16.mxu1 %vm5640_vm0, %v8950_v0  ;;  %v5720_v4 = vld [vmem:[#allocation2 + $0x100] sm:$0xff]   ;;  %v2740_v5 = vunpack.c.l.bf16 %v58_v3  ;;  %v2741_v6 = vunpack.c.h.bf16 %v58_v3  ;;  %v2742_v13 = vunpack.c.l.bf16 %v60_v10  ;;  %v2743_v14 = vunpack.c.h.bf16 %v60_v10  ;;  %v5731_v17 = vld [vmem:[#allocation2 + $0x108] sm:$0xff]   ;;  %v5733_v18 = vld [vmem:[#allocation2 + $0x18] sm:$0xff]   ;;  %s5641_s2 = smov [#allocation8]  }
  0x3b   :  { %4343 = vmatpush3.bf16.xpose.msra.mxu0 %v701_v2  ;;  %4597 = vmatpush3.bf16.xpose.msra.mxu1 %v701_v2  ;;  %v2744_v15 = vunpack.c.l.bf16 %v62_v11  ;;  %v2745_v16 = vunpack.c.h.bf16 %v62_v11  ;;  %v2746_v22 = vunpack.c.l.bf16 %v5733_v18  ;;  %v2747_v26 = vunpack.c.h.bf16 %v5733_v18  ;;  %v5739_v27 = vld [vmem:[#allocation2 + $0x20] sm:$0xff]   ;;  %v126_v34 = vld [vmem:[#allocation2 + $0x110] sm:$0xff]   ;;  %v5752_v35 = vld [vmem:[#allocation2 + $0x28] sm:$0xff]   ;;  %s4121_s26 = sshll.u32 %s5641_s2, 4  ;;  %s8766_s26 = int_to_ptr.vmem [resolvable:$true] %s4121_s26 }
  0x3c   :  { %v2865_v7 = vmul.f32 %v2740_v5, %v2740_v5  ;;  %v2866_v8 = vmul.f32 %v2741_v6, %v2741_v6  ;;  %v2867_v19 = vmul.f32 %v2742_v13, %v2742_v13  ;;  %v2868_v20 = vmul.f32 %v2743_v14, %v2743_v14  ;;  %v5758_v42 = vld [vmem:[#allocation2 + $0x30] sm:$0xff]   ;;  %v128_v49 = vld [vmem:[#allocation2 + $0x118] sm:$0xff]   ;;  %v5776_v57 = vld [vmem:[#allocation2 + $0x40] sm:$0xff]   ;;  %s5582_s27 = scalar_lea.vmem %s8766_s26, 16000  ;;  %p5587_p11 = scmp.lt.s32.totalorder %s8766_s26, %s8766_s26 }
  0x3d   :  { %v2869_v21 = vmul.f32 %v2744_v15, %v2744_v15  ;;  %v2870_v25 = vmul.f32 %v2745_v16, %v2745_v16  ;;  %v2871_v28 = vmul.f32 %v2746_v22, %v2746_v22  ;;  %v2748_v29 = vunpack.c.l.bf16 %v5739_v27  ;;  %v5770_v50 = vld [vmem:[#allocation2 + $0x38] sm:$0xff]   ;;  %v130_v1 = vld [vmem:[#allocation2 + $0x120] sm:$0xff]   ;;  %v5789_v2 = vld [vmem:[#allocation2 + $0x48] sm:$0xff]   ;;  %p5583_p10 = scmp.ne.s32.totalorder %s8766_s26, %s5582_s27  ;;  %p5588_p12 = scmp.lt.s32.totalorder %s5582_s27, %s5582_s27 }
  0x3e   :  { %v2990_v9 = vsel %vm510_vm1, %v2865_v7, 0.0  ;;  %v2993_v12 = vsel %vm510_vm1, %v2866_v8, 0.0  ;;  %v2996_v23 = vsel %vm510_vm1, %v2867_v19, 0.0  ;;  %v2999_v24 = vsel %vm510_vm1, %v2868_v20, 0.0  ;;  %v5808_v19 = vld [vmem:[#allocation2 + $0x58] sm:$0xff]  }
  0x3f   :  { %2991 = vadd.xlane.f32.xlu0 %v2990_v9  ;;  %2994 = vadd.xlane.f32.xlu1 %v2993_v12  ;;  %v3002_v30 = vsel %vm510_vm1, %v2869_v21, 0.0  ;;  %v3005_v31 = vsel %vm510_vm1, %v2870_v25, 0.0  ;;  %v2872_v32 = vmul.f32 %v2747_v26, %v2747_v26  ;;  %v2749_v33 = vunpack.c.h.bf16 %v5739_v27  ;;  %v5814_v26 = vld [vmem:[#allocation2 + $0x60] sm:$0xff]   ;;  %p5589_p13 = por %p5588_p12, %p5587_p11 }
  0x40   :  { %v3008_v36 = vsel %vm510_vm1, %v2871_v28, 0.0  ;;  %v2873_v37 = vmul.f32 %v2748_v29, %v2748_v29  ;;  %v2750_v40 = vunpack.c.l.bf16 %v5752_v35  ;;  %v2751_v41 = vunpack.c.h.bf16 %v5752_v35 }
  0x41   :  { %v3011_v38 = vsel %vm510_vm1, %v2872_v32, 0.0  ;;  %v2874_v39 = vmul.f32 %v2749_v33, %v2749_v33  ;;  %v2752_v44 = vunpack.c.l.bf16 %v5758_v42  ;;  %v2753_v48 = vunpack.c.h.bf16 %v5758_v42  ;;  %v134_v33 = vld [vmem:[#allocation2 + $0x130] sm:$0xff]   ;;  %p5590_p0 = pnand %p5589_p13, %p5583_p10 }
  0x42   :  { %4345 = vmatmul.mubr.msk.bf16.vlgmr.msra.gmra.mrb[0].mxu0 %vm510_vm1, %v58_v3  ;;  %4473 = vmatmul.mubr.msk.bf16.vlgmr.msra.gmra.mrb[0].mxu1 %vm510_vm1, %v5720_v4  ;;  %v3014_v43 = vsel %vm510_vm1, %v2873_v37, 0.0  ;;  %v2875_v46 = vmul.f32 %v2750_v40, %v2750_v40  ;;  %v2876_v47 = vmul.f32 %v2751_v41, %v2751_v41  ;;  %v2754_v52 = vunpack.c.l.bf16 %v5770_v50  ;;  %v5833_v41 = vld [vmem:[#allocation2 + $0x70] sm:$0xff]  }
  0x43   :  { %4348 = vmatprep.mubr.msk.bf16.mxu0 %vm5640_vm0, %v8950_v0  ;;  %4476 = vmatprep.mubr.msk.bf16.mxu1 %vm5640_vm0, %v8950_v0  ;;  %v3017_v45 = vsel %vm510_vm1, %v2874_v39, 0.0  ;;  %v2877_v51 = vmul.f32 %v2752_v44, %v2752_v44  ;;  %v2878_v55 = vmul.f32 %v2753_v48, %v2753_v48  ;;  %v2755_v56 = vunpack.c.h.bf16 %v5770_v50 }
  0x44   :  { %2997 = vadd.xlane.f32.xlu0 %v2996_v23  ;;  %3000 = vadd.xlane.f32.xlu1 %v2999_v24  ;;  %v3020_v53 = vsel %vm510_vm1, %v2875_v46, 0.0  ;;  %v3023_v54 = vsel %vm510_vm1, %v2876_v47, 0.0  ;;  %v2879_v58 = vmul.f32 %v2754_v52, %v2754_v52  ;;  %v2756_v59 = vunpack.c.l.bf16 %v5776_v57 }
  0x45   :  { %v3026_v60 = vsel %vm510_vm1, %v2877_v51, 0.0  ;;  %v3029_v61 = vsel %vm510_vm1, %v2878_v55, 0.0  ;;  %v2880_v62 = vmul.f32 %v2755_v56, %v2755_v56  ;;  %v2757_v63 = vunpack.c.h.bf16 %v5776_v57  ;;  %v5846_v51 = vld [vmem:[#allocation2 + $0x78] sm:$0xff]  }
  0x46   :  { %v3032_v3 = vsel %vm510_vm1, %v2879_v58, 0.0  ;;  %v2881_v5 = vmul.f32 %v2756_v59, %v2756_v59  ;;  %v2758_v8 = vunpack.c.l.bf16 %v5789_v2  ;;  %v2759_v9 = vunpack.c.h.bf16 %v5789_v2  ;;  %v5852_v58 = vld [vmem:[#allocation2 + $0x80] sm:$0xff]  }
  0x47   :  { %v3035_v6 = vsel %vm510_vm1, %v2880_v62, 0.0  ;;  %v2882_v7 = vmul.f32 %v2757_v63, %v2757_v63  ;;  %v2762_v21 = vunpack.c.l.bf16 %v5808_v19  ;;  %v2763_v25 = vunpack.c.h.bf16 %v5808_v19 }
  0x48   :  { %3003 = vadd.xlane.f32.xlu0 %v3002_v30  ;;  %3006 = vadd.xlane.f32.xlu1 %v3005_v31  ;;  %v2883_v14 = vmul.f32 %v2758_v8, %v2758_v8  ;;  %v2884_v15 = vmul.f32 %v2759_v9, %v2759_v9  ;;  %v2764_v28 = vunpack.c.l.bf16 %v5814_v26  ;;  %v2765_v32 = vunpack.c.h.bf16 %v5814_v26 }
  0x49   :  { %v3041_v13 = vsel %vm510_vm1, %v2882_v7, 0.0  ;;  %v2888_v31 = vmul.f32 %v2763_v25, %v2763_v25  ;;  %v2768_v44 = vunpack.c.l.bf16 %v5833_v41  ;;  %v2769_v48 = vunpack.c.h.bf16 %v5833_v41 }
  0x4a   :  { %4349 = vmatmul.mubr.msk.bf16.gmra.mrb[4].mxu0 %vm510_vm1, %v60_v10  ;;  %4477 = vmatmul.mubr.msk.bf16.gmra.mrb[4].mxu1 %vm510_vm1, %v5731_v17  ;;  %v5795_v10 = vld [vmem:[#allocation2 + $0x50] sm:$0xff]   ;;  %v3044_v22 = vsel %vm510_vm1, %v2883_v14, 0.0  ;;  %v3047_v23 = vsel %vm510_vm1, %v2884_v15, 0.0  ;;  %v2889_v37 = vmul.f32 %v2764_v28, %v2764_v28  ;;  %v2890_v39 = vmul.f32 %v2765_v32, %v2765_v32 }
  0x4b   :  { %4352 = vmatprep.mubr.msk.bf16.mxu0 %vm5640_vm0, %v8950_v0  ;;  %4480 = vmatprep.mubr.msk.bf16.mxu1 %vm5640_vm0, %v8950_v0  ;;  %v2760_v12 = vunpack.c.l.bf16 %v5795_v10  ;;  %v2761_v16 = vunpack.c.h.bf16 %v5795_v10  ;;  %v2893_v52 = vmul.f32 %v2768_v44, %v2768_v44  ;;  %v2894_v55 = vmul.f32 %v2769_v48, %v2769_v48 }
  0x4c   :  { %3009 = vadd.xlane.f32.xlu0 %v3008_v36  ;;  %3012 = vadd.xlane.f32.xlu1 %v3011_v38  ;;  %v3059_v38 = vsel %vm510_vm1, %v2888_v31, 0.0  ;;  %v2771_v56 = vunpack.c.h.bf16 %v5846_v51 }
  0x4d   :  { %v2885_v20 = vmul.f32 %v2760_v12, %v2760_v12  ;;  %v2886_v24 = vmul.f32 %v2761_v16, %v2761_v16  ;;  %v3077_v62 = vsel %vm510_vm1, %v2894_v55, 0.0  ;;  %v5871_v12 = vld [vmem:[#allocation2 + $0x90] sm:$0xff]   ;;  %v144_v55 = vld [vmem:[#allocation2 + $0x158] sm:$0xff]  }
  0x4e   :  { %v2896_v63 = vmul.f32 %v2771_v56, %v2771_v56  ;;  %v2776_v14 = vunpack.c.l.bf16 %v5871_v12 }
  0x4f   :  { %v3050_v29 = vsel %vm510_vm1, %v2885_v20, 0.0  ;;  %v3053_v30 = vsel %vm510_vm1, %v2886_v24, 0.0  ;;  %v5876_v20 = vld [vmem:[#allocation2 + $0x98] sm:$0xff]  }
  0x50   :  { %3015 = vadd.xlane.f32.xlu0 %v3014_v43  ;;  %3018 = vadd.xlane.f32.xlu1 %v3017_v45  ;;  %v3062_v43 = vsel %vm510_vm1, %v2889_v37, 0.0  ;;  %v3065_v45 = vsel %vm510_vm1, %v2890_v39, 0.0  ;;  %v3083_v8 = vsel %vm510_vm1, %v2896_v63, 0.0  ;;  %v2778_v24 = vunpack.c.l.bf16 %v5876_v20  ;;  %v142_v39 = vld [vmem:[#allocation2 + $0x150] sm:$0xff]   ;;  %v5928_v63 = vld [vmem:[#allocation2 + $0xc0] sm:$0xff]  }
  0x52   :  { %4353 = vmatmul.mubr.msk.bf16.gmra.mrb[8].mxu0 %vm510_vm1, %v62_v11  ;;  %4481 = vmatmul.mubr.msk.bf16.gmra.mrb[8].mxu1 %vm510_vm1, %v126_v34  ;;  %v3038_v11 = vsel %vm510_vm1, %v2881_v5, 0.0  ;;  %v5827_v34 = vld [vmem:[#allocation2 + $0x68] sm:$0xff]  }
  0x53   :  { %4356 = vmatprep.mubr.msk.bf16.mxu0 %vm5640_vm0, %v8950_v0  ;;  %4484 = vmatprep.mubr.msk.bf16.mxu1 %vm5640_vm0, %v8950_v0  ;;  %v2767_v40 = vunpack.c.h.bf16 %v5827_v34  ;;  %v5865_v5 = vld [vmem:[#allocation2 + $0x88] sm:$0xff]  }
  0x54   :  { %3021 = vadd.xlane.f32.xlu0 %v3020_v53  ;;  %3024 = vadd.xlane.f32.xlu1 %v3023_v54  ;;  %v2770_v53 = vunpack.c.l.bf16 %v5846_v51 }
  0x55   :  { %v2892_v47 = vmul.f32 %v2767_v40, %v2767_v40 }
  0x56   :  { %v2895_v59 = vmul.f32 %v2770_v53, %v2770_v53 }
  0x58   :  { %3027 = vadd.xlane.f32.xlu0 %v3026_v60  ;;  %3030 = vadd.xlane.f32.xlu1 %v3029_v61  ;;  %v2772_v60 = vunpack.c.l.bf16 %v5852_v58  ;;  %v3074_v61 = vsel %vm510_vm1, %v2893_v52, 0.0 }
  0x5a   :  { %4357 = vmatmul.mubr.msk.bf16.gmra.mrb[12].mxu0 %vm510_vm1, %v5733_v18  ;;  %4485 = vmatmul.mubr.msk.bf16.gmra.mrb[12].mxu1 %vm510_vm1, %v128_v49  ;;  %v132_v18 = vld [vmem:[#allocation2 + $0x128] sm:$0xff]   ;;  %v136_v49 = vld [vmem:[#allocation2 + $0x138] sm:$0xff]   ;;  %v2897_v7 = vmul.f32 %v2772_v60, %v2772_v60 }
  0x5b   :  { %4360 = vmatprep.mubr.msk.bf16.mxu0 %vm5640_vm0, %v8950_v0  ;;  %4488 = vmatprep.mubr.msk.bf16.mxu1 %vm5640_vm0, %v8950_v0 }
  0x5c   :  { %3033 = vadd.xlane.f32.xlu0 %v3032_v3  ;;  %3036 = vadd.xlane.f32.xlu1 %v3035_v6  ;;  %v138_v3 = vld [vmem:[#allocation2 + $0x140] sm:$0xff]   ;;  %v3080_v6 = vsel %vm510_vm1, %v2895_v59, 0.0 }
  0x60   :  { %3039 = vadd.xlane.f32.xlu0 %v3038_v11  ;;  %3042 = vadd.xlane.f32.xlu1 %v3041_v13  ;;  %v2775_v11 = vunpack.c.h.bf16 %v5865_v5  ;;  %v3086_v13 = vsel %vm510_vm1, %v2897_v7, 0.0 }
  0x62   :  { %4361 = vmatmul.mubr.msk.bf16.gmra.mrb[16].mxu0 %vm510_vm1, %v5739_v27  ;;  %4489 = vmatmul.mubr.msk.bf16.gmra.mrb[16].mxu1 %vm510_vm1, %v130_v1  ;;  %v2887_v27 = vmul.f32 %v2762_v21, %v2762_v21  ;;  %v2773_v1 = vunpack.c.h.bf16 %v5852_v58  ;;  %v2777_v21 = vunpack.c.h.bf16 %v5871_v12 }
  0x63   :  { %4364 = vmatprep.mubr.msk.bf16.mxu0 %vm5640_vm0, %v8950_v0  ;;  %4492 = vmatprep.mubr.msk.bf16.mxu1 %vm5640_vm0, %v8950_v0 }
  0x64   :  { %3045 = vadd.xlane.f32.xlu0 %v3044_v22  ;;  %3048 = vadd.xlane.f32.xlu1 %v3047_v23  ;;  %v3056_v36 = vsel %vm510_vm1, %v2887_v27, 0.0  ;;  %v2898_v9 = vmul.f32 %v2773_v1, %v2773_v1  ;;  %v140_v22 = vld [vmem:[#allocation2 + $0x148] sm:$0xff]   ;;  %v2901_v23 = vmul.f32 %v2776_v14, %v2776_v14  ;;  %v2902_v28 = vmul.f32 %v2777_v21, %v2777_v21  ;;  %v5947_v21 = vld [vmem:[#allocation2 + $0xd0] sm:$0xff]  }
  0x66   :  { %v3089_v15 = vsel %vm510_vm1, %v2898_v9, 0.0  ;;  %v3098_v32 = vsel %vm510_vm1, %v2901_v23, 0.0  ;;  %v2789_v9 = vunpack.c.h.bf16 %v5928_v63  ;;  %v2793_v23 = vunpack.c.h.bf16 %v5947_v21 }
  0x68   :  { %3051 = vadd.xlane.f32.xlu0 %v3050_v29  ;;  %3054 = vadd.xlane.f32.xlu1 %v3053_v30  ;;  %v5890_v29 = vld [vmem:[#allocation2 + $0xa0] sm:$0xff]   ;;  %v2903_v30 = vmul.f32 %v2778_v24, %v2778_v24 }
  0x69   :  { %v2780_v31 = vunpack.c.l.bf16 %v5890_v29  ;;  %v2781_v37 = vunpack.c.h.bf16 %v5890_v29 }
  0x6a   :  { %4365 = vmatmul.mubr.msk.bf16.gmra.mrb[20].mxu0 %vm510_vm1, %v5752_v35  ;;  %4493 = vmatmul.mubr.msk.bf16.gmra.mrb[20].mxu1 %vm510_vm1, %v132_v18  ;;  %v2766_v35 = vunpack.c.l.bf16 %v5827_v34  ;;  %v2900_v18 = vmul.f32 %v2775_v11, %v2775_v11  ;;  %v146_v11 = vld [vmem:[#allocation2 + $0x160] sm:$0xff]  }
  0x6b   :  { %4368 = vmatprep.mubr.msk.bf16.mxu0 %vm5640_vm0, %v8950_v0  ;;  %4496 = vmatprep.mubr.msk.bf16.mxu1 %vm5640_vm0, %v8950_v0  ;;  %v2905_v40 = vmul.f32 %v2780_v31, %v2780_v31  ;;  %v2906_v44 = vmul.f32 %v2781_v37, %v2781_v37  ;;  %v2918_v37 = vmul.f32 %v2793_v23, %v2793_v23  ;;  %v154_v23 = vld [vmem:[#allocation2 + $0x180] sm:$0xff]  }
  0x6c   :  { %3057 = vadd.xlane.f32.xlu0 %v3056_v36  ;;  %3060 = vadd.xlane.f32.xlu1 %v3059_v38  ;;  %v2891_v46 = vmul.f32 %v2766_v35, %v2766_v35  ;;  %v3095_v27 = vsel %vm510_vm1, %v2900_v18, 0.0  ;;  %v5899_v38 = vld [vmem:[#allocation2 + $0xa8] sm:$0xff]   ;;  %v3104_v35 = vsel %vm510_vm1, %v2903_v30, 0.0 }
  0x6d   :  { %v148_v30 = vld [vmem:[#allocation2 + $0x168] sm:$0xff]  }
  0x6e   :  { %v3068_v54 = vsel %vm510_vm1, %v2891_v46, 0.0  ;;  %v5909_v46 = vld [vmem:[#allocation2 + $0xb0] sm:$0xff]  }
  0x6f   :  { %v2784_v48 = vunpack.c.l.bf16 %v5909_v46 }
  0x70   :  { %3063 = vadd.xlane.f32.xlu0 %v3062_v43  ;;  %3066 = vadd.xlane.f32.xlu1 %v3065_v45  ;;  %v2783_v45 = vunpack.c.h.bf16 %v5899_v38 }
  0x72   :  { %4369 = vmatmul.mubr.msk.bf16.gmra.mrb[24].mxu0 %vm510_vm1, %v5758_v42  ;;  %4497 = vmatmul.mubr.msk.bf16.gmra.mrb[24].mxu1 %vm510_vm1, %v134_v33  ;;  %v3071_v42 = vsel %vm510_vm1, %v2892_v47, 0.0  ;;  %v3101_v33 = vsel %vm510_vm1, %v2902_v28, 0.0  ;;  %v3110_v47 = vsel %vm510_vm1, %v2905_v40, 0.0  ;;  %v2908_v53 = vmul.f32 %v2783_v45, %v2783_v45 }
  0x73   :  { %4372 = vmatprep.mubr.msk.bf16.mxu0 %vm5640_vm0, %v8950_v0  ;;  %4500 = vmatprep.mubr.msk.bf16.mxu1 %vm5640_vm0, %v8950_v0 }
  0x74   :  { %3069 = vadd.xlane.f32.xlu0 %v3068_v54  ;;  %3072 = vadd.xlane.f32.xlu1 %v3071_v42  ;;  %v2785_v54 = vunpack.c.h.bf16 %v5909_v46  ;;  %v5915_v42 = vld [vmem:[#allocation2 + $0xb8] sm:$0xff]  }
  0x75   :  { %v2786_v56 = vunpack.c.l.bf16 %v5915_v42  ;;  %v2787_v59 = vunpack.c.h.bf16 %v5915_v42 }
  0x77   :  { %v2911_v1 = vmul.f32 %v2786_v56, %v2786_v56  ;;  %v5985_v56 = vld [vmem:[#allocation2 + $0xf0] sm:$0xff]  }
  0x78   :  { %3075 = vadd.xlane.f32.xlu0 %v3074_v61  ;;  %3078 = vadd.xlane.f32.xlu1 %v3077_v62  ;;  %v3119_v61 = vsel %vm510_vm1, %v2908_v53, 0.0  ;;  %v2910_v62 = vmul.f32 %v2785_v54, %v2785_v54 }
  0x7a   :  { %4373 = vmatmul.mubr.msk.bf16.gmra.mrb[28].mxu0 %vm510_vm1, %v5770_v50  ;;  %4501 = vmatmul.mubr.msk.bf16.gmra.mrb[28].mxu1 %vm510_vm1, %v136_v49  ;;  %v2774_v50 = vunpack.c.l.bf16 %v5865_v5  ;;  %v3113_v49 = vsel %vm510_vm1, %v2906_v44, 0.0  ;;  %v3125_v7 = vsel %vm510_vm1, %v2910_v62, 0.0 }
  0x7b   :  { %4376 = vmatprep.mubr.msk.bf16.mxu0 %vm5640_vm0, %v8950_v0  ;;  %4504 = vmatprep.mubr.msk.bf16.mxu1 %vm5640_vm0, %v8950_v0 }
  0x7c   :  { %3081 = vadd.xlane.f32.xlu0 %v3080_v6  ;;  %3084 = vadd.xlane.f32.xlu1 %v3083_v8  ;;  %v2899_v16 = vmul.f32 %v2774_v50, %v2774_v50  ;;  %v2788_v8 = vunpack.c.l.bf16 %v5928_v63  ;;  %v5937_v50 = vld [vmem:[#allocation2 + $0xc8] sm:$0xff]  }
  0x7d   :  { %v2791_v18 = vunpack.c.h.bf16 %v5937_v50 }
  0x7e   :  { %v3092_v25 = vsel %vm510_vm1, %v2899_v16, 0.0  ;;  %v2914_v16 = vmul.f32 %v2789_v9, %v2789_v9 }
  0x7f   :  { %v2916_v28 = vmul.f32 %v2791_v18, %v2791_v18 }
  0x80   :  { %3087 = vadd.xlane.f32.xlu0 %v3086_v13  ;;  %3090 = vadd.xlane.f32.xlu1 %v3089_v15  ;;  %v3128_v13 = vsel %vm510_vm1, %v2911_v1, 0.0  ;;  %v2913_v15 = vmul.f32 %v2788_v8, %v2788_v8  ;;  %v2801_v1 = vunpack.c.h.bf16 %v5985_v56 }
  0x82   :  { %4377 = vmatmul.mubr.msk.bf16.gmra.mrb[32].mxu0 %vm510_vm1, %v5776_v57  ;;  %4505 = vmatmul.mubr.msk.bf16.gmra.mrb[32].mxu1 %vm510_vm1, %v138_v3  ;;  %v2779_v57 = vunpack.c.h.bf16 %v5876_v20  ;;  %v2912_v3 = vmul.f32 %v2787_v59, %v2787_v59  ;;  %v3134_v24 = vsel %vm510_vm1, %v2913_v15, 0.0  ;;  %v2804_v15 = vunpack.c.l.bf16 %v5720_v4 }
  0x83   :  { %4380 = vmatprep.mubr.msk.bf16.mxu0 %vm5640_vm0, %v8950_v0  ;;  %4508 = vmatprep.mubr.msk.bf16.mxu1 %vm5640_vm0, %v8950_v0 }
  0x84   :  { %3093 = vadd.xlane.f32.xlu0 %v3092_v25  ;;  %3096 = vadd.xlane.f32.xlu1 %v3095_v27  ;;  %v2904_v36 = vmul.f32 %v2779_v57, %v2779_v57  ;;  %v3131_v14 = vsel %vm510_vm1, %v2912_v3, 0.0  ;;  %v3137_v25 = vsel %vm510_vm1, %v2914_v16, 0.0  ;;  %v5953_v57 = vld [vmem:[#allocation2 + $0xd8] sm:$0xff]  }
  0x85   :  { %v5991_v3 = vld [vmem:[#allocation2 + $0xf8] sm:$0xff]  }
  0x86   :  { %v3107_v43 = vsel %vm510_vm1, %v2904_v36, 0.0  ;;  %v3143_v36 = vsel %vm510_vm1, %v2916_v28, 0.0  ;;  %v2802_v8 = vunpack.c.l.bf16 %v5991_v3  ;;  %v2806_v28 = vunpack.c.l.bf16 %v5731_v17 }
  0x88   :  { %3099 = vadd.xlane.f32.xlu0 %v3098_v32  ;;  %3102 = vadd.xlane.f32.xlu1 %v3101_v33  ;;  %v2794_v32 = vunpack.c.l.bf16 %v5953_v57 }
  0x8a   :  { %4381 = vmatmul.mubr.msk.bf16.gmra.mrb[36].mxu0 %vm510_vm1, %v5789_v2  ;;  %4509 = vmatmul.mubr.msk.bf16.gmra.mrb[36].mxu1 %vm510_vm1, %v140_v22  ;;  %v2782_v2 = vunpack.c.l.bf16 %v5899_v38  ;;  %v2792_v22 = vunpack.c.l.bf16 %v5947_v21  ;;  %v2919_v40 = vmul.f32 %v2794_v32, %v2794_v32  ;;  %v2931_v32 = vmul.f32 %v2806_v28, %v2806_v28 }
  0x8b   :  { %4384 = vmatprep.mubr.msk.bf16.mxu0 %vm5640_vm0, %v8950_v0  ;;  %4512 = vmatprep.mubr.msk.bf16.mxu1 %vm5640_vm0, %v8950_v0 }
  0x8c   :  { %3105 = vadd.xlane.f32.xlu0 %v3104_v35  ;;  %3108 = vadd.xlane.f32.xlu1 %v3107_v43  ;;  %v2907_v52 = vmul.f32 %v2782_v2, %v2782_v2  ;;  %v2917_v31 = vmul.f32 %v2792_v22, %v2792_v22  ;;  %v3149_v43 = vsel %vm510_vm1, %v2918_v37, 0.0  ;;  %v2805_v22 = vunpack.c.h.bf16 %v5720_v4 }
  0x8e   :  { %v3116_v60 = vsel %vm510_vm1, %v2907_v52, 0.0  ;;  %v3146_v35 = vsel %vm510_vm1, %v2917_v31, 0.0  ;;  %v2930_v4 = vmul.f32 %v2805_v22, %v2805_v22 }
  0x90   :  { %3111 = vadd.xlane.f32.xlu0 %v3110_v47  ;;  %3114 = vadd.xlane.f32.xlu1 %v3113_v49  ;;  %v5972_v47 = vld [vmem:[#allocation2 + $0xe8] sm:$0xff]   ;;  %v3152_v49 = vsel %vm510_vm1, %v2919_v40, 0.0  ;;  %v3185_v31 = vsel %vm510_vm1, %v2930_v4, 0.0 }
  0x91   :  { %v2798_v52 = vunpack.c.l.bf16 %v5972_v47 }
  0x92   :  { %4385 = vmatmul.mubr.msk.bf16.gmra.mrb[40].mxu0 %vm510_vm1, %v5795_v10  ;;  %4513 = vmatmul.mubr.msk.bf16.gmra.mrb[40].mxu1 %vm510_vm1, %v142_v39  ;;  %v2909_v10 = vmul.f32 %v2784_v48, %v2784_v48  ;;  %v5966_v39 = vld [vmem:[#allocation2 + $0xe0] sm:$0xff]   ;;  %v150_v48 = vld [vmem:[#allocation2 + $0x170] sm:$0xff]  }
  0x93   :  { %4388 = vmatprep.mubr.msk.bf16.mxu0 %vm5640_vm0, %v8950_v0  ;;  %4516 = vmatprep.mubr.msk.bf16.mxu1 %vm5640_vm0, %v8950_v0  ;;  %v2796_v2 = vunpack.c.l.bf16 %v5966_v39  ;;  %v2797_v45 = vunpack.c.h.bf16 %v5966_v39  ;;  %v2923_v59 = vmul.f32 %v2798_v52, %v2798_v52 }
  0x94   :  { %3117 = vadd.xlane.f32.xlu0 %v3116_v60  ;;  %3120 = vadd.xlane.f32.xlu1 %v3119_v61  ;;  %v3122_v6 = vsel %vm510_vm1, %v2909_v10, 0.0  ;;  %v2800_v60 = vunpack.c.l.bf16 %v5985_v56 }
  0x95   :  { %v2921_v54 = vmul.f32 %v2796_v2, %v2796_v2  ;;  %v3164_v9 = vsel %vm510_vm1, %v2923_v59, 0.0 }
  0x97   :  { %v3158_v61 = vsel %vm510_vm1, %v2921_v54, 0.0 }
  0x98   :  { %3123 = vadd.xlane.f32.xlu0 %v3122_v6  ;;  %3126 = vadd.xlane.f32.xlu1 %v3125_v7  ;;  %v152_v6 = vld [vmem:[#allocation2 + $0x178] sm:$0xff]   ;;  %v2925_v7 = vmul.f32 %v2800_v60, %v2800_v60 }
  0x9a   :  { %4389 = vmatmul.mubr.msk.bf16.gmra.mrb[44].mxu0 %vm510_vm1, %v5808_v19  ;;  %4517 = vmatmul.mubr.msk.bf16.gmra.mrb[44].mxu1 %vm510_vm1, %v144_v55  ;;  %v2790_v19 = vunpack.c.l.bf16 %v5937_v50  ;;  %v2922_v55 = vmul.f32 %v2797_v45, %v2797_v45  ;;  %v3170_v16 = vsel %vm510_vm1, %v2925_v7, 0.0 }
  0x9b   :  { %4392 = vmatprep.mubr.msk.bf16.mxu0 %vm5640_vm0, %v8950_v0  ;;  %4520 = vmatprep.mubr.msk.bf16.mxu1 %vm5640_vm0, %v8950_v0 }
  0x9c   :  { %3129 = vadd.xlane.f32.xlu0 %v3128_v13  ;;  %3132 = vadd.xlane.f32.xlu1 %v3131_v14  ;;  %v2915_v27 = vmul.f32 %v2790_v19, %v2790_v19  ;;  %v3161_v10 = vsel %vm510_vm1, %v2922_v55, 0.0  ;;  %v2926_v13 = vmul.f32 %v2801_v1, %v2801_v1  ;;  %v2927_v14 = vmul.f32 %v2802_v8, %v2802_v8 }
  0x9e   :  { %v3140_v33 = vsel %vm510_vm1, %v2915_v27, 0.0  ;;  %v3173_v19 = vsel %vm510_vm1, %v2926_v13, 0.0  ;;  %v172_v13 = vld [vmem:[#allocation2 + $0x1c8] sm:$0xff]  }
  0xa0   :  { %3135 = vadd.xlane.f32.xlu0 %v3134_v24  ;;  %3138 = vadd.xlane.f32.xlu1 %v3137_v25  ;;  %v3176_v24 = vsel %vm510_vm1, %v2927_v14, 0.0  ;;  %v2929_v25 = vmul.f32 %v2804_v15, %v2804_v15 }
  0xa2   :  { %4393 = vmatmul.mubr.msk.bf16.gmra.mrb[48].mxu0 %vm510_vm1, %v5814_v26  ;;  %4521 = vmatmul.mubr.msk.bf16.gmra.mrb[48].mxu1 %vm510_vm1, %v146_v11  ;;  %v2795_v26 = vunpack.c.h.bf16 %v5953_v57 }
  0xa3   :  { %4396 = vmatprep.mubr.msk.bf16.mxu0 %vm5640_vm0, %v8950_v0  ;;  %4524 = vmatprep.mubr.msk.bf16.mxu1 %vm5640_vm0, %v8950_v0 }
  0xa4   :  { %3141 = vadd.xlane.f32.xlu0 %v3140_v33  ;;  %3144 = vadd.xlane.f32.xlu1 %v3143_v36  ;;  %v2920_v44 = vmul.f32 %v2795_v26, %v2795_v26  ;;  %v3188_v36 = vsel %vm510_vm1, %v2931_v32, 0.0 }
  0xa6   :  { %v3155_v53 = vsel %vm510_vm1, %v2920_v44, 0.0 }
  0xa8   :  { %3147 = vadd.xlane.f32.xlu0 %v3146_v35  ;;  %3150 = vadd.xlane.f32.xlu1 %v3149_v43 }
  0xaa   :  { %4397 = vmatmul.mubr.msk.bf16.gmra.mrb[52].mxu0 %vm510_vm1, %v5827_v34  ;;  %4525 = vmatmul.mubr.msk.bf16.gmra.mrb[52].mxu1 %vm510_vm1, %v148_v30  ;;  %v2799_v34 = vunpack.c.h.bf16 %v5972_v47  ;;  %v3182_v30 = vsel %vm510_vm1, %v2929_v25, 0.0 }
  0xab   :  { %4400 = vmatprep.mubr.msk.bf16.mxu0 %vm5640_vm0, %v8950_v0  ;;  %4528 = vmatprep.mubr.msk.bf16.mxu1 %vm5640_vm0, %v8950_v0 }
  0xac   :  { %3153 = vadd.xlane.f32.xlu0 %v3152_v49  ;;  %3156 = vadd.xlane.f32.xlu1 %v3155_v53  ;;  %v2924_v62 = vmul.f32 %v2799_v34, %v2799_v34 }
  0xae   :  { %v3167_v11 = vsel %vm510_vm1, %v2924_v62, 0.0 }
  0xb0   :  { %3159 = vadd.xlane.f32.xlu0 %v3158_v61  ;;  %3162 = vadd.xlane.f32.xlu1 %v3161_v10 }
  0xb2   :  { %4401 = vmatmul.mubr.msk.bf16.gmra.mrb[56].mxu0 %vm510_vm1, %v5833_v41  ;;  %4529 = vmatmul.mubr.msk.bf16.gmra.mrb[56].mxu1 %vm510_vm1, %v150_v48  ;;  %v2803_v41 = vunpack.c.h.bf16 %v5991_v3 }
  0xb3   :  { %4404 = vmatprep.mubr.msk.bf16.mxu0 %vm5640_vm0, %v8950_v0  ;;  %4532 = vmatprep.mubr.msk.bf16.mxu1 %vm5640_vm0, %v8950_v0 }
  0xb4   :  { %3165 = vadd.xlane.f32.xlu0 %v3164_v9  ;;  %3168 = vadd.xlane.f32.xlu1 %v3167_v11  ;;  %v2928_v18 = vmul.f32 %v2803_v41, %v2803_v41 }
  0xb6   :  { %v3179_v27 = vsel %vm510_vm1, %v2928_v18, 0.0  ;;  %v6158_v18 = vld [vmem:[#allocation7] ss:$0 sm:$0xff] }
  0xb8   :  { %3171 = vadd.xlane.f32.xlu0 %v3170_v16  ;;  %3174 = vadd.xlane.f32.xlu1 %v3173_v19 }
  0xba   :  { %4405 = vmatmul.mubr.msk.bf16.gmra.mrb[60].mxu0 %vm510_vm1, %v5846_v51  ;;  %4533 = vmatmul.mubr.msk.bf16.gmra.mrb[60].mxu1 %vm510_vm1, %v152_v6  ;;  %v2807_v51 = vunpack.c.h.bf16 %v5731_v17  ;;  %v156_v17 = vld [vmem:[#allocation2 + $0x188] sm:$0xff]  }
  0xbb   :  { %4408 = vmatprep.mubr.msk.bf16.mxu0 %vm5640_vm0, %v8950_v0  ;;  %4536 = vmatprep.mubr.msk.bf16.mxu1 %vm5640_vm0, %v8950_v0 }
  0xbc   :  { %3177 = vadd.xlane.f32.xlu0 %v3176_v24  ;;  %3180 = vadd.xlane.f32.xlu1 %v3179_v27  ;;  %v2932_v33 = vmul.f32 %v2807_v51, %v2807_v51 }
  0xbe   :  { %v3191_v37 = vsel %vm510_vm1, %v2932_v33, 0.0 }
  0xc0   :  { %3183 = vadd.xlane.f32.xlu0 %v3182_v30  ;;  %3186 = vadd.xlane.f32.xlu1 %v3185_v31 }
  0xc2   :  { %4409 = vmatmul.mubr.msk.bf16.gmra.mrb[64].mxu0 %vm510_vm1, %v5852_v58  ;;  %4537 = vmatmul.mubr.msk.bf16.gmra.mrb[64].mxu1 %vm510_vm1, %v154_v23  ;;  %v158_v58 = vld [vmem:[#allocation2 + $0x190] sm:$0xff]  }
  0xc3   :  { %4412 = vmatprep.mubr.msk.bf16.mxu0 %vm5640_vm0, %v8950_v0  ;;  %4540 = vmatprep.mubr.msk.bf16.mxu1 %vm5640_vm0, %v8950_v0 }
  0xc4   :  { %3189 = vadd.xlane.f32.xlu0 %v3188_v36  ;;  %3192 = vadd.xlane.f32.xlu1 %v3191_v37  ;;  %v178_v37 = vld [vmem:[#allocation2 + $0x1e0] sm:$0xff]  }
  0xca   :  { %4413 = vmatmul.mubr.msk.bf16.gmra.mrb[68].mxu0 %vm510_vm1, %v5865_v5  ;;  %4541 = vmatmul.mubr.msk.bf16.gmra.mrb[68].mxu1 %vm510_vm1, %v156_v17  ;;  %v160_v5 = vld [vmem:[#allocation2 + $0x198] sm:$0xff]  }
  0xcb   :  { %4416 = vmatprep.mubr.msk.bf16.mxu0 %vm5640_vm0, %v8950_v0  ;;  %4544 = vmatprep.mubr.msk.bf16.mxu1 %vm5640_vm0, %v8950_v0 }
  0xcc   :  { %v6037_v26 = vpop.xlane.xlu0 %2991  ;;  %v6039_v35 = vpop.xlane.xlu1 %2994 }
  0xcd   :  { %9270 = vst [vmem:[#allocation15_spill] sm:$0xff] %v6037_v26  ;;  %9271 = vst [vmem:[#allocation16_spill] sm:$0xff] %v6039_v35 }
  0xd1   :  { %v6048_v40 = vpop.xlane.xlu0 %2997  ;;  %v6050_v43 = vpop.xlane.xlu1 %3000 }
  0xd2   :  { %4417 = vmatmul.mubr.msk.bf16.gmra.mrb[72].mxu0 %vm510_vm1, %v5871_v12  ;;  %4545 = vmatmul.mubr.msk.bf16.gmra.mrb[72].mxu1 %vm510_vm1, %v158_v58  ;;  %9272 = vst [vmem:[#allocation17_spill] sm:$0xff] %v6048_v40  ;;  %9273 = vst [vmem:[#allocation18_spill] sm:$0xff] %v6050_v43  ;;  %v162_v12 = vld [vmem:[#allocation2 + $0x1a0] sm:$0xff]  }
  0xd3   :  { %4420 = vmatprep.mubr.msk.bf16.mxu0 %vm5640_vm0, %v8950_v0  ;;  %4548 = vmatprep.mubr.msk.bf16.mxu1 %vm5640_vm0, %v8950_v0 }
  0xd5   :  { %v6052_v44 = vpop.xlane.xlu0 %3003  ;;  %v6054_v2 = vpop.xlane.xlu1 %3006 }
  0xd6   :  { %9274 = vst [vmem:[#allocation19_spill] sm:$0xff] %v6052_v44  ;;  %9275 = vst [vmem:[#allocation20_spill] sm:$0xff] %v6054_v2 }
  0xd9   :  { %v6063_v45 = vpop.xlane.xlu0 %3009  ;;  %v6065_v48 = vpop.xlane.xlu1 %3012 }
  0xda   :  { %4421 = vmatmul.mubr.msk.bf16.gmra.mrb[76].mxu0 %vm510_vm1, %v5876_v20  ;;  %4549 = vmatmul.mubr.msk.bf16.gmra.mrb[76].mxu1 %vm510_vm1, %v160_v5  ;;  %9276 = vst [vmem:[#allocation21_spill] sm:$0xff] %v6063_v45  ;;  %9277 = vst [vmem:[#allocation22_spill] sm:$0xff] %v6065_v48  ;;  %v164_v20 = vld [vmem:[#allocation2 + $0x1a8] sm:$0xff]  }
  0xdb   :  { %4424 = vmatprep.mubr.msk.bf16.mxu0 %vm5640_vm0, %v8950_v0  ;;  %4552 = vmatprep.mubr.msk.bf16.mxu1 %vm5640_vm0, %v8950_v0 }
  0xdd   :  { %v6067_v49 = vpop.xlane.xlu0 %3015  ;;  %v6069_v52 = vpop.xlane.xlu1 %3018 }
  0xde   :  { %9278 = vst [vmem:[#allocation23_spill] sm:$0xff] %v6067_v49  ;;  %9279 = vst [vmem:[#allocation24_spill] sm:$0xff] %v6069_v52 }
  0xe1   :  { %v6078_v53 = vpop.xlane.xlu0 %3021  ;;  %v6080_v54 = vpop.xlane.xlu1 %3024 }
  0xe2   :  { %4425 = vmatmul.mubr.msk.bf16.gmra.mrb[80].mxu0 %vm510_vm1, %v5890_v29  ;;  %4553 = vmatmul.mubr.msk.bf16.gmra.mrb[80].mxu1 %vm510_vm1, %v162_v12  ;;  %9280 = vst [vmem:[#allocation25_spill] sm:$0xff] %v6078_v53  ;;  %9281 = vst [vmem:[#allocation26_spill] sm:$0xff] %v6080_v54  ;;  %v166_v29 = vld [vmem:[#allocation2 + $0x1b0] sm:$0xff]  }
  0xe3   :  { %4428 = vmatprep.mubr.msk.bf16.mxu0 %vm5640_vm0, %v8950_v0  ;;  %4556 = vmatprep.mubr.msk.bf16.mxu1 %vm5640_vm0, %v8950_v0 }
  0xe5   :  { %v6082_v55 = vpop.xlane.xlu0 %3027  ;;  %v6084_v34 = vpop.xlane.xlu1 %3030 }
  0xe6   :  { %9282 = vst [vmem:[#allocation27_spill] sm:$0xff] %v6082_v55  ;;  %9283 = vst [vmem:[#allocation28_spill] sm:$0xff] %v6084_v34 }
  0xe9   :  { %v6093_v59 = vpop.xlane.xlu0 %3033  ;;  %v6095_v60 = vpop.xlane.xlu1 %3036 }
  0xea   :  { %4429 = vmatmul.mubr.msk.bf16.gmra.mrb[84].mxu0 %vm510_vm1, %v5899_v38  ;;  %4557 = vmatmul.mubr.msk.bf16.gmra.mrb[84].mxu1 %vm510_vm1, %v164_v20  ;;  %9284 = vst [vmem:[#allocation29_spill] sm:$0xff] %v6093_v59  ;;  %9285 = vst [vmem:[#allocation30_spill] sm:$0xff] %v6095_v60  ;;  %v168_v38 = vld [vmem:[#allocation2 + $0x1b8] sm:$0xff]  }
  0xeb   :  { %4432 = vmatprep.mubr.msk.bf16.mxu0 %vm5640_vm0, %v8950_v0  ;;  %4560 = vmatprep.mubr.msk.bf16.mxu1 %vm5640_vm0, %v8950_v0 }
  0xed   :  { %v6097_v61 = vpop.xlane.xlu0 %3039  ;;  %v6099_v10 = vpop.xlane.xlu1 %3042 }
  0xee   :  { %9286 = vst [vmem:[#allocation31_spill] sm:$0xff] %v6097_v61  ;;  %9287 = vst [vmem:[#allocation32_spill] sm:$0xff] %v6099_v10 }
  0xf1   :  { %v6108_v62 = vpop.xlane.xlu0 %3045  ;;  %v6110_v1 = vpop.xlane.xlu1 %3048 }
  0xf2   :  { %4433 = vmatmul.mubr.msk.bf16.gmra.mrb[88].mxu0 %vm510_vm1, %v5909_v46  ;;  %4561 = vmatmul.mubr.msk.bf16.gmra.mrb[88].mxu1 %vm510_vm1, %v166_v29  ;;  %9288 = vst [vmem:[#allocation33_spill] sm:$0xff] %v6108_v62  ;;  %9289 = vst [vmem:[#allocation34_spill] sm:$0xff] %v6110_v1  ;;  %v170_v46 = vld [vmem:[#allocation2 + $0x1c0] sm:$0xff]  }
  0xf3   :  { %4436 = vmatprep.mubr.msk.bf16.mxu0 %vm5640_vm0, %v8950_v0  ;;  %4564 = vmatprep.mubr.msk.bf16.mxu1 %vm5640_vm0, %v8950_v0 }
  0xf5   :  { %v6112_v6 = vpop.xlane.xlu0 %3051  ;;  %v6114_v7 = vpop.xlane.xlu1 %3054 }
  0xf6   :  { %9290 = vst [vmem:[#allocation35_spill] sm:$0xff] %v6112_v6  ;;  %9291 = vst [vmem:[#allocation36_spill] sm:$0xff] %v6114_v7 }
  0xf9   :  { %v6123_v8 = vpop.xlane.xlu0 %3057  ;;  %v6125_v9 = vpop.xlane.xlu1 %3060 }
  0xfa   :  { %4437 = vmatmul.mubr.msk.bf16.gmra.mrb[92].mxu0 %vm510_vm1, %v5915_v42  ;;  %4565 = vmatmul.mubr.msk.bf16.gmra.mrb[92].mxu1 %vm510_vm1, %v168_v38  ;;  %9292 = vst [vmem:[#allocation37_spill] sm:$0xff] %v6123_v8  ;;  %9293 = vst [vmem:[#allocation38_spill] sm:$0xff] %v6125_v9 }
  0xfb   :  { %4440 = vmatprep.mubr.msk.bf16.mxu0 %vm5640_vm0, %v8950_v0  ;;  %4568 = vmatprep.mubr.msk.bf16.mxu1 %vm5640_vm0, %v8950_v0 }
  0xfd   :  { %v6127_v11 = vpop.xlane.xlu0 %3063  ;;  %v6132_v42 = vpop.xlane.xlu1 %3066 }
  0xfe   :  { %9294 = vst [vmem:[#allocation39_spill] sm:$0xff] %v6127_v11  ;;  %9295 = vst [vmem:[#allocation40_spill] sm:$0xff] %v6132_v42 }
 0x101   :  { %v6138_v41 = vpop.xlane.xlu0 %3069  ;;  %v6140_v14 = vpop.xlane.xlu1 %3072 }
 0x102   :  { %4441 = vmatmul.mubr.msk.bf16.gmra.mrb[96].mxu0 %vm510_vm1, %v5928_v63  ;;  %4569 = vmatmul.mubr.msk.bf16.gmra.mrb[96].mxu1 %vm510_vm1, %v170_v46  ;;  %9296 = vst [vmem:[#allocation41_spill] sm:$0xff] %v6138_v41  ;;  %9297 = vst [vmem:[#allocation42_spill] sm:$0xff] %v6140_v14  ;;  %v174_v63 = vld [vmem:[#allocation2 + $0x1d0] sm:$0xff]  }
 0x103   :  { %4444 = vmatprep.mubr.msk.bf16.mxu0 %vm5640_vm0, %v8950_v0  ;;  %4572 = vmatprep.mubr.msk.bf16.mxu1 %vm5640_vm0, %v8950_v0 }
 0x105   :  { %v6142_v15 = vpop.xlane.xlu0 %3075  ;;  %v6151_v16 = vpop.xlane.xlu1 %3078 }
 0x106   :  { %9298 = vst [vmem:[#allocation43_spill] sm:$0xff] %v6142_v15  ;;  %9299 = vst [vmem:[#allocation44_spill] sm:$0xff] %v6151_v16 }
 0x109   :  { %v6153_v19 = vpop.xlane.xlu0 %3081  ;;  %v6164_v22 = vpop.xlane.xlu1 %3084 }
 0x10a   :  { %4445 = vmatmul.mubr.msk.bf16.gmra.mrb[100].mxu0 %vm510_vm1, %v5937_v50  ;;  %4573 = vmatmul.mubr.msk.bf16.gmra.mrb[100].mxu1 %vm510_vm1, %v172_v13  ;;  %9300 = vst [vmem:[#allocation45_spill] sm:$0xff] %v6153_v19  ;;  %v176_v50 = vld [vmem:[#allocation2 + $0x1d8] sm:$0xff]   ;;  %9301 = vst [vmem:[#allocation46_spill] sm:$0xff] %v6164_v22 }
 0x10b   :  { %4448 = vmatprep.mubr.msk.bf16.mxu0 %vm5640_vm0, %v8950_v0  ;;  %4576 = vmatprep.mubr.msk.bf16.mxu1 %vm5640_vm0, %v8950_v0 }
 0x10d   :  { %v6166_v23 = vpop.xlane.xlu0 %3087  ;;  %v6191_v12 = vpop.xlane.xlu1 %3090 }
 0x10e   :  { %9302 = vst [vmem:[#allocation47_spill] sm:$0xff] %v6166_v23  ;;  %9303 = vst [vmem:[#allocation48_spill] sm:$0xff] %v6191_v12 }
 0x111   :  { %v6195_v20 = vpop.xlane.xlu0 %3093 }
 0x112   :  { %4449 = vmatmul.mubr.msk.bf16.gmra.mrb[104].mxu0 %vm510_vm1, %v5947_v21  ;;  %4577 = vmatmul.mubr.msk.bf16.gmra.mrb[104].mxu1 %vm510_vm1, %v174_v63  ;;  %9304 = vst [vmem:[#allocation49_spill] sm:$0xff] %v6195_v20 }
 0x113   :  { %4452 = vmatprep.mubr.msk.bf16.mxu0 %vm5640_vm0, %v8950_v0  ;;  %4580 = vmatprep.mubr.msk.bf16.mxu1 %vm5640_vm0, %v8950_v0 }
 0x115   :  { %v993_v24 = vpop.f32.mrb[0].mxu1  ;;  %v737_v25 = vpop.f32.mrb[0].mxu0 }
 0x116   :  { %v6169_v21 = vadd.f32 %v6158_v18, %v737_v25  ;;  %v4346_v27 = vpop.f32.mrb[1].mxu0  ;;  %v4474_v4 = vpop.f32.mrb[1].mxu1  ;;  %v6172_v30 = vadd.f32 %v6158_v18, %v993_v24 }
 0x117   :  { %v996_v28 = vpop.f32.mrb[2].mxu1  ;;  %v740_v51 = vpop.f32.mrb[2].mxu0 }
 0x118   :  { %v6175_v31 = vadd.f32 %v6158_v18, %v996_v28  ;;  %v4347_v32 = vpop.f32.mrb[3].mxu0  ;;  %v4475_v33 = vpop.f32.mrb[3].mxu1  ;;  %v1240_v17 = vsel %vm1239_vm2, %v6169_v21, -inf  ;;  %v6187_v58 = vadd.f32 %v6158_v18, %v740_v51  ;;  %v1432_v5 = vsel %vm1239_vm2, %v6172_v30, -inf }
 0x119   :  { %1241 = vmax.xlane.f32.xlu0 %v1240_v17  ;;  %v180_v33 = vld [vmem:[#allocation2 + $0x1e8] sm:$0xff]  }
 0x11a   :  { %v1435_v36 = vsel %vm1239_vm2, %v6175_v31, -inf  ;;  %4453 = vmatmul.mubr.msk.bf16.gmra.mrb[108].mxu0 %vm510_vm1, %v5953_v57  ;;  %4581 = vmatmul.mubr.msk.bf16.gmra.mrb[108].mxu1 %vm510_vm1, %v176_v50  ;;  %v1243_v28 = vsel %vm1239_vm2, %v6187_v58, -inf }
 0x11b   :  { %1436 = vmax.xlane.f32.xlu1 %v1435_v36  ;;  %4456 = vmatprep.mubr.msk.bf16.mxu0 %vm5640_vm0, %v8950_v0 }
 0x11c   :  { %4584 = vmatprep.mubr.msk.bf16.mxu1 %vm5640_vm0, %v8950_v0 }
 0x11d   :  { %1433 = vmax.xlane.f32.xlu0 %v1432_v5  ;;  %v745_v57 = vpop.f32.mrb[4].mxu0  ;;  %v1001_v29 = vpop.f32.mrb[4].mxu1 }
 0x11e   :  { %v6198_v38 = vadd.f32 %v6158_v18, %v745_v57  ;;  %v6201_v46 = vadd.f32 %v6158_v18, %v1001_v29  ;;  %v4350_v13 = vpop.f32.mrb[5].mxu0  ;;  %v4478_v63 = vpop.f32.mrb[5].mxu1 }
 0x11f   :  { %v748_v50 = vpop.f32.mrb[6].mxu0  ;;  %v1004_v24 = vpop.f32.mrb[6].mxu1 }
 0x120   :  { %v6204_v25 = vadd.f32 %v6158_v18, %v748_v50  ;;  %v4351_v27 = vpop.f32.mrb[7].mxu0  ;;  %v4479_v4 = vpop.f32.mrb[7].mxu1  ;;  %v1246_v51 = vsel %vm1239_vm2, %v6198_v38, -inf  ;;  %v1438_v32 = vsel %vm1239_vm2, %v6201_v46, -inf  ;;  %v6220_v17 = vadd.f32 %v6158_v18, %v1004_v24 }
 0x121   :  { %1244 = vmax.xlane.f32.xlu0 %v1243_v28  ;;  %1247 = vmax.xlane.f32.xlu1 %v1246_v51  ;;  %v6224_v5 = vpop.xlane.xlu1 %3096  ;;  %v6226_v57 = vpop.xlane.xlu0 %3099 }
 0x122   :  { %4457 = vmatmul.mubr.msk.bf16.gmra.mrb[112].mxu0 %vm510_vm1, %v5966_v39  ;;  %4585 = vmatmul.mubr.msk.bf16.gmra.mrb[112].mxu1 %vm510_vm1, %v178_v37  ;;  %v1249_v36 = vsel %vm1239_vm2, %v6204_v25, -inf  ;;  %9305 = vst [vmem:[#allocation50_spill] sm:$0xff] %v6224_v5  ;;  %9306 = vst [vmem:[#allocation51_spill] sm:$0xff] %v6226_v57 }
 0x123   :  { %4460 = vmatprep.mubr.msk.bf16.mxu0 %vm5640_vm0, %v8950_v0  ;;  %4588 = vmatprep.mubr.msk.bf16.mxu1 %vm5640_vm0, %v8950_v0 }
 0x125   :  { %1439 = vmax.xlane.f32.xlu0 %v1438_v32  ;;  %1250 = vmax.xlane.f32.xlu1 %v1249_v36  ;;  %v753_v39 = vpop.f32.mrb[8].mxu0  ;;  %v1009_v37 = vpop.f32.mrb[8].mxu1  ;;  %v1441_v32 = vsel %vm1239_vm2, %v6220_v17, -inf }
 0x126   :  { %v6229_v29 = vadd.f32 %v6158_v18, %v753_v39  ;;  %v6232_v13 = vadd.f32 %v6158_v18, %v1009_v37  ;;  %v4354_v63 = vpop.f32.mrb[9].mxu0  ;;  %v4482_v50 = vpop.f32.mrb[9].mxu1  ;;  %v182_v37 = vld [vmem:[#allocation2 + $0x1f0] sm:$0xf] }
 0x127   :  { %v756_v24 = vpop.f32.mrb[10].mxu0  ;;  %v1012_v27 = vpop.f32.mrb[10].mxu1 }
 0x128   :  { %v6235_v4 = vadd.f32 %v6158_v18, %v756_v24  ;;  %v4355_v28 = vpop.f32.mrb[11].mxu0  ;;  %v4483_v51 = vpop.f32.mrb[11].mxu1  ;;  %v1252_v36 = vsel %vm1239_vm2, %v6229_v29, -inf  ;;  %v1444_v39 = vsel %vm1239_vm2, %v6232_v13, -inf  ;;  %v6251_v63 = vadd.f32 %v6158_v18, %v1012_v27 }
 0x129   :  { %1442 = vmax.xlane.f32.xlu1 %v1441_v32  ;;  %1253 = vmax.xlane.f32.xlu0 %v1252_v36  ;;  %v6255_v24 = vpop.xlane.xlu1 %3102  ;;  %v6257_v28 = vpop.xlane.xlu0 %3105 }
 0x12a   :  { %4461 = vmatmul.mubr.msk.bf16.gmra.mrb[116].mxu0 %vm510_vm1, %v5972_v47  ;;  %4589 = vmatmul.mubr.msk.bf16.gmra.mrb[116].mxu1 %vm510_vm1, %v180_v33  ;;  %v1255_v50 = vsel %vm1239_vm2, %v6235_v4, -inf  ;;  %9307 = vst [vmem:[#allocation52_spill] sm:$0xff] %v6255_v24  ;;  %9308 = vst [vmem:[#allocation53_spill] sm:$0xff] %v6257_v28 }
 0x12b   :  { %4464 = vmatprep.mubr.msk.bf16.mxu0 %vm5640_vm0, %v8950_v0  ;;  %4592 = vmatprep.mubr.msk.bf16.mxu1 %vm5640_vm0, %v8950_v0  ;;  %v4213_v0 = vcombine.low %v182_v37, %v182_v37 }
 0x12d   :  { %1445 = vmax.xlane.f32.xlu0 %v1444_v39  ;;  %1256 = vmax.xlane.f32.xlu1 %v1255_v50  ;;  %v761_v47 = vpop.f32.mrb[12].mxu0  ;;  %v1017_v33 = vpop.f32.mrb[12].mxu1  ;;  %v1447_v39 = vsel %vm1239_vm2, %v6251_v63, -inf }
 0x12e   :  { %v6260_v51 = vadd.f32 %v6158_v18, %v761_v47  ;;  %v6263_v32 = vadd.f32 %v6158_v18, %v1017_v33  ;;  %v4358_v36 = vpop.f32.mrb[13].mxu0  ;;  %v4486_v27 = vpop.f32.mrb[13].mxu1 }
 0x12f   :  { %v764_v57 = vpop.f32.mrb[14].mxu0  ;;  %v1020_v20 = vpop.f32.mrb[14].mxu1 }
 0x130   :  { %v6266_v5 = vadd.f32 %v6158_v18, %v764_v57  ;;  %v4359_v24 = vpop.f32.mrb[15].mxu0  ;;  %v4487_v28 = vpop.f32.mrb[15].mxu1  ;;  %v1258_v50 = vsel %vm1239_vm2, %v6260_v51, -inf  ;;  %v1450_v47 = vsel %vm1239_vm2, %v6263_v32, -inf  ;;  %v9309_v57 = vmov 0.0  }
 0x131   :  { %1448 = vmax.xlane.f32.xlu1 %v1447_v39  ;;  %1259 = vmax.xlane.f32.xlu0 %v1258_v50  ;;  %v6280_v37 = vadd.f32 %v6158_v18, %v1020_v20  ;;  %v6284_v28 = vpop.xlane.xlu1 %3108  ;;  %v6286_v33 = vpop.xlane.xlu0 %3111 }
 0x132   :  { %4465 = vmatmul.mubr.msk.bf16.gmra.mrb[120].mxu0 %vm510_vm1, %v5985_v56  ;;  %4593 = vmatmul.mubr.msk.bf16.gmra.mrb[120].mxu1 %vm510_vm1, %v4213_v0  ;;  %v1261_v24 = vsel %vm1239_vm2, %v6266_v5, -inf  ;;  %9310 = vst [vmem:[#allocation54_spill] sm:$0xff] %v6284_v28  ;;  %9311 = vst [vmem:[#allocation55_spill] sm:$0xff] %v6286_v33 }
 0x133   :  { %4468 = vmatprep.mubr.msk.bf16.mxu0 %vm5640_vm0, %v9309_v57 }
 0x135   :  { %1451 = vmax.xlane.f32.xlu0 %v1450_v47  ;;  %1262 = vmax.xlane.f32.xlu1 %v1261_v24  ;;  %v769_v36 = vpop.f32.mrb[16].mxu0  ;;  %v1025_v27 = vpop.f32.mrb[16].mxu1  ;;  %v1453_v47 = vsel %vm1239_vm2, %v6280_v37, -inf }
 0x136   :  { %v6289_v56 = vadd.f32 %v6158_v18, %v769_v36  ;;  %v6292_v0 = vadd.f32 %v6158_v18, %v1025_v27  ;;  %v4362_v39 = vpop.f32.mrb[17].mxu0  ;;  %v4490_v20 = vpop.f32.mrb[17].mxu1 }
 0x137   :  { %v772_v50 = vpop.f32.mrb[18].mxu0  ;;  %v1028_v57 = vpop.f32.mrb[18].mxu1 }
 0x138   :  { %v6295_v23 = vadd.f32 %v6158_v18, %v772_v50  ;;  %v4363_v28 = vpop.f32.mrb[19].mxu0  ;;  %v4491_v12 = vpop.f32.mrb[19].mxu1  ;;  %v1264_v24 = vsel %vm1239_vm2, %v6289_v56, -inf  ;;  %v1456_v36 = vsel %vm1239_vm2, %v6292_v0, -inf  ;;  %v6306_v27 = vadd.f32 %v6158_v18, %v1028_v57 }
 0x139   :  { %1454 = vmax.xlane.f32.xlu1 %v1453_v47  ;;  %1265 = vmax.xlane.f32.xlu0 %v1264_v24  ;;  %v6310_v28 = vpop.xlane.xlu1 %3114  ;;  %v6312_v39 = vpop.xlane.xlu0 %3117 }
 0x13a   :  { %4469 = vmatmul.mubr.msk.bf16.gmra.mrb[124].mxu0 %vm510_vm1, %v5991_v3  ;;  %v1267_v12 = vsel %vm1239_vm2, %v6295_v23, -inf  ;;  %9312 = vst [vmem:[#allocation56_spill] sm:$0xff] %v6310_v28  ;;  %9313 = vst [vmem:[#allocation57_spill] sm:$0xff] %v6312_v39 }
 0x13d   :  { %1457 = vmax.xlane.f32.xlu0 %v1456_v36  ;;  %1268 = vmax.xlane.f32.xlu1 %v1267_v12  ;;  %v777_v20 = vpop.f32.mrb[20].mxu0  ;;  %v1033_v50 = vpop.f32.mrb[20].mxu1  ;;  %v1459_v36 = vsel %vm1239_vm2, %v6306_v27, -inf }
 0x13e   :  { %v6315_v47 = vadd.f32 %v6158_v18, %v777_v20  ;;  %v6318_v24 = vadd.f32 %v6158_v18, %v1033_v50  ;;  %v4366_v3 = vpop.f32.mrb[21].mxu0  ;;  %v4494_v57 = vpop.f32.mrb[21].mxu1 }
 0x13f   :  { %v780_v33 = vpop.f32.mrb[22].mxu0  ;;  %v1036_v19 = vpop.f32.mrb[22].mxu1 }
 0x140   :  { %v6321_v22 = vadd.f32 %v6158_v18, %v780_v33  ;;  %v4367_v28 = vpop.f32.mrb[23].mxu0  ;;  %v4495_v15 = vpop.f32.mrb[23].mxu1  ;;  %v1270_v12 = vsel %vm1239_vm2, %v6315_v47, -inf  ;;  %v1462_v20 = vsel %vm1239_vm2, %v6318_v24, -inf  ;;  %v6330_v50 = vadd.f32 %v6158_v18, %v1036_v19 }
 0x141   :  { %1460 = vmax.xlane.f32.xlu1 %v1459_v36  ;;  %1271 = vmax.xlane.f32.xlu0 %v1270_v12  ;;  %v6334_v3 = vpop.xlane.xlu1 %3120  ;;  %v6336_v15 = vpop.xlane.xlu0 %3123 }
 0x142   :  { %v1273_v33 = vsel %vm1239_vm2, %v6321_v22, -inf  ;;  %9314 = vst [vmem:[#allocation58_spill] sm:$0xff] %v6334_v3  ;;  %9315 = vst [vmem:[#allocation59_spill] sm:$0xff] %v6336_v15 }
 0x145   :  { %1463 = vmax.xlane.f32.xlu0 %v1462_v20  ;;  %1274 = vmax.xlane.f32.xlu1 %v1273_v33  ;;  %v785_v28 = vpop.f32.mrb[24].mxu0  ;;  %v1041_v57 = vpop.f32.mrb[24].mxu1  ;;  %v1465_v20 = vsel %vm1239_vm2, %v6330_v50, -inf }
 0x146   :  { %v6339_v36 = vadd.f32 %v6158_v18, %v785_v28  ;;  %v6342_v12 = vadd.f32 %v6158_v18, %v1041_v57  ;;  %v4370_v39 = vpop.f32.mrb[25].mxu0  ;;  %v4498_v19 = vpop.f32.mrb[25].mxu1 }
 0x147   :  { %v788_v16 = vpop.f32.mrb[26].mxu0  ;;  %v1044_v41 = vpop.f32.mrb[26].mxu1 }
 0x148   :  { %v6345_v14 = vadd.f32 %v6158_v18, %v788_v16  ;;  %v4371_v3 = vpop.f32.mrb[27].mxu0  ;;  %v4499_v11 = vpop.f32.mrb[27].mxu1  ;;  %v1276_v33 = vsel %vm1239_vm2, %v6339_v36, -inf  ;;  %v1468_v28 = vsel %vm1239_vm2, %v6342_v12, -inf  ;;  %v6354_v39 = vadd.f32 %v6158_v18, %v1044_v41 }
 0x149   :  { %1466 = vmax.xlane.f32.xlu1 %v1465_v20  ;;  %1277 = vmax.xlane.f32.xlu0 %v1276_v33  ;;  %v6358_v57 = vpop.xlane.xlu1 %3126  ;;  %v6360_v11 = vpop.xlane.xlu0 %3129 }
 0x14a   :  { %v1279_v16 = vsel %vm1239_vm2, %v6345_v14, -inf  ;;  %9316 = vst [vmem:[#allocation60_spill] sm:$0xff] %v6358_v57  ;;  %9317 = vst [vmem:[#allocation61_spill] sm:$0xff] %v6360_v11 }
 0x14d   :  { %1469 = vmax.xlane.f32.xlu0 %v1468_v28  ;;  %1280 = vmax.xlane.f32.xlu1 %v1279_v16  ;;  %v793_v3 = vpop.f32.mrb[28].mxu0  ;;  %v1049_v19 = vpop.f32.mrb[28].mxu1  ;;  %v1471_v28 = vsel %vm1239_vm2, %v6354_v39, -inf }
 0x14e   :  { %v6363_v20 = vadd.f32 %v6158_v18, %v793_v3  ;;  %v6366_v33 = vadd.f32 %v6158_v18, %v1049_v19  ;;  %v4374_v15 = vpop.f32.mrb[29].mxu0  ;;  %v4502_v41 = vpop.f32.mrb[29].mxu1 }
 0x14f   :  { %v796_v42 = vpop.f32.mrb[30].mxu0  ;;  %v1052_v9 = vpop.f32.mrb[30].mxu1 }
 0x150   :  { %v6369_v8 = vadd.f32 %v6158_v18, %v796_v42  ;;  %v4375_v57 = vpop.f32.mrb[31].mxu0  ;;  %v4503_v7 = vpop.f32.mrb[31].mxu1  ;;  %v1282_v16 = vsel %vm1239_vm2, %v6363_v20, -inf  ;;  %v1474_v3 = vsel %vm1239_vm2, %v6366_v33, -inf  ;;  %v6378_v15 = vadd.f32 %v6158_v18, %v1052_v9 }
 0x151   :  { %1472 = vmax.xlane.f32.xlu1 %v1471_v28  ;;  %1283 = vmax.xlane.f32.xlu0 %v1282_v16  ;;  %v6382_v19 = vpop.xlane.xlu1 %3132  ;;  %v6384_v7 = vpop.xlane.xlu0 %3135 }
 0x152   :  { %v1285_v42 = vsel %vm1239_vm2, %v6369_v8, -inf  ;;  %9318 = vst [vmem:[#allocation62_spill] sm:$0xff] %v6382_v19  ;;  %9319 = vst [vmem:[#allocation63_spill] sm:$0xff] %v6384_v7 }
 0x155   :  { %1475 = vmax.xlane.f32.xlu0 %v1474_v3  ;;  %1286 = vmax.xlane.f32.xlu1 %v1285_v42  ;;  %v801_v57 = vpop.f32.mrb[32].mxu0  ;;  %v1057_v41 = vpop.f32.mrb[32].mxu1  ;;  %v1477_v3 = vsel %vm1239_vm2, %v6378_v15, -inf }
 0x156   :  { %v6387_v28 = vadd.f32 %v6158_v18, %v801_v57  ;;  %v6390_v16 = vadd.f32 %v6158_v18, %v1057_v41  ;;  %v4378_v11 = vpop.f32.mrb[33].mxu0  ;;  %v4506_v9 = vpop.f32.mrb[33].mxu1 }
 0x157   :  { %v804_v6 = vpop.f32.mrb[34].mxu0  ;;  %v1060_v1 = vpop.f32.mrb[34].mxu1 }
 0x158   :  { %v6393_v62 = vadd.f32 %v6158_v18, %v804_v6  ;;  %v4379_v19 = vpop.f32.mrb[35].mxu0  ;;  %v4507_v10 = vpop.f32.mrb[35].mxu1  ;;  %v1288_v42 = vsel %vm1239_vm2, %v6387_v28, -inf  ;;  %v1480_v57 = vsel %vm1239_vm2, %v6390_v16, -inf  ;;  %v6402_v11 = vadd.f32 %v6158_v18, %v1060_v1 }
 0x159   :  { %1478 = vmax.xlane.f32.xlu1 %v1477_v3  ;;  %1289 = vmax.xlane.f32.xlu0 %v1288_v42  ;;  %v6406_v41 = vpop.xlane.xlu1 %3138  ;;  %v6408_v10 = vpop.xlane.xlu0 %3141 }
 0x15a   :  { %9320 = vst [vmem:[#allocation64_spill] sm:$0xff] %v6402_v11  ;;  %v1291_v6 = vsel %vm1239_vm2, %v6393_v62, -inf  ;;  %9321 = vst [vmem:[#allocation65_spill] sm:$0xff] %v6406_v41 }
 0x15b   :  { %9322 = vst [vmem:[#allocation66_spill] sm:$0xff] %v6408_v10 }
 0x15d   :  { %1481 = vmax.xlane.f32.xlu0 %v1480_v57  ;;  %1292 = vmax.xlane.f32.xlu1 %v1291_v6  ;;  %v809_v19 = vpop.f32.mrb[36].mxu0  ;;  %v1065_v9 = vpop.f32.mrb[36].mxu1  ;;  %v1483_v57 = vsel %vm1239_vm2, %v6402_v11, -inf }
 0x15e   :  { %v6411_v3 = vadd.f32 %v6158_v18, %v809_v19  ;;  %v6414_v42 = vadd.f32 %v6158_v18, %v1065_v9  ;;  %v4382_v7 = vpop.f32.mrb[37].mxu0  ;;  %v4510_v1 = vpop.f32.mrb[37].mxu1 }
 0x15f   :  { %v812_v61 = vpop.f32.mrb[38].mxu0  ;;  %v1068_v60 = vpop.f32.mrb[38].mxu1 }
 0x160   :  { %9323 = vst [vmem:[#allocation67_spill] sm:$0xff] %v6411_v3  ;;  %9324 = vst [vmem:[#allocation68_spill] sm:$0xff] %v6414_v42  ;;  %v6417_v59 = vadd.f32 %v6158_v18, %v812_v61  ;;  %v4383_v41 = vpop.f32.mrb[39].mxu0  ;;  %v4511_v34 = vpop.f32.mrb[39].mxu1  ;;  %v1294_v6 = vsel %vm1239_vm2, %v6411_v3, -inf  ;;  %v1486_v19 = vsel %vm1239_vm2, %v6414_v42, -inf  ;;  %v6426_v7 = vadd.f32 %v6158_v18, %v1068_v60 }
 0x161   :  { %1484 = vmax.xlane.f32.xlu1 %v1483_v57  ;;  %1295 = vmax.xlane.f32.xlu0 %v1294_v6  ;;  %v6430_v9 = vpop.xlane.xlu1 %3144  ;;  %v6432_v34 = vpop.xlane.xlu0 %3147 }
 0x162   :  { %9325 = vst [vmem:[#allocation69_spill] sm:$0xff] %v6417_v59  ;;  %9326 = vst [vmem:[#allocation70_spill] sm:$0xff] %v6426_v7  ;;  %v1297_v61 = vsel %vm1239_vm2, %v6417_v59, -inf }
 0x163   :  { %9327 = vst [vmem:[#allocation71_spill] sm:$0xff] %v6430_v9  ;;  %9328 = vst [vmem:[#allocation72_spill] sm:$0xff] %v6432_v34 }
 0x165   :  { %1487 = vmax.xlane.f32.xlu0 %v1486_v19  ;;  %1298 = vmax.xlane.f32.xlu1 %v1297_v61  ;;  %v817_v41 = vpop.f32.mrb[40].mxu0  ;;  %v1073_v1 = vpop.f32.mrb[40].mxu1  ;;  %v1489_v19 = vsel %vm1239_vm2, %v6426_v7, -inf }
 0x166   :  { %v6435_v57 = vadd.f32 %v6158_v18, %v817_v41  ;;  %v6438_v6 = vadd.f32 %v6158_v18, %v1073_v1  ;;  %v4386_v10 = vpop.f32.mrb[41].mxu0  ;;  %v4514_v60 = vpop.f32.mrb[41].mxu1 }
 0x167   :  { %v820_v55 = vpop.f32.mrb[42].mxu0  ;;  %v1076_v54 = vpop.f32.mrb[42].mxu1 }
 0x168   :  { %9329 = vst [vmem:[#allocation73_spill] sm:$0xff] %v6435_v57  ;;  %9330 = vst [vmem:[#allocation74_spill] sm:$0xff] %v6438_v6  ;;  %v6441_v53 = vadd.f32 %v6158_v18, %v820_v55  ;;  %v4387_v9 = vpop.f32.mrb[43].mxu0  ;;  %v4515_v52 = vpop.f32.mrb[43].mxu1  ;;  %v1300_v61 = vsel %vm1239_vm2, %v6435_v57, -inf  ;;  %v1492_v41 = vsel %vm1239_vm2, %v6438_v6, -inf  ;;  %v6450_v10 = vadd.f32 %v6158_v18, %v1076_v54 }
 0x169   :  { %1490 = vmax.xlane.f32.xlu1 %v1489_v19  ;;  %1301 = vmax.xlane.f32.xlu0 %v1300_v61  ;;  %v6454_v1 = vpop.xlane.xlu1 %3150  ;;  %v6456_v52 = vpop.xlane.xlu0 %3153 }
 0x16a   :  { %9331 = vst [vmem:[#allocation75_spill] sm:$0xff] %v6441_v53  ;;  %9332 = vst [vmem:[#allocation76_spill] sm:$0xff] %v6450_v10  ;;  %v1303_v55 = vsel %vm1239_vm2, %v6441_v53, -inf }
 0x16b   :  { %9333 = vst [vmem:[#allocation77_spill] sm:$0xff] %v6454_v1  ;;  %9334 = vst [vmem:[#allocation78_spill] sm:$0xff] %v6456_v52 }
 0x16d   :  { %1493 = vmax.xlane.f32.xlu0 %v1492_v41  ;;  %1304 = vmax.xlane.f32.xlu1 %v1303_v55  ;;  %v825_v9 = vpop.f32.mrb[44].mxu0  ;;  %v1081_v60 = vpop.f32.mrb[44].mxu1  ;;  %v1495_v41 = vsel %vm1239_vm2, %v6450_v10, -inf }
 0x16e   :  { %v6459_v19 = vadd.f32 %v6158_v18, %v825_v9  ;;  %v6462_v61 = vadd.f32 %v6158_v18, %v1081_v60  ;;  %v4390_v34 = vpop.f32.mrb[45].mxu0  ;;  %v4518_v54 = vpop.f32.mrb[45].mxu1 }
 0x16f   :  { %v828_v49 = vpop.f32.mrb[46].mxu0  ;;  %v1084_v48 = vpop.f32.mrb[46].mxu1 }
 0x170   :  { %9335 = vst [vmem:[#allocation79_spill] sm:$0xff] %v6459_v19  ;;  %9336 = vst [vmem:[#allocation80_spill] sm:$0xff] %v6462_v61  ;;  %v6465_v45 = vadd.f32 %v6158_v18, %v828_v49  ;;  %v4391_v1 = vpop.f32.mrb[47].mxu0  ;;  %v4519_v2 = vpop.f32.mrb[47].mxu1  ;;  %v1306_v55 = vsel %vm1239_vm2, %v6459_v19, -inf  ;;  %v1498_v9 = vsel %vm1239_vm2, %v6462_v61, -inf  ;;  %v6474_v34 = vadd.f32 %v6158_v18, %v1084_v48 }
 0x171   :  { %1496 = vmax.xlane.f32.xlu1 %v1495_v41  ;;  %1307 = vmax.xlane.f32.xlu0 %v1306_v55  ;;  %v6478_v60 = vpop.xlane.xlu1 %3156  ;;  %v6480_v2 = vpop.xlane.xlu0 %3159 }
 0x172   :  { %9337 = vst [vmem:[#allocation81_spill] sm:$0xff] %v6465_v45  ;;  %9338 = vst [vmem:[#allocation82_spill] sm:$0xff] %v6474_v34  ;;  %v1309_v49 = vsel %vm1239_vm2, %v6465_v45, -inf }
 0x173   :  { %9339 = vst [vmem:[#allocation83_spill] sm:$0xff] %v6478_v60  ;;  %9340 = vst [vmem:[#allocation84_spill] sm:$0xff] %v6480_v2 }
 0x175   :  { %1499 = vmax.xlane.f32.xlu0 %v1498_v9  ;;  %1310 = vmax.xlane.f32.xlu1 %v1309_v49  ;;  %v833_v1 = vpop.f32.mrb[48].mxu0  ;;  %v1089_v54 = vpop.f32.mrb[48].mxu1  ;;  %v1501_v9 = vsel %vm1239_vm2, %v6474_v34, -inf }
 0x176   :  { %v6483_v41 = vadd.f32 %v6158_v18, %v833_v1  ;;  %v6486_v55 = vadd.f32 %v6158_v18, %v1089_v54  ;;  %v4394_v52 = vpop.f32.mrb[49].mxu0  ;;  %v4522_v48 = vpop.f32.mrb[49].mxu1 }
 0x177   :  { %v836_v44 = vpop.f32.mrb[50].mxu0  ;;  %v1092_v43 = vpop.f32.mrb[50].mxu1 }
 0x178   :  { %9341 = vst [vmem:[#allocation85_spill] sm:$0xff] %v6483_v41  ;;  %9342 = vst [vmem:[#allocation86_spill] sm:$0xff] %v6486_v55  ;;  %v6489_v40 = vadd.f32 %v6158_v18, %v836_v44  ;;  %v4395_v60 = vpop.f32.mrb[51].mxu0  ;;  %v4523_v35 = vpop.f32.mrb[51].mxu1  ;;  %v1312_v49 = vsel %vm1239_vm2, %v6483_v41, -inf  ;;  %v1504_v1 = vsel %vm1239_vm2, %v6486_v55, -inf  ;;  %v6498_v52 = vadd.f32 %v6158_v18, %v1092_v43 }
 0x179   :  { %1502 = vmax.xlane.f32.xlu1 %v1501_v9  ;;  %1313 = vmax.xlane.f32.xlu0 %v1312_v49  ;;  %v6502_v54 = vpop.xlane.xlu1 %3162  ;;  %v6504_v35 = vpop.xlane.xlu0 %3165 }
 0x17a   :  { %9343 = vst [vmem:[#allocation87_spill] sm:$0xff] %v6489_v40  ;;  %9344 = vst [vmem:[#allocation88_spill] sm:$0xff] %v6498_v52  ;;  %v1315_v44 = vsel %vm1239_vm2, %v6489_v40, -inf }
 0x17b   :  { %9345 = vst [vmem:[#allocation89_spill] sm:$0xff] %v6502_v54  ;;  %9346 = vst [vmem:[#allocation90_spill] sm:$0xff] %v6504_v35 }
 0x17d   :  { %1505 = vmax.xlane.f32.xlu0 %v1504_v1  ;;  %1316 = vmax.xlane.f32.xlu1 %v1315_v44  ;;  %v841_v60 = vpop.f32.mrb[52].mxu0  ;;  %v1097_v48 = vpop.f32.mrb[52].mxu1  ;;  %v1507_v1 = vsel %vm1239_vm2, %v6498_v52, -inf }
 0x17e   :  { %v6507_v9 = vadd.f32 %v6158_v18, %v841_v60  ;;  %v6510_v49 = vadd.f32 %v6158_v18, %v1097_v48  ;;  %v4398_v2 = vpop.f32.mrb[53].mxu0  ;;  %v4526_v43 = vpop.f32.mrb[53].mxu1 }
 0x17f   :  { %v844_v55 = vpop.f32.mrb[54].mxu0  ;;  %v1100_v41 = vpop.f32.mrb[54].mxu1 }
 0x180   :  { %9347 = vst [vmem:[#allocation91_spill] sm:$0xff] %v6507_v9  ;;  %9348 = vst [vmem:[#allocation92_spill] sm:$0xff] %v6510_v49  ;;  %v6513_v40 = vadd.f32 %v6158_v18, %v844_v55  ;;  %v4399_v54 = vpop.f32.mrb[55].mxu0  ;;  %v4527_v26 = vpop.f32.mrb[55].mxu1  ;;  %v1318_v44 = vsel %vm1239_vm2, %v6507_v9, -inf  ;;  %v1510_v60 = vsel %vm1239_vm2, %v6510_v49, -inf  ;;  %v6522_v2 = vadd.f32 %v6158_v18, %v1100_v41 }
 0x181   :  { %1508 = vmax.xlane.f32.xlu1 %v1507_v1  ;;  %1319 = vmax.xlane.f32.xlu0 %v1318_v44  ;;  %v6526_v48 = vpop.xlane.xlu1 %3168  ;;  %v6528_v26 = vpop.xlane.xlu0 %3171 }
 0x182   :  { %9349 = vst [vmem:[#allocation93_spill] sm:$0xff] %v6513_v40  ;;  %9350 = vst [vmem:[#allocation94_spill] sm:$0xff] %v6522_v2  ;;  %v1321_v55 = vsel %vm1239_vm2, %v6513_v40, -inf }
 0x183   :  { %9351 = vst [vmem:[#allocation95_spill] sm:$0xff] %v6526_v48  ;;  %9352 = vst [vmem:[#allocation96_spill] sm:$0xff] %v6528_v26 }
 0x185   :  { %1511 = vmax.xlane.f32.xlu0 %v1510_v60  ;;  %1322 = vmax.xlane.f32.xlu1 %v1321_v55  ;;  %v849_v54 = vpop.f32.mrb[56].mxu0  ;;  %v1105_v43 = vpop.f32.mrb[56].mxu1  ;;  %v1513_v60 = vsel %vm1239_vm2, %v6522_v2, -inf }
 0x186   :  { %v6531_v1 = vadd.f32 %v6158_v18, %v849_v54  ;;  %v6534_v44 = vadd.f32 %v6158_v18, %v1105_v43  ;;  %v4402_v35 = vpop.f32.mrb[57].mxu0  ;;  %v4530_v41 = vpop.f32.mrb[57].mxu1 }
 0x187   :  { %v852_v49 = vpop.f32.mrb[58].mxu0  ;;  %v1108_v9 = vpop.f32.mrb[58].mxu1 }
 0x188   :  { %9353 = vst [vmem:[#allocation97_spill] sm:$0xff] %v6531_v1  ;;  %9354 = vst [vmem:[#allocation98_spill] sm:$0xff] %v6534_v44  ;;  %v6537_v40 = vadd.f32 %v6158_v18, %v852_v49  ;;  %v4403_v48 = vpop.f32.mrb[59].mxu0  ;;  %v4531_v52 = vpop.f32.mrb[59].mxu1  ;;  %v1324_v55 = vsel %vm1239_vm2, %v6531_v1, -inf  ;;  %v1516_v54 = vsel %vm1239_vm2, %v6534_v44, -inf  ;;  %v6546_v35 = vadd.f32 %v6158_v18, %v1108_v9 }
 0x189   :  { %1514 = vmax.xlane.f32.xlu1 %v1513_v60  ;;  %1325 = vmax.xlane.f32.xlu0 %v1324_v55  ;;  %v6550_v43 = vpop.xlane.xlu1 %3174  ;;  %v6552_v52 = vpop.xlane.xlu0 %3177 }
 0x18a   :  { %9355 = vst [vmem:[#allocation99_spill] sm:$0xff] %v6537_v40  ;;  %9356 = vst [vmem:[#allocation100_spill] sm:$0xff] %v6546_v35  ;;  %v1327_v49 = vsel %vm1239_vm2, %v6537_v40, -inf }
 0x18b   :  { %9357 = vst [vmem:[#allocation101_spill] sm:$0xff] %v6550_v43  ;;  %9358 = vst [vmem:[#allocation102_spill] sm:$0xff] %v6552_v52 }
 0x18d   :  { %1517 = vmax.xlane.f32.xlu0 %v1516_v54  ;;  %1328 = vmax.xlane.f32.xlu1 %v1327_v49  ;;  %v857_v48 = vpop.f32.mrb[60].mxu0  ;;  %v1113_v41 = vpop.f32.mrb[60].mxu1  ;;  %v1519_v54 = vsel %vm1239_vm2, %v6546_v35, -inf }
 0x18e   :  { %v6555_v60 = vadd.f32 %v6158_v18, %v857_v48  ;;  %v6558_v55 = vadd.f32 %v6158_v18, %v1113_v41  ;;  %v4406_v26 = vpop.f32.mrb[61].mxu0  ;;  %v4534_v9 = vpop.f32.mrb[61].mxu1 }
 0x18f   :  { %v860_v44 = vpop.f32.mrb[62].mxu0  ;;  %v1116_v1 = vpop.f32.mrb[62].mxu1 }
 0x190   :  { %9359 = vst [vmem:[#allocation103_spill] sm:$0xff] %v6555_v60  ;;  %9360 = vst [vmem:[#allocation104_spill] sm:$0xff] %v6558_v55  ;;  %v6561_v40 = vadd.f32 %v6158_v18, %v860_v44  ;;  %v4407_v43 = vpop.f32.mrb[63].mxu0  ;;  %v4535_v2 = vpop.f32.mrb[63].mxu1  ;;  %v1330_v49 = vsel %vm1239_vm2, %v6555_v60, -inf  ;;  %v1522_v48 = vsel %vm1239_vm2, %v6558_v55, -inf  ;;  %v6570_v26 = vadd.f32 %v6158_v18, %v1116_v1 }
 0x191   :  { %1520 = vmax.xlane.f32.xlu1 %v1519_v54  ;;  %1331 = vmax.xlane.f32.xlu0 %v1330_v49  ;;  %v6574_v41 = vpop.xlane.xlu1 %3180  ;;  %v6576_v2 = vpop.xlane.xlu0 %3183 }
 0x192   :  { %9361 = vst [vmem:[#allocation105_spill] sm:$0xff] %v6561_v40  ;;  %9362 = vst [vmem:[#allocation106_spill] sm:$0xff] %v6570_v26  ;;  %v1333_v44 = vsel %vm1239_vm2, %v6561_v40, -inf }
 0x193   :  { %9363 = vst [vmem:[#allocation107_spill] sm:$0xff] %v6574_v41  ;;  %9364 = vst [vmem:[#allocation108_spill] sm:$0xff] %v6576_v2 }
 0x195   :  { %1523 = vmax.xlane.f32.xlu0 %v1522_v48  ;;  %1334 = vmax.xlane.f32.xlu1 %v1333_v44  ;;  %v865_v43 = vpop.f32.mrb[64].mxu0  ;;  %v1121_v9 = vpop.f32.mrb[64].mxu1  ;;  %v1525_v48 = vsel %vm1239_vm2, %v6570_v26, -inf }
 0x196   :  { %v6579_v54 = vadd.f32 %v6158_v18, %v865_v43  ;;  %v6582_v49 = vadd.f32 %v6158_v18, %v1121_v9  ;;  %v4410_v52 = vpop.f32.mrb[65].mxu0  ;;  %v4538_v1 = vpop.f32.mrb[65].mxu1 }
 0x197   :  { %v868_v55 = vpop.f32.mrb[66].mxu0  ;;  %v1124_v60 = vpop.f32.mrb[66].mxu1 }
 0x198   :  { %9365 = vst [vmem:[#allocation109_spill] sm:$0xff] %v6579_v54  ;;  %9366 = vst [vmem:[#allocation110_spill] sm:$0xff] %v6582_v49  ;;  %v6585_v40 = vadd.f32 %v6158_v18, %v868_v55  ;;  %v4411_v41 = vpop.f32.mrb[67].mxu0  ;;  %v4539_v35 = vpop.f32.mrb[67].mxu1  ;;  %v1336_v44 = vsel %vm1239_vm2, %v6579_v54, -inf  ;;  %v1528_v43 = vsel %vm1239_vm2, %v6582_v49, -inf  ;;  %v6594_v52 = vadd.f32 %v6158_v18, %v1124_v60 }
 0x199   :  { %1526 = vmax.xlane.f32.xlu1 %v1525_v48  ;;  %1337 = vmax.xlane.f32.xlu0 %v1336_v44  ;;  %v6598_v9 = vpop.xlane.xlu1 %3186  ;;  %v6600_v35 = vpop.xlane.xlu0 %3189 }
 0x19a   :  { %9367 = vst [vmem:[#allocation111_spill] sm:$0xff] %v6585_v40  ;;  %9368 = vst [vmem:[#allocation112_spill] sm:$0xff] %v6594_v52  ;;  %v1339_v55 = vsel %vm1239_vm2, %v6585_v40, -inf }
 0x19b   :  { %9369 = vst [vmem:[#allocation113_spill] sm:$0xff] %v6598_v9  ;;  %9370 = vst [vmem:[#allocation114_spill] sm:$0xff] %v6600_v35 }
 0x19d   :  { %1529 = vmax.xlane.f32.xlu0 %v1528_v43  ;;  %1340 = vmax.xlane.f32.xlu1 %v1339_v55  ;;  %v873_v41 = vpop.f32.mrb[68].mxu0  ;;  %v1129_v1 = vpop.f32.mrb[68].mxu1  ;;  %v1531_v43 = vsel %vm1239_vm2, %v6594_v52, -inf }
 0x19e   :  { %v6603_v48 = vadd.f32 %v6158_v18, %v873_v41  ;;  %v6606_v44 = vadd.f32 %v6158_v18, %v1129_v1  ;;  %v4414_v49 = vpop.f32.mrb[69].mxu0  ;;  %v4542_v60 = vpop.f32.mrb[69].mxu1 }
 0x19f   :  { %v876_v54 = vpop.f32.mrb[70].mxu0  ;;  %v1132_v26 = vpop.f32.mrb[70].mxu1 }
 0x1a0   :  { %9371 = vst [vmem:[#allocation115_spill] sm:$0xff] %v6603_v48  ;;  %9372 = vst [vmem:[#allocation116_spill] sm:$0xff] %v6606_v44  ;;  %v6609_v40 = vadd.f32 %v6158_v18, %v876_v54  ;;  %v4415_v9 = vpop.f32.mrb[71].mxu0  ;;  %v4543_v2 = vpop.f32.mrb[71].mxu1  ;;  %v1342_v55 = vsel %vm1239_vm2, %v6603_v48, -inf  ;;  %v1534_v41 = vsel %vm1239_vm2, %v6606_v44, -inf  ;;  %v6618_v49 = vadd.f32 %v6158_v18, %v1132_v26 }
 0x1a1   :  { %1532 = vmax.xlane.f32.xlu1 %v1531_v43  ;;  %1343 = vmax.xlane.f32.xlu0 %v1342_v55  ;;  %v6620_v1 = vpop.xlane.xlu1 %3192 }
 0x1a2   :  { %9373 = vst [vmem:[#allocation117_spill] sm:$0xff] %v6609_v40  ;;  %9374 = vst [vmem:[#allocation118_spill] sm:$0xff] %v6618_v49  ;;  %v1345_v54 = vsel %vm1239_vm2, %v6609_v40, -inf }
 0x1a3   :  { %9375 = vst [vmem:[#allocation119_spill] sm:$0xff] %v6620_v1 }
 0x1a5   :  { %1535 = vmax.xlane.f32.xlu0 %v1534_v41  ;;  %1346 = vmax.xlane.f32.xlu1 %v1345_v54  ;;  %v881_v2 = vpop.f32.mrb[72].mxu0  ;;  %v1137_v9 = vpop.f32.mrb[72].mxu1  ;;  %v1537_v54 = vsel %vm1239_vm2, %v6618_v49, -inf }
 0x1a6   :  { %v6625_v60 = vadd.f32 %v6158_v18, %v881_v2  ;;  %v6628_v43 = vadd.f32 %v6158_v18, %v1137_v9  ;;  %v6630_v55 = vpop.xlane.xlu0 %1241  ;;  %v4418_v44 = vpop.f32.mrb[73].mxu0 }
 0x1a7   :  { %9378 = vst [vmem:[#allocation122_spill] sm:$0xff] %v6630_v55  ;;  %v1615_v26 = vsub.f32 %v6169_v21, %v6630_v55  ;;  %v884_v48 = vpop.f32.mrb[74].mxu0  ;;  %v4546_v52 = vpop.f32.mrb[73].mxu1 }
 0x1a8   :  { %9376 = vst [vmem:[#allocation120_spill] sm:$0xff] %v6625_v60  ;;  %9377 = vst [vmem:[#allocation121_spill] sm:$0xff] %v6628_v43  ;;  %v6635_v40 = vadd.f32 %v6158_v18, %v884_v48  ;;  %v1140_v41 = vpop.f32.mrb[74].mxu1  ;;  %v1348_v2 = vsel %vm1239_vm2, %v6625_v60, -inf  ;;  %v4419_v9 = vpop.f32.mrb[75].mxu0  ;;  %v1540_v21 = vsel %vm1239_vm2, %v6628_v43, -inf }
 0x1a9   :  { %v4547_v1 = vpop.f32.mrb[75].mxu1  ;;  %1538 = vmax.xlane.f32.xlu1 %v1537_v54  ;;  %1349 = vmax.xlane.f32.xlu0 %v1348_v2  ;;  %v6641_v44 = vpop.xlane.xlu1 %1436  ;;  %v1740_v52 = vmul.f32 1.442695, %v1615_v26  ;;  %v6650_v49 = vadd.f32 %v6158_v18, %v1140_v41 }
 0x1aa   :  { %9379 = vst [vmem:[#allocation123_spill] sm:$0xff] %v6635_v40  ;;  %9380 = vst [vmem:[#allocation124_spill] sm:$0xff] %v6641_v44  ;;  %v6643_v35 = vpop.xlane.xlu0 %1433  ;;  %v1351_v9 = vsel %vm1239_vm2, %v6635_v40, -inf  ;;  %v1680_v41 = vsub.f32 %v6175_v31, %v6641_v44  ;;  %v6726_v44 = vld [vmem:[#allocation7] ss:$0 sm:$0xff] }
 0x1ab   :  { %9381 = vst [vmem:[#allocation125_spill] sm:$0xff] %v6643_v35  ;;  %v1679_v48 = vsub.f32 %v6172_v30, %v6643_v35  ;;  %9382 = vst [vmem:[#allocation126_spill] sm:$0xff] %v6650_v49  ;;  %4735 = vpow2.f32 %v1740_v52 }
 0x1ad   :  { %1541 = vmax.xlane.f32.xlu0 %v1540_v21  ;;  %1352 = vmax.xlane.f32.xlu1 %v1351_v9  ;;  %v889_v1 = vpop.f32.mrb[76].mxu0  ;;  %v1145_v54 = vpop.f32.mrb[76].mxu1  ;;  %v1868_v2 = vmul.f32 1.442695, %v1679_v48 }
 0x1ae   :  { %v6655_v60 = vadd.f32 %v6158_v18, %v889_v1  ;;  %v6658_v43 = vadd.f32 %v6158_v18, %v1145_v54  ;;  %v6660_v26 = vpop.xlane.xlu0 %1244  ;;  %v6662_v30 = vpop.xlane.xlu1 %1247  ;;  %v1543_v1 = vsel %vm1239_vm2, %v6650_v49, -inf }
 0x1af   :  { %9385 = vst [vmem:[#allocation129_spill] sm:$0xff] %v6660_v26  ;;  %9386 = vst [vmem:[#allocation130_spill] sm:$0xff] %v6662_v30  ;;  %v1616_v21 = vsub.f32 %v6187_v58, %v6660_v26  ;;  %v4422_v9 = vpop.f32.mrb[77].mxu0  ;;  %v4550_v40 = vpop.f32.mrb[77].mxu1  ;;  %4737 = vpow2.f32 %v1868_v2 }
 0x1b0   :  { %9383 = vst [vmem:[#allocation127_spill] sm:$0xff] %v6655_v60  ;;  %9384 = vst [vmem:[#allocation128_spill] sm:$0xff] %v6658_v43  ;;  %v892_v48 = vpop.f32.mrb[78].mxu0  ;;  %v1148_v35 = vpop.f32.mrb[78].mxu1  ;;  %v1354_v54 = vsel %vm1239_vm2, %v6655_v60, -inf  ;;  %v1546_v58 = vsel %vm1239_vm2, %v6658_v43, -inf }
 0x1b1   :  { %v1742_v55 = vmul.f32 1.442695, %v1616_v21  ;;  %v6673_v34 = vadd.f32 %v6158_v18, %v892_v48  ;;  %v4423_v52 = vpop.f32.mrb[79].mxu0  ;;  %v4551_v45 = vpop.f32.mrb[79].mxu1  ;;  %1544 = vmax.xlane.f32.xlu1 %v1543_v1  ;;  %1355 = vmax.xlane.f32.xlu0 %v1354_v54  ;;  %v1870_v9 = vmul.f32 1.442695, %v1680_v41  ;;  %v6682_v60 = vadd.f32 %v6158_v18, %v1148_v35 }
 0x1b2   :  { %v6675_v31 = vpop.xlane.xlu0 %1439  ;;  %v6677_v40 = vpop.xlane.xlu1 %1250  ;;  %v1617_v35 = vsub.f32 %v6198_v38, %v6662_v30 }
 0x1b3   :  { %9387 = vst [vmem:[#allocation131_spill] sm:$0xff] %v6673_v34  ;;  %9388 = vst [vmem:[#allocation132_spill] sm:$0xff] %v6675_v31  ;;  %4739 = vpow2.f32 %v1742_v55  ;;  %v1357_v21 = vsel %vm1239_vm2, %v6673_v34, -inf  ;;  %v1549_v34 = vsel %vm1239_vm2, %v6682_v60, -inf }
 0x1b4   :  { %9389 = vst [vmem:[#allocation133_spill] sm:$0xff] %v6677_v40  ;;  %9390 = vst [vmem:[#allocation134_spill] sm:$0xff] %v6682_v60  ;;  %4741 = vpow2.f32 %v1870_v9  ;;  %v1681_v9 = vsub.f32 %v6201_v46, %v6675_v31  ;;  %v1744_v60 = vmul.f32 1.442695, %v1617_v35 }
 0x1b5   :  { %1547 = vmax.xlane.f32.xlu0 %v1546_v58  ;;  %1358 = vmax.xlane.f32.xlu1 %v1357_v21  ;;  %v897_v45 = vpop.f32.mrb[80].mxu0  ;;  %v1153_v48 = vpop.f32.mrb[80].mxu1 }
 0x1b6   :  { %v6687_v2 = vadd.f32 %v6158_v18, %v897_v45  ;;  %v6690_v1 = vadd.f32 %v6158_v18, %v1153_v48  ;;  %v6692_v54 = vpop.xlane.xlu1 %1442  ;;  %v6694_v41 = vpop.xlane.xlu0 %1253  ;;  %4743 = vpow2.f32 %v1744_v60 }
 0x1b7   :  { %9393 = vst [vmem:[#allocation137_spill] sm:$0xff] %v6692_v54  ;;  %9394 = vst [vmem:[#allocation138_spill] sm:$0xff] %v6694_v41  ;;  %v4426_v55 = vpop.f32.mrb[81].mxu0  ;;  %v4554_v52 = vpop.f32.mrb[81].mxu1 }
 0x1b8   :  { %9391 = vst [vmem:[#allocation135_spill] sm:$0xff] %v6687_v2  ;;  %9392 = vst [vmem:[#allocation136_spill] sm:$0xff] %v6690_v1  ;;  %v900_v58 = vpop.f32.mrb[82].mxu0  ;;  %v1156_v21 = vpop.f32.mrb[82].mxu1  ;;  %v1360_v45 = vsel %vm1239_vm2, %v6687_v2, -inf  ;;  %v1552_v52 = vsel %vm1239_vm2, %v6690_v1, -inf  ;;  %v1618_v2 = vsub.f32 %v6204_v25, %v6677_v40  ;;  %v1682_v25 = vsub.f32 %v6220_v17, %v6692_v54 }
 0x1b9   :  { %v6702_v18 = vpop.eup %4735  ;;  %v4427_v48 = vpop.f32.mrb[83].mxu0  ;;  %1550 = vmax.xlane.f32.xlu1 %v1549_v34  ;;  %1361 = vmax.xlane.f32.xlu0 %v1360_v45  ;;  %v6729_v26 = vadd.f32 %v6726_v44, %v900_v58 }
 0x1ba   :  { %9395 = vst [vmem:[#allocation139_spill] sm:$0xff] %v6702_v18  ;;  %v4555_v43 = vpop.f32.mrb[83].mxu1  ;;  %v6706_v38 = vpop.xlane.xlu0 %1445  ;;  %v1990_v34 = vsel %vm1239_vm2, %v6702_v18, 0.0  ;;  %v1872_v48 = vmul.f32 1.442695, %v1681_v9 }
 0x1bb   :  { %9396 = vst [vmem:[#allocation140_spill] sm:$0xff] %v6706_v38  ;;  %v6708_v55 = vpop.xlane.xlu1 %1256  ;;  %v6714_v49 = vpop.eup %4737  ;;  %v1746_v35 = vmul.f32 1.442695, %v1618_v2  ;;  %9402 = vst [vmem:[#allocation146_spill] sm:$0xff] %v6729_v26  ;;  %v1874_v54 = vmul.f32 1.442695, %v1682_v25  ;;  %v1619_v25 = vsub.f32 %v6229_v29, %v6694_v41 }
 0x1bc   :  { %9397 = vst [vmem:[#allocation141_spill] sm:$0xff] %v6708_v55  ;;  %9398 = vst [vmem:[#allocation142_spill] sm:$0xff] %v6714_v49  ;;  %4745 = vpow2.f32 %v1872_v48 }
 0x1bd   :  { %v6718_v43 = vpop.eup %4739  ;;  %1991 = vadd.xlane.f32.xlu1 %v1990_v34  ;;  %1553 = vmax.xlane.f32.xlu0 %v1552_v52  ;;  %v905_v46 = vpop.f32.mrb[84].mxu0  ;;  %v2182_v52 = vsel %vm1239_vm2, %v6714_v49, 0.0  ;;  %4747 = vpow2.f32 %v1746_v35 }
 0x1be   :  { %9399 = vst [vmem:[#allocation143_spill] sm:$0xff] %v6718_v43  ;;  %v1161_v45 = vpop.f32.mrb[84].mxu1  ;;  %v6722_v30 = vpop.xlane.xlu0 %1259  ;;  %v1993_v9 = vsel %vm1239_vm2, %v6718_v43, 0.0  ;;  %v6744_v58 = vadd.f32 %v6726_v44, %v905_v46  ;;  %v6747_v43 = vadd.f32 %v6726_v44, %v1156_v21  ;;  %4749 = vpow2.f32 %v1874_v54 }
 0x1bf   :  { %v6720_v31 = vpop.xlane.xlu1 %1448  ;;  %9401 = vst [vmem:[#allocation145_spill] sm:$0xff] %v6722_v30  ;;  %v4430_v1 = vpop.f32.mrb[85].mxu0  ;;  %v1683_v54 = vsub.f32 %v6232_v13, %v6706_v38 }
 0x1c0   :  { %9400 = vst [vmem:[#allocation144_spill] sm:$0xff] %v6720_v31  ;;  %v4558_v40 = vpop.f32.mrb[85].mxu1  ;;  %v908_v34 = vpop.f32.mrb[86].mxu0  ;;  %9406 = vst [vmem:[#allocation150_spill] sm:$0xff] %v6744_v58  ;;  %v1366_v21 = vsel %vm1239_vm2, %v6744_v58, -inf }
 0x1c1   :  { %v6735_v18 = vpop.f32.mrb[86].mxu1  ;;  %v6737_v60 = vpop.eup %4741  ;;  %2183 = vadd.xlane.f32.xlu1 %v2182_v52  ;;  %1994 = vadd.xlane.f32.xlu0 %v1993_v9  ;;  %9407 = vst [vmem:[#allocation151_spill] sm:$0xff] %v6747_v43  ;;  %v1363_v52 = vsel %vm1239_vm2, %v6729_v26, -inf  ;;  %v6799_v10 = vadd.f32 %v6726_v44, %v908_v34 }
 0x1c2   :  { %9403 = vst [vmem:[#allocation147_spill] sm:$0xff] %v6737_v60  ;;  %v4431_v17 = vpop.f32.mrb[87].mxu0  ;;  %v4559_v40 = vpop.f32.mrb[87].mxu1  ;;  %v2185_v49 = vsel %vm1239_vm2, %v6737_v60, 0.0 }
 0x1c3   :  { %v6739_v2 = vpop.xlane.xlu0 %1451  ;;  %v6741_v1 = vpop.xlane.xlu1 %1262  ;;  %v6754_v17 = vadd.f32 %v6726_v44, %v1161_v45  ;;  %9418 = vst [vmem:[#allocation162_spill] sm:$0xff] %v6799_v10 }
 0x1c4   :  { %9404 = vst [vmem:[#allocation148_spill] sm:$0xff] %v6739_v2  ;;  %9405 = vst [vmem:[#allocation149_spill] sm:$0xff] %v6741_v1  ;;  %v6770_v60 = vpop.eup %4743 }
 0x1c5   :  { %2186 = vadd.xlane.f32.xlu0 %v2185_v49  ;;  %1364 = vmax.xlane.f32.xlu1 %v1363_v52  ;;  %v913_v48 = vpop.f32.mrb[88].mxu0  ;;  %v1169_v9 = vpop.f32.mrb[88].mxu1  ;;  %9408 = vst [vmem:[#allocation152_spill] sm:$0xff] %v6754_v17  ;;  %v1555_v49 = vsel %vm1239_vm2, %v6747_v43, -inf  ;;  %9411 = vst [vmem:[#allocation155_spill] sm:$0xff] %v6770_v60  ;;  %v1620_v43 = vsub.f32 %v6235_v4, %v6708_v55 }
 0x1c6   :  { %v4434_v40 = vpop.f32.mrb[89].mxu0  ;;  %v4562_v26 = vpop.f32.mrb[89].mxu1 }
 0x1c7   :  { %v6756_v46 = vpop.xlane.xlu1 %1454  ;;  %v6758_v35 = vpop.xlane.xlu0 %1265  ;;  %v1558_v26 = vsel %vm1239_vm2, %v6754_v17, -inf  ;;  %v1748_v40 = vmul.f32 1.442695, %v1619_v25  ;;  %v1750_v4 = vmul.f32 1.442695, %v1620_v43  ;;  %v1684_v17 = vsub.f32 %v6251_v63, %v6720_v31 }
 0x1c8   :  { %9409 = vst [vmem:[#allocation153_spill] sm:$0xff] %v6756_v46  ;;  %9410 = vst [vmem:[#allocation154_spill] sm:$0xff] %v6758_v35  ;;  %v6766_v52 = vpop.f32.mrb[90].mxu0  ;;  %v6768_v45 = vpop.f32.mrb[90].mxu1 }
 0x1c9   :  { %1556 = vmax.xlane.f32.xlu1 %v1555_v49  ;;  %1367 = vmax.xlane.f32.xlu0 %v1366_v21  ;;  %v4435_v61 = vpop.f32.mrb[91].mxu0  ;;  %v4563_v19 = vpop.f32.mrb[91].mxu1  ;;  %v1876_v49 = vmul.f32 1.442695, %v1683_v54  ;;  %4751 = vpow2.f32 %v1748_v40  ;;  %v1878_v31 = vmul.f32 1.442695, %v1684_v17 }
 0x1ca   :  { %v6782_v41 = vpop.eup %4745  ;;  %v1996_v61 = vsel %vm1239_vm2, %v6770_v60, 0.0 }
 0x1cb   :  { %v6774_v58 = vpop.xlane.xlu0 %1457  ;;  %v6776_v29 = vpop.xlane.xlu1 %1268  ;;  %9414 = vst [vmem:[#allocation158_spill] sm:$0xff] %v6782_v41  ;;  %4753 = vpow2.f32 %v1876_v49 }
 0x1cc   :  { %9412 = vst [vmem:[#allocation156_spill] sm:$0xff] %v6774_v58  ;;  %9413 = vst [vmem:[#allocation157_spill] sm:$0xff] %v6776_v29  ;;  %v6786_v19 = vpop.eup %4747  ;;  %4755 = vpow2.f32 %v1750_v4 }
 0x1cd   :  { %9415 = vst [vmem:[#allocation159_spill] sm:$0xff] %v6786_v19  ;;  %1997 = vadd.xlane.f32.xlu1 %v1996_v61  ;;  %1559 = vmax.xlane.f32.xlu0 %v1558_v26  ;;  %v6788_v13 = vpop.f32.mrb[92].mxu0  ;;  %v6790_v21 = vpop.f32.mrb[92].mxu1  ;;  %v2188_v26 = vsel %vm1239_vm2, %v6782_v41, 0.0  ;;  %v1999_v54 = vsel %vm1239_vm2, %v6786_v19, 0.0  ;;  %v6820_v19 = vadd.f32 %v6726_v44, %v6735_v18  ;;  %4757 = vpow2.f32 %v1878_v31 }
 0x1ce   :  { %v4438_v55 = vpop.f32.mrb[93].mxu0  ;;  %v4566_v60 = vpop.f32.mrb[93].mxu1  ;;  %v1685_v31 = vsub.f32 %v6263_v32, %v6739_v2 }
 0x1cf   :  { %v6792_v38 = vpop.xlane.xlu1 %1460  ;;  %v6794_v25 = vpop.xlane.xlu0 %1271  ;;  %v6816_v60 = vadd.f32 %v6726_v44, %v913_v48  ;;  %9423 = vst [vmem:[#allocation167_spill] sm:$0xff] %v6820_v19  ;;  %v6831_v48 = vadd.f32 %v6726_v44, %v1169_v9 }
 0x1d0   :  { %9416 = vst [vmem:[#allocation160_spill] sm:$0xff] %v6792_v38  ;;  %9417 = vst [vmem:[#allocation161_spill] sm:$0xff] %v6794_v25  ;;  %v6805_v61 = vpop.f32.mrb[94].mxu0  ;;  %v6807_v53 = vpop.f32.mrb[94].mxu1 }
 0x1d1   :  { %v6809_v40 = vpop.eup %4749  ;;  %2189 = vadd.xlane.f32.xlu1 %v2188_v26  ;;  %2000 = vadd.xlane.f32.xlu0 %v1999_v54  ;;  %v4439_v63 = vpop.f32.mrb[95].mxu0  ;;  %9422 = vst [vmem:[#allocation166_spill] sm:$0xff] %v6816_v60  ;;  %v1369_v54 = vsel %vm1239_vm2, %v6799_v10, -inf  ;;  %9424 = vst [vmem:[#allocation168_spill] sm:$0xff] %v6831_v48  ;;  %v1372_v18 = vsel %vm1239_vm2, %v6816_v60, -inf  ;;  %v1561_v10 = vsel %vm1239_vm2, %v6820_v19, -inf  ;;  %v1622_v19 = vsub.f32 %v6266_v5, %v6741_v1 }
 0x1d2   :  { %9419 = vst [vmem:[#allocation163_spill] sm:$0xff] %v6809_v40  ;;  %v4567_v55 = vpop.f32.mrb[95].mxu1  ;;  %v2191_v26 = vsel %vm1239_vm2, %v6809_v40, 0.0 }
 0x1d3   :  { %v6811_v43 = vpop.xlane.xlu0 %1463  ;;  %v6813_v34 = vpop.xlane.xlu1 %1274  ;;  %v1621_v55 = vsub.f32 %v6260_v51, %v6722_v30  ;;  %v1754_v5 = vmul.f32 1.442695, %v1622_v19 }
 0x1d4   :  { %9420 = vst [vmem:[#allocation164_spill] sm:$0xff] %v6811_v43  ;;  %9421 = vst [vmem:[#allocation165_spill] sm:$0xff] %v6813_v34  ;;  %v6847_v41 = vpop.eup %4751 }
 0x1d5   :  { %2192 = vadd.xlane.f32.xlu0 %v2191_v26  ;;  %1370 = vmax.xlane.f32.xlu1 %v1369_v54  ;;  %v6826_v49 = vpop.f32.mrb[96].mxu0  ;;  %v6828_v63 = vpop.f32.mrb[96].mxu1  ;;  %9427 = vst [vmem:[#allocation171_spill] sm:$0xff] %v6847_v41 }
 0x1d6   :  { %v4442_v26 = vpop.f32.mrb[97].mxu0  ;;  %v4570_v54 = vpop.f32.mrb[97].mxu1 }
 0x1d7   :  { %v6833_v17 = vpop.xlane.xlu1 %1466  ;;  %v6835_v4 = vpop.xlane.xlu0 %1277  ;;  %v1564_v26 = vsel %vm1239_vm2, %v6831_v48, -inf  ;;  %v1752_v54 = vmul.f32 1.442695, %v1621_v55  ;;  %v1686_v48 = vsub.f32 %v6280_v37, %v6756_v46 }
 0x1d8   :  { %9425 = vst [vmem:[#allocation169_spill] sm:$0xff] %v6833_v17  ;;  %9426 = vst [vmem:[#allocation170_spill] sm:$0xff] %v6835_v4  ;;  %v6843_v40 = vpop.f32.mrb[98].mxu0  ;;  %v6845_v9 = vpop.f32.mrb[98].mxu1 }
 0x1d9   :  { %1562 = vmax.xlane.f32.xlu1 %v1561_v10  ;;  %1373 = vmax.xlane.f32.xlu0 %v1372_v18  ;;  %v4443_v6 = vpop.f32.mrb[99].mxu0  ;;  %v4571_v57 = vpop.f32.mrb[99].mxu1  ;;  %v1880_v18 = vmul.f32 1.442695, %v1685_v31  ;;  %4759 = vpow2.f32 %v1752_v54  ;;  %v6895_v54 = vadd.f32 %v6726_v44, %v6788_v13  ;;  %v1882_v46 = vmul.f32 1.442695, %v1686_v48 }
 0x1da   :  { %v6859_v30 = vpop.eup %4753  ;;  %v2002_v6 = vsel %vm1239_vm2, %v6847_v41, 0.0  ;;  %v6911_v13 = vadd.f32 %v6726_v44, %v6790_v21 }
 0x1db   :  { %v6851_v60 = vpop.xlane.xlu0 %1469  ;;  %v6853_v51 = vpop.xlane.xlu1 %1280  ;;  %9430 = vst [vmem:[#allocation174_spill] sm:$0xff] %v6859_v30  ;;  %4761 = vpow2.f32 %v1880_v18  ;;  %9438 = vst [vmem:[#allocation182_spill] sm:$0xff] %v6895_v54 }
 0x1dc   :  { %9428 = vst [vmem:[#allocation172_spill] sm:$0xff] %v6851_v60  ;;  %9429 = vst [vmem:[#allocation173_spill] sm:$0xff] %v6853_v51  ;;  %v6863_v57 = vpop.eup %4755  ;;  %4763 = vpow2.f32 %v1754_v5  ;;  %v1378_v5 = vsel %vm1239_vm2, %v6895_v54, -inf }
 0x1dd   :  { %9431 = vst [vmem:[#allocation175_spill] sm:$0xff] %v6863_v57  ;;  %2003 = vadd.xlane.f32.xlu1 %v2002_v6  ;;  %1565 = vmax.xlane.f32.xlu0 %v1564_v26  ;;  %v6865_v32 = vpop.f32.mrb[100].mxu0  ;;  %v6867_v10 = vpop.f32.mrb[100].mxu1  ;;  %v6877_v6 = vadd.f32 %v6726_v44, %v6766_v52  ;;  %v2194_v26 = vsel %vm1239_vm2, %v6859_v30, 0.0  ;;  %v2005_v31 = vsel %vm1239_vm2, %v6863_v57, 0.0  ;;  %v6899_v57 = vadd.f32 %v6726_v44, %v6768_v45 }
 0x1de   :  { %v4446_v1 = vpop.f32.mrb[101].mxu0  ;;  %v4574_v41 = vpop.f32.mrb[101].mxu1  ;;  %9440 = vst [vmem:[#allocation184_spill] sm:$0xff] %v6911_v13  ;;  %4765 = vpow2.f32 %v1882_v46  ;;  %v1687_v46 = vsub.f32 %v6292_v0, %v6774_v58 }
 0x1df   :  { %v6869_v2 = vpop.xlane.xlu1 %1472  ;;  %v6871_v55 = vpop.xlane.xlu0 %1283  ;;  %9434 = vst [vmem:[#allocation178_spill] sm:$0xff] %v6877_v6  ;;  %9439 = vst [vmem:[#allocation183_spill] sm:$0xff] %v6899_v57  ;;  %v1375_v18 = vsel %vm1239_vm2, %v6877_v6, -inf  ;;  %v1567_v6 = vsel %vm1239_vm2, %v6899_v57, -inf  ;;  %v1624_v57 = vsub.f32 %v6295_v23, %v6776_v29 }
 0x1e0   :  { %9432 = vst [vmem:[#allocation176_spill] sm:$0xff] %v6869_v2  ;;  %9433 = vst [vmem:[#allocation177_spill] sm:$0xff] %v6871_v55  ;;  %v6883_v7 = vpop.f32.mrb[102].mxu0  ;;  %v6885_v59 = vpop.f32.mrb[102].mxu1 }
 0x1e1   :  { %v6887_v19 = vpop.eup %4757  ;;  %2195 = vadd.xlane.f32.xlu1 %v2194_v26  ;;  %2006 = vadd.xlane.f32.xlu0 %v2005_v31  ;;  %v4447_v37 = vpop.f32.mrb[103].mxu0  ;;  %v1758_v23 = vmul.f32 1.442695, %v1624_v57 }
 0x1e2   :  { %9435 = vst [vmem:[#allocation179_spill] sm:$0xff] %v6887_v19  ;;  %v4575_v41 = vpop.f32.mrb[103].mxu1  ;;  %v2197_v26 = vsel %vm1239_vm2, %v6887_v19, 0.0 }
 0x1e3   :  { %v6889_v1 = vpop.xlane.xlu0 %1475  ;;  %v6891_v52 = vpop.xlane.xlu1 %1286  ;;  %v1623_v41 = vsub.f32 %v6289_v56, %v6758_v35 }
 0x1e4   :  { %9436 = vst [vmem:[#allocation180_spill] sm:$0xff] %v6889_v1  ;;  %9437 = vst [vmem:[#allocation181_spill] sm:$0xff] %v6891_v52  ;;  %v6927_v30 = vpop.eup %4759 }
 0x1e5   :  { %2198 = vadd.xlane.f32.xlu0 %v2197_v26  ;;  %1376 = vmax.xlane.f32.xlu1 %v1375_v18  ;;  %v6905_v31 = vpop.f32.mrb[104].mxu0  ;;  %v6907_v37 = vpop.f32.mrb[104].mxu1  ;;  %9443 = vst [vmem:[#allocation187_spill] sm:$0xff] %v6927_v30 }
 0x1e6   :  { %v4450_v26 = vpop.f32.mrb[105].mxu0  ;;  %v4578_v18 = vpop.f32.mrb[105].mxu1 }
 0x1e7   :  { %v6913_v48 = vpop.xlane.xlu1 %1478  ;;  %v6915_v45 = vpop.xlane.xlu0 %1289  ;;  %v1570_v26 = vsel %vm1239_vm2, %v6911_v13, -inf  ;;  %v1756_v18 = vmul.f32 1.442695, %v1623_v41  ;;  %v1688_v13 = vsub.f32 %v6306_v27, %v6792_v38 }
 0x1e8   :  { %9441 = vst [vmem:[#allocation185_spill] sm:$0xff] %v6913_v48  ;;  %9442 = vst [vmem:[#allocation186_spill] sm:$0xff] %v6915_v45  ;;  %v6923_v19 = vpop.f32.mrb[106].mxu0  ;;  %v6925_v21 = vpop.f32.mrb[106].mxu1 }
 0x1e9   :  { %1568 = vmax.xlane.f32.xlu1 %v1567_v6  ;;  %1379 = vmax.xlane.f32.xlu0 %v1378_v5  ;;  %v4451_v42 = vpop.f32.mrb[107].mxu0  ;;  %v4579_v3 = vpop.f32.mrb[107].mxu1  ;;  %v1884_v5 = vmul.f32 1.442695, %v1687_v46  ;;  %4767 = vpow2.f32 %v1756_v18  ;;  %v6975_v18 = vadd.f32 %v6726_v44, %v6826_v49  ;;  %v1886_v38 = vmul.f32 1.442695, %v1688_v13 }
 0x1ea   :  { %v6939_v35 = vpop.eup %4761  ;;  %v2008_v42 = vsel %vm1239_vm2, %v6927_v30, 0.0  ;;  %v6991_v49 = vadd.f32 %v6726_v44, %v6828_v63 }
 0x1eb   :  { %v6931_v54 = vpop.xlane.xlu0 %1481  ;;  %v6933_v56 = vpop.xlane.xlu1 %1292  ;;  %9446 = vst [vmem:[#allocation190_spill] sm:$0xff] %v6939_v35  ;;  %4769 = vpow2.f32 %v1884_v5  ;;  %9454 = vst [vmem:[#allocation198_spill] sm:$0xff] %v6975_v18 }
 0x1ec   :  { %9444 = vst [vmem:[#allocation188_spill] sm:$0xff] %v6931_v54  ;;  %9445 = vst [vmem:[#allocation189_spill] sm:$0xff] %v6933_v56  ;;  %v6943_v3 = vpop.eup %4763  ;;  %4771 = vpow2.f32 %v1758_v23  ;;  %v1384_v23 = vsel %vm1239_vm2, %v6975_v18, -inf }
 0x1ed   :  { %9447 = vst [vmem:[#allocation191_spill] sm:$0xff] %v6943_v3  ;;  %2009 = vadd.xlane.f32.xlu1 %v2008_v42  ;;  %1571 = vmax.xlane.f32.xlu0 %v1570_v26  ;;  %v6945_v0 = vpop.f32.mrb[108].mxu0  ;;  %v6947_v6 = vpop.f32.mrb[108].mxu1  ;;  %v6957_v42 = vadd.f32 %v6726_v44, %v6805_v61  ;;  %v2200_v26 = vsel %vm1239_vm2, %v6939_v35, 0.0  ;;  %v2011_v46 = vsel %vm1239_vm2, %v6943_v3, 0.0  ;;  %v6979_v3 = vadd.f32 %v6726_v44, %v6807_v53 }
 0x1ee   :  { %v4454_v29 = vpop.f32.mrb[109].mxu0  ;;  %v4582_v30 = vpop.f32.mrb[109].mxu1  ;;  %9456 = vst [vmem:[#allocation200_spill] sm:$0xff] %v6991_v49  ;;  %4773 = vpow2.f32 %v1886_v38  ;;  %v1689_v38 = vsub.f32 %v6318_v24, %v6811_v43 }
 0x1ef   :  { %v6949_v58 = vpop.xlane.xlu1 %1484  ;;  %v6951_v41 = vpop.xlane.xlu0 %1295  ;;  %9450 = vst [vmem:[#allocation194_spill] sm:$0xff] %v6957_v42  ;;  %9455 = vst [vmem:[#allocation199_spill] sm:$0xff] %v6979_v3  ;;  %v1381_v5 = vsel %vm1239_vm2, %v6957_v42, -inf  ;;  %v1573_v42 = vsel %vm1239_vm2, %v6979_v3, -inf  ;;  %v1626_v3 = vsub.f32 %v6321_v22, %v6813_v34 }
 0x1f0   :  { %9448 = vst [vmem:[#allocation192_spill] sm:$0xff] %v6949_v58  ;;  %9449 = vst [vmem:[#allocation193_spill] sm:$0xff] %v6951_v41  ;;  %v6963_v11 = vpop.f32.mrb[110].mxu0  ;;  %v6965_v41 = vpop.f32.mrb[110].mxu1 }
 0x1f1   :  { %v6967_v57 = vpop.eup %4765  ;;  %2201 = vadd.xlane.f32.xlu1 %v2200_v26  ;;  %2012 = vadd.xlane.f32.xlu0 %v2011_v46  ;;  %v4455_v27 = vpop.f32.mrb[111].mxu0  ;;  %v1762_v22 = vmul.f32 1.442695, %v1626_v3 }
 0x1f2   :  { %9451 = vst [vmem:[#allocation195_spill] sm:$0xff] %v6967_v57  ;;  %v4583_v30 = vpop.f32.mrb[111].mxu1  ;;  %v2203_v26 = vsel %vm1239_vm2, %v6967_v57, 0.0 }
 0x1f3   :  { %v6969_v29 = vpop.xlane.xlu0 %1487  ;;  %v6971_v61 = vpop.xlane.xlu1 %1298  ;;  %v1625_v30 = vsub.f32 %v6315_v47, %v6794_v25 }
 0x1f4   :  { %9452 = vst [vmem:[#allocation196_spill] sm:$0xff] %v6969_v29  ;;  %9453 = vst [vmem:[#allocation197_spill] sm:$0xff] %v6971_v61  ;;  %v7007_v35 = vpop.eup %4767 }
 0x1f5   :  { %2204 = vadd.xlane.f32.xlu0 %v2203_v26  ;;  %1382 = vmax.xlane.f32.xlu1 %v1381_v5  ;;  %v6985_v46 = vpop.f32.mrb[112].mxu0  ;;  %v6987_v27 = vpop.f32.mrb[112].mxu1  ;;  %9459 = vst [vmem:[#allocation203_spill] sm:$0xff] %v7007_v35 }
 0x1f6   :  { %v4458_v26 = vpop.f32.mrb[113].mxu0  ;;  %v4586_v5 = vpop.f32.mrb[113].mxu1 }
 0x1f7   :  { %v6993_v13 = vpop.xlane.xlu1 %1490  ;;  %v6995_v53 = vpop.xlane.xlu0 %1301  ;;  %v1576_v26 = vsel %vm1239_vm2, %v6991_v49, -inf  ;;  %v1760_v5 = vmul.f32 1.442695, %v1625_v30  ;;  %v1690_v49 = vsub.f32 %v6330_v50, %v6833_v17 }
 0x1f8   :  { %9457 = vst [vmem:[#allocation201_spill] sm:$0xff] %v6993_v13  ;;  %9458 = vst [vmem:[#allocation202_spill] sm:$0xff] %v6995_v53  ;;  %v7003_v57 = vpop.f32.mrb[114].mxu0  ;;  %v7005_v63 = vpop.f32.mrb[114].mxu1 }
 0x1f9   :  { %1574 = vmax.xlane.f32.xlu1 %v1573_v42  ;;  %1385 = vmax.xlane.f32.xlu0 %v1384_v23  ;;  %v4459_v53 = vpop.f32.mrb[115].mxu0  ;;  %v4587_v13 = vpop.f32.mrb[115].mxu1  ;;  %v2014_v42 = vsel %vm1239_vm2, %v7007_v35, 0.0  ;;  %v1888_v23 = vmul.f32 1.442695, %v1689_v38  ;;  %4775 = vpow2.f32 %v1760_v5  ;;  %v7055_v5 = vadd.f32 %v6726_v44, %v6865_v32 }
 0x1fa   :  { %v7019_v25 = vpop.eup %4769  ;;  %v1890_v17 = vmul.f32 1.442695, %v1690_v49  ;;  %v7071_v32 = vadd.f32 %v6726_v44, %v6867_v10 }
 0x1fb   :  { %v7011_v18 = vpop.xlane.xlu0 %1493  ;;  %v7013_v47 = vpop.xlane.xlu1 %1304  ;;  %9462 = vst [vmem:[#allocation206_spill] sm:$0xff] %v7019_v25  ;;  %4777 = vpow2.f32 %v1888_v23  ;;  %9470 = vst [vmem:[#allocation214_spill] sm:$0xff] %v7055_v5 }
 0x1fc   :  { %9460 = vst [vmem:[#allocation204_spill] sm:$0xff] %v7011_v18  ;;  %9461 = vst [vmem:[#allocation205_spill] sm:$0xff] %v7013_v47  ;;  %v7023_v13 = vpop.eup %4771  ;;  %4779 = vpow2.f32 %v1762_v22  ;;  %v1390_v22 = vsel %vm1239_vm2, %v7055_v5, -inf }
 0x1fd   :  { %9463 = vst [vmem:[#allocation207_spill] sm:$0xff] %v7023_v13  ;;  %2015 = vadd.xlane.f32.xlu1 %v2014_v42  ;;  %1577 = vmax.xlane.f32.xlu0 %v1576_v26  ;;  %v7025_v24 = vpop.f32.mrb[116].mxu0  ;;  %v7027_v53 = vpop.f32.mrb[116].mxu1  ;;  %v7037_v42 = vadd.f32 %v6726_v44, %v6843_v40  ;;  %v2206_v26 = vsel %vm1239_vm2, %v7019_v25, 0.0  ;;  %v2017_v38 = vsel %vm1239_vm2, %v7023_v13, 0.0  ;;  %v7059_v13 = vadd.f32 %v6726_v44, %v6845_v9 }
 0x1fe   :  { %v4462_v34 = vpop.f32.mrb[117].mxu0  ;;  %v4590_v35 = vpop.f32.mrb[117].mxu1  ;;  %9472 = vst [vmem:[#allocation216_spill] sm:$0xff] %v7071_v32  ;;  %4781 = vpow2.f32 %v1890_v17  ;;  %v1691_v17 = vsub.f32 %v6342_v12, %v6851_v60 }
 0x1ff   :  { %v7029_v43 = vpop.xlane.xlu1 %1496  ;;  %v7031_v30 = vpop.xlane.xlu0 %1307  ;;  %9466 = vst [vmem:[#allocation210_spill] sm:$0xff] %v7037_v42  ;;  %9471 = vst [vmem:[#allocation215_spill] sm:$0xff] %v7059_v13  ;;  %v1387_v23 = vsel %vm1239_vm2, %v7037_v42, -inf  ;;  %v1579_v42 = vsel %vm1239_vm2, %v7059_v13, -inf }
 0x200   :  { %9464 = vst [vmem:[#allocation208_spill] sm:$0xff] %v7029_v43  ;;  %9465 = vst [vmem:[#allocation209_spill] sm:$0xff] %v7031_v30  ;;  %v7043_v43 = vpop.f32.mrb[118].mxu0  ;;  %v7045_v30 = vpop.f32.mrb[118].mxu1 }
 0x201   :  { %v7047_v3 = vpop.eup %4773  ;;  %2207 = vadd.xlane.f32.xlu1 %v2206_v26  ;;  %2018 = vadd.xlane.f32.xlu0 %v2017_v38  ;;  %v4463_v50 = vpop.f32.mrb[119].mxu0 }
 0x202   :  { %9467 = vst [vmem:[#allocation211_spill] sm:$0xff] %v7047_v3  ;;  %v4591_v35 = vpop.f32.mrb[119].mxu1  ;;  %v2209_v26 = vsel %vm1239_vm2, %v7047_v3, 0.0 }
 0x203   :  { %v7049_v34 = vpop.xlane.xlu0 %1499  ;;  %v7051_v40 = vpop.xlane.xlu1 %1310  ;;  %v1627_v35 = vsub.f32 %v6339_v36, %v6835_v4 }
 0x204   :  { %9468 = vst [vmem:[#allocation212_spill] sm:$0xff] %v7049_v34  ;;  %9469 = vst [vmem:[#allocation213_spill] sm:$0xff] %v7051_v40  ;;  %v7085_v25 = vpop.eup %4775 }
 0x205   :  { %2210 = vadd.xlane.f32.xlu0 %v2209_v26  ;;  %1388 = vmax.xlane.f32.xlu1 %v1387_v23  ;;  %v7065_v38 = vpop.f32.mrb[120].mxu0  ;;  %v7067_v50 = vpop.f32.mrb[120].mxu1  ;;  %9475 = vst [vmem:[#allocation219_spill] sm:$0xff] %v7085_v25 }
 0x206   :  { %v4466_v26 = vpop.f32.mrb[121].mxu0  ;;  %v4594_v23 = vpop.f32.mrb[121].mxu1 }
 0x207   :  { %v7073_v49 = vpop.xlane.xlu1 %1502  ;;  %v7075_v9 = vpop.xlane.xlu0 %1313  ;;  %v1582_v26 = vsel %vm1239_vm2, %v7071_v32, -inf  ;;  %v1764_v23 = vmul.f32 1.442695, %v1627_v35 }
 0x208   :  { %9473 = vst [vmem:[#allocation217_spill] sm:$0xff] %v7073_v49  ;;  %9474 = vst [vmem:[#allocation218_spill] sm:$0xff] %v7075_v9  ;;  %v7083_v3 = vpop.f32.mrb[122].mxu0  ;;  %v1236_v10 = vpop.f32.mrb[122].mxu1 }
 0x209   :  { %1580 = vmax.xlane.f32.xlu1 %v1579_v42  ;;  %1391 = vmax.xlane.f32.xlu0 %v1390_v22  ;;  %v4467_v9 = vpop.f32.mrb[123].mxu0  ;;  %v4595_v49 = vpop.f32.mrb[123].mxu1  ;;  %v1628_v10 = vsub.f32 %v6345_v14, %v6853_v51  ;;  %v2020_v42 = vsel %vm1239_vm2, %v7085_v25, 0.0  ;;  %4783 = vpow2.f32 %v1764_v23  ;;  %v1692_v14 = vsub.f32 %v6354_v39, %v6869_v2 }
 0x20a   :  { %v7097_v13 = vpop.eup %4777  ;;  %v1892_v9 = vmul.f32 1.442695, %v1691_v17  ;;  %v7113_v51 = vadd.f32 %v6726_v44, %v6883_v7  ;;  %v7129_v7 = vadd.f32 %v6726_v44, %v6905_v31  ;;  %v7133_v2 = vadd.f32 %v6726_v44, %v6885_v59 }
 0x20b   :  { %v7089_v5 = vpop.xlane.xlu0 %1505  ;;  %v7091_v36 = vpop.xlane.xlu1 %1316  ;;  %9478 = vst [vmem:[#allocation222_spill] sm:$0xff] %v7097_v13  ;;  %v1766_v35 = vmul.f32 1.442695, %v1628_v10  ;;  %v1894_v10 = vmul.f32 1.442695, %v1692_v14  ;;  %v1629_v14 = vsub.f32 %v6363_v20, %v6871_v55  ;;  %v1630_v20 = vsub.f32 %v6369_v8, %v6891_v52 }
 0x20c   :  { %9476 = vst [vmem:[#allocation220_spill] sm:$0xff] %v7089_v5  ;;  %9477 = vst [vmem:[#allocation221_spill] sm:$0xff] %v7091_v36  ;;  %v7101_v49 = vpop.eup %4779  ;;  %4785 = vpow2.f32 %v1892_v9  ;;  %v1393_v9 = vsel %vm1239_vm2, %v7113_v51, -inf  ;;  %v1396_v59 = vsel %vm1239_vm2, %v7129_v7, -inf  ;;  %v7179_v8 = vadd.f32 %v6726_v44, %v6923_v19 }
 0x20d   :  { %9479 = vst [vmem:[#allocation223_spill] sm:$0xff] %v7101_v49  ;;  %2021 = vadd.xlane.f32.xlu1 %v2020_v42  ;;  %1583 = vmax.xlane.f32.xlu0 %v1582_v26  ;;  %v7103_v12 = vpop.f32.mrb[124].mxu0  ;;  %9482 = vst [vmem:[#allocation226_spill] sm:$0xff] %v7113_v51  ;;  %v2212_v26 = vsel %vm1239_vm2, %v7097_v13, 0.0  ;;  %v2023_v17 = vsel %vm1239_vm2, %v7101_v49, 0.0  ;;  %v7121_v4 = vpop.eup %4781  ;;  %4787 = vpow2.f32 %v1766_v35  ;;  %v9572_v13 = vld [vmem:[#allocation16_spill] sm:$0xff] }
 0x20e   :  { %v4470_v32 = vpop.f32.mrb[125].mxu0  ;;  %9483 = vst [vmem:[#allocation227_spill] sm:$0xff] %v7121_v4  ;;  %9486 = vst [vmem:[#allocation230_spill] sm:$0xff] %v7129_v7  ;;  %4789 = vpow2.f32 %v1894_v10  ;;  %v1768_v7 = vmul.f32 1.442695, %v1629_v14  ;;  %v1694_v14 = vsub.f32 %v6378_v15, %v6913_v48  ;;  %v7193_v15 = vadd.f32 %v6726_v44, %v6945_v0 }
 0x20f   :  { %v7105_v22 = vpop.xlane.xlu1 %1508  ;;  %v7107_v60 = vpop.xlane.xlu0 %1319  ;;  %9487 = vst [vmem:[#allocation231_spill] sm:$0xff] %v7133_v2  ;;  %9498 = vst [vmem:[#allocation242_spill] sm:$0xff] %v7179_v8  ;;  %v7416_v25 = vmul.f32 0.5, %v9572_v13 }
 0x210   :  { %9480 = vst [vmem:[#allocation224_spill] sm:$0xff] %v7105_v22  ;;  %9481 = vst [vmem:[#allocation225_spill] sm:$0xff] %v7107_v60  ;;  %v7119_v42 = vpop.f32.mrb[126].mxu0  ;;  %4791 = vpow2.f32 %v1768_v7  ;;  %v1898_v19 = vmul.f32 1.442695, %v1694_v14  ;;  %v1631_v14 = vsub.f32 %v6387_v28, %v6915_v45  ;;  %v1632_v28 = vsub.f32 %v6393_v62, %v6933_v56 }
 0x211   :  { %2213 = vadd.xlane.f32.xlu1 %v2212_v26  ;;  %2024 = vadd.xlane.f32.xlu0 %v2023_v17  ;;  %v4471_v23 = vpop.f32.mrb[127].mxu0  ;;  %v2215_v26 = vsel %vm1239_vm2, %v7121_v4, 0.0  ;;  %v7141_v17 = vadd.f32 %v6726_v44, %v6907_v37  ;;  %v1693_v37 = vsub.f32 %v6366_v33, %v6889_v1  ;;  %9502 = vst [vmem:[#allocation246_spill] sm:$0xff] %v7193_v15  ;;  %v9571_v4 = vld [vmem:[#allocation15_spill] sm:$0xff] }
 0x212   :  { %v1585_v23 = vsel %vm1239_vm2, %v7133_v2, -inf  ;;  %v7243_v62 = vadd.f32 %v6726_v44, %v6963_v11  ;;  %v3740_v49 = vmul.f32 0.5, %v9571_v4 }
 0x213   :  { %v7123_v39 = vpop.xlane.xlu0 %1511  ;;  %v7125_v32 = vpop.xlane.xlu1 %1322  ;;  %9488 = vst [vmem:[#allocation232_spill] sm:$0xff] %v7141_v17  ;;  %v1588_v10 = vsel %vm1239_vm2, %v7141_v17, -inf  ;;  %v1896_v33 = vmul.f32 1.442695, %v1693_v37  ;;  %v1770_v17 = vmul.f32 1.442695, %v1630_v20 }
 0x214   :  { %9484 = vst [vmem:[#allocation228_spill] sm:$0xff] %v7123_v39  ;;  %9485 = vst [vmem:[#allocation229_spill] sm:$0xff] %v7125_v32 }
 0x215   :  { %2216 = vadd.xlane.f32.xlu0 %v2215_v26  ;;  %1394 = vmax.xlane.f32.xlu1 %v1393_v9  ;;  %v7153_v26 = vpop.eup %4783  ;;  %4793 = vpow2.f32 %v1896_v33  ;;  %v7205_v33 = vadd.f32 %v6726_v44, %v6947_v6  ;;  %v1695_v6 = vsub.f32 %v6390_v16, %v6931_v54 }
 0x216   :  { %9491 = vst [vmem:[#allocation235_spill] sm:$0xff] %v7153_v26  ;;  %v7165_v55 = vpop.eup %4785  ;;  %4795 = vpow2.f32 %v1770_v17 }
 0x217   :  { %v7143_v31 = vpop.xlane.xlu1 %1514  ;;  %v7145_v35 = vpop.xlane.xlu0 %1325  ;;  %9494 = vst [vmem:[#allocation238_spill] sm:$0xff] %v7165_v55  ;;  %v2218_v52 = vsel %vm1239_vm2, %v7165_v55, 0.0  ;;  %9504 = vst [vmem:[#allocation248_spill] sm:$0xff] %v7205_v33  ;;  %4797 = vpow2.f32 %v1898_v19  ;;  %v1594_v19 = vsel %vm1239_vm2, %v7205_v33, -inf  ;;  %v1900_v16 = vmul.f32 1.442695, %v1695_v6 }
 0x218   :  { %9489 = vst [vmem:[#allocation233_spill] sm:$0xff] %v7143_v31  ;;  %9490 = vst [vmem:[#allocation234_spill] sm:$0xff] %v7145_v35  ;;  %v1774_v33 = vmul.f32 1.442695, %v1632_v28 }
 0x219   :  { %1586 = vmax.xlane.f32.xlu1 %v1585_v23  ;;  %1397 = vmax.xlane.f32.xlu0 %v1396_v59  ;;  %v2026_v23 = vsel %vm1239_vm2, %v7153_v26, 0.0  ;;  %v7169_v59 = vpop.eup %4787 }
 0x21a   :  { %9495 = vst [vmem:[#allocation239_spill] sm:$0xff] %v7169_v59  ;;  %v7185_v37 = vpop.eup %4789 }
 0x21b   :  { %v7157_v9 = vpop.xlane.xlu0 %1517  ;;  %v7159_v51 = vpop.xlane.xlu1 %1328  ;;  %9499 = vst [vmem:[#allocation243_spill] sm:$0xff] %v7185_v37  ;;  %v2221_v48 = vsel %vm1239_vm2, %v7185_v37, 0.0 }
 0x21c   :  { %9492 = vst [vmem:[#allocation236_spill] sm:$0xff] %v7157_v9  ;;  %9493 = vst [vmem:[#allocation237_spill] sm:$0xff] %v7159_v51 }
 0x21d   :  { %2027 = vadd.xlane.f32.xlu1 %v2026_v23  ;;  %1589 = vmax.xlane.f32.xlu0 %v1588_v10  ;;  %v2029_v10 = vsel %vm1239_vm2, %v7169_v59, 0.0  ;;  %v7197_v23 = vadd.f32 %v6726_v44, %v6925_v21  ;;  %v1402_v21 = vsel %vm1239_vm2, %v7193_v15, -inf  ;;  %v1772_v15 = vmul.f32 1.442695, %v1631_v14  ;;  %v9514_v14 = vld [vmem:[#allocation64_spill] sm:$0xff]  ;;  %v9536_v59 = vld [vmem:[#allocation70_spill] sm:$0xff] }
 0x21e   :  { %v1696_v37 = vsub.f32 %v9514_v14, %v6949_v58  ;;  %9515 = vst [vmem:[#allocation64_spill] sm:$0xff] %v7243_v62  ;;  %v7261_v14 = vadd.f32 %v6726_v44, %v6965_v41 }
 0x21f   :  { %v7171_v1 = vpop.xlane.xlu1 %1520  ;;  %v7173_v2 = vpop.xlane.xlu0 %1331  ;;  %9503 = vst [vmem:[#allocation247_spill] sm:$0xff] %v7197_v23  ;;  %4799 = vpow2.f32 %v1772_v15 }
 0x220   :  { %9496 = vst [vmem:[#allocation240_spill] sm:$0xff] %v7171_v1  ;;  %9497 = vst [vmem:[#allocation241_spill] sm:$0xff] %v7173_v2  ;;  %4801 = vpow2.f32 %v1900_v16  ;;  %v1902_v11 = vmul.f32 1.442695, %v1696_v37  ;;  %v7269_v16 = vadd.f32 %v6726_v44, %v6987_v27  ;;  %v9524_v37 = vld [vmem:[#allocation193_spill] sm:$0xff]  ;;  %v9527_v27 = vld [vmem:[#allocation68_spill] sm:$0xff] }
 0x221   :  { %2219 = vadd.xlane.f32.xlu1 %v2218_v52  ;;  %2030 = vadd.xlane.f32.xlu0 %v2029_v10  ;;  %v1399_v52 = vsel %vm1239_vm2, %v7179_v8, -inf  ;;  %v1591_v10 = vsel %vm1239_vm2, %v7197_v23, -inf  ;;  %4803 = vpow2.f32 %v1774_v33  ;;  %9520 = vst [vmem:[#allocation262_spill] sm:$0xff] %v7261_v14 }
 0x222   :  { %9521 = vst [vmem:[#allocation263_spill] sm:$0xff] %v7269_v16  ;;  %4805 = vpow2.f32 %v1902_v11  ;;  %v1600_v11 = vsel %vm1239_vm2, %v7269_v16, -inf }
 0x223   :  { %v7187_v7 = vpop.xlane.xlu0 %1523  ;;  %v7189_v20 = vpop.xlane.xlu1 %1334 }
 0x224   :  { %9500 = vst [vmem:[#allocation244_spill] sm:$0xff] %v7187_v7  ;;  %9501 = vst [vmem:[#allocation245_spill] sm:$0xff] %v7189_v20 }
 0x225   :  { %2222 = vadd.xlane.f32.xlu0 %v2221_v48  ;;  %1400 = vmax.xlane.f32.xlu1 %v1399_v52  ;;  %v7217_v48 = vpop.eup %4791 }
 0x226   :  { %9507 = vst [vmem:[#allocation251_spill] sm:$0xff] %v7217_v48  ;;  %v7229_v45 = vpop.eup %4793 }
 0x227   :  { %v7207_v0 = vpop.xlane.xlu1 %1526  ;;  %v7209_v17 = vpop.xlane.xlu0 %1337  ;;  %9510 = vst [vmem:[#allocation254_spill] sm:$0xff] %v7229_v45  ;;  %v2224_v56 = vsel %vm1239_vm2, %v7229_v45, 0.0 }
 0x228   :  { %9505 = vst [vmem:[#allocation249_spill] sm:$0xff] %v7207_v0  ;;  %9506 = vst [vmem:[#allocation250_spill] sm:$0xff] %v7209_v17 }
 0x229   :  { %1592 = vmax.xlane.f32.xlu1 %v1591_v10  ;;  %1403 = vmax.xlane.f32.xlu0 %v1402_v21  ;;  %v2032_v10 = vsel %vm1239_vm2, %v7217_v48, 0.0  ;;  %v7233_v21 = vpop.eup %4795 }
 0x22a   :  { %9511 = vst [vmem:[#allocation255_spill] sm:$0xff] %v7233_v21  ;;  %v7249_v6 = vpop.eup %4797 }
 0x22b   :  { %v7221_v52 = vpop.xlane.xlu0 %1529  ;;  %v7223_v8 = vpop.xlane.xlu1 %1340  ;;  %9516 = vst [vmem:[#allocation258_spill] sm:$0xff] %v7249_v6  ;;  %v2227_v58 = vsel %vm1239_vm2, %v7249_v6, 0.0 }
 0x22c   :  { %9508 = vst [vmem:[#allocation252_spill] sm:$0xff] %v7221_v52  ;;  %9509 = vst [vmem:[#allocation253_spill] sm:$0xff] %v7223_v8 }
 0x22d   :  { %2033 = vadd.xlane.f32.xlu1 %v2032_v10  ;;  %1595 = vmax.xlane.f32.xlu0 %v1594_v19  ;;  %v2035_v19 = vsel %vm1239_vm2, %v7233_v21, 0.0  ;;  %v7257_v10 = vadd.f32 %v6726_v44, %v6985_v46 }
 0x22f   :  { %v7235_v54 = vpop.xlane.xlu1 %1532  ;;  %v7237_v23 = vpop.xlane.xlu0 %1343  ;;  %9519 = vst [vmem:[#allocation261_spill] sm:$0xff] %v7257_v10  ;;  %v1408_v41 = vsel %vm1239_vm2, %v7257_v10, -inf }
 0x230   :  { %9512 = vst [vmem:[#allocation256_spill] sm:$0xff] %v7235_v54  ;;  %9513 = vst [vmem:[#allocation257_spill] sm:$0xff] %v7237_v23 }
 0x231   :  { %2225 = vadd.xlane.f32.xlu1 %v2224_v56  ;;  %2036 = vadd.xlane.f32.xlu0 %v2035_v19  ;;  %v1405_v56 = vsel %vm1239_vm2, %v7243_v62, -inf  ;;  %v9525_v19 = vld [vmem:[#allocation67_spill] sm:$0xff]  ;;  %v1597_v62 = vsel %vm1239_vm2, %v7261_v14, -inf }
 0x232   :  { %v1633_v6 = vsub.f32 %v9525_v19, %v9524_v37  ;;  %v9530_v19 = vld [vmem:[#allocation69_spill] sm:$0xff] }
 0x233   :  { %v7251_v15 = vpop.xlane.xlu0 %1535  ;;  %v7253_v28 = vpop.xlane.xlu1 %1346  ;;  %v1634_v37 = vsub.f32 %v9530_v19, %v6971_v61  ;;  %v7307_v19 = vadd.f32 %v6726_v44, %v7003_v57 }
 0x234   :  { %9517 = vst [vmem:[#allocation259_spill] sm:$0xff] %v7251_v15  ;;  %9518 = vst [vmem:[#allocation260_spill] sm:$0xff] %v7253_v28  ;;  %v1776_v10 = vmul.f32 1.442695, %v1633_v6  ;;  %v9535_v6 = vld [vmem:[#allocation201_spill] sm:$0xff] }
 0x235   :  { %2228 = vadd.xlane.f32.xlu0 %v2227_v58  ;;  %1406 = vmax.xlane.f32.xlu1 %v1405_v56  ;;  %v7281_v58 = vpop.eup %4799  ;;  %v1697_v56 = vsub.f32 %v9527_v27, %v6969_v29  ;;  %v1778_v16 = vmul.f32 1.442695, %v1634_v37  ;;  %v1698_v55 = vsub.f32 %v9536_v59, %v9535_v6  ;;  %9537 = vst [vmem:[#allocation70_spill] sm:$0xff] %v7307_v19  ;;  %v9543_v6 = vld [vmem:[#allocation73_spill] sm:$0xff] }
 0x236   :  { %9526 = vst [vmem:[#allocation67_spill] sm:$0xff] %v7281_v58  ;;  %v7293_v48 = vpop.eup %4801  ;;  %4807 = vpow2.f32 %v1776_v10  ;;  %v7321_v59 = vadd.f32 %v6726_v44, %v7025_v24 }
 0x237   :  { %v7271_v46 = vpop.xlane.xlu1 %1538  ;;  %v7273_v33 = vpop.xlane.xlu0 %1349  ;;  %9531 = vst [vmem:[#allocation69_spill] sm:$0xff] %v7293_v48  ;;  %v1904_v27 = vmul.f32 1.442695, %v1697_v56  ;;  %v2230_v61 = vsel %vm1239_vm2, %v7293_v48, 0.0  ;;  %v1906_v57 = vmul.f32 1.442695, %v1698_v55  ;;  %v7337_v55 = vadd.f32 %v6726_v44, %v7027_v53 }
 0x238   :  { %9522 = vst [vmem:[#allocation264_spill] sm:$0xff] %v7271_v46  ;;  %9523 = vst [vmem:[#allocation265_spill] sm:$0xff] %v7273_v33 }
 0x239   :  { %1598 = vmax.xlane.f32.xlu1 %v1597_v62  ;;  %1409 = vmax.xlane.f32.xlu0 %v1408_v41  ;;  %v2038_v62 = vsel %vm1239_vm2, %v7281_v58, 0.0  ;;  %v7297_v41 = vpop.eup %4803  ;;  %4809 = vpow2.f32 %v1904_v27  ;;  %9541 = vst [vmem:[#allocation273_spill] sm:$0xff] %v7321_v59 }
 0x23a   :  { %9532 = vst [vmem:[#allocation267_spill] sm:$0xff] %v7297_v41  ;;  %v7313_v56 = vpop.eup %4805  ;;  %4811 = vpow2.f32 %v1778_v16 }
 0x23b   :  { %v7285_v21 = vpop.xlane.xlu0 %1541  ;;  %v7287_v45 = vpop.xlane.xlu1 %1352  ;;  %9538 = vst [vmem:[#allocation270_spill] sm:$0xff] %v7313_v56  ;;  %v2233_v27 = vsel %vm1239_vm2, %v7313_v56, 0.0  ;;  %4813 = vpow2.f32 %v1906_v57  ;;  %v1606_v56 = vsel %vm1239_vm2, %v7337_v55, -inf }
 0x23c   :  { %9528 = vst [vmem:[#allocation68_spill] sm:$0xff] %v7285_v21  ;;  %9529 = vst [vmem:[#allocation266_spill] sm:$0xff] %v7287_v45 }
 0x23d   :  { %2039 = vadd.xlane.f32.xlu1 %v2038_v62  ;;  %1601 = vmax.xlane.f32.xlu0 %v1600_v11  ;;  %v2041_v11 = vsel %vm1239_vm2, %v7297_v41, 0.0  ;;  %v9542_v62 = vld [vmem:[#allocation202_spill] sm:$0xff] }
 0x23e   :  { %v1635_v48 = vsub.f32 %v9543_v6, %v9542_v62  ;;  %v9544_v41 = vld [vmem:[#allocation74_spill] sm:$0xff]  ;;  %v9549_v6 = vld [vmem:[#allocation75_spill] sm:$0xff] }
 0x23f   :  { %v7299_v29 = vpop.xlane.xlu1 %1544  ;;  %v7301_v14 = vpop.xlane.xlu0 %1355  ;;  %v1699_v58 = vsub.f32 %v9544_v41, %v7011_v18  ;;  %9546 = vst [vmem:[#allocation74_spill] sm:$0xff] %v7337_v55  ;;  %v1636_v18 = vsub.f32 %v9549_v6, %v7013_v47  ;;  %v9554_v47 = vld [vmem:[#allocation208_spill] sm:$0xff] }
 0x240   :  { %9533 = vst [vmem:[#allocation268_spill] sm:$0xff] %v7299_v29  ;;  %9534 = vst [vmem:[#allocation269_spill] sm:$0xff] %v7301_v14  ;;  %v1780_v41 = vmul.f32 1.442695, %v1635_v48 }
 0x241   :  { %2231 = vadd.xlane.f32.xlu1 %v2230_v61  ;;  %2042 = vadd.xlane.f32.xlu0 %v2041_v11  ;;  %v7329_v61 = vadd.f32 %v6726_v44, %v7005_v63  ;;  %v1411_v11 = vsel %vm1239_vm2, %v7307_v19, -inf  ;;  %v1414_v63 = vsel %vm1239_vm2, %v7321_v59, -inf  ;;  %v1908_v62 = vmul.f32 1.442695, %v1699_v58  ;;  %v9555_v59 = vld [vmem:[#allocation76_spill] sm:$0xff] }
 0x242   :  { %4815 = vpow2.f32 %v1780_v41  ;;  %v1782_v57 = vmul.f32 1.442695, %v1636_v18  ;;  %v1700_v55 = vsub.f32 %v9555_v59, %v9554_v47  ;;  %v7365_v18 = vadd.f32 %v6726_v44, %v7043_v43 }
 0x243   :  { %v7315_v10 = vpop.xlane.xlu0 %1547  ;;  %v7317_v37 = vpop.xlane.xlu1 %1358  ;;  %9545 = vst [vmem:[#allocation73_spill] sm:$0xff] %v7329_v61  ;;  %4817 = vpow2.f32 %v1908_v62  ;;  %v7379_v43 = vadd.f32 %v6726_v44, %v7065_v38 }
 0x244   :  { %9539 = vst [vmem:[#allocation271_spill] sm:$0xff] %v7315_v10  ;;  %9540 = vst [vmem:[#allocation272_spill] sm:$0xff] %v7317_v37  ;;  %v1417_v38 = vsel %vm1239_vm2, %v7365_v18, -inf }
 0x245   :  { %2234 = vadd.xlane.f32.xlu0 %v2233_v27  ;;  %1412 = vmax.xlane.f32.xlu1 %v1411_v11  ;;  %v1603_v27 = vsel %vm1239_vm2, %v7329_v61, -inf  ;;  %v7349_v11 = vpop.eup %4807  ;;  %9556 = vst [vmem:[#allocation76_spill] sm:$0xff] %v7365_v18  ;;  %9561 = vst [vmem:[#allocation280_spill] sm:$0xff] %v7379_v43 }
 0x246   :  { %9550 = vst [vmem:[#allocation75_spill] sm:$0xff] %v7349_v11  ;;  %v7355_v48 = vpop.eup %4809  ;;  %v2044_v58 = vsel %vm1239_vm2, %v7349_v11, 0.0  ;;  %v9562_v11 = vld [vmem:[#allocation80_spill] sm:$0xff] }
 0x247   :  { %v7339_v24 = vpop.xlane.xlu1 %1550  ;;  %v7341_v16 = vpop.xlane.xlu0 %1361  ;;  %9552 = vst [vmem:[#allocation277_spill] sm:$0xff] %v7355_v48  ;;  %v2236_v62 = vsel %vm1239_vm2, %v7355_v48, 0.0  ;;  %v1910_v48 = vmul.f32 1.442695, %v1700_v55 }
 0x248   :  { %9547 = vst [vmem:[#allocation274_spill] sm:$0xff] %v7339_v24  ;;  %9548 = vst [vmem:[#allocation275_spill] sm:$0xff] %v7341_v16  ;;  %v7359_v6 = vpop.eup %4811 }
 0x249   :  { %1604 = vmax.xlane.f32.xlu1 %v1603_v27  ;;  %1415 = vmax.xlane.f32.xlu0 %v1414_v63  ;;  %9553 = vst [vmem:[#allocation278_spill] sm:$0xff] %v7359_v6  ;;  %v2047_v41 = vsel %vm1239_vm2, %v7359_v6, 0.0  ;;  %v1701_v6 = vsub.f32 %v9562_v11, %v7049_v34  ;;  %v7399_v11 = vadd.f32 %v6726_v44, %v7067_v50  ;;  %v1420_v34 = vsel %vm1239_vm2, %v7379_v43, -inf  ;;  %v9573_v43 = vld [vmem:[#allocation108_spill] sm:$0xff] }
 0x24b   :  { %v1992_v53 = vpop.xlane.xlu1 %1991  ;;  %v7351_v19 = vpop.xlane.xlu0 %1553  ;;  %v1612_v4 = vsel %vm1239_vm2, %v7399_v11, -inf }
 0x24c   :  { %9551 = vst [vmem:[#allocation276_spill] sm:$0xff] %v7351_v19  ;;  %4819 = vrcp.f32 %v1992_v53 }
 0x24d   :  { %2045 = vadd.xlane.f32.xlu1 %v2044_v58  ;;  %1607 = vmax.xlane.f32.xlu0 %v1606_v56  ;;  %4821 = vlog2.f32 %v1992_v53  ;;  %v7371_v58 = vpop.eup %4813  ;;  %v9558_v56 = vld [vmem:[#allocation209_spill] sm:$0xff]  ;;  %v9559_v53 = vld [vmem:[#allocation79_spill] sm:$0xff] }
 0x24e   :  { %4823 = vpow2.f32 %v1782_v57  ;;  %9557 = vst [vmem:[#allocation279_spill] sm:$0xff] %v7371_v58  ;;  %v1637_v57 = vsub.f32 %v9559_v53, %v9558_v56  ;;  %v2239_v53 = vsel %vm1239_vm2, %v7371_v58, 0.0  ;;  %v7393_v56 = vpop.eup %4815  ;;  %v1912_v58 = vmul.f32 1.442695, %v1701_v6 }
 0x24f   :  { %v2184_v63 = vpop.xlane.xlu1 %2183  ;;  %v1995_v27 = vpop.xlane.xlu0 %1994 }
 0x250   :  { %4825 = vrcp.f32 %v2184_v63  ;;  %v7395_v55 = vpop.eup %4817 }
 0x251   :  { %4827 = vlog2.f32 %v2184_v63  ;;  %2237 = vadd.xlane.f32.xlu1 %v2236_v62  ;;  %2048 = vadd.xlane.f32.xlu0 %v2047_v41  ;;  %v7385_v63 = vadd.f32 %v6726_v44, %v7045_v30  ;;  %v9564_v62 = vld [vmem:[#allocation81_spill] sm:$0xff]  ;;  %v1784_v30 = vmul.f32 1.442695, %v1637_v57  ;;  %v9570_v57 = vld [vmem:[#allocation139_spill] sm:$0xff] }
 0x252   :  { %4829 = vrcp.f32 %v1995_v27  ;;  %v1638_v41 = vsub.f32 %v9564_v62, %v7051_v40  ;;  %9565 = vst [vmem:[#allocation81_spill] sm:$0xff] %v7399_v11  ;;  %v9580_v11 = vld [vmem:[#allocation143_spill] sm:$0xff] }
 0x253   :  { %v2187_v59 = vpop.xlane.xlu0 %2186  ;;  %v7375_v47 = vpop.xlane.xlu1 %1364  ;;  %9563 = vst [vmem:[#allocation80_spill] sm:$0xff] %v7385_v63  ;;  %4831 = vlog2.f32 %v1995_v27  ;;  %v1609_v44 = vsel %vm1239_vm2, %v7385_v63, -inf }
 0x254   :  { %9560 = vst [vmem:[#allocation79_spill] sm:$0xff] %v7375_v47  ;;  %4833 = vrcp.f32 %v2187_v59  ;;  %v1786_v61 = vmul.f32 1.442695, %v1638_v41 }
 0x255   :  { %4835 = vlog2.f32 %v2187_v59  ;;  %2240 = vadd.xlane.f32.xlu0 %v2239_v53  ;;  %1418 = vmax.xlane.f32.xlu1 %v1417_v38  ;;  %v9568_v59 = vld [vmem:[#allocation217_spill] sm:$0xff]  ;;  %v9569_v53 = vld [vmem:[#allocation82_spill] sm:$0xff] }
 0x256   :  { %v4820_v40 = vpop.eup %4819  ;;  %4837 = vpow2.f32 %v1910_v48  ;;  %v1702_v38 = vsub.f32 %v9569_v53, %v9568_v59  ;;  %v3804_v48 = vmul.f32 0.5, %v9573_v43  ;;  %v9574_v59 = vld [vmem:[#allocation113_spill] sm:$0xff] }
 0x257   :  { %v7401_v27 = vpop.xlane.xlu1 %1556  ;;  %v7403_v62 = vpop.xlane.xlu0 %1367  ;;  %v2366_v26 = vmul.f32 %v4820_v40, %v9570_v57  ;;  %v7420_v41 = vmul.f32 0.5, %v9574_v59  ;;  %4839 = vpow2.f32 %v1784_v30  ;;  %v9578_v59 = vld [vmem:[#allocation218_spill] sm:$0xff]  ;;  %v9579_v30 = vld [vmem:[#allocation85_spill] sm:$0xff] }
 0x258   :  { %9566 = vst [vmem:[#allocation281_spill] sm:$0xff] %v7401_v27  ;;  %9567 = vst [vmem:[#allocation282_spill] sm:$0xff] %v7403_v62  ;;  %v4822_v18 = vpop.eup %4821  ;;  %4841 = vpow2.f32 %v1912_v58  ;;  %v1914_v43 = vmul.f32 1.442695, %v1702_v38  ;;  %v1639_v27 = vsub.f32 %v9579_v30, %v9578_v59  ;;  %v7435_v38 = vld [vmem:[#allocation7] ss:$0 sm:$0xff] }
 0x259   :  { %v7412_v50 = vpop.eup %4823  ;;  %v3366_v6 = vmul.f32 0.6931472, %v4822_v18  ;;  %1610 = vmax.xlane.f32.xlu1 %v1609_v44  ;;  %1421 = vmax.xlane.f32.xlu0 %v1420_v34  ;;  %2615 = vst.msk [vmem:[#allocation8] sm:$0xff] %vm1239_vm2, %v2366_v26  ;;  %v9576_v18 = vld [vmem:[#allocation122_spill] sm:$0xff]  ;;  %4843 = vpow2.f32 %v1786_v61  ;;  %v2050_v26 = vsel %vm1239_vm2, %v7393_v56, 0.0 }
 0x25a   :  { %v4826_v53 = vpop.eup %4825  ;;  %v9577_v34 = vld [vmem:[#allocation142_spill] sm:$0xff] }
 0x25b   :  { %v1998_v40 = vpop.xlane.xlu1 %1997  ;;  %v7423_v57 = vpop.xlane.xlu0 %1559  ;;  %v3615_v44 = vadd.f32 %v3366_v6, %v9576_v18  ;;  %v2494_v63 = vmul.f32 %v4826_v53, %v9577_v34  ;;  %v7439_v6 = vadd.f32 %v7435_v38, %v7083_v3  ;;  %v9581_v53 = vld [vmem:[#allocation125_spill] sm:$0xff]  ;;  %v9583_v3 = vld [vmem:[#allocation147_spill] sm:$0xff]  ;;  %v9585_v59 = vld [vmem:[#allocation86_spill] sm:$0xff] }
 0x25c   :  { %9575 = vst [vmem:[#allocation82_spill] sm:$0xff] %v7423_v57  ;;  %v4828_v13 = vpop.eup %4827  ;;  %4845 = vrcp.f32 %v1998_v40 }
 0x25d   :  { %v4830_v62 = vpop.eup %4829  ;;  %v3494_v19 = vmul.f32 0.6931472, %v4828_v13  ;;  %v3865_v47 = vsub.f32 %v3615_v44, %v3740_v49  ;;  %2679 = vst.msk [vmem:[#allocation8 + $0x200] sm:$0xff] %vm1239_vm2, %v2494_v63  ;;  %2051 = vadd.xlane.f32.xlu1 %v2050_v26  ;;  %1613 = vmax.xlane.f32.xlu0 %v1612_v4  ;;  %4847 = vlog2.f32 %v1998_v40  ;;  %v2242_v63 = vsel %vm1239_vm2, %v7395_v55, 0.0 }
 0x25e   :  { %v4832_v57 = vpop.eup %4831  ;;  %v2368_v58 = vmul.f32 %v4830_v62, %v9580_v11  ;;  %4849 = vpow2.f32 %v1914_v43  ;;  %v9582_v62 = vld [vmem:[#allocation87_spill] sm:$0xff]  ;;  %v1788_v43 = vmul.f32 1.442695, %v1639_v27  ;;  %v9587_v27 = vld [vmem:[#allocation124_spill] sm:$0xff] }
 0x25f   :  { %v4834_v61 = vpop.eup %4833  ;;  %v3679_v13 = vadd.f32 %v3494_v19, %v9581_v53  ;;  %v3368_v18 = vmul.f32 0.6931472, %v4832_v57  ;;  %v2190_v34 = vpop.xlane.xlu1 %2189  ;;  %v1640_v44 = vsub.f32 %v9582_v62, %v7091_v36  ;;  %3991 = vst.msk [vmem:[#allocation9] sm:$0xff] %vm3990_vm3, %v3865_v47  ;;  %v2053_v19 = vsel %vm1239_vm2, %v7412_v50, 0.0  ;;  %v9584_v57 = vld [vmem:[#allocation129_spill] sm:$0xff] }
 0x260   :  { %v2001_v49 = vpop.xlane.xlu0 %2000  ;;  %v4836_v11 = vpop.eup %4835  ;;  %2616 = vst.msk [vmem:[#allocation8 + $0x8] sm:$0xff] %vm1239_vm2, %v2368_v58  ;;  %v2496_v4 = vmul.f32 %v4834_v61, %v9583_v3  ;;  %4851 = vrcp.f32 %v2190_v34  ;;  %v1703_v62 = vsub.f32 %v9585_v59, %v7089_v5  ;;  %v7459_v47 = vadd.f32 %v7435_v38, %v7103_v12 }
 0x261   :  { %v3929_v40 = vsub.f32 %v3679_v13, %v3804_v48  ;;  %v3616_v30 = vadd.f32 %v3368_v18, %v9584_v57  ;;  %v3496_v26 = vmul.f32 0.6931472, %v4836_v11  ;;  %v7452_v53 = vpop.eup %4837  ;;  %4853 = vlog2.f32 %v2190_v34  ;;  %2243 = vadd.xlane.f32.xlu1 %v2242_v63  ;;  %2054 = vadd.xlane.f32.xlu0 %v2053_v19  ;;  %v9586_v48 = vld [vmem:[#allocation88_spill] sm:$0xff]  ;;  %v9589_v63 = vld [vmem:[#allocation91_spill] sm:$0xff] }
 0x262   :  { %2680 = vst.msk [vmem:[#allocation8 + $0x208] sm:$0xff] %vm1239_vm2, %v2496_v4  ;;  %v1704_v58 = vsub.f32 %v9586_v48, %v7105_v22  ;;  %4855 = vrcp.f32 %v2001_v49  ;;  %v1790_v34 = vmul.f32 1.442695, %v1640_v44  ;;  %v1641_v11 = vsub.f32 %v9589_v63, %v7107_v60  ;;  %v7472_v3 = vpop.eup %4839  ;;  %v9591_v4 = vld [vmem:[#allocation92_spill] sm:$0xff]  ;;  %v9595_v63 = vld [vmem:[#allocation17_spill] sm:$0xff] }
 0x263   :  { %4055 = vst.msk [vmem:[#allocation9 + $0x200] sm:$0xff] %vm3990_vm3, %v3929_v40  ;;  %v3866_v61 = vsub.f32 %v3616_v30, %v7416_v25  ;;  %v3680_v13 = vadd.f32 %v3496_v26, %v9587_v27  ;;  %v7466_v18 = vpop.xlane.xlu1 %1370  ;;  %4857 = vlog2.f32 %v2001_v49  ;;  %v1423_v12 = vsel %vm1239_vm2, %v7439_v6, -inf  ;;  %9590 = vst [vmem:[#allocation15_spill] sm:$0xff] %v7472_v3  ;;  %v7480_v40 = vpop.eup %4841 }
 0x264   :  { %v2193_v59 = vpop.xlane.xlu0 %2192  ;;  %9588 = vst [vmem:[#allocation139_spill] sm:$0xff] %v7466_v18  ;;  %v1705_v19 = vsub.f32 %v9591_v4, %v7123_v39  ;;  %v2245_v44 = vsel %vm1239_vm2, %v7452_v53, 0.0  ;;  %v1916_v57 = vmul.f32 1.442695, %v1703_v62  ;;  %v7482_v49 = vpop.eup %4843  ;;  %v1918_v30 = vmul.f32 1.442695, %v1704_v58 }
 0x265   :  { %3992 = vst.msk [vmem:[#allocation9 + $0x8] sm:$0xff] %vm3990_vm3, %v3866_v61  ;;  %v3930_v25 = vsub.f32 %v3680_v13, %v7420_v41  ;;  %4859 = vrcp.f32 %v2193_v59  ;;  %2246 = vadd.xlane.f32.xlu0 %v2245_v44  ;;  %1424 = vmax.xlane.f32.xlu1 %v1423_v12  ;;  %v1426_v41 = vsel %vm1239_vm2, %v7459_v47, -inf  ;;  %v1792_v27 = vmul.f32 1.442695, %v1641_v11  ;;  %v9594_v62 = vld [vmem:[#allocation93_spill] sm:$0xff]  ;;  %v9596_v58 = vld [vmem:[#allocation155_spill] sm:$0xff] }
 0x266   :  { %4861 = vlog2.f32 %v2193_v59  ;;  %v4846_v61 = vpop.eup %4845  ;;  %v1642_v13 = vsub.f32 %v9594_v62, %v7125_v32  ;;  %v3742_v12 = vmul.f32 0.5, %v9595_v63  ;;  %v9597_v39 = vld [vmem:[#allocation18_spill] sm:$0xff] }
 0x267   :  { %4863 = vpow2.f32 %v1788_v43  ;;  %4056 = vst.msk [vmem:[#allocation9 + $0x208] sm:$0xff] %vm3990_vm3, %v3930_v25  ;;  %v7485_v26 = vpop.xlane.xlu1 %1562  ;;  %v4848_v59 = vpop.eup %4847  ;;  %v1920_v43 = vmul.f32 1.442695, %v1705_v19  ;;  %v2370_v4 = vmul.f32 %v4846_v61, %v9596_v58  ;;  %v2056_v25 = vsel %vm1239_vm2, %v7472_v3, 0.0  ;;  %v9599_v63 = vld [vmem:[#allocation114_spill] sm:$0xff] }
 0x268   :  { %9592 = vst [vmem:[#allocation16_spill] sm:$0xff] %v7485_v26  ;;  %v7487_v48 = vpop.xlane.xlu0 %1373  ;;  %4865 = vpow2.f32 %v1790_v34  ;;  %v7497_v44 = vpop.eup %4849  ;;  %v7500_v22 = vmul.f32 0.5, %v9597_v39  ;;  %v9598_v34 = vld [vmem:[#allocation94_spill] sm:$0xff]  ;;  %v3370_v5 = vmul.f32 0.6931472, %v4848_v59  ;;  %v3806_v19 = vmul.f32 0.5, %v9599_v63 }
 0x269   :  { %9593 = vst [vmem:[#allocation108_spill] sm:$0xff] %v7487_v48  ;;  %4867 = vpow2.f32 %v1916_v57  ;;  %v1706_v11 = vsub.f32 %v9598_v34, %v7143_v31  ;;  %2057 = vadd.xlane.f32.xlu1 %v2056_v25  ;;  %1427 = vmax.xlane.f32.xlu0 %v1426_v41  ;;  %2617 = vst.msk [vmem:[#allocation8 + $0x10] sm:$0xff] %vm1239_vm2, %v2370_v4  ;;  %v7508_v61 = vadd.f32 %v7435_v38, %v7119_v42  ;;  %v9601_v41 = vld [vmem:[#allocation130_spill] sm:$0xff]  ;;  %v9603_v4 = vld [vmem:[#allocation97_spill] sm:$0xff] }
 0x26a   :  { %v4852_v62 = vpop.eup %4851  ;;  %4869 = vpow2.f32 %v1918_v30  ;;  %v2248_v57 = vsel %vm1239_vm2, %v7480_v40, 0.0  ;;  %v1794_v59 = vmul.f32 1.442695, %v1642_v13  ;;  %v3617_v25 = vadd.f32 %v3370_v5, %v9601_v41  ;;  %v9602_v31 = vld [vmem:[#allocation158_spill] sm:$0xff] }
 0x26b   :  { %v2004_v58 = vpop.xlane.xlu1 %2003  ;;  %v4854_v34 = vpop.eup %4853  ;;  %4871 = vpow2.f32 %v1792_v27  ;;  %v2498_v63 = vmul.f32 %v4852_v62, %v9602_v31  ;;  %v1643_v60 = vsub.f32 %v9603_v4, %v7145_v35  ;;  %v2059_v38 = vsel %vm1239_vm2, %v7482_v49, 0.0  ;;  %v9604_v27 = vld [vmem:[#allocation159_spill] sm:$0xff]  ;;  %v9605_v31 = vld [vmem:[#allocation132_spill] sm:$0xff]  ;;  %v9627_v35 = vld [vmem:[#allocation174_spill] sm:$0xff] }
 0x26c   :  { %v7510_v39 = vpop.xlane.xlu0 %1565  ;;  %v4856_v30 = vpop.eup %4855  ;;  %4873 = vpow2.f32 %v1920_v43  ;;  %v3498_v42 = vmul.f32 0.6931472, %v4854_v34  ;;  %v1922_v36 = vmul.f32 1.442695, %v1706_v11  ;;  %v3867_v3 = vsub.f32 %v3617_v25, %v3742_v12  ;;  %v9607_v12 = vld [vmem:[#allocation99_spill] sm:$0xff] }
 0x26d   :  { %9600 = vst [vmem:[#allocation113_spill] sm:$0xff] %v7510_v39  ;;  %v4858_v32 = vpop.eup %4857  ;;  %2681 = vst.msk [vmem:[#allocation8 + $0x210] sm:$0xff] %vm1239_vm2, %v2498_v63  ;;  %v2372_v13 = vmul.f32 %v4856_v30, %v9604_v27  ;;  %4875 = vrcp.f32 %v2004_v58  ;;  %2249 = vadd.xlane.f32.xlu1 %v2248_v57  ;;  %2060 = vadd.xlane.f32.xlu0 %v2059_v38  ;;  %v1429_v4 = vsel %vm1239_vm2, %v7508_v61, -inf  ;;  %v9608_v57 = vld [vmem:[#allocation163_spill] sm:$0xff] }
 0x26e   :  { %v3681_v43 = vadd.f32 %v3498_v42, %v9605_v31  ;;  %v3372_v62 = vmul.f32 0.6931472, %v4858_v32  ;;  %4877 = vlog2.f32 %v2004_v58  ;;  %v1644_v25 = vsub.f32 %v9607_v12, %v7159_v51  ;;  %3993 = vst.msk [vmem:[#allocation9 + $0x10] sm:$0xff] %vm3990_vm3, %v3867_v3  ;;  %v9609_v42 = vld [vmem:[#allocation133_spill] sm:$0xff]  ;;  %v9610_v31 = vld [vmem:[#allocation119_spill] sm:$0xff]  ;;  %v9631_v51 = vld [vmem:[#allocation20_spill] sm:$0xff] }
 0x26f   :  { %v4860_v5 = vpop.eup %4859  ;;  %v7523_v41 = vpop.xlane.xlu1 %2195  ;;  %4879 = vpow2.f32 %v1794_v59  ;;  %2618 = vst.msk [vmem:[#allocation8 + $0x18] sm:$0xff] %vm1239_vm2, %v2372_v13  ;;  %v2251_v32 = vsel %vm1239_vm2, %v7497_v44, 0.0  ;;  %v3807_v12 = vmul.f32 0.5, %v9610_v31  ;;  %v1796_v3 = vmul.f32 1.442695, %v1643_v60  ;;  %v9611_v13 = vld [vmem:[#allocation98_spill] sm:$0xff] }
 0x270   :  { %9606 = vst [vmem:[#allocation122_spill] sm:$0xff] %v7523_v41  ;;  %v2007_v34 = vpop.xlane.xlu0 %2006  ;;  %v4862_v11 = vpop.eup %4861  ;;  %v2500_v63 = vmul.f32 %v4860_v5, %v9608_v57  ;;  %v3931_v30 = vsub.f32 %v3681_v43, %v3806_v19  ;;  %v3618_v38 = vadd.f32 %v3372_v62, %v9609_v42  ;;  %4881 = vrcp.f32 %v7523_v41  ;;  %v9612_v19 = vld [vmem:[#allocation100_spill] sm:$0xff] }
 0x271   :  { %v7534_v58 = vpop.eup %4863  ;;  %v3500_v27 = vmul.f32 0.6931472, %v4862_v11  ;;  %4883 = vpow2.f32 %v1922_v36  ;;  %v1707_v5 = vsub.f32 %v9611_v13, %v7157_v9  ;;  %2252 = vadd.xlane.f32.xlu0 %v2251_v32  ;;  %1430 = vmax.xlane.f32.xlu1 %v1429_v4  ;;  %v1708_v43 = vsub.f32 %v9612_v19, %v7171_v1  ;;  %v9613_v11 = vld [vmem:[#allocation137_spill] sm:$0xff]  ;;  %v9623_v9 = vld [vmem:[#allocation106_spill] sm:$0xff] }
 0x272   :  { %v7538_v59 = vpop.eup %4865  ;;  %2682 = vst.msk [vmem:[#allocation8 + $0x218] sm:$0xff] %vm1239_vm2, %v2500_v63  ;;  %v3868_v62 = vsub.f32 %v3618_v38, %v7500_v22  ;;  %4885 = vrcp.f32 %v2007_v34  ;;  %v1798_v31 = vmul.f32 1.442695, %v1644_v25  ;;  %v9616_v63 = vld [vmem:[#allocation103_spill] sm:$0xff]  ;;  %v2062_v32 = vsel %vm1239_vm2, %v7534_v58, 0.0  ;;  %v9617_v22 = vld [vmem:[#allocation104_spill] sm:$0xff] }
 0x273   :  { %4057 = vst.msk [vmem:[#allocation9 + $0x210] sm:$0xff] %vm3990_vm3, %v3931_v30  ;;  %v3682_v57 = vadd.f32 %v3500_v27, %v9613_v11  ;;  %v7551_v60 = vpop.xlane.xlu1 %1376  ;;  %v7553_v36 = vpop.eup %4867  ;;  %v1645_v4 = vsub.f32 %v9616_v63, %v7173_v2  ;;  %4887 = vlog2.f32 %v2007_v34  ;;  %v1709_v38 = vsub.f32 %v9617_v22, %v7187_v7  ;;  %v9621_v22 = vld [vmem:[#allocation105_spill] sm:$0xff] }
 0x274   :  { %v7549_v42 = vpop.xlane.xlu0 %2198  ;;  %9615 = vst [vmem:[#allocation85_spill] sm:$0xff] %v7551_v60  ;;  %v7559_v30 = vpop.eup %4869  ;;  %3994 = vst.msk [vmem:[#allocation9 + $0x18] sm:$0xff] %vm3990_vm3, %v3868_v62  ;;  %v2065_v25 = vsel %vm1239_vm2, %v7538_v59, 0.0  ;;  %v1924_v19 = vmul.f32 1.442695, %v1707_v5  ;;  %v1646_v7 = vsub.f32 %v9621_v22, %v7189_v20 }
 0x275   :  { %9614 = vst [vmem:[#allocation142_spill] sm:$0xff] %v7549_v42  ;;  %v3932_v27 = vsub.f32 %v3682_v57, %v3807_v12  ;;  %4889 = vrcp.f32 %v7549_v42  ;;  %v7567_v13 = vpop.eup %4871  ;;  %2066 = vadd.xlane.f32.xlu0 %v2065_v25  ;;  %2063 = vadd.xlane.f32.xlu1 %v2062_v32  ;;  %v1926_v11 = vmul.f32 1.442695, %v1708_v43  ;;  %v1800_v57 = vmul.f32 1.442695, %v1645_v4  ;;  %v9622_v25 = vld [vmem:[#allocation171_spill] sm:$0xff] }
 0x276   :  { %9618 = vst [vmem:[#allocation143_spill] sm:$0xff] %v7567_v13  ;;  %v7569_v34 = vpop.eup %4873  ;;  %4891 = vpow2.f32 %v1796_v3  ;;  %v1928_v5 = vmul.f32 1.442695, %v1709_v38  ;;  %v2257_v3 = vsel %vm1239_vm2, %v7559_v30, 0.0  ;;  %v2254_v43 = vsel %vm1239_vm2, %v7553_v36, 0.0  ;;  %v9624_v42 = vld [vmem:[#allocation19_spill] sm:$0xff] }
 0x277   :  { %4058 = vst.msk [vmem:[#allocation9 + $0x218] sm:$0xff] %vm3990_vm3, %v3932_v27  ;;  %v7572_v63 = vpop.xlane.xlu1 %1568  ;;  %v4876_v12 = vpop.eup %4875  ;;  %4893 = vpow2.f32 %v1798_v31  ;;  %v1710_v31 = vsub.f32 %v9623_v9, %v7207_v0  ;;  %v3744_v38 = vmul.f32 0.5, %v9624_v42  ;;  %v1802_v2 = vmul.f32 1.442695, %v1646_v7  ;;  %v9628_v0 = vld [vmem:[#allocation175_spill] sm:$0xff] }
 0x278   :  { %9619 = vst [vmem:[#allocation125_spill] sm:$0xff] %v7572_v63  ;;  %v7574_v62 = vpop.xlane.xlu0 %1379  ;;  %v4878_v1 = vpop.eup %4877  ;;  %v2374_v32 = vmul.f32 %v4876_v12, %v9622_v25  ;;  %4895 = vpow2.f32 %v1924_v19  ;;  %v9626_v19 = vld [vmem:[#allocation138_spill] sm:$0xff]  ;;  %v2068_v42 = vsel %vm1239_vm2, %v7567_v13, 0.0  ;;  %v3745_v13 = vmul.f32 0.5, %v9631_v51 }
 0x279   :  { %9620 = vst [vmem:[#allocation87_spill] sm:$0xff] %v7574_v62  ;;  %v7583_v27 = vpop.eup %4879  ;;  %v3374_v4 = vmul.f32 0.6931472, %v4878_v1  ;;  %2258 = vadd.xlane.f32.xlu0 %v2257_v3  ;;  %2255 = vadd.xlane.f32.xlu1 %v2254_v43  ;;  %4897 = vpow2.f32 %v1926_v11 }
 0x27a   :  { %v4882_v22 = vpop.eup %4881  ;;  %2619 = vst.msk [vmem:[#allocation8 + $0x20] sm:$0xff] %vm1239_vm2, %v2374_v32  ;;  %4899 = vpow2.f32 %v1800_v57  ;;  %v2071_v3 = vsel %vm1239_vm2, %v7583_v27, 0.0  ;;  %v1930_v32 = vmul.f32 1.442695, %v1710_v31 }
 0x27b   :  { %v2010_v12 = vpop.xlane.xlu1 %2009  ;;  %v7591_v41 = vpop.eup %4883  ;;  %v3619_v20 = vadd.f32 %v3374_v4, %v9626_v19  ;;  %v2502_v9 = vmul.f32 %v4882_v22, %v9627_v35  ;;  %4901 = vpow2.f32 %v1928_v5  ;;  %v9629_v35 = vld [vmem:[#allocation109_spill] sm:$0xff] }
 0x27c   :  { %v7589_v25 = vpop.xlane.xlu0 %1571  ;;  %v4886_v1 = vpop.eup %4885  ;;  %4903 = vrcp.f32 %v2010_v12  ;;  %v1647_v5 = vsub.f32 %v9629_v35, %v7209_v17 }
 0x27d   :  { %9625 = vst [vmem:[#allocation147_spill] sm:$0xff] %v7589_v25  ;;  %v4888_v11 = vpop.eup %4887  ;;  %v3869_v43 = vsub.f32 %v3619_v20, %v3744_v38  ;;  %2683 = vst.msk [vmem:[#allocation8 + $0x220] sm:$0xff] %vm1239_vm2, %v2502_v9  ;;  %v2376_v57 = vmul.f32 %v4886_v1, %v9628_v0  ;;  %2072 = vadd.xlane.f32.xlu0 %v2071_v3  ;;  %2069 = vadd.xlane.f32.xlu1 %v2068_v42  ;;  %4905 = vlog2.f32 %v2010_v12  ;;  %v9632_v20 = vld [vmem:[#allocation111_spill] sm:$0xff]  ;;  %v9634_v1 = vld [vmem:[#allocation141_spill] sm:$0xff] }
 0x27e   :  { %v3376_v4 = vmul.f32 0.6931472, %v4888_v11  ;;  %4907 = vpow2.f32 %v1802_v2  ;;  %v1648_v31 = vsub.f32 %v9632_v20, %v7223_v8  ;;  %v9633_v0 = vld [vmem:[#allocation179_spill] sm:$0xff]  ;;  %v2263_v12 = vsel %vm1239_vm2, %v7591_v41, 0.0  ;;  %v9635_v42 = vld [vmem:[#allocation110_spill] sm:$0xff] }
 0x27f   :  { %v4890_v7 = vpop.eup %4889  ;;  %v7603_v22 = vpop.xlane.xlu1 %2201  ;;  %3995 = vst.msk [vmem:[#allocation9 + $0x20] sm:$0xff] %vm3990_vm3, %v3869_v43  ;;  %v2260_v2 = vsel %vm1239_vm2, %v7569_v34, 0.0  ;;  %v1711_v11 = vsub.f32 %v9635_v42, %v7221_v52  ;;  %v1804_v43 = vmul.f32 1.442695, %v1647_v5  ;;  %v9642_v5 = vld [vmem:[#allocation116_spill] sm:$0xff] }
 0x280   :  { %9630 = vst [vmem:[#allocation129_spill] sm:$0xff] %v7603_v22  ;;  %v2013_v19 = vpop.xlane.xlu0 %2012  ;;  %2620 = vst.msk [vmem:[#allocation8 + $0x28] sm:$0xff] %vm1239_vm2, %v2376_v57  ;;  %v2504_v38 = vmul.f32 %v4890_v7, %v9633_v0  ;;  %v7611_v9 = vpop.eup %4891  ;;  %v3620_v3 = vadd.f32 %v3376_v4, %v9634_v1  ;;  %4909 = vrcp.f32 %v7603_v22  ;;  %v9636_v57 = vld [vmem:[#allocation112_spill] sm:$0xff]  ;;  %v9640_v1 = vld [vmem:[#allocation115_spill] sm:$0xff] }
 0x281   :  { %v7619_v51 = vpop.eup %4893  ;;  %4911 = vpow2.f32 %v1930_v32  ;;  %2264 = vadd.xlane.f32.xlu0 %v2263_v12  ;;  %2261 = vadd.xlane.f32.xlu1 %v2260_v2  ;;  %v1712_v7 = vsub.f32 %v9636_v57, %v7235_v54  ;;  %v1806_v32 = vmul.f32 1.442695, %v1648_v31  ;;  %v1649_v42 = vsub.f32 %v9640_v1, %v7237_v23  ;;  %v9646_v54 = vld [vmem:[#allocation117_spill] sm:$0xff]  ;;  %v9647_v23 = vld [vmem:[#allocation187_spill] sm:$0xff] }
 0x282   :  { %2684 = vst.msk [vmem:[#allocation8 + $0x228] sm:$0xff] %vm1239_vm2, %v2504_v38  ;;  %v3870_v35 = vsub.f32 %v3620_v3, %v3745_v13  ;;  %4913 = vrcp.f32 %v2013_v19  ;;  %v7630_v0 = vpop.eup %4895  ;;  %v1713_v12 = vsub.f32 %v9642_v5, %v7251_v15  ;;  %v2077_v13 = vsel %vm1239_vm2, %v7619_v51, 0.0 }
 0x283   :  { %v7628_v20 = vpop.xlane.xlu1 %1382  ;;  %9639 = vst [vmem:[#allocation124_spill] sm:$0xff] %v7630_v0  ;;  %4915 = vlog2.f32 %v2013_v19  ;;  %v7634_v38 = vpop.eup %4897  ;;  %v2074_v3 = vsel %vm1239_vm2, %v7611_v9, 0.0  ;;  %v1932_v2 = vmul.f32 1.442695, %v1711_v11  ;;  %v1934_v57 = vmul.f32 1.442695, %v1712_v7 }
 0x284   :  { %v7626_v4 = vpop.xlane.xlu0 %2204  ;;  %9638 = vst [vmem:[#allocation88_spill] sm:$0xff] %v7628_v20  ;;  %9641 = vst [vmem:[#allocation91_spill] sm:$0xff] %v7634_v38  ;;  %v7644_v31 = vpop.eup %4899  ;;  %v1808_v15 = vmul.f32 1.442695, %v1649_v42  ;;  %v1650_v52 = vsub.f32 %v9646_v54, %v7253_v28  ;;  %v1936_v22 = vmul.f32 1.442695, %v1713_v12 }
 0x285   :  { %9637 = vst [vmem:[#allocation86_spill] sm:$0xff] %v7626_v4  ;;  %3996 = vst.msk [vmem:[#allocation9 + $0x28] sm:$0xff] %vm3990_vm3, %v3870_v35  ;;  %4917 = vrcp.f32 %v7626_v4  ;;  %2078 = vadd.xlane.f32.xlu0 %v2077_v13  ;;  %2075 = vadd.xlane.f32.xlu1 %v2074_v3  ;;  %v7646_v19 = vpop.eup %4901  ;;  %v2269_v13 = vsel %vm1239_vm2, %v7634_v38, 0.0  ;;  %v9649_v3 = vld [vmem:[#allocation118_spill] sm:$0xff]  ;;  %v9650_v28 = vld [vmem:[#allocation21_spill] sm:$0xff] }
 0x286   :  { %9643 = vst [vmem:[#allocation92_spill] sm:$0xff] %v7644_v31  ;;  %4919 = vpow2.f32 %v1804_v43  ;;  %v4904_v5 = vpop.eup %4903  ;;  %v2266_v43 = vsel %vm1239_vm2, %v7630_v0, 0.0  ;;  %v3746_v12 = vmul.f32 0.5, %v9650_v28  ;;  %v1810_v8 = vmul.f32 1.442695, %v1650_v52  ;;  %v9653_v38 = vld [vmem:[#allocation190_spill] sm:$0xff] }
 0x287   :  { %v7648_v1 = vpop.xlane.xlu1 %1574  ;;  %4921 = vpow2.f32 %v1806_v32  ;;  %v4906_v4 = vpop.eup %4905  ;;  %v2378_v11 = vmul.f32 %v4904_v5, %v9647_v23  ;;  %v1714_v32 = vsub.f32 %v9649_v3, %v7271_v46  ;;  %v2080_v28 = vsel %vm1239_vm2, %v7644_v31, 0.0  ;;  %v9654_v46 = vld [vmem:[#allocation191_spill] sm:$0xff]  ;;  %v9657_v31 = vld [vmem:[#allocation22_spill] sm:$0xff] }
 0x288   :  { %9644 = vst [vmem:[#allocation93_spill] sm:$0xff] %v7648_v1  ;;  %v7650_v35 = vpop.xlane.xlu0 %1385  ;;  %v7659_v7 = vpop.eup %4907  ;;  %4923 = vpow2.f32 %v1932_v2  ;;  %v3378_v42 = vmul.f32 0.6931472, %v4906_v4  ;;  %v9652_v2 = vld [vmem:[#allocation145_spill] sm:$0xff] }
 0x289   :  { %9645 = vst [vmem:[#allocation17_spill] sm:$0xff] %v7650_v35  ;;  %9648 = vst [vmem:[#allocation155_spill] sm:$0xff] %v7659_v7  ;;  %2270 = vadd.xlane.f32.xlu0 %v2269_v13  ;;  %2267 = vadd.xlane.f32.xlu1 %v2266_v43  ;;  %4925 = vpow2.f32 %v1934_v57  ;;  %v2083_v13 = vsel %vm1239_vm2, %v7659_v7, 0.0  ;;  %v3747_v7 = vmul.f32 0.5, %v9657_v31 }
 0x28a   :  { %v4910_v54 = vpop.eup %4909  ;;  %2621 = vst.msk [vmem:[#allocation8 + $0x30] sm:$0xff] %vm1239_vm2, %v2378_v11  ;;  %4927 = vpow2.f32 %v1808_v15  ;;  %v3621_v0 = vadd.f32 %v3378_v42, %v9652_v2  ;;  %v1938_v11 = vmul.f32 1.442695, %v1714_v32 }
 0x28b   :  { %v2016_v23 = vpop.xlane.xlu1 %2015  ;;  %v7667_v17 = vpop.eup %4911  ;;  %v2506_v3 = vmul.f32 %v4910_v54, %v9653_v38  ;;  %4929 = vpow2.f32 %v1936_v22  ;;  %v9655_v38 = vld [vmem:[#allocation120_spill] sm:$0xff] }
 0x28c   :  { %v7665_v5 = vpop.xlane.xlu0 %1577  ;;  %v4914_v4 = vpop.eup %4913  ;;  %v3871_v43 = vsub.f32 %v3621_v0, %v3746_v12  ;;  %4931 = vrcp.f32 %v2016_v23  ;;  %v1651_v22 = vsub.f32 %v9655_v38, %v7273_v33  ;;  %v9658_v0 = vld [vmem:[#allocation123_spill] sm:$0xff] }
 0x28d   :  { %9651 = vst [vmem:[#allocation18_spill] sm:$0xff] %v7665_v5  ;;  %v4916_v57 = vpop.eup %4915  ;;  %2685 = vst.msk [vmem:[#allocation8 + $0x230] sm:$0xff] %vm1239_vm2, %v2506_v3  ;;  %v2380_v15 = vmul.f32 %v4914_v4, %v9654_v46  ;;  %2084 = vadd.xlane.f32.xlu0 %v2083_v13  ;;  %2081 = vadd.xlane.f32.xlu1 %v2080_v28  ;;  %4933 = vlog2.f32 %v2016_v23  ;;  %v1652_v32 = vsub.f32 %v9658_v0, %v7287_v45  ;;  %v9659_v46 = vld [vmem:[#allocation195_spill] sm:$0xff]  ;;  %v9661_v4 = vld [vmem:[#allocation149_spill] sm:$0xff] }
 0x28e   :  { %v3380_v42 = vmul.f32 0.6931472, %v4916_v57  ;;  %4935 = vpow2.f32 %v1810_v8  ;;  %3997 = vst.msk [vmem:[#allocation9 + $0x30] sm:$0xff] %vm3990_vm3, %v3871_v43  ;;  %v2275_v23 = vsel %vm1239_vm2, %v7667_v17, 0.0  ;;  %v2272_v8 = vsel %vm1239_vm2, %v7646_v19, 0.0  ;;  %v9662_v28 = vld [vmem:[#allocation121_spill] sm:$0xff] }
 0x28f   :  { %v4918_v52 = vpop.eup %4917  ;;  %v7679_v54 = vpop.xlane.xlu1 %2207  ;;  %2622 = vst.msk [vmem:[#allocation8 + $0x38] sm:$0xff] %vm1239_vm2, %v2380_v15  ;;  %v1715_v57 = vsub.f32 %v9662_v28, %v7285_v21  ;;  %v1812_v43 = vmul.f32 1.442695, %v1651_v22  ;;  %v9663_v15 = vld [vmem:[#allocation126_spill] sm:$0xff]  ;;  %v9669_v22 = vld [vmem:[#allocation128_spill] sm:$0xff] }
 0x290   :  { %9656 = vst [vmem:[#allocation94_spill] sm:$0xff] %v7679_v54  ;;  %v2019_v2 = vpop.xlane.xlu0 %2018  ;;  %v2508_v12 = vmul.f32 %v4918_v52, %v9659_v46  ;;  %v7687_v3 = vpop.eup %4919  ;;  %v3622_v13 = vadd.f32 %v3380_v42, %v9661_v4  ;;  %4937 = vrcp.f32 %v7679_v54  ;;  %v1716_v52 = vsub.f32 %v9663_v15, %v7299_v29  ;;  %v9667_v4 = vld [vmem:[#allocation127_spill] sm:$0xff] }
 0x291   :  { %9660 = vst [vmem:[#allocation114_spill] sm:$0xff] %v7687_v3  ;;  %v7695_v31 = vpop.eup %4921  ;;  %4939 = vpow2.f32 %v1938_v11  ;;  %2276 = vadd.xlane.f32.xlu0 %v2275_v23  ;;  %2273 = vadd.xlane.f32.xlu1 %v2272_v8  ;;  %v1814_v11 = vmul.f32 1.442695, %v1652_v32  ;;  %v1653_v28 = vsub.f32 %v9667_v4, %v7301_v14  ;;  %v1717_v23 = vsub.f32 %v9669_v22, %v7315_v10  ;;  %v9674_v29 = vld [vmem:[#allocation131_spill] sm:$0xff] }
 0x292   :  { %2686 = vst.msk [vmem:[#allocation8 + $0x238] sm:$0xff] %vm1239_vm2, %v2508_v12  ;;  %v3872_v38 = vsub.f32 %v3622_v13, %v3747_v7  ;;  %4941 = vrcp.f32 %v2019_v2  ;;  %v7706_v46 = vpop.eup %4923  ;;  %v2089_v7 = vsel %vm1239_vm2, %v7695_v31, 0.0  ;;  %v2086_v13 = vsel %vm1239_vm2, %v7687_v3, 0.0  ;;  %v9675_v14 = vld [vmem:[#allocation203_spill] sm:$0xff]  ;;  %v9715_v3 = vld [vmem:[#allocation222_spill] sm:$0xff] }
 0x293   :  { %v7704_v0 = vpop.xlane.xlu1 %1388  ;;  %9666 = vst [vmem:[#allocation97_spill] sm:$0xff] %v7706_v46  ;;  %4943 = vlog2.f32 %v2019_v2  ;;  %v7710_v12 = vpop.eup %4925  ;;  %v1940_v8 = vmul.f32 1.442695, %v1715_v57  ;;  %v1942_v15 = vmul.f32 1.442695, %v1716_v52  ;;  %v1654_v21 = vsub.f32 %v9674_v29, %v7317_v37  ;;  %v9678_v37 = vld [vmem:[#allocation23_spill] sm:$0xff] }
 0x294   :  { %v7702_v42 = vpop.xlane.xlu0 %2210  ;;  %9665 = vst [vmem:[#allocation158_spill] sm:$0xff] %v7704_v0  ;;  %9668 = vst [vmem:[#allocation159_spill] sm:$0xff] %v7710_v12  ;;  %v7720_v32 = vpop.eup %4927  ;;  %v1816_v10 = vmul.f32 1.442695, %v1653_v28  ;;  %v1944_v54 = vmul.f32 1.442695, %v1717_v23 }
 0x295   :  { %9664 = vst [vmem:[#allocation130_spill] sm:$0xff] %v7702_v42  ;;  %3998 = vst.msk [vmem:[#allocation9 + $0x38] sm:$0xff] %vm3990_vm3, %v3872_v38  ;;  %4945 = vrcp.f32 %v7702_v42  ;;  %2090 = vadd.xlane.f32.xlu0 %v2089_v7  ;;  %2087 = vadd.xlane.f32.xlu1 %v2086_v13  ;;  %v7722_v2 = vpop.eup %4929  ;;  %v2281_v7 = vsel %vm1239_vm2, %v7710_v12, 0.0  ;;  %v9677_v13 = vld [vmem:[#allocation134_spill] sm:$0xff]  ;;  %v3748_v23 = vmul.f32 0.5, %v9678_v37  ;;  %v2092_v37 = vsel %vm1239_vm2, %v7720_v32, 0.0 }
 0x296   :  { %9670 = vst [vmem:[#allocation132_spill] sm:$0xff] %v7720_v32  ;;  %9671 = vst [vmem:[#allocation99_spill] sm:$0xff] %v7722_v2  ;;  %4947 = vpow2.f32 %v1812_v43  ;;  %v4932_v22 = vpop.eup %4931  ;;  %v2278_v43 = vsel %vm1239_vm2, %v7706_v46, 0.0  ;;  %v1818_v45 = vmul.f32 1.442695, %v1654_v21  ;;  %v9682_v12 = vld [vmem:[#allocation206_spill] sm:$0xff] }
 0x297   :  { %v7724_v4 = vpop.xlane.xlu1 %1580  ;;  %4949 = vpow2.f32 %v1814_v11  ;;  %v4934_v42 = vpop.eup %4933  ;;  %v2382_v57 = vmul.f32 %v4932_v22, %v9675_v14  ;;  %v1718_v11 = vsub.f32 %v9677_v13, %v7339_v24  ;;  %v9683_v24 = vld [vmem:[#allocation207_spill] sm:$0xff]  ;;  %v9686_v32 = vld [vmem:[#allocation24_spill] sm:$0xff] }
 0x298   :  { %9672 = vst [vmem:[#allocation163_spill] sm:$0xff] %v7724_v4  ;;  %v7726_v38 = vpop.xlane.xlu0 %1391  ;;  %v7735_v52 = vpop.eup %4935  ;;  %4951 = vpow2.f32 %v1940_v8  ;;  %v3382_v28 = vmul.f32 0.6931472, %v4934_v42  ;;  %v9681_v8 = vld [vmem:[#allocation154_spill] sm:$0xff] }
 0x299   :  { %9673 = vst [vmem:[#allocation133_spill] sm:$0xff] %v7726_v38  ;;  %9676 = vst [vmem:[#allocation119_spill] sm:$0xff] %v7735_v52  ;;  %2282 = vadd.xlane.f32.xlu0 %v2281_v7  ;;  %2279 = vadd.xlane.f32.xlu1 %v2278_v43  ;;  %4953 = vpow2.f32 %v1942_v15  ;;  %v2095_v7 = vsel %vm1239_vm2, %v7735_v52, 0.0  ;;  %v3749_v52 = vmul.f32 0.5, %v9686_v32 }
 0x29a   :  { %v4938_v29 = vpop.eup %4937  ;;  %2623 = vst.msk [vmem:[#allocation8 + $0x40] sm:$0xff] %vm1239_vm2, %v2382_v57  ;;  %4955 = vpow2.f32 %v1816_v10  ;;  %v3623_v46 = vadd.f32 %v3382_v28, %v9681_v8  ;;  %v1946_v57 = vmul.f32 1.442695, %v1718_v11  ;;  %v9688_v11 = vld [vmem:[#allocation146_spill] sm:$0xff] }
 0x29b   :  { %v2022_v14 = vpop.xlane.xlu1 %2021  ;;  %v7743_v33 = vpop.eup %4939  ;;  %v2510_v13 = vmul.f32 %v4938_v29, %v9682_v12  ;;  %4957 = vpow2.f32 %v1944_v54  ;;  %v9684_v12 = vld [vmem:[#allocation135_spill] sm:$0xff] }
 0x29c   :  { %v7741_v22 = vpop.xlane.xlu0 %1583  ;;  %9680 = vst [vmem:[#allocation100_spill] sm:$0xff] %v7743_v33  ;;  %v4942_v42 = vpop.eup %4941  ;;  %v3873_v43 = vsub.f32 %v3623_v46, %v3748_v23  ;;  %4959 = vrcp.f32 %v2022_v14  ;;  %v1655_v54 = vsub.f32 %v9684_v12, %v7341_v16  ;;  %v9687_v46 = vld [vmem:[#allocation79_spill] sm:$0xff]  ;;  %v9695_v12 = vld [vmem:[#allocation281_spill] sm:$0xff] }
 0x29d   :  { %9679 = vst [vmem:[#allocation98_spill] sm:$0xff] %v7741_v22  ;;  %v4944_v15 = vpop.eup %4943  ;;  %2687 = vst.msk [vmem:[#allocation8 + $0x240] sm:$0xff] %vm1239_vm2, %v2510_v13  ;;  %v2384_v10 = vmul.f32 %v4942_v42, %v9683_v24  ;;  %2096 = vadd.xlane.f32.xlu0 %v2095_v7  ;;  %2093 = vadd.xlane.f32.xlu1 %v2092_v37  ;;  %4961 = vlog2.f32 %v2022_v14  ;;  %v1656_v23 = vsub.f32 %v9688_v11, %v9687_v46  ;;  %v9689_v24 = vld [vmem:[#allocation211_spill] sm:$0xff]  ;;  %v9691_v7 = vld [vmem:[#allocation157_spill] sm:$0xff] }
 0x29e   :  { %v3384_v28 = vmul.f32 0.6931472, %v4944_v15  ;;  %4963 = vpow2.f32 %v1818_v45  ;;  %3999 = vst.msk [vmem:[#allocation9 + $0x40] sm:$0xff] %vm3990_vm3, %v3873_v43  ;;  %v2287_v14 = vsel %vm1239_vm2, %v7743_v33, 0.0  ;;  %v2284_v45 = vsel %vm1239_vm2, %v7722_v2, 0.0  ;;  %v9693_v15 = vld [vmem:[#allocation276_spill] sm:$0xff] }
 0x29f   :  { %v4946_v21 = vpop.eup %4945  ;;  %v7755_v29 = vpop.xlane.xlu1 %2213  ;;  %2624 = vst.msk [vmem:[#allocation8 + $0x48] sm:$0xff] %vm1239_vm2, %v2384_v10  ;;  %v9694_v43 = vld [vmem:[#allocation136_spill] sm:$0xff]  ;;  %v9700_v46 = vld [vmem:[#allocation282_spill] sm:$0xff] }
 0x2a0   :  { %9685 = vst [vmem:[#allocation137_spill] sm:$0xff] %v7755_v29  ;;  %v2025_v8 = vpop.xlane.xlu0 %2024  ;;  %v2512_v13 = vmul.f32 %v4946_v21, %v9689_v24  ;;  %v7763_v42 = vpop.eup %4947  ;;  %v3624_v37 = vadd.f32 %v3384_v28, %v9691_v7  ;;  %4965 = vrcp.f32 %v7755_v29  ;;  %v1719_v10 = vsub.f32 %v9694_v43, %v9693_v15  ;;  %v9696_v28 = vld [vmem:[#allocation151_spill] sm:$0xff]  ;;  %v9701_v2 = vld [vmem:[#allocation150_spill] sm:$0xff] }
 0x2a1   :  { %9690 = vst [vmem:[#allocation103_spill] sm:$0xff] %v7763_v42  ;;  %v7771_v32 = vpop.eup %4949  ;;  %4967 = vpow2.f32 %v1946_v57  ;;  %2288 = vadd.xlane.f32.xlu0 %v2287_v14  ;;  %2285 = vadd.xlane.f32.xlu1 %v2284_v45  ;;  %v1820_v21 = vmul.f32 1.442695, %v1655_v54  ;;  %v1720_v11 = vsub.f32 %v9696_v28, %v9695_v12  ;;  %v1822_v57 = vmul.f32 1.442695, %v1656_v23  ;;  %v9703_v14 = vld [vmem:[#allocation82_spill] sm:$0xff] }
 0x2a2   :  { %9692 = vst [vmem:[#allocation104_spill] sm:$0xff] %v7771_v32  ;;  %2688 = vst.msk [vmem:[#allocation8 + $0x248] sm:$0xff] %vm1239_vm2, %v2512_v13  ;;  %v3874_v24 = vsub.f32 %v3624_v37, %v3749_v52  ;;  %4969 = vrcp.f32 %v2025_v8  ;;  %v7782_v16 = vpop.eup %4951  ;;  %v1657_v43 = vsub.f32 %v9701_v2, %v9700_v46  ;;  %v9704_v54 = vld [vmem:[#allocation152_spill] sm:$0xff]  ;;  %v2101_v52 = vsel %vm1239_vm2, %v7771_v32, 0.0  ;;  %v9708_v15 = vld [vmem:[#allocation162_spill] sm:$0xff] }
 0x2a3   :  { %v7780_v29 = vpop.xlane.xlu1 %1394  ;;  %9699 = vst [vmem:[#allocation106_spill] sm:$0xff] %v7782_v16  ;;  %4971 = vlog2.f32 %v2025_v8  ;;  %v7786_v13 = vpop.eup %4953  ;;  %v1721_v45 = vsub.f32 %v9704_v54, %v9703_v14  ;;  %v2098_v37 = vsel %vm1239_vm2, %v7763_v42, 0.0  ;;  %v1948_v28 = vmul.f32 1.442695, %v1719_v10  ;;  %v9709_v32 = vld [vmem:[#allocation219_spill] sm:$0xff] }
 0x2a4   :  { %v7778_v7 = vpop.xlane.xlu0 %2216  ;;  %9698 = vst [vmem:[#allocation171_spill] sm:$0xff] %v7780_v29  ;;  %9702 = vst [vmem:[#allocation19_spill] sm:$0xff] %v7786_v13  ;;  %v7796_v23 = vpop.eup %4955  ;;  %v1950_v8 = vmul.f32 1.442695, %v1720_v11  ;;  %v1824_v12 = vmul.f32 1.442695, %v1657_v43 }
 0x2a5   :  { %9697 = vst [vmem:[#allocation105_spill] sm:$0xff] %v7778_v7  ;;  %4000 = vst.msk [vmem:[#allocation9 + $0x48] sm:$0xff] %vm3990_vm3, %v3874_v24  ;;  %4973 = vrcp.f32 %v7778_v7  ;;  %2102 = vadd.xlane.f32.xlu0 %v2101_v52  ;;  %2099 = vadd.xlane.f32.xlu1 %v2098_v37  ;;  %v7798_v2 = vpop.eup %4957  ;;  %v1658_v7 = vsub.f32 %v9708_v15, %v7466_v18  ;;  %v1952_v42 = vmul.f32 1.442695, %v1721_v45  ;;  %v2293_v52 = vsel %vm1239_vm2, %v7786_v13, 0.0  ;;  %v9711_v37 = vld [vmem:[#allocation167_spill] sm:$0xff] }
 0x2a6   :  { %9705 = vst [vmem:[#allocation138_spill] sm:$0xff] %v7796_v23  ;;  %4975 = vpow2.f32 %v1820_v21  ;;  %v4960_v14 = vpop.eup %4959  ;;  %v2290_v21 = vsel %vm1239_vm2, %v7782_v16, 0.0  ;;  %v9712_v18 = vld [vmem:[#allocation25_spill] sm:$0xff] }
 0x2a7   :  { %v7800_v54 = vpop.xlane.xlu1 %1586  ;;  %4977 = vpow2.f32 %v1822_v57  ;;  %v4962_v46 = vpop.eup %4961  ;;  %v2386_v10 = vmul.f32 %v4960_v14, %v9709_v32  ;;  %v1722_v57 = vsub.f32 %v9711_v37, %v7485_v26  ;;  %v3750_v45 = vmul.f32 0.5, %v9712_v18  ;;  %v9716_v26 = vld [vmem:[#allocation223_spill] sm:$0xff] }
 0x2a8   :  { %9706 = vst [vmem:[#allocation174_spill] sm:$0xff] %v7800_v54  ;;  %v7802_v24 = vpop.xlane.xlu0 %1397  ;;  %v7811_v11 = vpop.eup %4963  ;;  %4979 = vpow2.f32 %v1948_v28  ;;  %v3386_v43 = vmul.f32 0.6931472, %v4962_v46  ;;  %v1826_v16 = vmul.f32 1.442695, %v1658_v7  ;;  %v9714_v28 = vld [vmem:[#allocation161_spill] sm:$0xff] }
 0x2a9   :  { %9707 = vst [vmem:[#allocation175_spill] sm:$0xff] %v7802_v24  ;;  %9710 = vst [vmem:[#allocation109_spill] sm:$0xff] %v7811_v11  ;;  %2294 = vadd.xlane.f32.xlu0 %v2293_v52  ;;  %2291 = vadd.xlane.f32.xlu1 %v2290_v21  ;;  %4981 = vpow2.f32 %v1950_v8  ;;  %v2107_v52 = vsel %vm1239_vm2, %v7811_v11, 0.0  ;;  %v2104_v18 = vsel %vm1239_vm2, %v7796_v23, 0.0  ;;  %v9719_v23 = vld [vmem:[#allocation26_spill] sm:$0xff] }
 0x2aa   :  { %v4966_v15 = vpop.eup %4965  ;;  %2625 = vst.msk [vmem:[#allocation8 + $0x50] sm:$0xff] %vm1239_vm2, %v2386_v10  ;;  %4983 = vpow2.f32 %v1824_v12  ;;  %v3625_v33 = vadd.f32 %v3386_v43, %v9714_v28  ;;  %v1954_v10 = vmul.f32 1.442695, %v1722_v57  ;;  %v3751_v11 = vmul.f32 0.5, %v9719_v23 }
 0x2ab   :  { %v2028_v32 = vpop.xlane.xlu1 %2027  ;;  %v7819_v13 = vpop.eup %4967  ;;  %v2514_v37 = vmul.f32 %v4966_v15, %v9715_v3  ;;  %4985 = vpow2.f32 %v1952_v42  ;;  %v9717_v3 = vld [vmem:[#allocation166_spill] sm:$0xff] }
 0x2ac   :  { %v7817_v14 = vpop.xlane.xlu0 %1589  ;;  %v4970_v46 = vpop.eup %4969  ;;  %v3875_v21 = vsub.f32 %v3625_v33, %v3750_v45  ;;  %4987 = vrcp.f32 %v2028_v32  ;;  %v1659_v42 = vsub.f32 %v9717_v3, %v7487_v48  ;;  %v9720_v33 = vld [vmem:[#allocation178_spill] sm:$0xff] }
 0x2ad   :  { %9713 = vst [vmem:[#allocation20_spill] sm:$0xff] %v7817_v14  ;;  %v4972_v8 = vpop.eup %4971  ;;  %2689 = vst.msk [vmem:[#allocation8 + $0x250] sm:$0xff] %vm1239_vm2, %v2514_v37  ;;  %v2388_v12 = vmul.f32 %v4970_v46, %v9716_v26  ;;  %2108 = vadd.xlane.f32.xlu0 %v2107_v52  ;;  %2105 = vadd.xlane.f32.xlu1 %v2104_v18  ;;  %4989 = vlog2.f32 %v2028_v32  ;;  %v1660_v57 = vsub.f32 %v9720_v33, %v7551_v60  ;;  %v9721_v26 = vld [vmem:[#allocation227_spill] sm:$0xff]  ;;  %v9722_v46 = vld [vmem:[#allocation165_spill] sm:$0xff] }
 0x2ae   :  { %v3388_v43 = vmul.f32 0.6931472, %v4972_v8  ;;  %4991 = vpow2.f32 %v1826_v16  ;;  %4001 = vst.msk [vmem:[#allocation9 + $0x50] sm:$0xff] %vm3990_vm3, %v3875_v21  ;;  %v2299_v32 = vsel %vm1239_vm2, %v7819_v13, 0.0  ;;  %v2296_v16 = vsel %vm1239_vm2, %v7798_v2, 0.0  ;;  %v9723_v18 = vld [vmem:[#allocation168_spill] sm:$0xff] }
 0x2af   :  { %v4974_v7 = vpop.eup %4973  ;;  %v7831_v15 = vpop.xlane.xlu1 %2219  ;;  %2626 = vst.msk [vmem:[#allocation8 + $0x58] sm:$0xff] %vm1239_vm2, %v2388_v12  ;;  %v1723_v8 = vsub.f32 %v9723_v18, %v7510_v39  ;;  %v1828_v21 = vmul.f32 1.442695, %v1659_v42  ;;  %v9724_v12 = vld [vmem:[#allocation183_spill] sm:$0xff]  ;;  %v9730_v42 = vld [vmem:[#allocation184_spill] sm:$0xff] }
 0x2b0   :  { %9718 = vst [vmem:[#allocation111_spill] sm:$0xff] %v7831_v15  ;;  %v2031_v28 = vpop.xlane.xlu0 %2030  ;;  %v2516_v45 = vmul.f32 %v4974_v7, %v9721_v26  ;;  %v7839_v37 = vpop.eup %4975  ;;  %v3626_v52 = vadd.f32 %v3388_v43, %v9722_v46  ;;  %4993 = vrcp.f32 %v7831_v15  ;;  %v1724_v7 = vsub.f32 %v9724_v12, %v7572_v63  ;;  %v9728_v46 = vld [vmem:[#allocation182_spill] sm:$0xff] }
 0x2b1   :  { %v7847_v23 = vpop.eup %4977  ;;  %4995 = vpow2.f32 %v1954_v10  ;;  %2300 = vadd.xlane.f32.xlu0 %v2299_v32  ;;  %2297 = vadd.xlane.f32.xlu1 %v2296_v16  ;;  %v1830_v10 = vmul.f32 1.442695, %v1660_v57  ;;  %v1661_v18 = vsub.f32 %v9728_v46, %v7574_v62  ;;  %v1725_v32 = vsub.f32 %v9730_v42, %v7589_v25  ;;  %v9734_v63 = vld [vmem:[#allocation194_spill] sm:$0xff]  ;;  %v9735_v62 = vld [vmem:[#allocation235_spill] sm:$0xff] }
 0x2b2   :  { %2690 = vst.msk [vmem:[#allocation8 + $0x258] sm:$0xff] %vm1239_vm2, %v2516_v45  ;;  %v3876_v3 = vsub.f32 %v3626_v52, %v3751_v11  ;;  %4997 = vrcp.f32 %v2031_v28  ;;  %v7858_v26 = vpop.eup %4979  ;;  %v2113_v11 = vsel %vm1239_vm2, %v7847_v23, 0.0  ;;  %v2110_v52 = vsel %vm1239_vm2, %v7839_v37, 0.0 }
 0x2b3   :  { %v7856_v33 = vpop.xlane.xlu1 %1400  ;;  %9727 = vst [vmem:[#allocation110_spill] sm:$0xff] %v7858_v26  ;;  %4999 = vlog2.f32 %v2031_v28  ;;  %v7862_v45 = vpop.eup %4981  ;;  %v1956_v16 = vmul.f32 1.442695, %v1723_v8  ;;  %v1958_v12 = vmul.f32 1.442695, %v1724_v7  ;;  %v1662_v39 = vsub.f32 %v9734_v63, %v7628_v20  ;;  %v9738_v20 = vld [vmem:[#allocation27_spill] sm:$0xff] }
 0x2b4   :  { %v7854_v43 = vpop.xlane.xlu0 %2222  ;;  %9726 = vst [vmem:[#allocation141_spill] sm:$0xff] %v7856_v33  ;;  %9729 = vst [vmem:[#allocation112_spill] sm:$0xff] %v7862_v45  ;;  %v7872_v57 = vpop.eup %4983  ;;  %v1832_v25 = vmul.f32 1.442695, %v1661_v18  ;;  %v1960_v15 = vmul.f32 1.442695, %v1725_v32 }
 0x2b5   :  { %9725 = vst [vmem:[#allocation179_spill] sm:$0xff] %v7854_v43  ;;  %4002 = vst.msk [vmem:[#allocation9 + $0x58] sm:$0xff] %vm3990_vm3, %v3876_v3  ;;  %5001 = vrcp.f32 %v7854_v43  ;;  %2114 = vadd.xlane.f32.xlu0 %v2113_v11  ;;  %2111 = vadd.xlane.f32.xlu1 %v2110_v52  ;;  %v7874_v28 = vpop.eup %4985  ;;  %v2305_v11 = vsel %vm1239_vm2, %v7862_v45, 0.0  ;;  %v9737_v52 = vld [vmem:[#allocation199_spill] sm:$0xff]  ;;  %v3752_v32 = vmul.f32 0.5, %v9738_v20  ;;  %v9741_v45 = vld [vmem:[#allocation238_spill] sm:$0xff] }
 0x2b6   :  { %9731 = vst [vmem:[#allocation115_spill] sm:$0xff] %v7872_v57  ;;  %5003 = vpow2.f32 %v1828_v21  ;;  %v4988_v42 = vpop.eup %4987  ;;  %v2302_v21 = vsel %vm1239_vm2, %v7858_v26, 0.0  ;;  %v1834_v60 = vmul.f32 1.442695, %v1662_v39  ;;  %v2116_v20 = vsel %vm1239_vm2, %v7872_v57, 0.0  ;;  %v9745_v57 = vld [vmem:[#allocation28_spill] sm:$0xff] }
 0x2b7   :  { %v7876_v46 = vpop.xlane.xlu1 %1592  ;;  %5005 = vpow2.f32 %v1830_v10  ;;  %v4990_v43 = vpop.eup %4989  ;;  %v2390_v8 = vmul.f32 %v4988_v42, %v9735_v62  ;;  %v1726_v10 = vsub.f32 %v9737_v52, %v7648_v1  ;;  %v9742_v1 = vld [vmem:[#allocation239_spill] sm:$0xff] }
 0x2b8   :  { %9732 = vst [vmem:[#allocation116_spill] sm:$0xff] %v7876_v46  ;;  %v7878_v3 = vpop.xlane.xlu0 %1403  ;;  %v7887_v7 = vpop.eup %4991  ;;  %5007 = vpow2.f32 %v1956_v16  ;;  %v3390_v18 = vmul.f32 0.6931472, %v4990_v43  ;;  %v9740_v16 = vld [vmem:[#allocation170_spill] sm:$0xff] }
 0x2b9   :  { %9733 = vst [vmem:[#allocation117_spill] sm:$0xff] %v7878_v3  ;;  %9736 = vst [vmem:[#allocation187_spill] sm:$0xff] %v7887_v7  ;;  %2306 = vadd.xlane.f32.xlu0 %v2305_v11  ;;  %2303 = vadd.xlane.f32.xlu1 %v2302_v21  ;;  %5009 = vpow2.f32 %v1958_v12  ;;  %v2119_v11 = vsel %vm1239_vm2, %v7887_v7, 0.0  ;;  %v3753_v7 = vmul.f32 0.5, %v9745_v57 }
 0x2ba   :  { %v4994_v63 = vpop.eup %4993  ;;  %2627 = vst.msk [vmem:[#allocation8 + $0x60] sm:$0xff] %vm1239_vm2, %v2390_v8  ;;  %5011 = vpow2.f32 %v1832_v25  ;;  %v3627_v26 = vadd.f32 %v3390_v18, %v9740_v16  ;;  %v1962_v8 = vmul.f32 1.442695, %v1726_v10 }
 0x2bb   :  { %v2034_v62 = vpop.xlane.xlu1 %2033  ;;  %v7895_v48 = vpop.eup %4995  ;;  %v2518_v52 = vmul.f32 %v4994_v63, %v9741_v45  ;;  %5013 = vpow2.f32 %v1960_v15  ;;  %v9743_v45 = vld [vmem:[#allocation198_spill] sm:$0xff] }
 0x2bc   :  { %v7893_v42 = vpop.xlane.xlu0 %1595  ;;  %v4998_v43 = vpop.eup %4997  ;;  %v3877_v21 = vsub.f32 %v3627_v26, %v3752_v32  ;;  %5015 = vrcp.f32 %v2034_v62  ;;  %v1663_v15 = vsub.f32 %v9743_v45, %v7650_v35  ;;  %v9746_v26 = vld [vmem:[#allocation210_spill] sm:$0xff] }
 0x2bd   :  { %9739 = vst [vmem:[#allocation118_spill] sm:$0xff] %v7893_v42  ;;  %v5000_v12 = vpop.eup %4999  ;;  %2691 = vst.msk [vmem:[#allocation8 + $0x260] sm:$0xff] %vm1239_vm2, %v2518_v52  ;;  %v2392_v25 = vmul.f32 %v4998_v43, %v9742_v1  ;;  %2120 = vadd.xlane.f32.xlu0 %v2119_v11  ;;  %2117 = vadd.xlane.f32.xlu1 %v2116_v20  ;;  %5017 = vlog2.f32 %v2034_v62  ;;  %v1664_v10 = vsub.f32 %v9746_v26, %v7704_v0  ;;  %v9747_v1 = vld [vmem:[#allocation243_spill] sm:$0xff]  ;;  %v9748_v43 = vld [vmem:[#allocation173_spill] sm:$0xff] }
 0x2be   :  { %v3392_v18 = vmul.f32 0.6931472, %v5000_v12  ;;  %5019 = vpow2.f32 %v1834_v60  ;;  %4003 = vst.msk [vmem:[#allocation9 + $0x60] sm:$0xff] %vm3990_vm3, %v3877_v21  ;;  %v2311_v62 = vsel %vm1239_vm2, %v7895_v48, 0.0  ;;  %v2308_v60 = vsel %vm1239_vm2, %v7874_v28, 0.0  ;;  %v9749_v20 = vld [vmem:[#allocation200_spill] sm:$0xff] }
 0x2bf   :  { %v5002_v39 = vpop.eup %5001  ;;  %v7907_v63 = vpop.xlane.xlu1 %2225  ;;  %2628 = vst.msk [vmem:[#allocation8 + $0x68] sm:$0xff] %vm1239_vm2, %v2392_v25  ;;  %v1727_v12 = vsub.f32 %v9749_v20, %v7665_v5  ;;  %v1836_v21 = vmul.f32 1.442695, %v1663_v15  ;;  %v9750_v25 = vld [vmem:[#allocation215_spill] sm:$0xff]  ;;  %v9756_v15 = vld [vmem:[#allocation216_spill] sm:$0xff] }
 0x2c0   :  { %9744 = vst [vmem:[#allocation21_spill] sm:$0xff] %v7907_v63  ;;  %v2037_v16 = vpop.xlane.xlu0 %2036  ;;  %v2520_v32 = vmul.f32 %v5002_v39, %v9747_v1  ;;  %v7915_v52 = vpop.eup %5003  ;;  %v3628_v11 = vadd.f32 %v3392_v18, %v9748_v43  ;;  %5021 = vrcp.f32 %v7907_v63  ;;  %v1728_v39 = vsub.f32 %v9750_v25, %v7724_v4  ;;  %v9754_v43 = vld [vmem:[#allocation214_spill] sm:$0xff] }
 0x2c1   :  { %v7923_v57 = vpop.eup %5005  ;;  %5023 = vpow2.f32 %v1962_v8  ;;  %2312 = vadd.xlane.f32.xlu0 %v2311_v62  ;;  %2309 = vadd.xlane.f32.xlu1 %v2308_v60  ;;  %v1838_v8 = vmul.f32 1.442695, %v1664_v10  ;;  %v1665_v20 = vsub.f32 %v9754_v43, %v7726_v38  ;;  %v1729_v62 = vsub.f32 %v9756_v15, %v7741_v22  ;;  %v9760_v4 = vld [vmem:[#allocation226_spill] sm:$0xff]  ;;  %v9761_v38 = vld [vmem:[#allocation251_spill] sm:$0xff] }
 0x2c2   :  { %2692 = vst.msk [vmem:[#allocation8 + $0x268] sm:$0xff] %vm1239_vm2, %v2520_v32  ;;  %v3878_v45 = vsub.f32 %v3628_v11, %v3753_v7  ;;  %5025 = vrcp.f32 %v2037_v16  ;;  %v7934_v1 = vpop.eup %5007  ;;  %v2125_v7 = vsel %vm1239_vm2, %v7923_v57, 0.0  ;;  %v2122_v11 = vsel %vm1239_vm2, %v7915_v52, 0.0 }
 0x2c3   :  { %v7932_v26 = vpop.xlane.xlu1 %1406  ;;  %9753 = vst [vmem:[#allocation191_spill] sm:$0xff] %v7934_v1  ;;  %5027 = vlog2.f32 %v2037_v16  ;;  %v7938_v32 = vpop.eup %5009  ;;  %v1964_v60 = vmul.f32 1.442695, %v1727_v12  ;;  %v1966_v25 = vmul.f32 1.442695, %v1728_v39  ;;  %v1666_v5 = vsub.f32 %v9760_v4, %v7780_v29  ;;  %v9764_v29 = vld [vmem:[#allocation29_spill] sm:$0xff] }
 0x2c4   :  { %v7930_v18 = vpop.xlane.xlu0 %2228  ;;  %9752 = vst [vmem:[#allocation190_spill] sm:$0xff] %v7932_v26  ;;  %9755 = vst [vmem:[#allocation120_spill] sm:$0xff] %v7938_v32  ;;  %v7948_v10 = vpop.eup %5011  ;;  %v1840_v22 = vmul.f32 1.442695, %v1665_v20  ;;  %v1968_v63 = vmul.f32 1.442695, %v1729_v62 }
 0x2c5   :  { %9751 = vst [vmem:[#allocation145_spill] sm:$0xff] %v7930_v18  ;;  %4004 = vst.msk [vmem:[#allocation9 + $0x68] sm:$0xff] %vm3990_vm3, %v3878_v45  ;;  %5029 = vrcp.f32 %v7930_v18  ;;  %2126 = vadd.xlane.f32.xlu0 %v2125_v7  ;;  %2123 = vadd.xlane.f32.xlu1 %v2122_v11  ;;  %v7950_v16 = vpop.eup %5013  ;;  %v2317_v7 = vsel %vm1239_vm2, %v7938_v32, 0.0  ;;  %v9763_v11 = vld [vmem:[#allocation231_spill] sm:$0xff]  ;;  %v3754_v62 = vmul.f32 0.5, %v9764_v29  ;;  %v9767_v32 = vld [vmem:[#allocation254_spill] sm:$0xff] }
 0x2c6   :  { %9757 = vst [vmem:[#allocation22_spill] sm:$0xff] %v7948_v10  ;;  %5031 = vpow2.f32 %v1836_v21  ;;  %v5016_v15 = vpop.eup %5015  ;;  %v2314_v21 = vsel %vm1239_vm2, %v7934_v1, 0.0  ;;  %v1842_v0 = vmul.f32 1.442695, %v1666_v5  ;;  %v2128_v29 = vsel %vm1239_vm2, %v7948_v10, 0.0  ;;  %v9771_v10 = vld [vmem:[#allocation30_spill] sm:$0xff] }
 0x2c7   :  { %v7952_v43 = vpop.xlane.xlu1 %1598  ;;  %5033 = vpow2.f32 %v1838_v8  ;;  %v5018_v18 = vpop.eup %5017  ;;  %v2394_v12 = vmul.f32 %v5016_v15, %v9761_v38  ;;  %v1730_v8 = vsub.f32 %v9763_v11, %v7800_v54  ;;  %v9768_v54 = vld [vmem:[#allocation255_spill] sm:$0xff] }
 0x2c8   :  { %9758 = vst [vmem:[#allocation123_spill] sm:$0xff] %v7952_v43  ;;  %v7954_v45 = vpop.xlane.xlu0 %1409  ;;  %v7963_v39 = vpop.eup %5019  ;;  %5035 = vpow2.f32 %v1964_v60  ;;  %v3394_v20 = vmul.f32 0.6931472, %v5018_v18  ;;  %v9766_v60 = vld [vmem:[#allocation177_spill] sm:$0xff] }
 0x2c9   :  { %9759 = vst [vmem:[#allocation195_spill] sm:$0xff] %v7954_v45  ;;  %9762 = vst [vmem:[#allocation149_spill] sm:$0xff] %v7963_v39  ;;  %2318 = vadd.xlane.f32.xlu0 %v2317_v7  ;;  %2315 = vadd.xlane.f32.xlu1 %v2314_v21  ;;  %5037 = vpow2.f32 %v1966_v25  ;;  %v2131_v7 = vsel %vm1239_vm2, %v7963_v39, 0.0  ;;  %v3755_v39 = vmul.f32 0.5, %v9771_v10 }
 0x2ca   :  { %v5022_v4 = vpop.eup %5021  ;;  %2629 = vst.msk [vmem:[#allocation8 + $0x70] sm:$0xff] %vm1239_vm2, %v2394_v12  ;;  %5039 = vpow2.f32 %v1840_v22  ;;  %v3629_v1 = vadd.f32 %v3394_v20, %v9766_v60  ;;  %v1970_v12 = vmul.f32 1.442695, %v1730_v8 }
 0x2cb   :  { %v2040_v38 = vpop.xlane.xlu1 %2039  ;;  %v7971_v35 = vpop.eup %5023  ;;  %v2522_v11 = vmul.f32 %v5022_v4, %v9767_v32  ;;  %5041 = vpow2.f32 %v1968_v63  ;;  %v9769_v32 = vld [vmem:[#allocation230_spill] sm:$0xff] }
 0x2cc   :  { %v7969_v15 = vpop.xlane.xlu0 %1601  ;;  %v5026_v18 = vpop.eup %5025  ;;  %v3879_v21 = vsub.f32 %v3629_v1, %v3754_v62  ;;  %5043 = vrcp.f32 %v2040_v38  ;;  %v1667_v63 = vsub.f32 %v9769_v32, %v7802_v24  ;;  %v9772_v1 = vld [vmem:[#allocation242_spill] sm:$0xff] }
 0x2cd   :  { %9765 = vst [vmem:[#allocation121_spill] sm:$0xff] %v7969_v15  ;;  %v5028_v25 = vpop.eup %5027  ;;  %2693 = vst.msk [vmem:[#allocation8 + $0x270] sm:$0xff] %vm1239_vm2, %v2522_v11  ;;  %v2396_v22 = vmul.f32 %v5026_v18, %v9768_v54  ;;  %2132 = vadd.xlane.f32.xlu0 %v2131_v7  ;;  %2129 = vadd.xlane.f32.xlu1 %v2128_v29  ;;  %5045 = vlog2.f32 %v2040_v38  ;;  %v1668_v8 = vsub.f32 %v9772_v1, %v7856_v33  ;;  %v9773_v54 = vld [vmem:[#allocation258_spill] sm:$0xff]  ;;  %v9774_v18 = vld [vmem:[#allocation181_spill] sm:$0xff] }
 0x2ce   :  { %v3396_v20 = vmul.f32 0.6931472, %v5028_v25  ;;  %5047 = vpow2.f32 %v1842_v0  ;;  %4005 = vst.msk [vmem:[#allocation9 + $0x70] sm:$0xff] %vm3990_vm3, %v3879_v21  ;;  %v2323_v38 = vsel %vm1239_vm2, %v7971_v35, 0.0  ;;  %v2320_v0 = vsel %vm1239_vm2, %v7950_v16, 0.0  ;;  %v9775_v29 = vld [vmem:[#allocation232_spill] sm:$0xff] }
 0x2cf   :  { %v5030_v5 = vpop.eup %5029  ;;  %v7983_v4 = vpop.xlane.xlu1 %2231  ;;  %2630 = vst.msk [vmem:[#allocation8 + $0x78] sm:$0xff] %vm1239_vm2, %v2396_v22  ;;  %v1731_v25 = vsub.f32 %v9775_v29, %v7817_v14  ;;  %v1844_v21 = vmul.f32 1.442695, %v1667_v63  ;;  %v9776_v22 = vld [vmem:[#allocation247_spill] sm:$0xff]  ;;  %v9782_v63 = vld [vmem:[#allocation248_spill] sm:$0xff] }
 0x2d0   :  { %9770 = vst [vmem:[#allocation126_spill] sm:$0xff] %v7983_v4  ;;  %v2043_v60 = vpop.xlane.xlu0 %2042  ;;  %v2524_v62 = vmul.f32 %v5030_v5, %v9773_v54  ;;  %v7991_v11 = vpop.eup %5031  ;;  %v3630_v7 = vadd.f32 %v3396_v20, %v9774_v18  ;;  %5049 = vrcp.f32 %v7983_v4  ;;  %v1732_v5 = vsub.f32 %v9776_v22, %v7876_v46  ;;  %v9780_v18 = vld [vmem:[#allocation246_spill] sm:$0xff]  ;;  %v9786_v46 = vld [vmem:[#allocation64_spill] sm:$0xff] }
 0x2d1   :  { %v7999_v10 = vpop.eup %5033  ;;  %5051 = vpow2.f32 %v1970_v12  ;;  %2324 = vadd.xlane.f32.xlu0 %v2323_v38  ;;  %2321 = vadd.xlane.f32.xlu1 %v2320_v0  ;;  %v1846_v12 = vmul.f32 1.442695, %v1668_v8  ;;  %v1669_v29 = vsub.f32 %v9780_v18, %v7878_v3  ;;  %v1733_v38 = vsub.f32 %v9782_v63, %v7893_v42  ;;  %v9787_v3 = vld [vmem:[#allocation67_spill] sm:$0xff] }
 0x2d2   :  { %2694 = vst.msk [vmem:[#allocation8 + $0x278] sm:$0xff] %vm1239_vm2, %v2524_v62  ;;  %v3880_v32 = vsub.f32 %v3630_v7, %v3755_v39  ;;  %5053 = vrcp.f32 %v2043_v60  ;;  %v8010_v54 = vpop.eup %5035  ;;  %v2137_v39 = vsel %vm1239_vm2, %v7999_v10, 0.0  ;;  %v2134_v7 = vsel %vm1239_vm2, %v7991_v11, 0.0 }
 0x2d3   :  { %v8008_v1 = vpop.xlane.xlu1 %1412  ;;  %9779 = vst [vmem:[#allocation131_spill] sm:$0xff] %v8010_v54  ;;  %5055 = vlog2.f32 %v2043_v60  ;;  %v8014_v62 = vpop.eup %5037  ;;  %v1972_v0 = vmul.f32 1.442695, %v1731_v25  ;;  %v1974_v22 = vmul.f32 1.442695, %v1732_v5  ;;  %v1670_v14 = vsub.f32 %v9786_v46, %v7932_v26  ;;  %v9790_v26 = vld [vmem:[#allocation31_spill] sm:$0xff] }
 0x2d4   :  { %v8006_v20 = vpop.xlane.xlu0 %2234  ;;  %9778 = vst [vmem:[#allocation128_spill] sm:$0xff] %v8008_v1  ;;  %9781 = vst [vmem:[#allocation203_spill] sm:$0xff] %v8014_v62  ;;  %v8024_v8 = vpop.eup %5039  ;;  %v1848_v42 = vmul.f32 1.442695, %v1669_v29  ;;  %v1976_v4 = vmul.f32 1.442695, %v1733_v38 }
 0x2d5   :  { %9777 = vst [vmem:[#allocation127_spill] sm:$0xff] %v8006_v20  ;;  %4006 = vst.msk [vmem:[#allocation9 + $0x78] sm:$0xff] %vm3990_vm3, %v3880_v32  ;;  %5057 = vrcp.f32 %v8006_v20  ;;  %2138 = vadd.xlane.f32.xlu0 %v2137_v39  ;;  %2135 = vadd.xlane.f32.xlu1 %v2134_v7  ;;  %v8026_v60 = vpop.eup %5041  ;;  %v2329_v39 = vsel %vm1239_vm2, %v8014_v62, 0.0  ;;  %v9789_v7 = vld [vmem:[#allocation262_spill] sm:$0xff]  ;;  %v3756_v38 = vmul.f32 0.5, %v9790_v26  ;;  %v9793_v62 = vld [vmem:[#allocation69_spill] sm:$0xff] }
 0x2d6   :  { %9783 = vst [vmem:[#allocation134_spill] sm:$0xff] %v8024_v8  ;;  %5059 = vpow2.f32 %v1844_v21  ;;  %v5044_v63 = vpop.eup %5043  ;;  %v2326_v21 = vsel %vm1239_vm2, %v8010_v54, 0.0  ;;  %v1850_v33 = vmul.f32 1.442695, %v1670_v14  ;;  %v2140_v26 = vsel %vm1239_vm2, %v8024_v8, 0.0  ;;  %v9797_v8 = vld [vmem:[#allocation32_spill] sm:$0xff] }
 0x2d7   :  { %v8028_v18 = vpop.xlane.xlu1 %1604  ;;  %5061 = vpow2.f32 %v1846_v12  ;;  %v5046_v20 = vpop.eup %5045  ;;  %v2398_v25 = vmul.f32 %v5044_v63, %v9787_v3  ;;  %v1734_v12 = vsub.f32 %v9789_v7, %v7952_v43  ;;  %v9794_v43 = vld [vmem:[#allocation267_spill] sm:$0xff] }
 0x2d8   :  { %9784 = vst [vmem:[#allocation23_spill] sm:$0xff] %v8028_v18  ;;  %v8030_v32 = vpop.xlane.xlu0 %1415  ;;  %v8039_v5 = vpop.eup %5047  ;;  %5063 = vpow2.f32 %v1972_v0  ;;  %v3398_v29 = vmul.f32 0.6931472, %v5046_v20  ;;  %v9792_v0 = vld [vmem:[#allocation186_spill] sm:$0xff] }
 0x2d9   :  { %9785 = vst [vmem:[#allocation154_spill] sm:$0xff] %v8030_v32  ;;  %9788 = vst [vmem:[#allocation206_spill] sm:$0xff] %v8039_v5  ;;  %2330 = vadd.xlane.f32.xlu0 %v2329_v39  ;;  %2327 = vadd.xlane.f32.xlu1 %v2326_v21  ;;  %5065 = vpow2.f32 %v1974_v22  ;;  %v2143_v39 = vsel %vm1239_vm2, %v8039_v5, 0.0  ;;  %v3757_v5 = vmul.f32 0.5, %v9797_v8 }
 0x2da   :  { %v5050_v46 = vpop.eup %5049  ;;  %2631 = vst.msk [vmem:[#allocation8 + $0x80] sm:$0xff] %vm1239_vm2, %v2398_v25  ;;  %5067 = vpow2.f32 %v1848_v42  ;;  %v3631_v54 = vadd.f32 %v3398_v29, %v9792_v0  ;;  %v1978_v25 = vmul.f32 1.442695, %v1734_v12  ;;  %v9799_v12 = vld [vmem:[#allocation70_spill] sm:$0xff] }
 0x2db   :  { %v2046_v3 = vpop.xlane.xlu1 %2045  ;;  %v8047_v24 = vpop.eup %5051  ;;  %v2526_v7 = vmul.f32 %v5050_v46, %v9793_v62  ;;  %5069 = vpow2.f32 %v1976_v4  ;;  %v9795_v62 = vld [vmem:[#allocation261_spill] sm:$0xff] }
 0x2dc   :  { %v8045_v63 = vpop.xlane.xlu0 %1607  ;;  %v5054_v20 = vpop.eup %5053  ;;  %v3881_v21 = vsub.f32 %v3631_v54, %v3756_v38  ;;  %5071 = vrcp.f32 %v2046_v3  ;;  %v1671_v4 = vsub.f32 %v9795_v62, %v7954_v45  ;;  %v1672_v38 = vsub.f32 %v9799_v12, %v8008_v1  ;;  %v9816_v1 = vld [vmem:[#allocation193_spill] sm:$0xff] }
 0x2dd   :  { %9791 = vst [vmem:[#allocation207_spill] sm:$0xff] %v8045_v63  ;;  %v5056_v22 = vpop.eup %5055  ;;  %2695 = vst.msk [vmem:[#allocation8 + $0x280] sm:$0xff] %vm1239_vm2, %v2526_v7  ;;  %v2400_v42 = vmul.f32 %v5054_v20, %v9794_v43  ;;  %2144 = vadd.xlane.f32.xlu0 %v2143_v39  ;;  %2141 = vadd.xlane.f32.xlu1 %v2140_v26  ;;  %5073 = vlog2.f32 %v2046_v3  ;;  %v9798_v43 = vld [vmem:[#allocation270_spill] sm:$0xff]  ;;  %v9800_v20 = vld [vmem:[#allocation189_spill] sm:$0xff]  ;;  %v2335_v3 = vsel %vm1239_vm2, %v8047_v24, 0.0 }
 0x2de   :  { %v3400_v29 = vmul.f32 0.6931472, %v5056_v22  ;;  %5075 = vpow2.f32 %v1850_v33  ;;  %4007 = vst.msk [vmem:[#allocation9 + $0x80] sm:$0xff] %vm3990_vm3, %v3881_v21  ;;  %v2332_v33 = vsel %vm1239_vm2, %v8026_v60, 0.0  ;;  %v9801_v26 = vld [vmem:[#allocation263_spill] sm:$0xff] }
 0x2df   :  { %v5058_v14 = vpop.eup %5057  ;;  %v8059_v46 = vpop.xlane.xlu1 %2237  ;;  %2632 = vst.msk [vmem:[#allocation8 + $0x88] sm:$0xff] %vm1239_vm2, %v2400_v42  ;;  %v1735_v22 = vsub.f32 %v9801_v26, %v7969_v15  ;;  %v1852_v21 = vmul.f32 1.442695, %v1671_v4 }
 0x2e0   :  { %9796 = vst [vmem:[#allocation135_spill] sm:$0xff] %v8059_v46  ;;  %v2049_v0 = vpop.xlane.xlu0 %2048  ;;  %v2528_v54 = vmul.f32 %v5058_v14, %v9798_v43  ;;  %v8067_v7 = vpop.eup %5059  ;;  %v3632_v39 = vadd.f32 %v3400_v29, %v9800_v20  ;;  %5077 = vrcp.f32 %v8059_v46  ;;  %v9802_v14 = vld [vmem:[#allocation73_spill] sm:$0xff]  ;;  %v9812_v46 = vld [vmem:[#allocation75_spill] sm:$0xff] }
 0x2e1   :  { %v8075_v8 = vpop.eup %5061  ;;  %5079 = vpow2.f32 %v1978_v25  ;;  %2336 = vadd.xlane.f32.xlu0 %v2335_v3  ;;  %2333 = vadd.xlane.f32.xlu1 %v2332_v33  ;;  %v1736_v62 = vsub.f32 %v9802_v14, %v8028_v18  ;;  %v1854_v25 = vmul.f32 1.442695, %v1672_v38  ;;  %v9806_v20 = vld [vmem:[#allocation273_spill] sm:$0xff]  ;;  %v2146_v3 = vsel %vm1239_vm2, %v8067_v7, 0.0  ;;  %v9811_v18 = vld [vmem:[#allocation76_spill] sm:$0xff] }
 0x2e2   :  { %2696 = vst.msk [vmem:[#allocation8 + $0x288] sm:$0xff] %vm1239_vm2, %v2528_v54  ;;  %v3882_v42 = vsub.f32 %v3632_v39, %v3757_v5  ;;  %5081 = vrcp.f32 %v2049_v0  ;;  %v8086_v12 = vpop.eup %5063  ;;  %v1673_v26 = vsub.f32 %v9806_v20, %v8030_v32  ;;  %v9808_v5 = vld [vmem:[#allocation74_spill] sm:$0xff]  ;;  %v2149_v39 = vsel %vm1239_vm2, %v8075_v8, 0.0 }
 0x2e3   :  { %v8084_v43 = vpop.xlane.xlu1 %1418  ;;  %9805 = vst [vmem:[#allocation211_spill] sm:$0xff] %v8086_v12  ;;  %5083 = vlog2.f32 %v2049_v0  ;;  %v8090_v54 = vpop.eup %5065  ;;  %v1737_v4 = vsub.f32 %v9808_v5, %v8045_v63  ;;  %v1980_v33 = vmul.f32 1.442695, %v1735_v22 }
 0x2e4   :  { %v8082_v29 = vpop.xlane.xlu0 %2240  ;;  %9804 = vst [vmem:[#allocation146_spill] sm:$0xff] %v8084_v43  ;;  %9807 = vst [vmem:[#allocation157_spill] sm:$0xff] %v8090_v54  ;;  %v8100_v38 = vpop.eup %5067  ;;  %v1856_v63 = vmul.f32 1.442695, %v1673_v26  ;;  %v1674_v15 = vsub.f32 %v9811_v18, %v8084_v43  ;;  %v9814_v43 = vld [vmem:[#allocation33_spill] sm:$0xff] }
 0x2e5   :  { %9803 = vst [vmem:[#allocation24_spill] sm:$0xff] %v8082_v29  ;;  %4008 = vst.msk [vmem:[#allocation9 + $0x88] sm:$0xff] %vm3990_vm3, %v3882_v42  ;;  %5085 = vrcp.f32 %v8082_v29  ;;  %2150 = vadd.xlane.f32.xlu0 %v2149_v39  ;;  %2147 = vadd.xlane.f32.xlu1 %v2146_v3  ;;  %v8102_v0 = vpop.eup %5069  ;;  %v1982_v42 = vmul.f32 1.442695, %v1736_v62  ;;  %v1984_v22 = vmul.f32 1.442695, %v1737_v4 }
 0x2e6   :  { %5087 = vpow2.f32 %v1852_v21  ;;  %v5072_v5 = vpop.eup %5071  ;;  %v2341_v39 = vsel %vm1239_vm2, %v8090_v54, 0.0  ;;  %v2338_v21 = vsel %vm1239_vm2, %v8086_v12, 0.0  ;;  %v3758_v45 = vmul.f32 0.5, %v9814_v43 }
 0x2e7   :  { %v8104_v14 = vpop.xlane.xlu1 %1610  ;;  %5089 = vpow2.f32 %v1854_v25  ;;  %v5074_v29 = vpop.eup %5073  ;;  %v2402_v32 = vmul.f32 %v5072_v5, %v9812_v46  ;;  %v9813_v25 = vld [vmem:[#allocation80_spill] sm:$0xff]  ;;  %v1858_v54 = vmul.f32 1.442695, %v1674_v15  ;;  %v2152_v43 = vsel %vm1239_vm2, %v8100_v38, 0.0 }
 0x2e8   :  { %9809 = vst [vmem:[#allocation136_spill] sm:$0xff] %v8104_v14  ;;  %v8106_v20 = vpop.xlane.xlu0 %1421  ;;  %v8115_v62 = vpop.eup %5075  ;;  %5091 = vpow2.f32 %v1980_v33  ;;  %v3402_v3 = vmul.f32 0.6931472, %v5074_v29  ;;  %v1738_v26 = vsub.f32 %v9813_v25, %v8104_v14  ;;  %v9817_v29 = vld [vmem:[#allocation277_spill] sm:$0xff] }
 0x2e9   :  { %9810 = vst [vmem:[#allocation151_spill] sm:$0xff] %v8106_v20  ;;  %2342 = vadd.xlane.f32.xlu0 %v2341_v39  ;;  %2339 = vadd.xlane.f32.xlu1 %v2338_v21  ;;  %5093 = vpow2.f32 %v1982_v42  ;;  %2633 = vst.msk [vmem:[#allocation8 + $0x90] sm:$0xff] %vm1239_vm2, %v2402_v32  ;;  %v2155_v39 = vsel %vm1239_vm2, %v8115_v62, 0.0  ;;  %v9818_v21 = vld [vmem:[#allocation278_spill] sm:$0xff] }
 0x2ea   :  { %v5078_v18 = vpop.eup %5077  ;;  %5095 = vpow2.f32 %v1856_v63  ;;  %v3633_v33 = vadd.f32 %v3402_v3, %v9816_v1  ;;  %v1986_v63 = vmul.f32 1.442695, %v1738_v26  ;;  %v9822_v26 = vld [vmem:[#allocation280_spill] sm:$0xff] }
 0x2eb   :  { %v2052_v46 = vpop.xlane.xlu1 %2051  ;;  %v8123_v5 = vpop.eup %5079  ;;  %v2530_v12 = vmul.f32 %v5078_v18, %v9817_v29  ;;  %5097 = vpow2.f32 %v1984_v22  ;;  %v9820_v18 = vld [vmem:[#allocation34_spill] sm:$0xff] }
 0x2ec   :  { %v8121_v4 = vpop.xlane.xlu0 %1613  ;;  %v5082_v25 = vpop.eup %5081  ;;  %v3883_v42 = vsub.f32 %v3633_v33, %v3758_v45  ;;  %5099 = vrcp.f32 %v2052_v46  ;;  %v3759_v29 = vmul.f32 0.5, %v9820_v18  ;;  %v9821_v45 = vld [vmem:[#allocation279_spill] sm:$0xff]  ;;  %v1675_v33 = vsub.f32 %v9822_v26, %v8106_v20 }
 0x2ed   :  { %9815 = vst [vmem:[#allocation150_spill] sm:$0xff] %v8121_v4  ;;  %v5084_v32 = vpop.eup %5083  ;;  %2697 = vst.msk [vmem:[#allocation8 + $0x290] sm:$0xff] %vm1239_vm2, %v2530_v12  ;;  %v2404_v14 = vmul.f32 %v5082_v25, %v9818_v21  ;;  %2156 = vadd.xlane.f32.xlu0 %v2155_v39  ;;  %2153 = vadd.xlane.f32.xlu1 %v2152_v43  ;;  %5101 = vlog2.f32 %v2052_v46  ;;  %v9823_v39 = vld [vmem:[#allocation197_spill] sm:$0xff]  ;;  %v2347_v46 = vsel %vm1239_vm2, %v8123_v5, 0.0 }
 0x2ee   :  { %v3404_v15 = vmul.f32 0.6931472, %v5084_v32  ;;  %4009 = vst.msk [vmem:[#allocation9 + $0x90] sm:$0xff] %vm3990_vm3, %v3883_v42  ;;  %5103 = vpow2.f32 %v1858_v54  ;;  %v2344_v32 = vsel %vm1239_vm2, %v8102_v0, 0.0 }
 0x2ef   :  { %v5086_v1 = vpop.eup %5085  ;;  %v8133_v22 = vpop.xlane.xlu1 %2243  ;;  %2634 = vst.msk [vmem:[#allocation8 + $0x98] sm:$0xff] %vm1239_vm2, %v2404_v14  ;;  %v9824_v14 = vld [vmem:[#allocation81_spill] sm:$0xff] }
 0x2f0   :  { %9819 = vst [vmem:[#allocation152_spill] sm:$0xff] %v8133_v22  ;;  %v2055_v3 = vpop.xlane.xlu0 %2054  ;;  %v2532_v12 = vmul.f32 %v5086_v1, %v9821_v45  ;;  %v8141_v25 = vpop.eup %5087  ;;  %v3634_v43 = vadd.f32 %v3404_v15, %v9823_v39  ;;  %5105 = vrcp.f32 %v8133_v22  ;;  %v1739_v21 = vsub.f32 %v9824_v14, %v8121_v4 }
 0x2f1   :  { %v8149_v42 = vpop.eup %5089  ;;  %5107 = vpow2.f32 %v1986_v63  ;;  %2348 = vadd.xlane.f32.xlu0 %v2347_v46  ;;  %2345 = vadd.xlane.f32.xlu1 %v2344_v32  ;;  %v1860_v45 = vmul.f32 1.442695, %v1675_v33 }
 0x2f2   :  { %2698 = vst.msk [vmem:[#allocation8 + $0x298] sm:$0xff] %vm1239_vm2, %v2532_v12  ;;  %v3884_v54 = vsub.f32 %v3634_v43, %v3759_v29  ;;  %5109 = vrcp.f32 %v2055_v3  ;;  %v8158_v18 = vpop.eup %5091  ;;  %v2161_v63 = vsel %vm1239_vm2, %v8149_v42, 0.0  ;;  %v2158_v29 = vsel %vm1239_vm2, %v8141_v25, 0.0 }
 0x2f3   :  { %v8156_v15 = vpop.xlane.xlu1 %1424  ;;  %9827 = vst [vmem:[#allocation167_spill] sm:$0xff] %v8158_v18  ;;  %5111 = vlog2.f32 %v2055_v3  ;;  %v8162_v12 = vpop.eup %5093  ;;  %v1988_v33 = vmul.f32 1.442695, %v1739_v21  ;;  %v8183_v21 = vld [vmem:[#allocation2 + $0x110] sm:$0xff]  }
 0x2f4   :  { %v8154_v1 = vpop.xlane.xlu0 %2246  ;;  %9826 = vst [vmem:[#allocation219_spill] sm:$0xff] %v8156_v15  ;;  %v1676_v26 = vsub.f32 %v7439_v6, %v8156_v15  ;;  %9828 = vst [vmem:[#allocation25_spill] sm:$0xff] %v8162_v12  ;;  %v8170_v39 = vpop.eup %5095  ;;  %v2353_v4 = vsel %vm1239_vm2, %v8162_v12, 0.0 }
 0x2f5   :  { %9825 = vst [vmem:[#allocation162_spill] sm:$0xff] %v8154_v1  ;;  %4010 = vst.msk [vmem:[#allocation9 + $0x98] sm:$0xff] %vm3990_vm3, %v3884_v54  ;;  %5113 = vrcp.f32 %v8154_v1  ;;  %2162 = vadd.xlane.f32.xlu0 %v2161_v63  ;;  %2159 = vadd.xlane.f32.xlu1 %v2158_v29  ;;  %v8172_v3 = vpop.eup %5097  ;;  %v2350_v63 = vsel %vm1239_vm2, %v8158_v18, 0.0 }
 0x2f6   :  { %v5100_v46 = vpop.eup %5099  ;;  %5115 = vpow2.f32 %v1860_v45  ;;  %v1862_v32 = vmul.f32 1.442695, %v1676_v26  ;;  %v2808_v45 = vunpack.c.l.bf16 %v8183_v21 }
 0x2f7   :  { %v2058_v6 = vpop.xlane.xlu1 %2057  ;;  %v5102_v54 = vpop.eup %5101  ;;  %v2406_v14 = vmul.f32 %v5100_v46, %v7393_v56 }
 0x2f8   :  { %v8174_v43 = vpop.xlane.xlu0 %1427  ;;  %5117 = vrcp.f32 %v2058_v6  ;;  %v8181_v29 = vpop.eup %5103  ;;  %v3406_v1 = vmul.f32 0.6931472, %v5102_v54  ;;  %v9832_v54 = vld [vmem:[#allocation35_spill] sm:$0xff] }
 0x2f9   :  { %9829 = vst [vmem:[#allocation161_spill] sm:$0xff] %v8174_v43  ;;  %9830 = vst [vmem:[#allocation222_spill] sm:$0xff] %v8181_v29  ;;  %5119 = vlog2.f32 %v2058_v6  ;;  %2354 = vadd.xlane.f32.xlu0 %v2353_v4  ;;  %2351 = vadd.xlane.f32.xlu1 %v2350_v63  ;;  %v1677_v56 = vsub.f32 %v7459_v47, %v8174_v43  ;;  %v3760_v6 = vmul.f32 0.5, %v9832_v54  ;;  %v9833_v4 = vld [vmem:[#allocation202_spill] sm:$0xff]  ;;  %v2164_v47 = vsel %vm1239_vm2, %v8170_v39, 0.0 }
 0x2fa   :  { %v5106_v26 = vpop.eup %5105  ;;  %2635 = vst.msk [vmem:[#allocation8 + $0xa0] sm:$0xff] %vm1239_vm2, %v2406_v14  ;;  %5121 = vpow2.f32 %v1988_v33  ;;  %v3635_v63 = vadd.f32 %v3406_v1, %v9833_v4  ;;  %v2167_v33 = vsel %vm1239_vm2, %v8181_v29, 0.0  ;;  %v2933_v1 = vmul.f32 %v2808_v45, %v2808_v45  ;;  %v9836_v29 = vld [vmem:[#allocation36_spill] sm:$0xff] }
 0x2fb   :  { %v8189_v46 = vpop.xlane.xlu1 %2249  ;;  %v8191_v15 = vpop.eup %5107  ;;  %v2534_v20 = vmul.f32 %v5106_v26, %v7395_v55  ;;  %5123 = vpow2.f32 %v1862_v32  ;;  %v1864_v26 = vmul.f32 1.442695, %v1677_v56  ;;  %v3761_v12 = vmul.f32 0.5, %v9836_v29 }
 0x2fc   :  { %9831 = vst [vmem:[#allocation223_spill] sm:$0xff] %v8189_v46  ;;  %v2061_v22 = vpop.xlane.xlu0 %2060  ;;  %v5110_v18 = vpop.eup %5109  ;;  %5125 = vrcp.f32 %v8189_v46  ;;  %v3885_v43 = vsub.f32 %v3635_v63, %v3760_v6  ;;  %v2359_v56 = vsel %vm1239_vm2, %v8191_v15, 0.0  ;;  %v2356_v29 = vsel %vm1239_vm2, %v8172_v3, 0.0 }
 0x2fd   :  { %v5112_v14 = vpop.eup %5111  ;;  %2699 = vst.msk [vmem:[#allocation8 + $0x2a0] sm:$0xff] %vm1239_vm2, %v2534_v20  ;;  %v2408_v54 = vmul.f32 %v5110_v18, %v7412_v50  ;;  %2168 = vadd.xlane.f32.xlu0 %v2167_v33  ;;  %2165 = vadd.xlane.f32.xlu1 %v2164_v47  ;;  %5127 = vrcp.f32 %v2061_v22  ;;  %v9837_v18 = vld [vmem:[#allocation205_spill] sm:$0xff] }
 0x2fe   :  { %v3408_v32 = vmul.f32 0.6931472, %v5112_v14  ;;  %4011 = vst.msk [vmem:[#allocation9 + $0xa0] sm:$0xff] %vm3990_vm3, %v3885_v43  ;;  %5129 = vlog2.f32 %v2061_v22  ;;  %v5488_v47 = vld [vmem:[#allocation2 + $0x118] sm:$0xff]  }
 0x2ff   :  { %v5114_v55 = vpop.eup %5113  ;;  %v8205_v46 = vpop.xlane.xlu1 %1430  ;;  %2636 = vst.msk [vmem:[#allocation8 + $0xa8] sm:$0xff] %vm1239_vm2, %v2408_v54  ;;  %v2810_v14 = vunpack.c.l.bf16 %v5488_v47  ;;  %v2809_v54 = vunpack.c.h.bf16 %v8183_v21 }
 0x300   :  { %v8203_v4 = vpop.xlane.xlu0 %2252  ;;  %9835 = vst [vmem:[#allocation26_spill] sm:$0xff] %v8205_v46  ;;  %v2536_v20 = vmul.f32 %v5114_v55, %v7452_v53  ;;  %v1678_v50 = vsub.f32 %v7508_v61, %v8205_v46  ;;  %v3636_v45 = vadd.f32 %v3408_v32, %v9837_v18  ;;  %v8219_v6 = vpop.eup %5115  ;;  %v3194_v53 = vsel %vm510_vm1, %v2933_v1, 0.0  ;;  %v9838_v32 = vld [vmem:[#allocation15_spill] sm:$0xff] }
 0x301   :  { %9834 = vst [vmem:[#allocation166_spill] sm:$0xff] %v8203_v4  ;;  %5131 = vrcp.f32 %v8203_v4  ;;  %2360 = vadd.xlane.f32.xlu0 %v2359_v56  ;;  %2357 = vadd.xlane.f32.xlu1 %v2356_v29 }
 0x302   :  { %2700 = vst.msk [vmem:[#allocation8 + $0x2a8] sm:$0xff] %vm1239_vm2, %v2536_v20  ;;  %v1866_v43 = vmul.f32 1.442695, %v1678_v50  ;;  %v5118_v61 = vpop.eup %5117  ;;  %v3886_v22 = vsub.f32 %v3636_v45, %v3761_v12  ;;  %5133 = vpow2.f32 %v1864_v26  ;;  %v2170_v12 = vsel %vm1239_vm2, %v8219_v6, 0.0  ;;  %v9840_v26 = vld [vmem:[#allocation37_spill] sm:$0xff] }
 0x303   :  { %v2064_v33 = vpop.xlane.xlu1 %2063  ;;  %v5120_v55 = vpop.eup %5119  ;;  %v2410_v18 = vmul.f32 %v5118_v61, %v9838_v32  ;;  %v3762_v50 = vmul.f32 0.5, %v9840_v26  ;;  %v9841_v45 = vld [vmem:[#allocation209_spill] sm:$0xff]  ;;  %v2935_v61 = vmul.f32 %v2810_v14, %v2810_v14  ;;  %v2811_v32 = vunpack.c.h.bf16 %v5488_v47 }
 0x304   :  { %v2067_v63 = vpop.xlane.xlu0 %2066  ;;  %5135 = vpow2.f32 %v1866_v43  ;;  %v8225_v4 = vpop.eup %5121  ;;  %4012 = vst.msk [vmem:[#allocation9 + $0xa8] sm:$0xff] %vm3990_vm3, %v3886_v22  ;;  %v3410_v20 = vmul.f32 0.6931472, %v5120_v55  ;;  %v2934_v22 = vmul.f32 %v2809_v54, %v2809_v54 }
 0x305   :  { %9839 = vst [vmem:[#allocation178_spill] sm:$0xff] %v8225_v4  ;;  %5137 = vrcp.f32 %v2067_v63  ;;  %v8230_v1 = vpop.eup %5123  ;;  %2637 = vst.msk [vmem:[#allocation8 + $0xb0] sm:$0xff] %vm1239_vm2, %v2410_v18  ;;  %3195 = vadd.xlane.f32.xlu0 %v3194_v53  ;;  %2171 = vadd.xlane.f32.xlu1 %v2170_v12 }
 0x306   :  { %5139 = vlog2.f32 %v2067_v63  ;;  %v5126_v21 = vpop.eup %5125  ;;  %v3637_v56 = vadd.f32 %v3410_v20, %v9841_v45  ;;  %v2173_v53 = vsel %vm1239_vm2, %v8230_v1, 0.0  ;;  %v2362_v63 = vsel %vm1239_vm2, %v8225_v4, 0.0  ;;  %v9851_v4 = vld [vmem:[#allocation39_spill] sm:$0xff] }
 0x307   :  { %5141 = vrcp.f32 %v2064_v33  ;;  %v8237_v43 = vpop.xlane.xlu1 %2255  ;;  %v2538_v55 = vmul.f32 %v5126_v21, %v7480_v40  ;;  %v5128_v26 = vpop.eup %5127  ;;  %v5489_v40 = vld [vmem:[#allocation2 + $0x120] sm:$0xff]   ;;  %v3197_v21 = vsel %vm510_vm1, %v2934_v22, 0.0  ;;  %v2936_v45 = vmul.f32 %v2811_v32, %v2811_v32 }
 0x308   :  { %v8235_v29 = vpop.xlane.xlu0 %2258  ;;  %9843 = vst [vmem:[#allocation165_spill] sm:$0xff] %v8237_v43  ;;  %5143 = vlog2.f32 %v2064_v33  ;;  %v3887_v46 = vsub.f32 %v3637_v56, %v3762_v50  ;;  %v5130_v18 = vpop.eup %5129  ;;  %v2412_v14 = vmul.f32 %v5128_v26, %v7482_v49  ;;  %v2812_v33 = vunpack.c.l.bf16 %v5489_v40  ;;  %v9845_v26 = vld [vmem:[#allocation38_spill] sm:$0xff] }
 0x309   :  { %9842 = vst [vmem:[#allocation227_spill] sm:$0xff] %v8235_v29  ;;  %5145 = vrcp.f32 %v8235_v29  ;;  %2701 = vst.msk [vmem:[#allocation8 + $0x2b0] sm:$0xff] %vm1239_vm2, %v2538_v55  ;;  %2174 = vadd.xlane.f32.xlu0 %v2173_v53  ;;  %2363 = vadd.xlane.f32.xlu1 %v2362_v63  ;;  %v3412_v54 = vmul.f32 0.6931472, %v5130_v18  ;;  %v3200_v50 = vsel %vm510_vm1, %v2935_v61, 0.0  ;;  %v2813_v56 = vunpack.c.h.bf16 %v5489_v40 }
 0x30a   :  { %4013 = vst.msk [vmem:[#allocation9 + $0xb0] sm:$0xff] %vm3990_vm3, %v3887_v46  ;;  %5147 = vrcp.f32 %v8237_v43  ;;  %v3763_v53 = vmul.f32 0.5, %v9845_v26  ;;  %v9846_v46 = vld [vmem:[#allocation213_spill] sm:$0xff]  ;;  %v2937_v61 = vmul.f32 %v2812_v33, %v2812_v33  ;;  %v5490_v26 = vld [vmem:[#allocation2 + $0x128] sm:$0xff]  }
 0x30b   :  { %v5132_v47 = vpop.eup %5131  ;;  %v2070_v12 = vpop.xlane.xlu1 %2069  ;;  %2638 = vst.msk [vmem:[#allocation8 + $0xb8] sm:$0xff] %vm1239_vm2, %v2412_v14  ;;  %v3638_v63 = vadd.f32 %v3412_v54, %v9846_v46  ;;  %v9848_v14 = vld [vmem:[#allocation40_spill] sm:$0xff]  ;;  %v2814_v54 = vunpack.c.l.bf16 %v5490_v26 }
 0x30c   :  { %v2073_v20 = vpop.xlane.xlu0 %2072  ;;  %v2540_v49 = vmul.f32 %v5132_v47, %v7497_v44  ;;  %v8253_v55 = vpop.eup %5133  ;;  %v3765_v44 = vmul.f32 0.5, %v9848_v14 }
 0x30d   :  { %9844 = vst [vmem:[#allocation168_spill] sm:$0xff] %v8253_v55  ;;  %5149 = vrcp.f32 %v2073_v20  ;;  %3201 = vadd.xlane.f32.xlu0 %v3200_v50  ;;  %3198 = vadd.xlane.f32.xlu1 %v3197_v21  ;;  %v3888_v32 = vsub.f32 %v3638_v63, %v3763_v53  ;;  %v2938_v50 = vmul.f32 %v2813_v56, %v2813_v56  ;;  %v5491_v56 = vld [vmem:[#allocation2 + $0x130] sm:$0xff]  }
 0x30e   :  { %v8257_v18 = vpop.eup %5135  ;;  %2702 = vst.msk [vmem:[#allocation8 + $0x2b8] sm:$0xff] %vm1239_vm2, %v2540_v49  ;;  %5151 = vlog2.f32 %v2073_v20  ;;  %v3203_v20 = vsel %vm510_vm1, %v2936_v45, 0.0  ;;  %v2176_v49 = vsel %vm1239_vm2, %v8253_v55, 0.0  ;;  %v2815_v45 = vunpack.c.h.bf16 %v5490_v26 }
 0x30f   :  { %9847 = vst [vmem:[#allocation183_spill] sm:$0xff] %v8257_v18  ;;  %v5138_v22 = vpop.eup %5137  ;;  %5153 = vrcp.f32 %v2070_v12  ;;  %v8263_v47 = vpop.xlane.xlu1 %2261  ;;  %4014 = vst.msk [vmem:[#allocation9 + $0xb8] sm:$0xff] %vm3990_vm3, %v3888_v32  ;;  %v2179_v53 = vsel %vm1239_vm2, %v8257_v18, 0.0  ;;  %v9850_v32 = vld [vmem:[#allocation221_spill] sm:$0xff]  ;;  %v2939_v18 = vmul.f32 %v2814_v54, %v2814_v54 }
 0x310   :  { %v8261_v40 = vpop.xlane.xlu0 %2264  ;;  %v5140_v46 = vpop.eup %5139  ;;  %v2416_v29 = vmul.f32 %v5138_v22, %v7538_v59  ;;  %5155 = vlog2.f32 %v2070_v12  ;;  %v3206_v12 = vsel %vm510_vm1, %v2937_v61, 0.0  ;;  %v2816_v22 = vunpack.c.l.bf16 %v5491_v56 }
 0x311   :  { %9849 = vst [vmem:[#allocation182_spill] sm:$0xff] %v8261_v40  ;;  %v5142_v21 = vpop.eup %5141  ;;  %v3416_v33 = vmul.f32 0.6931472, %v5140_v46  ;;  %5157 = vrcp.f32 %v8261_v40  ;;  %2177 = vadd.xlane.f32.xlu1 %v2176_v49  ;;  %2180 = vadd.xlane.f32.xlu0 %v2179_v53  ;;  %v9852_v49 = vld [vmem:[#allocation218_spill] sm:$0xff] }
 0x312   :  { %v5144_v63 = vpop.eup %5143  ;;  %2640 = vst.msk [vmem:[#allocation8 + $0xc8] sm:$0xff] %vm1239_vm2, %v2416_v29  ;;  %v2414_v59 = vmul.f32 %v5142_v21, %v7534_v58  ;;  %5159 = vrcp.f32 %v8263_v47  ;;  %v3764_v29 = vmul.f32 0.5, %v9851_v4  ;;  %v2817_v21 = vunpack.c.h.bf16 %v5491_v56  ;;  %v5492_v56 = vld [vmem:[#allocation2 + $0x138] sm:$0xff]  }
 0x313   :  { %v5146_v14 = vpop.eup %5145  ;;  %v3640_v46 = vadd.f32 %v3416_v33, %v9850_v32  ;;  %v3414_v40 = vmul.f32 0.6931472, %v5144_v63  ;;  %v2076_v55 = vpop.xlane.xlu1 %2075  ;;  %v3209_v33 = vsel %vm510_vm1, %v2938_v50, 0.0  ;;  %v2940_v4 = vmul.f32 %v2815_v45, %v2815_v45 }
 0x314   :  { %v2079_v43 = vpop.xlane.xlu0 %2078  ;;  %2639 = vst.msk [vmem:[#allocation8 + $0xc0] sm:$0xff] %vm1239_vm2, %v2414_v59  ;;  %v2544_v58 = vmul.f32 %v5146_v14, %v7559_v30  ;;  %v5148_v61 = vpop.eup %5147  ;;  %v2941_v54 = vmul.f32 %v2816_v22, %v2816_v22  ;;  %v3212_v50 = vsel %vm510_vm1, %v2939_v18, 0.0  ;;  %v2818_v14 = vunpack.c.l.bf16 %v5492_v56  ;;  %v9854_v18 = vld [vmem:[#allocation143_spill] sm:$0xff] }
 0x315   :  { %v3890_v26 = vsub.f32 %v3640_v46, %v3765_v44  ;;  %v3639_v53 = vadd.f32 %v3414_v40, %v9852_v49  ;;  %5161 = vrcp.f32 %v2079_v43  ;;  %v2542_v63 = vmul.f32 %v5148_v61, %v7553_v36  ;;  %3204 = vadd.xlane.f32.xlu1 %v3203_v20  ;;  %3207 = vadd.xlane.f32.xlu0 %v3206_v12  ;;  %v9853_v12 = vld [vmem:[#allocation42_spill] sm:$0xff]  ;;  %v9855_v49 = vld [vmem:[#allocation229_spill] sm:$0xff] }
 0x316   :  { %2704 = vst.msk [vmem:[#allocation8 + $0x2c8] sm:$0xff] %vm1239_vm2, %v2544_v58  ;;  %5163 = vlog2.f32 %v2079_v43  ;;  %v2942_v43 = vmul.f32 %v2817_v21, %v2817_v21  ;;  %v3767_v45 = vmul.f32 0.5, %v9853_v12  ;;  %v2819_v46 = vunpack.c.h.bf16 %v5492_v56  ;;  %v5493_v21 = vld [vmem:[#allocation2 + $0x140] sm:$0xff]  }
 0x317   :  { %v5150_v59 = vpop.eup %5149  ;;  %4016 = vst.msk [vmem:[#allocation9 + $0xc8] sm:$0xff] %vm3990_vm3, %v3890_v26  ;;  %v3889_v30 = vsub.f32 %v3639_v53, %v3764_v29  ;;  %5165 = vrcp.f32 %v2076_v55  ;;  %v8288_v40 = vpop.xlane.xlu1 %2267  ;;  %v2820_v61 = vunpack.c.l.bf16 %v5493_v21  ;;  %v2943_v56 = vmul.f32 %v2818_v14, %v2818_v14 }
 0x318   :  { %v8286_v44 = vpop.xlane.xlu0 %2270  ;;  %v5152_v32 = vpop.eup %5151  ;;  %2703 = vst.msk [vmem:[#allocation8 + $0x2c0] sm:$0xff] %vm1239_vm2, %v2542_v63  ;;  %v2420_v36 = vmul.f32 %v5150_v59, %v7583_v27  ;;  %5167 = vlog2.f32 %v2076_v55  ;;  %v3215_v27 = vsel %vm510_vm1, %v2940_v4, 0.0  ;;  %v3218_v55 = vsel %vm510_vm1, %v2941_v54, 0.0 }
 0x319   :  { %v5154_v20 = vpop.eup %5153  ;;  %4015 = vst.msk [vmem:[#allocation9 + $0xc0] sm:$0xff] %vm3990_vm3, %v3889_v30  ;;  %v3420_v22 = vmul.f32 0.6931472, %v5152_v32  ;;  %5169 = vrcp.f32 %v8286_v44  ;;  %3210 = vadd.xlane.f32.xlu1 %v3209_v33  ;;  %3213 = vadd.xlane.f32.xlu0 %v3212_v50  ;;  %v9856_v32 = vld [vmem:[#allocation41_spill] sm:$0xff]  ;;  %v3221_v4 = vsel %vm510_vm1, %v2942_v43, 0.0  ;;  %v2945_v14 = vmul.f32 %v2820_v61, %v2820_v61 }
 0x31a   :  { %v5156_v29 = vpop.eup %5155  ;;  %2642 = vst.msk [vmem:[#allocation8 + $0xd8] sm:$0xff] %vm1239_vm2, %v2420_v36  ;;  %v2418_v58 = vmul.f32 %v5154_v20, %v9854_v18  ;;  %5171 = vrcp.f32 %v8288_v40  ;;  %v3766_v36 = vmul.f32 0.5, %v9856_v32  ;;  %v9857_v20 = vld [vmem:[#allocation225_spill] sm:$0xff]  ;;  %v2821_v18 = vunpack.c.h.bf16 %v5493_v21  ;;  %v9858_v21 = vld [vmem:[#allocation44_spill] sm:$0xff] }
 0x31b   :  { %v5158_v26 = vpop.eup %5157  ;;  %v3642_v53 = vadd.f32 %v3420_v22, %v9855_v49  ;;  %v3418_v63 = vmul.f32 0.6931472, %v5156_v29  ;;  %v2082_v30 = vpop.xlane.xlu1 %2081  ;;  %v2944_v22 = vmul.f32 %v2819_v46, %v2819_v46  ;;  %v3224_v46 = vsel %vm510_vm1, %v2943_v56, 0.0 }
 0x31c   :  { %v2085_v59 = vpop.xlane.xlu0 %2084  ;;  %2641 = vst.msk [vmem:[#allocation8 + $0xd0] sm:$0xff] %vm1239_vm2, %v2418_v58  ;;  %v2548_v33 = vmul.f32 %v5158_v26, %v7591_v41  ;;  %v5160_v54 = vpop.eup %5159  ;;  %v5494_v26 = vld [vmem:[#allocation2 + $0x148] sm:$0xff]   ;;  %v3769_v61 = vmul.f32 0.5, %v9858_v21  ;;  %v9863_v21 = vld [vmem:[#allocation124_spill] sm:$0xff] }
 0x31d   :  { %v3892_v50 = vsub.f32 %v3642_v53, %v3767_v45  ;;  %v3641_v12 = vadd.f32 %v3418_v63, %v9857_v20  ;;  %5173 = vrcp.f32 %v2085_v59  ;;  %v2546_v29 = vmul.f32 %v5160_v54, %v7569_v34  ;;  %3216 = vadd.xlane.f32.xlu1 %v3215_v27  ;;  %3219 = vadd.xlane.f32.xlu0 %v3218_v55 }
 0x31e   :  { %2706 = vst.msk [vmem:[#allocation8 + $0x2d8] sm:$0xff] %vm1239_vm2, %v2548_v33  ;;  %5175 = vlog2.f32 %v2085_v59  ;;  %v2822_v49 = vunpack.c.l.bf16 %v5494_v26  ;;  %v2823_v27 = vunpack.c.h.bf16 %v5494_v26  ;;  %v3227_v59 = vsel %vm510_vm1, %v2944_v22, 0.0 }
 0x31f   :  { %v5162_v58 = vpop.eup %5161  ;;  %4018 = vst.msk [vmem:[#allocation9 + $0xd8] sm:$0xff] %vm3990_vm3, %v3892_v50  ;;  %v3891_v41 = vsub.f32 %v3641_v12, %v3766_v36  ;;  %5177 = vrcp.f32 %v2082_v30  ;;  %v8312_v45 = vpop.xlane.xlu1 %2273  ;;  %v5495_v36 = vld [vmem:[#allocation2 + $0x150] sm:$0xff]   ;;  %v9859_v50 = vld [vmem:[#allocation237_spill] sm:$0xff] }
 0x320   :  { %v8310_v43 = vpop.xlane.xlu0 %2276  ;;  %v5164_v53 = vpop.eup %5163  ;;  %2705 = vst.msk [vmem:[#allocation8 + $0x2d0] sm:$0xff] %vm1239_vm2, %v2546_v29  ;;  %v2424_v34 = vmul.f32 %v5162_v58, %v7619_v51  ;;  %5179 = vlog2.f32 %v2082_v30  ;;  %v3230_v51 = vsel %vm510_vm1, %v2945_v14, 0.0  ;;  %v2946_v30 = vmul.f32 %v2821_v18, %v2821_v18 }
 0x321   :  { %v5166_v55 = vpop.eup %5165  ;;  %4017 = vst.msk [vmem:[#allocation9 + $0xd0] sm:$0xff] %vm3990_vm3, %v3891_v41  ;;  %v3424_v63 = vmul.f32 0.6931472, %v5164_v53  ;;  %5181 = vrcp.f32 %v8310_v43  ;;  %3222 = vadd.xlane.f32.xlu1 %v3221_v4  ;;  %3225 = vadd.xlane.f32.xlu0 %v3224_v46  ;;  %v2824_v33 = vunpack.c.l.bf16 %v5495_v36  ;;  %v2947_v58 = vmul.f32 %v2822_v49, %v2822_v49  ;;  %v9860_v41 = vld [vmem:[#allocation43_spill] sm:$0xff]  ;;  %v9862_v53 = vld [vmem:[#allocation234_spill] sm:$0xff] }
 0x322   :  { %v5168_v56 = vpop.eup %5167  ;;  %2644 = vst.msk [vmem:[#allocation8 + $0xe8] sm:$0xff] %vm1239_vm2, %v2424_v34  ;;  %v2422_v32 = vmul.f32 %v5166_v55, %v7611_v9  ;;  %5183 = vrcp.f32 %v8312_v45  ;;  %v3768_v26 = vmul.f32 0.5, %v9860_v41  ;;  %v9861_v9 = vld [vmem:[#allocation91_spill] sm:$0xff]  ;;  %v2948_v46 = vmul.f32 %v2823_v27, %v2823_v27 }
 0x323   :  { %v5170_v54 = vpop.eup %5169  ;;  %v3644_v20 = vadd.f32 %v3424_v63, %v9859_v50  ;;  %v3422_v12 = vmul.f32 0.6931472, %v5168_v56  ;;  %v2088_v22 = vpop.xlane.xlu1 %2087  ;;  %v2825_v55 = vunpack.c.h.bf16 %v5495_v36  ;;  %v3233_v49 = vsel %vm510_vm1, %v2946_v30, 0.0  ;;  %v5496_v50 = vld [vmem:[#allocation2 + $0x158] sm:$0xff]  }
 0x324   :  { %v2091_v29 = vpop.xlane.xlu0 %2090  ;;  %2643 = vst.msk [vmem:[#allocation8 + $0xe0] sm:$0xff] %vm1239_vm2, %v2422_v32  ;;  %v2552_v4 = vmul.f32 %v5170_v54, %v9861_v9  ;;  %v5172_v14 = vpop.eup %5171  ;;  %v2949_v56 = vmul.f32 %v2824_v33, %v2824_v33  ;;  %v3236_v36 = vsel %vm510_vm1, %v2947_v58, 0.0 }
 0x325   :  { %v3894_v18 = vsub.f32 %v3644_v20, %v3769_v61  ;;  %v3643_v34 = vadd.f32 %v3422_v12, %v9862_v53  ;;  %5185 = vrcp.f32 %v2091_v29  ;;  %v2550_v63 = vmul.f32 %v5172_v14, %v9863_v21  ;;  %3228 = vadd.xlane.f32.xlu1 %v3227_v59  ;;  %3231 = vadd.xlane.f32.xlu0 %v3230_v51  ;;  %v9865_v51 = vld [vmem:[#allocation155_spill] sm:$0xff]  ;;  %v5497_v53 = vld [vmem:[#allocation2 + $0x160] sm:$0xff]  }
 0x326   :  { %2708 = vst.msk [vmem:[#allocation8 + $0x2e8] sm:$0xff] %vm1239_vm2, %v2552_v4  ;;  %5187 = vlog2.f32 %v2091_v29  ;;  %v2826_v20 = vunpack.c.l.bf16 %v5496_v50  ;;  %v9864_v29 = vld [vmem:[#allocation46_spill] sm:$0xff]  ;;  %v2950_v9 = vmul.f32 %v2825_v55, %v2825_v55  ;;  %v9866_v4 = vld [vmem:[#allocation92_spill] sm:$0xff] }
 0x327   :  { %v5174_v32 = vpop.eup %5173  ;;  %4020 = vst.msk [vmem:[#allocation9 + $0xe8] sm:$0xff] %vm3990_vm3, %v3894_v18  ;;  %v3893_v27 = vsub.f32 %v3643_v34, %v3768_v26  ;;  %5189 = vrcp.f32 %v2088_v22  ;;  %v8336_v54 = vpop.xlane.xlu1 %2279  ;;  %v3771_v59 = vmul.f32 0.5, %v9864_v29  ;;  %v3239_v26 = vsel %vm510_vm1, %v2948_v46, 0.0  ;;  %v9868_v29 = vld [vmem:[#allocation45_spill] sm:$0xff] }
 0x328   :  { %v8334_v61 = vpop.xlane.xlu0 %2282  ;;  %v5176_v12 = vpop.eup %5175  ;;  %2707 = vst.msk [vmem:[#allocation8 + $0x2e0] sm:$0xff] %vm1239_vm2, %v2550_v63  ;;  %v2428_v30 = vmul.f32 %v5174_v32, %v9865_v51  ;;  %5191 = vlog2.f32 %v2088_v22  ;;  %v3242_v18 = vsel %vm510_vm1, %v2949_v56, 0.0  ;;  %v2828_v22 = vunpack.c.l.bf16 %v5497_v53  ;;  %v9867_v63 = vld [vmem:[#allocation245_spill] sm:$0xff] }
 0x329   :  { %v5178_v33 = vpop.eup %5177  ;;  %4019 = vst.msk [vmem:[#allocation9 + $0xe0] sm:$0xff] %vm3990_vm3, %v3893_v27  ;;  %v3428_v41 = vmul.f32 0.6931472, %v5176_v12  ;;  %5193 = vrcp.f32 %v8334_v61  ;;  %3234 = vadd.xlane.f32.xlu1 %v3233_v49  ;;  %3237 = vadd.xlane.f32.xlu0 %v3236_v36  ;;  %v2827_v34 = vunpack.c.h.bf16 %v5496_v50  ;;  %v2951_v12 = vmul.f32 %v2826_v20, %v2826_v20  ;;  %v8353_v36 = vld [vmem:[#allocation2 + $0x168] sm:$0xff]  }
 0x32a   :  { %v5180_v58 = vpop.eup %5179  ;;  %2646 = vst.msk [vmem:[#allocation8 + $0xf8] sm:$0xff] %vm1239_vm2, %v2428_v30  ;;  %v2426_v14 = vmul.f32 %v5178_v33, %v9866_v4  ;;  %5195 = vrcp.f32 %v8336_v54  ;;  %v3770_v51 = vmul.f32 0.5, %v9868_v29  ;;  %v2830_v56 = vunpack.c.l.bf16 %v8353_v36  ;;  %v9869_v33 = vld [vmem:[#allocation241_spill] sm:$0xff]  ;;  %v8371_v29 = vld [vmem:[#allocation2 + $0x170] sm:$0xff]  }
 0x32b   :  { %v5182_v21 = vpop.eup %5181  ;;  %v3646_v32 = vadd.f32 %v3428_v41, %v9867_v63  ;;  %v3426_v27 = vmul.f32 0.6931472, %v5180_v58  ;;  %v2094_v55 = vpop.xlane.xlu1 %2093  ;;  %v3245_v58 = vsel %vm510_vm1, %v2950_v9, 0.0  ;;  %v2953_v4 = vmul.f32 %v2828_v22, %v2828_v22  ;;  %v9871_v22 = vld [vmem:[#allocation48_spill] sm:$0xff] }
 0x32c   :  { %v2097_v46 = vpop.xlane.xlu0 %2096  ;;  %2645 = vst.msk [vmem:[#allocation8 + $0xf0] sm:$0xff] %vm1239_vm2, %v2426_v14  ;;  %v2556_v49 = vmul.f32 %v5182_v21, %v7667_v17  ;;  %v5184_v50 = vpop.eup %5183  ;;  %v2952_v17 = vmul.f32 %v2827_v34, %v2827_v34  ;;  %v3248_v9 = vsel %vm510_vm1, %v2951_v12, 0.0  ;;  %v3773_v34 = vmul.f32 0.5, %v9871_v22 }
 0x32d   :  { %v3896_v30 = vsub.f32 %v3646_v32, %v3771_v59  ;;  %v3645_v41 = vadd.f32 %v3426_v27, %v9869_v33  ;;  %5197 = vrcp.f32 %v2097_v46  ;;  %v2554_v20 = vmul.f32 %v5184_v50, %v7646_v19  ;;  %3240 = vadd.xlane.f32.xlu1 %v3239_v26  ;;  %3243 = vadd.xlane.f32.xlu0 %v3242_v18 }
 0x32e   :  { %2710 = vst.msk [vmem:[#allocation8 + $0x2f8] sm:$0xff] %vm1239_vm2, %v2556_v49  ;;  %5199 = vlog2.f32 %v2097_v46  ;;  %v2829_v32 = vunpack.c.h.bf16 %v5497_v53  ;;  %v2955_v26 = vmul.f32 %v2830_v56, %v2830_v56  ;;  %v2832_v12 = vunpack.c.l.bf16 %v8371_v29 }
 0x32f   :  { %v5186_v14 = vpop.eup %5185  ;;  %4022 = vst.msk [vmem:[#allocation9 + $0xf8] sm:$0xff] %vm3990_vm3, %v3896_v30  ;;  %v3895_v21 = vsub.f32 %v3645_v41, %v3770_v51  ;;  %5201 = vrcp.f32 %v2094_v55  ;;  %v8363_v63 = vpop.xlane.xlu1 %2285  ;;  %v9872_v51 = vld [vmem:[#allocation114_spill] sm:$0xff]  ;;  %v2831_v56 = vunpack.c.h.bf16 %v8353_v36  ;;  %v9873_v30 = vld [vmem:[#allocation253_spill] sm:$0xff] }
 0x330   :  { %v8361_v59 = vpop.xlane.xlu0 %2288  ;;  %v5188_v27 = vpop.eup %5187  ;;  %2709 = vst.msk [vmem:[#allocation8 + $0x2f0] sm:$0xff] %vm1239_vm2, %v2554_v20  ;;  %v2432_v19 = vmul.f32 %v5186_v14, %v7695_v31  ;;  %5203 = vlog2.f32 %v2094_v55  ;;  %v3254_v31 = vsel %vm510_vm1, %v2953_v4, 0.0  ;;  %v3251_v55 = vsel %vm510_vm1, %v2952_v17, 0.0  ;;  %v9876_v36 = vld [vmem:[#allocation250_spill] sm:$0xff] }
 0x331   :  { %9870 = vst [vmem:[#allocation184_spill] sm:$0xff] %v8361_v59  ;;  %v5190_v18 = vpop.eup %5189  ;;  %4021 = vst.msk [vmem:[#allocation9 + $0xf0] sm:$0xff] %vm3990_vm3, %v3895_v21  ;;  %v3432_v46 = vmul.f32 0.6931472, %v5188_v27  ;;  %5205 = vrcp.f32 %v8361_v59  ;;  %3246 = vadd.xlane.f32.xlu1 %v3245_v58  ;;  %3249 = vadd.xlane.f32.xlu0 %v3248_v9  ;;  %v2954_v21 = vmul.f32 %v2829_v32, %v2829_v32  ;;  %v9874_v27 = vld [vmem:[#allocation47_spill] sm:$0xff]  ;;  %v3260_v4 = vsel %vm510_vm1, %v2955_v26, 0.0 }
 0x332   :  { %v5192_v53 = vpop.eup %5191  ;;  %2648 = vst.msk [vmem:[#allocation8 + $0x108] sm:$0xff] %vm1239_vm2, %v2432_v19  ;;  %v2430_v49 = vmul.f32 %v5190_v18, %v9872_v51  ;;  %5207 = vrcp.f32 %v8363_v63  ;;  %v3772_v19 = vmul.f32 0.5, %v9874_v27  ;;  %v9875_v58 = vld [vmem:[#allocation159_spill] sm:$0xff]  ;;  %v2956_v32 = vmul.f32 %v2831_v56, %v2831_v56  ;;  %v8397_v56 = vld [vmem:[#allocation2 + $0x180] sm:$0xff]  }
 0x333   :  { %v5194_v50 = vpop.eup %5193  ;;  %v3648_v33 = vadd.f32 %v3432_v46, %v9873_v30  ;;  %v3430_v41 = vmul.f32 0.6931472, %v5192_v53  ;;  %v2100_v14 = vpop.xlane.xlu1 %2099  ;;  %v2957_v46 = vmul.f32 %v2832_v12, %v2832_v12  ;;  %v9877_v53 = vld [vmem:[#allocation97_spill] sm:$0xff]  ;;  %v3257_v12 = vsel %vm510_vm1, %v2954_v21, 0.0 }
 0x334   :  { %v2103_v20 = vpop.xlane.xlu0 %2102  ;;  %2647 = vst.msk [vmem:[#allocation8 + $0x100] sm:$0xff] %vm1239_vm2, %v2430_v49  ;;  %v2560_v9 = vmul.f32 %v5194_v50, %v9875_v58  ;;  %v5196_v17 = vpop.eup %5195  ;;  %v5500_v30 = vld [vmem:[#allocation2 + $0x178] sm:$0xff]   ;;  %v9880_v58 = vld [vmem:[#allocation50_spill] sm:$0xff] }
 0x335   :  { %v3898_v18 = vsub.f32 %v3648_v33, %v3773_v34  ;;  %v3647_v22 = vadd.f32 %v3430_v41, %v9876_v36  ;;  %5209 = vrcp.f32 %v2103_v20  ;;  %v2558_v51 = vmul.f32 %v5196_v17, %v9877_v53  ;;  %3255 = vadd.xlane.f32.xlu0 %v3254_v31  ;;  %3252 = vadd.xlane.f32.xlu1 %v3251_v55  ;;  %v9879_v31 = vld [vmem:[#allocation119_spill] sm:$0xff] }
 0x336   :  { %2712 = vst.msk [vmem:[#allocation8 + $0x308] sm:$0xff] %vm1239_vm2, %v2560_v9  ;;  %5211 = vlog2.f32 %v2103_v20  ;;  %v2834_v49 = vunpack.c.l.bf16 %v5500_v30  ;;  %v2833_v33 = vunpack.c.h.bf16 %v8371_v29  ;;  %v2836_v20 = vunpack.c.l.bf16 %v8397_v56 }
 0x337   :  { %v5198_v27 = vpop.eup %5197  ;;  %4024 = vst.msk [vmem:[#allocation9 + $0x108] sm:$0xff] %vm3990_vm3, %v3898_v18  ;;  %v3897_v26 = vsub.f32 %v3647_v22, %v3772_v19  ;;  %5213 = vrcp.f32 %v2100_v14  ;;  %v8391_v50 = vpop.xlane.xlu1 %2291  ;;  %v3775_v9 = vmul.f32 0.5, %v9880_v58  ;;  %v3266_v29 = vsel %vm510_vm1, %v2957_v46, 0.0  ;;  %v9881_v18 = vld [vmem:[#allocation132_spill] sm:$0xff] }
 0x338   :  { %v8389_v34 = vpop.xlane.xlu0 %2294  ;;  %v5200_v41 = vpop.eup %5199  ;;  %2711 = vst.msk [vmem:[#allocation8 + $0x300] sm:$0xff] %vm1239_vm2, %v2558_v51  ;;  %v2436_v55 = vmul.f32 %v5198_v27, %v9879_v31  ;;  %5215 = vlog2.f32 %v2100_v14  ;;  %v3263_v14 = vsel %vm510_vm1, %v2956_v32, 0.0  ;;  %v2959_v22 = vmul.f32 %v2834_v49, %v2834_v49  ;;  %v9882_v27 = vld [vmem:[#allocation260_spill] sm:$0xff]  ;;  %v9885_v49 = vld [vmem:[#allocation257_spill] sm:$0xff] }
 0x339   :  { %9878 = vst [vmem:[#allocation194_spill] sm:$0xff] %v8389_v34  ;;  %v5202_v19 = vpop.eup %5201  ;;  %4023 = vst.msk [vmem:[#allocation9 + $0x100] sm:$0xff] %vm3990_vm3, %v3897_v26  ;;  %v3436_v17 = vmul.f32 0.6931472, %v5200_v41  ;;  %5217 = vrcp.f32 %v8389_v34  ;;  %3261 = vadd.xlane.f32.xlu0 %v3260_v4  ;;  %3258 = vadd.xlane.f32.xlu1 %v3257_v12  ;;  %v2835_v53 = vunpack.c.h.bf16 %v5500_v30  ;;  %v2958_v46 = vmul.f32 %v2833_v33, %v2833_v33  ;;  %v9883_v34 = vld [vmem:[#allocation49_spill] sm:$0xff] }
 0x33a   :  { %v5204_v21 = vpop.eup %5203  ;;  %2650 = vst.msk [vmem:[#allocation8 + $0x118] sm:$0xff] %vm1239_vm2, %v2436_v55  ;;  %v2434_v36 = vmul.f32 %v5202_v19, %v9881_v18  ;;  %5219 = vrcp.f32 %v8391_v50  ;;  %v3774_v59 = vmul.f32 0.5, %v9883_v34  ;;  %v9884_v55 = vld [vmem:[#allocation100_spill] sm:$0xff]  ;;  %v2961_v12 = vmul.f32 %v2836_v20, %v2836_v20  ;;  %v5502_v18 = vld [vmem:[#allocation2 + $0x188] sm:$0xff]  }
 0x33b   :  { %v5206_v51 = vpop.eup %5205  ;;  %v3650_v31 = vadd.f32 %v3436_v17, %v9882_v27  ;;  %v3434_v26 = vmul.f32 0.6931472, %v5204_v21  ;;  %v2106_v58 = vpop.xlane.xlu1 %2105  ;;  %v2838_v17 = vunpack.c.l.bf16 %v5502_v18  ;;  %v9886_v21 = vld [vmem:[#allocation99_spill] sm:$0xff]  ;;  %v3272_v34 = vsel %vm510_vm1, %v2959_v22, 0.0 }
 0x33c   :  { %v2109_v41 = vpop.xlane.xlu0 %2108  ;;  %2649 = vst.msk [vmem:[#allocation8 + $0x110] sm:$0xff] %vm1239_vm2, %v2434_v36  ;;  %v2564_v4 = vmul.f32 %v5206_v51, %v9884_v55  ;;  %v5208_v19 = vpop.eup %5207  ;;  %v2960_v33 = vmul.f32 %v2835_v53, %v2835_v53 }
 0x33d   :  { %v3900_v32 = vsub.f32 %v3650_v31, %v3775_v9  ;;  %v3649_v30 = vadd.f32 %v3434_v26, %v9885_v49  ;;  %5221 = vrcp.f32 %v2109_v41  ;;  %v2562_v27 = vmul.f32 %v5208_v19, %v9886_v21  ;;  %3267 = vadd.xlane.f32.xlu0 %v3266_v29  ;;  %3264 = vadd.xlane.f32.xlu1 %v3263_v14  ;;  %v9890_v14 = vld [vmem:[#allocation104_spill] sm:$0xff] }
 0x33e   :  { %2714 = vst.msk [vmem:[#allocation8 + $0x318] sm:$0xff] %vm1239_vm2, %v2564_v4  ;;  %5223 = vlog2.f32 %v2109_v41  ;;  %v3269_v31 = vsel %vm510_vm1, %v2958_v46, 0.0  ;;  %v2837_v26 = vunpack.c.h.bf16 %v8397_v56  ;;  %v9889_v41 = vld [vmem:[#allocation52_spill] sm:$0xff]  ;;  %v3278_v4 = vsel %vm510_vm1, %v2961_v12, 0.0  ;;  %v9891_v56 = vld [vmem:[#allocation103_spill] sm:$0xff] }
 0x33f   :  { %v5210_v36 = vpop.eup %5209  ;;  %4026 = vst.msk [vmem:[#allocation9 + $0x118] sm:$0xff] %vm3990_vm3, %v3900_v32  ;;  %v3899_v20 = vsub.f32 %v3649_v30, %v3774_v59  ;;  %5225 = vrcp.f32 %v2106_v58  ;;  %v8419_v51 = vpop.xlane.xlu1 %2297  ;;  %v3777_v29 = vmul.f32 0.5, %v9889_v41  ;;  %v2963_v19 = vmul.f32 %v2838_v17, %v2838_v17  ;;  %v5503_v30 = vld [vmem:[#allocation2 + $0x190] sm:$0xff]  }
 0x340   :  { %v8417_v9 = vpop.xlane.xlu0 %2300  ;;  %9888 = vst [vmem:[#allocation199_spill] sm:$0xff] %v8419_v51  ;;  %v5212_v55 = vpop.eup %5211  ;;  %2713 = vst.msk [vmem:[#allocation8 + $0x310] sm:$0xff] %vm1239_vm2, %v2562_v27  ;;  %v2440_v22 = vmul.f32 %v5210_v36, %v9890_v14  ;;  %5227 = vlog2.f32 %v2106_v58  ;;  %v3275_v49 = vsel %vm510_vm1, %v2960_v33, 0.0  ;;  %v2840_v58 = vunpack.c.l.bf16 %v5503_v30  ;;  %v9892_v36 = vld [vmem:[#allocation266_spill] sm:$0xff]  ;;  %v9893_v14 = vld [vmem:[#allocation51_spill] sm:$0xff] }
 0x341   :  { %9887 = vst [vmem:[#allocation235_spill] sm:$0xff] %v8417_v9  ;;  %v5214_v53 = vpop.eup %5213  ;;  %4025 = vst.msk [vmem:[#allocation9 + $0x110] sm:$0xff] %vm3990_vm3, %v3899_v20  ;;  %v3440_v59 = vmul.f32 0.6931472, %v5212_v55  ;;  %5229 = vrcp.f32 %v8417_v9  ;;  %3273 = vadd.xlane.f32.xlu0 %v3272_v34  ;;  %3270 = vadd.xlane.f32.xlu1 %v3269_v31  ;;  %v2839_v21 = vunpack.c.h.bf16 %v5502_v18  ;;  %v2962_v41 = vmul.f32 %v2837_v26, %v2837_v26  ;;  %v9894_v34 = vld [vmem:[#allocation19_spill] sm:$0xff]  ;;  %v9895_v9 = vld [vmem:[#allocation265_spill] sm:$0xff] }
 0x342   :  { %v5216_v46 = vpop.eup %5215  ;;  %2652 = vst.msk [vmem:[#allocation8 + $0x128] sm:$0xff] %vm1239_vm2, %v2440_v22  ;;  %v2438_v32 = vmul.f32 %v5214_v53, %v9891_v56  ;;  %5231 = vrcp.f32 %v8419_v51  ;;  %v3776_v22 = vmul.f32 0.5, %v9893_v14  ;;  %v8437_v53 = vld [vmem:[#allocation2 + $0x198] sm:$0xff]   ;;  %v9896_v26 = vld [vmem:[#allocation106_spill] sm:$0xff] }
 0x343   :  { %v5218_v27 = vpop.eup %5217  ;;  %v3652_v20 = vadd.f32 %v3440_v59, %v9892_v36  ;;  %v3438_v55 = vmul.f32 0.6931472, %v5216_v46  ;;  %v2112_v17 = vpop.xlane.xlu1 %2111  ;;  %v2842_v33 = vunpack.c.l.bf16 %v8437_v53  ;;  %v3284_v46 = vsel %vm510_vm1, %v2963_v19, 0.0 }
 0x344   :  { %v2115_v12 = vpop.xlane.xlu0 %2114  ;;  %2651 = vst.msk [vmem:[#allocation8 + $0x120] sm:$0xff] %vm1239_vm2, %v2438_v32  ;;  %v2568_v31 = vmul.f32 %v5218_v27, %v9894_v34  ;;  %v5220_v18 = vpop.eup %5219  ;;  %v2965_v32 = vmul.f32 %v2840_v58, %v2840_v58  ;;  %v2964_v27 = vmul.f32 %v2839_v21, %v2839_v21  ;;  %v3281_v19 = vsel %vm510_vm1, %v2962_v41, 0.0  ;;  %v9899_v21 = vld [vmem:[#allocation54_spill] sm:$0xff] }
 0x345   :  { %v3902_v56 = vsub.f32 %v3652_v20, %v3777_v29  ;;  %v3651_v59 = vadd.f32 %v3438_v55, %v9895_v9  ;;  %5233 = vrcp.f32 %v2115_v12  ;;  %v2566_v36 = vmul.f32 %v5220_v18, %v9896_v26  ;;  %3279 = vadd.xlane.f32.xlu0 %v3278_v4  ;;  %3276 = vadd.xlane.f32.xlu1 %v3275_v49  ;;  %v8455_v18 = vld [vmem:[#allocation2 + $0x1a0] sm:$0xff]  }
 0x346   :  { %2716 = vst.msk [vmem:[#allocation8 + $0x328] sm:$0xff] %vm1239_vm2, %v2568_v31  ;;  %5235 = vlog2.f32 %v2115_v12  ;;  %v2841_v20 = vunpack.c.h.bf16 %v5503_v30  ;;  %v9898_v12 = vld [vmem:[#allocation109_spill] sm:$0xff]  ;;  %v2967_v49 = vmul.f32 %v2842_v33, %v2842_v33  ;;  %v3779_v31 = vmul.f32 0.5, %v9899_v21 }
 0x347   :  { %v5222_v14 = vpop.eup %5221  ;;  %4028 = vst.msk [vmem:[#allocation9 + $0x128] sm:$0xff] %vm3990_vm3, %v3902_v56  ;;  %v3901_v34 = vsub.f32 %v3651_v59, %v3776_v22  ;;  %5237 = vrcp.f32 %v2112_v17  ;;  %v8447_v9 = vpop.xlane.xlu1 %2303  ;;  %v2844_v41 = vunpack.c.l.bf16 %v8455_v18  ;;  %v9900_v56 = vld [vmem:[#allocation138_spill] sm:$0xff]  ;;  %v3287_v33 = vsel %vm510_vm1, %v2964_v27, 0.0 }
 0x348   :  { %v8445_v29 = vpop.xlane.xlu0 %2306  ;;  %v5224_v55 = vpop.eup %5223  ;;  %2715 = vst.msk [vmem:[#allocation8 + $0x320] sm:$0xff] %vm1239_vm2, %v2566_v36  ;;  %v2444_v4 = vmul.f32 %v5222_v14, %v9898_v12  ;;  %5239 = vlog2.f32 %v2112_v17  ;;  %v3290_v17 = vsel %vm510_vm1, %v2965_v32, 0.0  ;;  %v2843_v26 = vunpack.c.h.bf16 %v8437_v53  ;;  %v9901_v14 = vld [vmem:[#allocation272_spill] sm:$0xff]  ;;  %v9903_v53 = vld [vmem:[#allocation269_spill] sm:$0xff] }
 0x349   :  { %9897 = vst [vmem:[#allocation27_spill] sm:$0xff] %v8445_v29  ;;  %v5226_v58 = vpop.eup %5225  ;;  %4027 = vst.msk [vmem:[#allocation9 + $0x120] sm:$0xff] %vm3990_vm3, %v3901_v34  ;;  %v3444_v22 = vmul.f32 0.6931472, %v5224_v55  ;;  %5241 = vrcp.f32 %v8445_v29  ;;  %3285 = vadd.xlane.f32.xlu0 %v3284_v46  ;;  %3282 = vadd.xlane.f32.xlu1 %v3281_v19  ;;  %v2966_v29 = vmul.f32 %v2841_v20, %v2841_v20  ;;  %v3296_v32 = vsel %vm510_vm1, %v2967_v49, 0.0 }
 0x34a   :  { %v5228_v30 = vpop.eup %5227  ;;  %2654 = vst.msk [vmem:[#allocation8 + $0x138] sm:$0xff] %vm1239_vm2, %v2444_v4  ;;  %v2442_v59 = vmul.f32 %v5226_v58, %v9900_v56  ;;  %5243 = vrcp.f32 %v8447_v9  ;;  %v9902_v4 = vld [vmem:[#allocation53_spill] sm:$0xff]  ;;  %v2968_v20 = vmul.f32 %v2843_v26, %v2843_v26  ;;  %v5506_v56 = vld [vmem:[#allocation2 + $0x1a8] sm:$0xff]  }
 0x34b   :  { %v5230_v36 = vpop.eup %5229  ;;  %v3654_v34 = vadd.f32 %v3444_v22, %v9901_v14  ;;  %v3442_v55 = vmul.f32 0.6931472, %v5228_v30  ;;  %v2118_v21 = vpop.xlane.xlu1 %2117  ;;  %v3778_v51 = vmul.f32 0.5, %v9902_v4  ;;  %v2969_v22 = vmul.f32 %v2844_v41, %v2844_v41 }
 0x34c   :  { %v2121_v12 = vpop.xlane.xlu0 %2120  ;;  %2653 = vst.msk [vmem:[#allocation8 + $0x130] sm:$0xff] %vm1239_vm2, %v2442_v59  ;;  %v2572_v46 = vmul.f32 %v5230_v36, %v7819_v13  ;;  %v5232_v27 = vpop.eup %5231  ;;  %v2846_v59 = vunpack.c.l.bf16 %v5506_v56  ;;  %v3293_v41 = vsel %vm510_vm1, %v2966_v29, 0.0  ;;  %v2845_v36 = vunpack.c.h.bf16 %v8455_v18 }
 0x34d   :  { %v3904_v19 = vsub.f32 %v3654_v34, %v3779_v31  ;;  %v3653_v58 = vadd.f32 %v3442_v55, %v9903_v53  ;;  %5245 = vrcp.f32 %v2121_v12  ;;  %v2570_v30 = vmul.f32 %v5232_v27, %v7798_v2  ;;  %3291 = vadd.xlane.f32.xlu0 %v3290_v17  ;;  %3288 = vadd.xlane.f32.xlu1 %v3287_v33  ;;  %v8481_v33 = vld [vmem:[#allocation2 + $0x1b0] sm:$0xff]  }
 0x34e   :  { %2718 = vst.msk [vmem:[#allocation8 + $0x338] sm:$0xff] %vm1239_vm2, %v2572_v46  ;;  %5247 = vlog2.f32 %v2121_v12  ;;  %v2848_v26 = vunpack.c.l.bf16 %v8481_v33  ;;  %v9904_v34 = vld [vmem:[#allocation56_spill] sm:$0xff]  ;;  %v3302_v29 = vsel %vm510_vm1, %v2969_v22, 0.0  ;;  %v2971_v4 = vmul.f32 %v2846_v59, %v2846_v59  ;;  %v9908_v59 = vld [vmem:[#allocation275_spill] sm:$0xff] }
 0x34f   :  { %v5234_v14 = vpop.eup %5233  ;;  %4030 = vst.msk [vmem:[#allocation9 + $0x138] sm:$0xff] %vm3990_vm3, %v3904_v19  ;;  %v3903_v13 = vsub.f32 %v3653_v58, %v3778_v51  ;;  %5249 = vrcp.f32 %v2118_v21  ;;  %v8475_v31 = vpop.xlane.xlu1 %2309  ;;  %v3781_v55 = vmul.f32 0.5, %v9904_v34  ;;  %v2847_v46 = vunpack.c.h.bf16 %v5506_v56  ;;  %v9905_v19 = vld [vmem:[#allocation79_spill] sm:$0xff] }
 0x350   :  { %v8473_v49 = vpop.xlane.xlu0 %2312  ;;  %v5236_v2 = vpop.eup %5235  ;;  %2717 = vst.msk [vmem:[#allocation8 + $0x330] sm:$0xff] %vm1239_vm2, %v2570_v30  ;;  %v2448_v17 = vmul.f32 %v5234_v14, %v7847_v23  ;;  %5251 = vlog2.f32 %v2118_v21  ;;  %v3299_v21 = vsel %vm510_vm1, %v2968_v20, 0.0  ;;  %v2970_v22 = vmul.f32 %v2845_v36, %v2845_v36 }
 0x351   :  { %v5238_v51 = vpop.eup %5237  ;;  %4029 = vst.msk [vmem:[#allocation9 + $0x130] sm:$0xff] %vm3990_vm3, %v3903_v13  ;;  %v3448_v12 = vmul.f32 0.6931472, %v5236_v2  ;;  %5253 = vrcp.f32 %v8473_v49  ;;  %3297 = vadd.xlane.f32.xlu0 %v3296_v32  ;;  %3294 = vadd.xlane.f32.xlu1 %v3293_v41  ;;  %v9906_v13 = vld [vmem:[#allocation55_spill] sm:$0xff]  ;;  %v2973_v41 = vmul.f32 %v2848_v26, %v2848_v26  ;;  %v3308_v36 = vsel %vm510_vm1, %v2971_v4, 0.0 }
 0x352   :  { %v5240_v18 = vpop.eup %5239  ;;  %2656 = vst.msk [vmem:[#allocation8 + $0x148] sm:$0xff] %vm1239_vm2, %v2448_v17  ;;  %v2446_v23 = vmul.f32 %v5238_v51, %v7839_v37  ;;  %5255 = vrcp.f32 %v8475_v31  ;;  %v3780_v2 = vmul.f32 0.5, %v9906_v13  ;;  %v9907_v37 = vld [vmem:[#allocation112_spill] sm:$0xff] }
 0x353   :  { %v5242_v27 = vpop.eup %5241  ;;  %v3656_v53 = vadd.f32 %v3448_v12, %v9905_v19  ;;  %v3446_v58 = vmul.f32 0.6931472, %v5240_v18  ;;  %v2124_v14 = vpop.xlane.xlu1 %2123  ;;  %v5508_v51 = vld [vmem:[#allocation2 + $0x1b8] sm:$0xff]   ;;  %v9909_v12 = vld [vmem:[#allocation110_spill] sm:$0xff] }
 0x354   :  { %v2127_v30 = vpop.xlane.xlu0 %2126  ;;  %2655 = vst.msk [vmem:[#allocation8 + $0x140] sm:$0xff] %vm1239_vm2, %v2446_v23  ;;  %v2576_v32 = vmul.f32 %v5242_v27, %v9907_v37  ;;  %v5244_v17 = vpop.eup %5243  ;;  %v2850_v34 = vunpack.c.l.bf16 %v5508_v51  ;;  %v2972_v23 = vmul.f32 %v2847_v46, %v2847_v46  ;;  %v3314_v37 = vsel %vm510_vm1, %v2973_v41, 0.0 }
 0x355   :  { %v3906_v20 = vsub.f32 %v3656_v53, %v3781_v55  ;;  %v3655_v56 = vadd.f32 %v3446_v58, %v9908_v59  ;;  %5257 = vrcp.f32 %v2127_v30  ;;  %v2574_v18 = vmul.f32 %v5244_v17, %v9909_v12  ;;  %3303 = vadd.xlane.f32.xlu0 %v3302_v29  ;;  %3300 = vadd.xlane.f32.xlu1 %v3299_v21  ;;  %v9911_v21 = vld [vmem:[#allocation187_spill] sm:$0xff]  ;;  %v5509_v59 = vld [vmem:[#allocation2 + $0x1c0] sm:$0xff]  }
 0x356   :  { %2720 = vst.msk [vmem:[#allocation8 + $0x348] sm:$0xff] %vm1239_vm2, %v2576_v32  ;;  %5259 = vlog2.f32 %v2127_v30  ;;  %v3305_v53 = vsel %vm510_vm1, %v2970_v22, 0.0  ;;  %v2849_v58 = vunpack.c.h.bf16 %v8481_v33  ;;  %v9910_v30 = vld [vmem:[#allocation58_spill] sm:$0xff]  ;;  %v2975_v32 = vmul.f32 %v2850_v34, %v2850_v34  ;;  %v9912_v33 = vld [vmem:[#allocation115_spill] sm:$0xff] }
 0x357   :  { %v5246_v19 = vpop.eup %5245  ;;  %4032 = vst.msk [vmem:[#allocation9 + $0x148] sm:$0xff] %vm3990_vm3, %v3906_v20  ;;  %v3905_v26 = vsub.f32 %v3655_v56, %v3780_v2  ;;  %5261 = vrcp.f32 %v2124_v14  ;;  %v8503_v27 = vpop.xlane.xlu1 %2315  ;;  %v3783_v29 = vmul.f32 0.5, %v9910_v30  ;;  %v3311_v20 = vsel %vm510_vm1, %v2972_v23, 0.0  ;;  %v9914_v30 = vld [vmem:[#allocation57_spill] sm:$0xff] }
 0x358   :  { %v8501_v55 = vpop.xlane.xlu0 %2318  ;;  %v5248_v13 = vpop.eup %5247  ;;  %2719 = vst.msk [vmem:[#allocation8 + $0x340] sm:$0xff] %vm1239_vm2, %v2574_v18  ;;  %v2452_v4 = vmul.f32 %v5246_v19, %v9911_v21  ;;  %5263 = vlog2.f32 %v2124_v14  ;;  %v2852_v14 = vunpack.c.l.bf16 %v5509_v59  ;;  %v2851_v56 = vunpack.c.h.bf16 %v5508_v51  ;;  %v9913_v18 = vld [vmem:[#allocation139_spill] sm:$0xff] }
 0x359   :  { %v5250_v46 = vpop.eup %5249  ;;  %4031 = vst.msk [vmem:[#allocation9 + $0x140] sm:$0xff] %vm3990_vm3, %v3905_v26  ;;  %v3452_v2 = vmul.f32 0.6931472, %v5248_v13  ;;  %5265 = vrcp.f32 %v8501_v55  ;;  %3309 = vadd.xlane.f32.xlu0 %v3308_v36  ;;  %3306 = vadd.xlane.f32.xlu1 %v3305_v53  ;;  %v2974_v13 = vmul.f32 %v2849_v58, %v2849_v58  ;;  %v3782_v21 = vmul.f32 0.5, %v9914_v30  ;;  %v8521_v53 = vld [vmem:[#allocation2 + $0x1c8] sm:$0xff]   ;;  %v8539_v30 = vld [vmem:[#allocation2 + $0x1d0] sm:$0xff]  }
 0x35a   :  { %v5252_v22 = vpop.eup %5251  ;;  %2658 = vst.msk [vmem:[#allocation8 + $0x158] sm:$0xff] %vm1239_vm2, %v2452_v4  ;;  %v2450_v17 = vmul.f32 %v5250_v46, %v9912_v33  ;;  %5267 = vrcp.f32 %v8503_v27  ;;  %v2854_v23 = vunpack.c.l.bf16 %v8521_v53  ;;  %v9915_v46 = vld [vmem:[#allocation282_spill] sm:$0xff]  ;;  %v2977_v33 = vmul.f32 %v2852_v14, %v2852_v14  ;;  %v9916_v14 = vld [vmem:[#allocation60_spill] sm:$0xff] }
 0x35b   :  { %v5254_v12 = vpop.eup %5253  ;;  %v3658_v19 = vadd.f32 %v3452_v2, %v9913_v18  ;;  %v3450_v26 = vmul.f32 0.6931472, %v5252_v22  ;;  %v2130_v34 = vpop.xlane.xlu1 %2129  ;;  %v3320_v22 = vsel %vm510_vm1, %v2975_v32, 0.0  ;;  %v3317_v32 = vsel %vm510_vm1, %v2974_v13, 0.0 }
 0x35c   :  { %v2133_v41 = vpop.xlane.xlu0 %2132  ;;  %2657 = vst.msk [vmem:[#allocation8 + $0x150] sm:$0xff] %vm1239_vm2, %v2450_v17  ;;  %v2580_v36 = vmul.f32 %v5254_v12, %v7895_v48  ;;  %v5256_v51 = vpop.eup %5255  ;;  %v2976_v48 = vmul.f32 %v2851_v56, %v2851_v56  ;;  %v3785_v56 = vmul.f32 0.5, %v9916_v14  ;;  %v2856_v13 = vunpack.c.l.bf16 %v8539_v30  ;;  %v9921_v14 = vld [vmem:[#allocation191_spill] sm:$0xff] }
 0x35d   :  { %v3908_v4 = vsub.f32 %v3658_v19, %v3783_v29  ;;  %v3657_v2 = vadd.f32 %v3450_v26, %v9915_v46  ;;  %5269 = vrcp.f32 %v2133_v41  ;;  %v2578_v58 = vmul.f32 %v5256_v51, %v7874_v28  ;;  %3315 = vadd.xlane.f32.xlu0 %v3314_v37  ;;  %3312 = vadd.xlane.f32.xlu1 %v3311_v20  ;;  %v9917_v51 = vld [vmem:[#allocation85_spill] sm:$0xff] }
 0x35e   :  { %2722 = vst.msk [vmem:[#allocation8 + $0x358] sm:$0xff] %vm1239_vm2, %v2580_v36  ;;  %5271 = vlog2.f32 %v2133_v41  ;;  %v2853_v19 = vunpack.c.h.bf16 %v5509_v59  ;;  %v2979_v37 = vmul.f32 %v2854_v23, %v2854_v23  ;;  %v2855_v36 = vunpack.c.h.bf16 %v8521_v53  ;;  %v9920_v53 = vld [vmem:[#allocation108_spill] sm:$0xff] }
 0x35f   :  { %v5258_v17 = vpop.eup %5257  ;;  %4034 = vst.msk [vmem:[#allocation9 + $0x158] sm:$0xff] %vm3990_vm3, %v3908_v4  ;;  %v3907_v12 = vsub.f32 %v3657_v2, %v3782_v21  ;;  %5273 = vrcp.f32 %v2130_v34  ;;  %v8531_v18 = vpop.xlane.xlu1 %2321 }
 0x360   :  { %v8529_v29 = vpop.xlane.xlu0 %2324  ;;  %v5260_v26 = vpop.eup %5259  ;;  %2721 = vst.msk [vmem:[#allocation8 + $0x350] sm:$0xff] %vm1239_vm2, %v2578_v58  ;;  %v2456_v28 = vmul.f32 %v5258_v17, %v7923_v57  ;;  %5275 = vlog2.f32 %v2130_v34  ;;  %v3326_v57 = vsel %vm510_vm1, %v2977_v33, 0.0  ;;  %v3323_v34 = vsel %vm510_vm1, %v2976_v48, 0.0 }
 0x361   :  { %v5262_v20 = vpop.eup %5261  ;;  %4033 = vst.msk [vmem:[#allocation9 + $0x150] sm:$0xff] %vm3990_vm3, %v3907_v12  ;;  %v3456_v41 = vmul.f32 0.6931472, %v5260_v26  ;;  %5277 = vrcp.f32 %v8529_v29  ;;  %3321 = vadd.xlane.f32.xlu0 %v3320_v22  ;;  %3318 = vadd.xlane.f32.xlu1 %v3317_v32  ;;  %v2978_v17 = vmul.f32 %v2853_v19, %v2853_v19  ;;  %v9918_v12 = vld [vmem:[#allocation59_spill] sm:$0xff]  ;;  %v3332_v33 = vsel %vm510_vm1, %v2979_v37, 0.0 }
 0x362   :  { %v5264_v59 = vpop.eup %5263  ;;  %2660 = vst.msk [vmem:[#allocation8 + $0x168] sm:$0xff] %vm1239_vm2, %v2456_v28  ;;  %v2454_v21 = vmul.f32 %v5262_v20, %v7915_v52  ;;  %5279 = vrcp.f32 %v8531_v18  ;;  %v3784_v26 = vmul.f32 0.5, %v9918_v12  ;;  %v9919_v52 = vld [vmem:[#allocation120_spill] sm:$0xff]  ;;  %v2981_v20 = vmul.f32 %v2856_v13, %v2856_v13 }
 0x363   :  { %v5266_v23 = vpop.eup %5265  ;;  %v3660_v4 = vadd.f32 %v3456_v41, %v9917_v51  ;;  %v3454_v46 = vmul.f32 0.6931472, %v5264_v59  ;;  %v2136_v58 = vpop.xlane.xlu1 %2135  ;;  %v2980_v19 = vmul.f32 %v2855_v36, %v2855_v36  ;;  %v5512_v59 = vld [vmem:[#allocation2 + $0x1d8] sm:$0xff]   ;;  %v3329_v13 = vsel %vm510_vm1, %v2978_v17, 0.0  ;;  %v8565_v36 = vld [vmem:[#allocation2 + $0x1e0] sm:$0xff]  }
 0x364   :  { %v2139_v2 = vpop.xlane.xlu0 %2138  ;;  %2659 = vst.msk [vmem:[#allocation8 + $0x160] sm:$0xff] %vm1239_vm2, %v2454_v21  ;;  %v2584_v22 = vmul.f32 %v5266_v23, %v9919_v52  ;;  %v5268_v48 = vpop.eup %5267  ;;  %v2858_v21 = vunpack.c.l.bf16 %v5512_v59  ;;  %v2859_v17 = vunpack.c.h.bf16 %v5512_v59 }
 0x365   :  { %v3910_v32 = vsub.f32 %v3660_v4, %v3785_v56  ;;  %v3659_v28 = vadd.f32 %v3454_v46, %v9920_v53  ;;  %5281 = vrcp.f32 %v2139_v2  ;;  %v2582_v41 = vmul.f32 %v5268_v48, %v9921_v14  ;;  %3327 = vadd.xlane.f32.xlu0 %v3326_v57  ;;  %3324 = vadd.xlane.f32.xlu1 %v3323_v34  ;;  %v9922_v57 = vld [vmem:[#allocation149_spill] sm:$0xff]  ;;  %v9924_v48 = vld [vmem:[#allocation22_spill] sm:$0xff] }
 0x366   :  { %2724 = vst.msk [vmem:[#allocation8 + $0x368] sm:$0xff] %vm1239_vm2, %v2584_v22  ;;  %5283 = vlog2.f32 %v2139_v2  ;;  %v2857_v4 = vunpack.c.h.bf16 %v8539_v30  ;;  %v2860_v2 = vunpack.c.l.bf16 %v8565_v36  ;;  %v3335_v53 = vsel %vm510_vm1, %v2980_v19, 0.0  ;;  %v9927_v19 = vld [vmem:[#allocation87_spill] sm:$0xff] }
 0x367   :  { %v5270_v51 = vpop.eup %5269  ;;  %4036 = vst.msk [vmem:[#allocation9 + $0x168] sm:$0xff] %vm3990_vm3, %v3910_v32  ;;  %v3909_v37 = vsub.f32 %v3659_v28, %v3784_v26  ;;  %5285 = vrcp.f32 %v2136_v58  ;;  %v8559_v23 = vpop.xlane.xlu1 %2327  ;;  %v9923_v26 = vld [vmem:[#allocation62_spill] sm:$0xff]  ;;  %v2983_v28 = vmul.f32 %v2858_v21, %v2858_v21 }
 0x368   :  { %v8557_v56 = vpop.xlane.xlu0 %2330  ;;  %v5272_v46 = vpop.eup %5271  ;;  %2723 = vst.msk [vmem:[#allocation8 + $0x360] sm:$0xff] %vm1239_vm2, %v2582_v41  ;;  %v2460_v34 = vmul.f32 %v5270_v51, %v9922_v57  ;;  %5287 = vlog2.f32 %v2136_v58  ;;  %v3787_v52 = vmul.f32 0.5, %v9923_v26  ;;  %v3338_v58 = vsel %vm510_vm1, %v2981_v20, 0.0  ;;  %v9925_v41 = vld [vmem:[#allocation88_spill] sm:$0xff]  ;;  %v9926_v26 = vld [vmem:[#allocation61_spill] sm:$0xff] }
 0x369   :  { %v5274_v12 = vpop.eup %5273  ;;  %4035 = vst.msk [vmem:[#allocation9 + $0x160] sm:$0xff] %vm3990_vm3, %v3909_v37  ;;  %v3460_v22 = vmul.f32 0.6931472, %v5272_v46  ;;  %5289 = vrcp.f32 %v8557_v56  ;;  %3333 = vadd.xlane.f32.xlu0 %v3332_v33  ;;  %3330 = vadd.xlane.f32.xlu1 %v3329_v13  ;;  %v2982_v57 = vmul.f32 %v2857_v4, %v2857_v4  ;;  %v2985_v13 = vmul.f32 %v2860_v2, %v2860_v2  ;;  %v5514_v4 = vld [vmem:[#allocation2 + $0x1e8] sm:$0xff]  }
 0x36a   :  { %v5276_v30 = vpop.eup %5275  ;;  %2662 = vst.msk [vmem:[#allocation8 + $0x178] sm:$0xff] %vm1239_vm2, %v2460_v34  ;;  %v2458_v32 = vmul.f32 %v5274_v12, %v9924_v48  ;;  %5291 = vrcp.f32 %v8559_v23  ;;  %v3786_v34 = vmul.f32 0.5, %v9926_v26  ;;  %v2984_v48 = vmul.f32 %v2859_v17, %v2859_v17 }
 0x36b   :  { %v5278_v14 = vpop.eup %5277  ;;  %v3662_v51 = vadd.f32 %v3460_v22, %v9925_v41  ;;  %v3458_v37 = vmul.f32 0.6931472, %v5276_v30  ;;  %v2142_v59 = vpop.xlane.xlu1 %2141  ;;  %v2862_v30 = vunpack.c.l.bf16 %v5514_v4  ;;  %v3344_v17 = vsel %vm510_vm1, %v2983_v28, 0.0 }
 0x36c   :  { %v2145_v46 = vpop.xlane.xlu0 %2144  ;;  %2661 = vst.msk [vmem:[#allocation8 + $0x170] sm:$0xff] %vm1239_vm2, %v2458_v32  ;;  %v2588_v33 = vmul.f32 %v5278_v14, %v7971_v35  ;;  %v5280_v20 = vpop.eup %5279  ;;  %v2861_v32 = vunpack.c.h.bf16 %v8565_v36  ;;  %v3347_v28 = vsel %vm510_vm1, %v2984_v48, 0.0  ;;  %v2863_v48 = vunpack.c.h.bf16 %v5514_v4 }
 0x36d   :  { %v3912_v12 = vsub.f32 %v3662_v51, %v3787_v52  ;;  %v3661_v21 = vadd.f32 %v3458_v37, %v9927_v19  ;;  %5293 = vrcp.f32 %v2145_v46  ;;  %v2586_v22 = vmul.f32 %v5280_v20, %v7950_v16  ;;  %3339 = vadd.xlane.f32.xlu0 %v3338_v58  ;;  %3336 = vadd.xlane.f32.xlu1 %v3335_v53  ;;  %v9928_v58 = vld [vmem:[#allocation65_spill] sm:$0xff] }
 0x36e   :  { %2726 = vst.msk [vmem:[#allocation8 + $0x378] sm:$0xff] %vm1239_vm2, %v2588_v33  ;;  %5295 = vlog2.f32 %v2145_v46  ;;  %v3341_v16 = vsel %vm510_vm1, %v2982_v57, 0.0  ;;  %v3789_v53 = vmul.f32 0.5, %v9928_v58  ;;  %v3350_v46 = vsel %vm510_vm1, %v2985_v13, 0.0  ;;  %v9933_v58 = vld [vmem:[#allocation131_spill] sm:$0xff] }
 0x36f   :  { %v5282_v41 = vpop.eup %5281  ;;  %4038 = vst.msk [vmem:[#allocation9 + $0x178] sm:$0xff] %vm3990_vm3, %v3912_v12  ;;  %v3911_v35 = vsub.f32 %v3661_v21, %v3786_v34  ;;  %5297 = vrcp.f32 %v2142_v59  ;;  %v8587_v52 = vpop.xlane.xlu1 %2333  ;;  %v2987_v34 = vmul.f32 %v2862_v30, %v2862_v30  ;;  %v9929_v12 = vld [vmem:[#allocation158_spill] sm:$0xff] }
 0x370   :  { %v8585_v2 = vpop.xlane.xlu0 %2336  ;;  %v5284_v14 = vpop.eup %5283  ;;  %2725 = vst.msk [vmem:[#allocation8 + $0x370] sm:$0xff] %vm1239_vm2, %v2586_v22  ;;  %v2464_v36 = vmul.f32 %v5282_v41, %v7999_v10  ;;  %5299 = vlog2.f32 %v2142_v59  ;;  %v2986_v10 = vmul.f32 %v2861_v32, %v2861_v32  ;;  %v5515_v59 = vld [vmem:[#allocation2 + $0x1f0] sm:$0xf]  ;;  %v9932_v32 = vld [vmem:[#allocation17_spill] sm:$0xff] }
 0x371   :  { %v5286_v51 = vpop.eup %5285  ;;  %4037 = vst.msk [vmem:[#allocation9 + $0x170] sm:$0xff] %vm3990_vm3, %v3911_v35  ;;  %v3464_v37 = vmul.f32 0.6931472, %v5284_v14  ;;  %5301 = vrcp.f32 %v8585_v2  ;;  %3345 = vadd.xlane.f32.xlu0 %v3344_v17  ;;  %3342 = vadd.xlane.f32.xlu1 %v3341_v16  ;;  %v2864_v33 = vunpack.c.l.bf16 %v5515_v59  ;;  %v9930_v41 = vld [vmem:[#allocation203_spill] sm:$0xff]  ;;  %v3356_v4 = vsel %vm510_vm1, %v2987_v34, 0.0 }
 0x372   :  { %v5288_v26 = vpop.eup %5287  ;;  %2664 = vst.msk [vmem:[#allocation8 + $0x188] sm:$0xff] %vm1239_vm2, %v2464_v36  ;;  %v2462_v57 = vmul.f32 %v5286_v51, %v7991_v11  ;;  %5303 = vrcp.f32 %v8587_v52  ;;  %v9931_v17 = vld [vmem:[#allocation63_spill] sm:$0xff]  ;;  %v3353_v59 = vsel %vm510_vm1, %v2986_v10, 0.0 }
 0x373   :  { %v5290_v20 = vpop.eup %5289  ;;  %v3664_v19 = vadd.f32 %v3464_v37, %v9929_v12  ;;  %v3462_v21 = vmul.f32 0.6931472, %v5288_v26  ;;  %v2148_v22 = vpop.xlane.xlu1 %2147  ;;  %v3788_v16 = vmul.f32 0.5, %v9931_v17  ;;  %v2989_v51 = vmul.f32 %v2864_v33, %v2864_v33 }
 0x374   :  { %v2151_v13 = vpop.xlane.xlu0 %2150  ;;  %2663 = vst.msk [vmem:[#allocation8 + $0x180] sm:$0xff] %vm1239_vm2, %v2462_v57  ;;  %v2592_v35 = vmul.f32 %v5290_v20, %v9930_v41  ;;  %v5292_v11 = vpop.eup %5291  ;;  %v2988_v20 = vmul.f32 %v2863_v48, %v2863_v48  ;;  %v9936_v41 = vld [vmem:[#allocation134_spill] sm:$0xff] }
 0x375   :  { %v3914_v30 = vsub.f32 %v3664_v19, %v3789_v53  ;;  %v3663_v14 = vadd.f32 %v3462_v21, %v9932_v32  ;;  %5305 = vrcp.f32 %v2151_v13  ;;  %v2590_v36 = vmul.f32 %v5292_v11, %v9933_v58  ;;  %3351 = vadd.xlane.f32.xlu0 %v3350_v46  ;;  %3348 = vadd.xlane.f32.xlu1 %v3347_v28  ;;  %v9934_v46 = vld [vmem:[#allocation206_spill] sm:$0xff]  ;;  %v9935_v21 = vld [vmem:[#allocation71_spill] sm:$0xff] }
 0x376   :  { %2728 = vst.msk [vmem:[#allocation8 + $0x388] sm:$0xff] %vm1239_vm2, %v2592_v35  ;;  %5307 = vlog2.f32 %v2151_v13  ;;  %v3791_v13 = vmul.f32 0.5, %v9935_v21  ;;  %v3362_v48 = vsel %vm510_vm1, %v2989_v51, 0.0  ;;  %v9937_v11 = vld [vmem:[#allocation171_spill] sm:$0xff]  ;;  %v3359_v32 = vsel %vm510_vm1, %v2988_v20, 0.0 }
 0x377   :  { %v5294_v37 = vpop.eup %5293  ;;  %4040 = vst.msk [vmem:[#allocation9 + $0x188] sm:$0xff] %vm3990_vm3, %v3914_v30  ;;  %v3913_v26 = vsub.f32 %v3663_v14, %v3788_v16  ;;  %5309 = vrcp.f32 %v2148_v22  ;;  %v8612_v53 = vpop.xlane.xlu1 %2339  ;;  %v9938_v14 = vld [vmem:[#allocation122_spill] sm:$0xff] }
 0x378   :  { %v8610_v57 = vpop.xlane.xlu0 %2342  ;;  %v5296_v12 = vpop.eup %5295  ;;  %2727 = vst.msk [vmem:[#allocation8 + $0x380] sm:$0xff] %vm1239_vm2, %v2590_v36  ;;  %v2468_v28 = vmul.f32 %v5294_v37, %v9934_v46  ;;  %5311 = vlog2.f32 %v2148_v22 }
 0x379   :  { %v5298_v34 = vpop.eup %5297  ;;  %4039 = vst.msk [vmem:[#allocation9 + $0x180] sm:$0xff] %vm3990_vm3, %v3913_v26  ;;  %v3468_v33 = vmul.f32 0.6931472, %v5296_v12  ;;  %5313 = vrcp.f32 %v8610_v57  ;;  %3357 = vadd.xlane.f32.xlu0 %v3356_v4  ;;  %3354 = vadd.xlane.f32.xlu1 %v3353_v59  ;;  %v9939_v4 = vld [vmem:[#allocation66_spill] sm:$0xff]  ;;  %v9940_v26 = vld [vmem:[#allocation133_spill] sm:$0xff] }
 0x37a   :  { %v5300_v19 = vpop.eup %5299  ;;  %2666 = vst.msk [vmem:[#allocation8 + $0x198] sm:$0xff] %vm1239_vm2, %v2468_v28  ;;  %v2466_v10 = vmul.f32 %v5298_v34, %v9936_v41  ;;  %5315 = vrcp.f32 %v8612_v53  ;;  %v3790_v37 = vmul.f32 0.5, %v9939_v4 }
 0x37b   :  { %v5302_v35 = vpop.eup %5301  ;;  %v3666_v22 = vadd.f32 %v3468_v33, %v9937_v11  ;;  %v3466_v17 = vmul.f32 0.6931472, %v5300_v19  ;;  %v2154_v30 = vpop.xlane.xlu1 %2153  ;;  %5317 = vlog2.f32 %v9938_v14  ;;  %v9943_v11 = vld [vmem:[#allocation141_spill] sm:$0xff] }
 0x37c   :  { %v2157_v16 = vpop.xlane.xlu0 %2156  ;;  %2665 = vst.msk [vmem:[#allocation8 + $0x190] sm:$0xff] %vm1239_vm2, %v2466_v10  ;;  %v2596_v58 = vmul.f32 %v5302_v35, %v8047_v24  ;;  %v5304_v36 = vpop.eup %5303 }
 0x37d   :  { %v3916_v51 = vsub.f32 %v3666_v22, %v3791_v13  ;;  %v3665_v59 = vadd.f32 %v3466_v17, %v9940_v26  ;;  %5319 = vrcp.f32 %v2157_v16  ;;  %v2594_v12 = vmul.f32 %v5304_v36, %v8026_v60  ;;  %3363 = vadd.xlane.f32.xlu0 %v3362_v48  ;;  %3360 = vadd.xlane.f32.xlu1 %v3359_v32  ;;  %v9941_v13 = vld [vmem:[#allocation142_spill] sm:$0xff]  ;;  %v9942_v48 = vld [vmem:[#allocation77_spill] sm:$0xff]  ;;  %v9946_v36 = vld [vmem:[#allocation72_spill] sm:$0xff] }
 0x37e   :  { %2730 = vst.msk [vmem:[#allocation8 + $0x398] sm:$0xff] %vm1239_vm2, %v2596_v58  ;;  %5321 = vlog2.f32 %v2157_v16  ;;  %v3793_v35 = vmul.f32 0.5, %v9942_v48  ;;  %v9945_v32 = vld [vmem:[#allocation157_spill] sm:$0xff]  ;;  %v3792_v4 = vmul.f32 0.5, %v9946_v36 }
 0x37f   :  { %v5306_v20 = vpop.eup %5305  ;;  %4042 = vst.msk [vmem:[#allocation9 + $0x198] sm:$0xff] %vm3990_vm3, %v3916_v51  ;;  %v3915_v46 = vsub.f32 %v3665_v59, %v3790_v37  ;;  %5323 = vrcp.f32 %v2154_v30  ;;  %v8636_v28 = vpop.xlane.xlu1 %2345  ;;  %v9947_v37 = vld [vmem:[#allocation175_spill] sm:$0xff] }
 0x380   :  { %v8634_v24 = vpop.xlane.xlu0 %2348  ;;  %v5308_v34 = vpop.eup %5307  ;;  %2729 = vst.msk [vmem:[#allocation8 + $0x390] sm:$0xff] %vm1239_vm2, %v2594_v12  ;;  %v2472_v33 = vmul.f32 %v5306_v20, %v8075_v8  ;;  %5325 = vlog2.f32 %v2154_v30  ;;  %v9944_v30 = vld [vmem:[#allocation129_spill] sm:$0xff]  ;;  %v9948_v59 = vld [vmem:[#allocation211_spill] sm:$0xff] }
 0x381   :  { %v5310_v19 = vpop.eup %5309  ;;  %4041 = vst.msk [vmem:[#allocation9 + $0x190] sm:$0xff] %vm3990_vm3, %v3915_v46  ;;  %v3472_v60 = vmul.f32 0.6931472, %v5308_v34  ;;  %5327 = vrcp.f32 %v8634_v24 }
 0x382   :  { %v5312_v21 = vpop.eup %5311  ;;  %5329 = vlog2.f32 %v9941_v13  ;;  %2668 = vst.msk [vmem:[#allocation8 + $0x1a8] sm:$0xff] %vm1239_vm2, %v2472_v33  ;;  %v2470_v41 = vmul.f32 %v5310_v19, %v8067_v7 }
 0x383   :  { %v5314_v10 = vpop.eup %5313  ;;  %v3668_v22 = vadd.f32 %v3472_v60, %v9943_v11  ;;  %v3470_v8 = vmul.f32 0.6931472, %v5312_v21  ;;  %5331 = vrcp.f32 %v8636_v28  ;;  %v2160_v16 = vpop.xlane.xlu1 %2159  ;;  %v9950_v11 = vld [vmem:[#allocation83_spill] sm:$0xff] }
 0x384   :  { %v2163_v17 = vpop.xlane.xlu0 %2162  ;;  %5333 = vlog2.f32 %v9944_v30  ;;  %2667 = vst.msk [vmem:[#allocation8 + $0x1a0] sm:$0xff] %vm1239_vm2, %v2470_v41  ;;  %v2600_v14 = vmul.f32 %v5314_v10, %v9945_v32  ;;  %v5316_v58 = vpop.eup %5315  ;;  %v9949_v10 = vld [vmem:[#allocation86_spill] sm:$0xff] }
 0x385   :  { %v3918_v7 = vsub.f32 %v3668_v22, %v3793_v35  ;;  %v3667_v51 = vadd.f32 %v3470_v8, %v9947_v37  ;;  %5335 = vrcp.f32 %v2163_v17  ;;  %v5318_v26 = vpop.eup %5317  ;;  %v2598_v12 = vmul.f32 %v5316_v58, %v9948_v59  ;;  %v9951_v8 = vld [vmem:[#allocation190_spill] sm:$0xff]  ;;  %v9954_v37 = vld [vmem:[#allocation117_spill] sm:$0xff] }
 0x386   :  { %2732 = vst.msk [vmem:[#allocation8 + $0x3a8] sm:$0xff] %vm1239_vm2, %v2600_v14  ;;  %5337 = vlog2.f32 %v2163_v17  ;;  %v3795_v22 = vmul.f32 0.5, %v9950_v11  ;;  %v9952_v14 = vld [vmem:[#allocation94_spill] sm:$0xff] }
 0x387   :  { %v5320_v20 = vpop.eup %5319  ;;  %4044 = vst.msk [vmem:[#allocation9 + $0x1a8] sm:$0xff] %vm3990_vm3, %v3918_v7  ;;  %v3917_v46 = vsub.f32 %v3667_v51, %v3792_v4  ;;  %5339 = vrcp.f32 %v2160_v16  ;;  %v8658_v33 = vpop.xlane.xlu1 %2351  ;;  %v9953_v4 = vld [vmem:[#allocation78_spill] sm:$0xff] }
 0x388   :  { %v8656_v34 = vpop.xlane.xlu0 %2354  ;;  %v5322_v19 = vpop.eup %5321  ;;  %2731 = vst.msk [vmem:[#allocation8 + $0x3a0] sm:$0xff] %vm1239_vm2, %v2598_v12  ;;  %v2476_v60 = vmul.f32 %v5320_v20, %v8115_v62  ;;  %5341 = vlog2.f32 %v2160_v16 }
 0x389   :  { %v5324_v21 = vpop.eup %5323  ;;  %4043 = vst.msk [vmem:[#allocation9 + $0x1a0] sm:$0xff] %vm3990_vm3, %v3917_v46  ;;  %v3476_v13 = vmul.f32 0.6931472, %v5322_v19  ;;  %5343 = vrcp.f32 %v8656_v34 }
 0x38a   :  { %v5326_v41 = vpop.eup %5325  ;;  %5345 = vlog2.f32 %v9949_v10  ;;  %2670 = vst.msk [vmem:[#allocation8 + $0x1b8] sm:$0xff] %vm1239_vm2, %v2476_v60  ;;  %v2474_v48 = vmul.f32 %v5324_v21, %v8100_v38  ;;  %v3794_v38 = vmul.f32 0.5, %v9953_v4  ;;  %v3502_v21 = vmul.f32 0.6931472, %v5318_v26  ;;  %v9956_v26 = vld [vmem:[#allocation89_spill] sm:$0xff]  ;;  %v9960_v4 = vld [vmem:[#allocation140_spill] sm:$0xff] }
 0x38b   :  { %v5328_v35 = vpop.eup %5327  ;;  %v3670_v17 = vadd.f32 %v3476_v13, %v9951_v8  ;;  %v3474_v62 = vmul.f32 0.6931472, %v5326_v41  ;;  %5347 = vrcp.f32 %v8658_v33  ;;  %v2166_v30 = vpop.xlane.xlu1 %2165  ;;  %v9957_v8 = vld [vmem:[#allocation128_spill] sm:$0xff] }
 0x38c   :  { %v2169_v16 = vpop.xlane.xlu0 %2168  ;;  %v5330_v32 = vpop.eup %5329  ;;  %5349 = vlog2.f32 %v9952_v14  ;;  %2669 = vst.msk [vmem:[#allocation8 + $0x1b0] sm:$0xff] %vm1239_vm2, %v2474_v48  ;;  %v2604_v58 = vmul.f32 %v5328_v35, %v8123_v5  ;;  %v9955_v48 = vld [vmem:[#allocation130_spill] sm:$0xff]  ;;  %v9958_v14 = vld [vmem:[#allocation137_spill] sm:$0xff] }
 0x38d   :  { %v5332_v36 = vpop.eup %5331  ;;  %v3920_v7 = vsub.f32 %v3670_v17, %v3795_v22  ;;  %v3669_v51 = vadd.f32 %v3474_v62, %v9954_v37  ;;  %5351 = vrcp.f32 %v2169_v16  ;;  %v3797_v22 = vmul.f32 0.5, %v9956_v26  ;;  %v9961_v37 = vld [vmem:[#allocation84_spill] sm:$0xff] }
 0x38e   :  { %v5334_v59 = vpop.eup %5333  ;;  %2734 = vst.msk [vmem:[#allocation8 + $0x3b8] sm:$0xff] %vm1239_vm2, %v2604_v58  ;;  %v2602_v12 = vmul.f32 %v5332_v36, %v8102_v0  ;;  %5353 = vlog2.f32 %v2169_v16  ;;  %v9959_v58 = vld [vmem:[#allocation25_spill] sm:$0xff] }
 0x38f   :  { %v5336_v20 = vpop.eup %5335  ;;  %4046 = vst.msk [vmem:[#allocation9 + $0x1b8] sm:$0xff] %vm3990_vm3, %v3920_v7  ;;  %v3919_v46 = vsub.f32 %v3669_v51, %v3794_v38  ;;  %5355 = vrcp.f32 %v2166_v30  ;;  %v8680_v5 = vpop.xlane.xlu1 %2357  ;;  %v3683_v38 = vadd.f32 %v3502_v21, %v9960_v4  ;;  %v3796_v51 = vmul.f32 0.5, %v9961_v37  ;;  %v9969_v37 = vld [vmem:[#allocation111_spill] sm:$0xff] }
 0x390   :  { %v8678_v19 = vpop.xlane.xlu0 %2360  ;;  %v5338_v60 = vpop.eup %5337  ;;  %2733 = vst.msk [vmem:[#allocation8 + $0x3b0] sm:$0xff] %vm1239_vm2, %v2602_v12  ;;  %v2480_v13 = vmul.f32 %v5336_v20, %v8149_v42  ;;  %5357 = vlog2.f32 %v2166_v30  ;;  %v9962_v20 = vld [vmem:[#allocation195_spill] sm:$0xff] }
 0x391   :  { %v5340_v41 = vpop.eup %5339  ;;  %4045 = vst.msk [vmem:[#allocation9 + $0x1b0] sm:$0xff] %vm3990_vm3, %v3919_v46  ;;  %v3480_v0 = vmul.f32 0.6931472, %v5338_v60  ;;  %5359 = vrcp.f32 %v8678_v19 }
 0x392   :  { %v5342_v10 = vpop.eup %5341  ;;  %5361 = vlog2.f32 %v9955_v48  ;;  %2672 = vst.msk [vmem:[#allocation8 + $0x1c8] sm:$0xff] %vm1239_vm2, %v2480_v13  ;;  %v2478_v35 = vmul.f32 %v5340_v41, %v8141_v25  ;;  %v3504_v13 = vmul.f32 0.6931472, %v5330_v32  ;;  %v9963_v41 = vld [vmem:[#allocation167_spill] sm:$0xff]  ;;  %v9965_v32 = vld [vmem:[#allocation222_spill] sm:$0xff] }
 0x393   :  { %v5344_v11 = vpop.eup %5343  ;;  %v3672_v17 = vadd.f32 %v3480_v0, %v9957_v8  ;;  %v3478_v42 = vmul.f32 0.6931472, %v5342_v10  ;;  %5363 = vrcp.f32 %v8680_v5  ;;  %v2172_v16 = vpop.xlane.xlu1 %2171 }
 0x394   :  { %v3196_v62 = vpop.xlane.xlu0 %3195  ;;  %v5346_v30 = vpop.eup %5345  ;;  %5365 = vlog2.f32 %v9958_v14  ;;  %2671 = vst.msk [vmem:[#allocation8 + $0x1c0] sm:$0xff] %vm1239_vm2, %v2478_v35  ;;  %v2608_v36 = vmul.f32 %v5344_v11, %v9959_v58  ;;  %v3506_v35 = vmul.f32 0.6931472, %v5334_v59  ;;  %v9964_v11 = vld [vmem:[#allocation105_spill] sm:$0xff]  ;;  %v9967_v58 = vld [vmem:[#allocation95_spill] sm:$0xff] }
 0x395   :  { %v3808_v25 = vmul.f32 0.5, %v3196_v62  ;;  %v5348_v7 = vpop.eup %5347  ;;  %v3922_v12 = vsub.f32 %v3672_v17, %v3797_v22  ;;  %v3671_v46 = vadd.f32 %v3478_v42, %v9962_v20  ;;  %5367 = vrcp.f32 %v2172_v16  ;;  %v9966_v62 = vld [vmem:[#allocation90_spill] sm:$0xff] }
 0x396   :  { %v5350_v60 = vpop.eup %5349  ;;  %2736 = vst.msk [vmem:[#allocation8 + $0x3c8] sm:$0xff] %vm1239_vm2, %v2608_v36  ;;  %v2606_v0 = vmul.f32 %v5348_v7, %v9963_v41  ;;  %5369 = vlog2.f32 %v2172_v16  ;;  %v3798_v16 = vmul.f32 0.5, %v9966_v62  ;;  %v3799_v36 = vmul.f32 0.5, %v9967_v58 }
 0x397   :  { %v3933_v10 = vsub.f32 %v3683_v38, %v3808_v25  ;;  %v5352_v48 = vpop.eup %5351  ;;  %5371 = vlog2.f32 %v9964_v11  ;;  %4048 = vst.msk [vmem:[#allocation9 + $0x1c8] sm:$0xff] %vm3990_vm3, %v3922_v12  ;;  %v3921_v21 = vsub.f32 %v3671_v46, %v3796_v51  ;;  %v8702_v22 = vpop.xlane.xlu1 %2363  ;;  %v9968_v38 = vld [vmem:[#allocation144_spill] sm:$0xff]  ;;  %v9970_v51 = vld [vmem:[#allocation146_spill] sm:$0xff]  ;;  %v9972_v11 = vld [vmem:[#allocation179_spill] sm:$0xff] }
 0x398   :  { %v2175_v26 = vpop.xlane.xlu0 %2174  ;;  %v5354_v8 = vpop.eup %5353  ;;  %2735 = vst.msk [vmem:[#allocation8 + $0x3c0] sm:$0xff] %vm1239_vm2, %v2606_v0  ;;  %v2484_v17 = vmul.f32 %v5352_v48, %v9965_v32  ;;  %v3684_v25 = vadd.f32 %v3504_v13, %v9968_v38  ;;  %v9971_v46 = vld [vmem:[#allocation148_spill] sm:$0xff]  ;;  %v9973_v32 = vld [vmem:[#allocation21_spill] sm:$0xff] }
 0x399   :  { %4059 = vst.msk [vmem:[#allocation9 + $0x220] sm:$0xff] %vm3990_vm3, %v3933_v10  ;;  %5373 = vrcp.f32 %v2175_v26  ;;  %v5356_v42 = vpop.eup %5355  ;;  %4047 = vst.msk [vmem:[#allocation9 + $0x1c0] sm:$0xff] %vm3990_vm3, %v3921_v21  ;;  %v3484_v59 = vmul.f32 0.6931472, %v5354_v8  ;;  %v3685_v41 = vadd.f32 %v3506_v35, %v9971_v46  ;;  %v3508_v8 = vmul.f32 0.6931472, %v5346_v30 }
 0x39a   :  { %5375 = vlog2.f32 %v2175_v26  ;;  %v5358_v14 = vpop.eup %5357  ;;  %2674 = vst.msk [vmem:[#allocation8 + $0x1d8] sm:$0xff] %vm1239_vm2, %v2484_v17  ;;  %v2482_v4 = vmul.f32 %v5356_v42, %v8170_v39  ;;  %v9974_v42 = vld [vmem:[#allocation154_spill] sm:$0xff]  ;;  %v9975_v35 = vld [vmem:[#allocation145_spill] sm:$0xff] }
 0x39b   :  { %5377 = vrcp.f32 %v8702_v22  ;;  %v5360_v7 = vpop.eup %5359  ;;  %v3674_v12 = vadd.f32 %v3484_v59, %v9970_v51  ;;  %v3482_v20 = vmul.f32 0.6931472, %v5358_v14  ;;  %v3199_v10 = vpop.xlane.xlu1 %3198  ;;  %v3510_v51 = vmul.f32 0.6931472, %v5350_v60  ;;  %v9978_v60 = vld [vmem:[#allocation153_spill] sm:$0xff] }
 0x39c   :  { %5379 = vlog2.f32 %v9969_v37  ;;  %v3202_v0 = vpop.xlane.xlu0 %3201  ;;  %v5362_v48 = vpop.eup %5361  ;;  %2673 = vst.msk [vmem:[#allocation8 + $0x1d0] sm:$0xff] %vm1239_vm2, %v2482_v4  ;;  %v2612_v39 = vmul.f32 %v5360_v7, %v8191_v15  ;;  %v3809_v26 = vmul.f32 0.5, %v3199_v10  ;;  %v9976_v15 = vld [vmem:[#allocation126_spill] sm:$0xff] }
 0x39d   :  { %5381 = vlog2.f32 %v9972_v11  ;;  %v3810_v21 = vmul.f32 0.5, %v3202_v0  ;;  %v5364_v13 = vpop.eup %5363  ;;  %v3924_v17 = vsub.f32 %v3674_v12, %v3799_v36  ;;  %v3673_v62 = vadd.f32 %v3482_v20, %v9974_v42  ;;  %v9979_v11 = vld [vmem:[#allocation151_spill] sm:$0xff]  ;;  %v9980_v42 = vld [vmem:[#allocation156_spill] sm:$0xff] }
 0x39e   :  { %5383 = vlog2.f32 %v9973_v32  ;;  %v5366_v59 = vpop.eup %5365  ;;  %2738 = vst.msk [vmem:[#allocation8 + $0x3d8] sm:$0xff] %vm1239_vm2, %v2612_v39  ;;  %v2610_v14 = vmul.f32 %v5364_v13, %v8172_v3  ;;  %v3934_v4 = vsub.f32 %v3684_v25, %v3809_v26  ;;  %v3686_v0 = vadd.f32 %v3508_v8, %v9978_v60  ;;  %v9982_v8 = vld [vmem:[#allocation178_spill] sm:$0xff]  ;;  %v9987_v60 = vld [vmem:[#allocation160_spill] sm:$0xff] }
 0x39f   :  { %5385 = vlog2.f32 %v9975_v35  ;;  %v3935_v58 = vsub.f32 %v3685_v41, %v3810_v21  ;;  %v5368_v38 = vpop.eup %5367  ;;  %4050 = vst.msk [vmem:[#allocation9 + $0x1d8] sm:$0xff] %vm3990_vm3, %v3924_v17  ;;  %v3923_v30 = vsub.f32 %v3673_v62, %v3798_v16  ;;  %v2178_v37 = vpop.xlane.xlu1 %2177  ;;  %v9977_v16 = vld [vmem:[#allocation96_spill] sm:$0xff]  ;;  %v3512_v41 = vmul.f32 0.6931472, %v5362_v48 }
 0x3a0   :  { %5387 = vlog2.f32 %v9976_v15  ;;  %v2181_v7 = vpop.xlane.xlu0 %2180  ;;  %v5370_v36 = vpop.eup %5369  ;;  %2737 = vst.msk [vmem:[#allocation8 + $0x3d0] sm:$0xff] %vm1239_vm2, %v2610_v14  ;;  %v2486_v12 = vmul.f32 %v5368_v38, %v8219_v6  ;;  %v3800_v46 = vmul.f32 0.5, %v9977_v16  ;;  %v3514_v10 = vmul.f32 0.6931472, %v5366_v59 }
 0x3a1   :  { %4061 = vst.msk [vmem:[#allocation9 + $0x230] sm:$0xff] %vm3990_vm3, %v3935_v58  ;;  %4060 = vst.msk [vmem:[#allocation9 + $0x228] sm:$0xff] %vm3990_vm3, %v3934_v4  ;;  %5389 = vrcp.f32 %v2181_v7  ;;  %v5372_v3 = vpop.eup %5371  ;;  %v3486_v25 = vmul.f32 0.6931472, %v5370_v36  ;;  %v3687_v62 = vadd.f32 %v3510_v51, %v9980_v42  ;;  %v9981_v58 = vld [vmem:[#allocation101_spill] sm:$0xff]  ;;  %v9985_v51 = vld [vmem:[#allocation135_spill] sm:$0xff] }
 0x3a2   :  { %4049 = vst.msk [vmem:[#allocation9 + $0x1d0] sm:$0xff] %vm3990_vm3, %v3923_v30  ;;  %5391 = vlog2.f32 %v2181_v7  ;;  %v3801_v4 = vmul.f32 0.5, %v9981_v58  ;;  %v9983_v30 = vld [vmem:[#allocation127_spill] sm:$0xff]  ;;  %v9988_v42 = vld [vmem:[#allocation102_spill] sm:$0xff]  ;;  %v9990_v58 = vld [vmem:[#allocation152_spill] sm:$0xff] }
 0x3a3   :  { %v5374_v20 = vpop.eup %5373  ;;  %2675 = vst.msk [vmem:[#allocation8 + $0x1e0] sm:$0xff] %vm1239_vm2, %v2486_v12  ;;  %5393 = vrcp.f32 %v2178_v37  ;;  %v3675_v39 = vadd.f32 %v3486_v25, %v9979_v11  ;;  %v3205_v13 = vpop.xlane.xlu1 %3204  ;;  %v3516_v25 = vmul.f32 0.6931472, %v5372_v3 }
 0x3a4   :  { %v5376_v6 = vpop.eup %5375  ;;  %v2488_v21 = vmul.f32 %v5374_v20, %v8230_v1  ;;  %5395 = vlog2.f32 %v2178_v37  ;;  %v3208_v26 = vpop.xlane.xlu0 %3207  ;;  %v3811_v48 = vmul.f32 0.5, %v3205_v13  ;;  %v9984_v1 = vld [vmem:[#allocation219_spill] sm:$0xff]  ;;  %v9986_v20 = vld [vmem:[#allocation164_spill] sm:$0xff] }
 0x3a5   :  { %v5378_v32 = vpop.eup %5377  ;;  %v3488_v17 = vmul.f32 0.6931472, %v5376_v6  ;;  %v3812_v35 = vmul.f32 0.5, %v3208_v26  ;;  %v3925_v38 = vsub.f32 %v3675_v39, %v3800_v46  ;;  %5397 = vlog2.f32 %v9983_v30 }
 0x3a6   :  { %v5380_v14 = vpop.eup %5379  ;;  %2676 = vst.msk [vmem:[#allocation8 + $0x1e8] sm:$0xff] %vm1239_vm2, %v2488_v21  ;;  %v2614_v59 = vmul.f32 %v5378_v32, %v9982_v8  ;;  %v3936_v36 = vsub.f32 %v3686_v0, %v3811_v48  ;;  %5399 = vlog2.f32 %v9985_v51  ;;  %v3689_v16 = vadd.f32 %v3514_v10, %v9986_v20  ;;  %v9989_v10 = vld [vmem:[#allocation24_spill] sm:$0xff] }
 0x3a7   :  { %v5382_v15 = vpop.eup %5381  ;;  %v3676_v7 = vadd.f32 %v3488_v17, %v9984_v1  ;;  %v3937_v37 = vsub.f32 %v3687_v62, %v3812_v35  ;;  %4051 = vst.msk [vmem:[#allocation9 + $0x1e0] sm:$0xff] %vm3990_vm3, %v3925_v38  ;;  %v3688_v6 = vadd.f32 %v3512_v41, %v9987_v60  ;;  %v3211_v11 = vpop.xlane.xlu1 %3210  ;;  %v3518_v21 = vmul.f32 0.6931472, %v5380_v14  ;;  %v9995_v60 = vld [vmem:[#allocation162_spill] sm:$0xff] }
 0x3a8   :  { %v5384_v12 = vpop.eup %5383  ;;  %2739 = vst.msk [vmem:[#allocation8 + $0x3e0] sm:$0xff] %vm1239_vm2, %v2614_v59  ;;  %v3214_v46 = vpop.xlane.xlu0 %3213  ;;  %v3813_v0 = vmul.f32 0.5, %v3211_v11  ;;  %v3520_v32 = vmul.f32 0.6931472, %v5382_v15  ;;  %v8751_v62 = vmul.f32 0.5, %v9988_v42  ;;  %5401 = vlog2.f32 %v9989_v10  ;;  %v9992_v59 = vld [vmem:[#allocation169_spill] sm:$0xff] }
 0x3a9   :  { %v5386_v39 = vpop.eup %5385  ;;  %v3926_v26 = vsub.f32 %v3676_v7, %v3801_v4  ;;  %4063 = vst.msk [vmem:[#allocation9 + $0x240] sm:$0xff] %vm3990_vm3, %v3937_v37  ;;  %4062 = vst.msk [vmem:[#allocation9 + $0x238] sm:$0xff] %vm3990_vm3, %v3936_v36  ;;  %v3814_v3 = vmul.f32 0.5, %v3214_v46  ;;  %v3522_v14 = vmul.f32 0.6931472, %v5384_v12  ;;  %5403 = vlog2.f32 %v9990_v58  ;;  %v9991_v4 = vld [vmem:[#allocation183_spill] sm:$0xff] }
 0x3aa   :  { %v5388_v13 = vpop.eup %5387  ;;  %v3938_v35 = vsub.f32 %v3688_v6, %v3813_v0  ;;  %v3690_v15 = vadd.f32 %v3516_v25, %v9992_v59  ;;  %v9993_v37 = vld [vmem:[#allocation172_spill] sm:$0xff]  ;;  %v9994_v12 = vld [vmem:[#allocation107_spill] sm:$0xff]  ;;  %5405 = vlog2.f32 %v9995_v60  ;;  %v3524_v10 = vmul.f32 0.6931472, %v5386_v39  ;;  %v10001_v59 = vld [vmem:[#allocation161_spill] sm:$0xff] }
 0x3ab   :  { %v5390_v17 = vpop.eup %5389  ;;  %4052 = vst.msk [vmem:[#allocation9 + $0x1e8] sm:$0xff] %vm3990_vm3, %v3926_v26  ;;  %v3939_v41 = vsub.f32 %v3689_v16, %v3814_v3  ;;  %v3217_v30 = vpop.xlane.xlu1 %3216  ;;  %v3691_v36 = vadd.f32 %v3518_v21, %v9993_v37  ;;  %v3803_v46 = vmul.f32 0.5, %v9994_v12  ;;  %v9996_v6 = vld [vmem:[#allocation168_spill] sm:$0xff]  ;;  %v9998_v3 = vld [vmem:[#allocation26_spill] sm:$0xff] }
 0x3ac   :  { %v5392_v48 = vpop.eup %5391  ;;  %v2492_v38 = vmul.f32 %v5390_v17, %v9991_v4  ;;  %v3220_v8 = vpop.xlane.xlu0 %3219  ;;  %4064 = vst.msk [vmem:[#allocation9 + $0x248] sm:$0xff] %vm3990_vm3, %v3938_v35  ;;  %v3815_v20 = vmul.f32 0.5, %v3217_v30  ;;  %v9997_v11 = vld [vmem:[#allocation176_spill] sm:$0xff]  ;;  %v9999_v35 = vld [vmem:[#allocation223_spill] sm:$0xff] }
 0x3ad   :  { %v5394_v1 = vpop.eup %5393  ;;  %v3492_v7 = vmul.f32 0.6931472, %v5392_v48  ;;  %4065 = vst.msk [vmem:[#allocation9 + $0x250] sm:$0xff] %vm3990_vm3, %v3939_v41  ;;  %v3816_v51 = vmul.f32 0.5, %v3220_v8  ;;  %v3692_v26 = vadd.f32 %v3520_v32, %v9997_v11  ;;  %v3526_v41 = vmul.f32 0.6931472, %v5388_v13 }
 0x3ae   :  { %v5396_v16 = vpop.eup %5395  ;;  %2678 = vst.msk [vmem:[#allocation8 + $0x1f8] sm:$0xff] %vm1239_vm2, %v2492_v38  ;;  %v2490_v25 = vmul.f32 %v5394_v1, %v9996_v6  ;;  %v3940_v21 = vsub.f32 %v3690_v15, %v3815_v20  ;;  %5407 = vlog2.f32 %v9999_v35  ;;  %v10000_v48 = vld [vmem:[#allocation180_spill] sm:$0xff] }
 0x3af   :  { %v3678_v0 = vadd.f32 %v3492_v7, %v9998_v3  ;;  %v3490_v17 = vmul.f32 0.6931472, %v5396_v16  ;;  %v3941_v42 = vsub.f32 %v3691_v36, %v3816_v51  ;;  %v3693_v58 = vadd.f32 %v3522_v14, %v10000_v48  ;;  %v3223_v32 = vpop.xlane.xlu1 %3222  ;;  %v5398_v38 = vpop.eup %5397 }
 0x3b0   :  { %2677 = vst.msk [vmem:[#allocation8 + $0x1f0] sm:$0xff] %vm1239_vm2, %v2490_v25  ;;  %v3226_v4 = vpop.xlane.xlu0 %3225  ;;  %v3817_v39 = vmul.f32 0.5, %v3223_v32 }
 0x3b1   :  { %v3928_v8 = vsub.f32 %v3678_v0, %v3803_v46  ;;  %v3677_v30 = vadd.f32 %v3490_v17, %v10001_v59  ;;  %4067 = vst.msk [vmem:[#allocation9 + $0x260] sm:$0xff] %vm3990_vm3, %v3941_v42  ;;  %4066 = vst.msk [vmem:[#allocation9 + $0x258] sm:$0xff] %vm3990_vm3, %v3940_v21  ;;  %v3818_v15 = vmul.f32 0.5, %v3226_v4 }
 0x3b2   :  { %5593 = shalt.err (!%p5590_p0)
}
 0x3b3   :  { %s5594_s30 = scalar_lea.hbm %s8948_s3, 16000 }
 0x3b4   :  { %p5595_p1 = scmp.ne.s32.totalorder %s8948_s3, %s5594_s30  ;;  %p5598_p2 = scmp.lt.u32.totalorder %s5594_s30, %s8948_s3 }
 0x3b6   :  { %p5600_p3 = pnand %p5598_p2, %p5595_p1 }
 0x3b8   :  { %5603 = shalt.err (!%p5600_p3)
}
 0x3b9   :  { %s5642_s9 = smov 128   ;;  %s5643_s10 = smov 8   ;;  %v5400_v13 = vpop.eup %5399  ;;  %v10002_v14 = vld [vmem:[#allocation166_spill] sm:$0xff]  ;;  %4054 = vst.msk [vmem:[#allocation9 + $0x1f8] sm:$0xff] %vm3990_vm3, %v3928_v8  ;;  %v3927_v1 = vsub.f32 %v3677_v30, %v8751_v62  ;;  %v3943_v7 = vsub.f32 %v3693_v58, %v3818_v15  ;;  %v3942_v37 = vsub.f32 %v3692_v26, %v3817_v39  ;;  %v3528_v36 = vmul.f32 0.6931472, %v5398_v38  ;;  %v3232_v20 = vpop.xlane.xlu0 %3231 }
 0x3ba   :  { %4127 = dma.vmem_to_hbm [thread:$0]  %s8766_s26, 16000, %s8948_s3, [#allocation4], %s5642_s9, %s5642_s9, %s5643_s10   ;;  %5409 = vlog2.f32 %v10002_v14  ;;  %v10003_v51 = vld [vmem:[#allocation165_spill] sm:$0xff]  ;;  %v3229_v46 = vpop.xlane.xlu1 %3228  ;;  %v5402_v60 = vpop.eup %5401  ;;  %v3530_v6 = vmul.f32 0.6931472, %v5400_v13  ;;  %v10005_v25 = vld [vmem:[#allocation188_spill] sm:$0xff] }
 0x3bb   :  { %5411 = vlog2.f32 %v10003_v51  ;;  %v10004_v16 = vld [vmem:[#allocation185_spill] sm:$0xff]  ;;  %4053 = vst.msk [vmem:[#allocation9 + $0x1f0] sm:$0xff] %vm3990_vm3, %v3927_v1  ;;  %4069 = vst.msk [vmem:[#allocation9 + $0x270] sm:$0xff] %vm3990_vm3, %v3943_v7  ;;  %v3695_v11 = vadd.f32 %v3526_v41, %v10005_v25  ;;  %v3820_v62 = vmul.f32 0.5, %v3232_v20  ;;  %v3819_v3 = vmul.f32 0.5, %v3229_v46  ;;  %v5404_v26 = vpop.eup %5403  ;;  %v10006_v0 = vld [vmem:[#allocation227_spill] sm:$0xff] }
 0x3bc   :  { %v3694_v12 = vadd.f32 %v3524_v10, %v10004_v16  ;;  %4068 = vst.msk [vmem:[#allocation9 + $0x268] sm:$0xff] %vm3990_vm3, %v3942_v37  ;;  %5413 = vlog2.f32 %v10006_v0  ;;  %v5406_v21 = vpop.eup %5405  ;;  %v3532_v10 = vmul.f32 0.6931472, %v5402_v60  ;;  %v10007_v48 = vld [vmem:[#allocation192_spill] sm:$0xff]  ;;  %v3534_v32 = vmul.f32 0.6931472, %v5404_v26 }
 0x3bd   :  { %v3945_v17 = vsub.f32 %v3695_v11, %v3820_v62  ;;  %5415 = vlog2.f32 %v8263_v47  ;;  %v3238_v35 = vpop.xlane.xlu0 %3237  ;;  %v3696_v58 = vadd.f32 %v3528_v36, %v10007_v48  ;;  %v10008_v41 = vld [vmem:[#allocation196_spill] sm:$0xff]  ;;  %v5408_v30 = vpop.eup %5407  ;;  %v10009_v15 = vld [vmem:[#allocation182_spill] sm:$0xff]  ;;  %v3536_v14 = vmul.f32 0.6931472, %v5406_v21  ;;  %v10010_v1 = vld [vmem:[#allocation201_spill] sm:$0xff]  ;;  %s5644_s3 = smov [#allocation9]  }
 0x3be   :  { %v3944_v42 = vsub.f32 %v3694_v12, %v3819_v3  ;;  %v3235_v4 = vpop.xlane.xlu1 %3234  ;;  %v3697_v38 = vadd.f32 %v3530_v6, %v10008_v41  ;;  %v3822_v8 = vmul.f32 0.5, %v3238_v35  ;;  %5417 = vlog2.f32 %v10009_v15  ;;  %v10011_v20 = vld [vmem:[#allocation204_spill] sm:$0xff]  ;;  %s4133_s1 = sshll.u32 %s5644_s3, 4  ;;  %s4134_s1 = int_to_ptr.vmem [resolvable:$true] %s4133_s1 }
 0x3bf   :  { %4071 = vst.msk [vmem:[#allocation9 + $0x280] sm:$0xff] %vm3990_vm3, %v3945_v17  ;;  %v3821_v59 = vmul.f32 0.5, %v3235_v4  ;;  %5419 = vlog2.f32 %v8288_v40  ;;  %v3698_v7 = vadd.f32 %v3532_v10, %v10010_v1  ;;  %v3538_v51 = vmul.f32 0.6931472, %v5408_v30  ;;  %v10012_v62 = vld [vmem:[#allocation208_spill] sm:$0xff]  ;;  %s5604_s13 = scalar_lea.vmem %s4134_s1, 16000  ;;  %p5609_p5 = scmp.lt.s32.totalorder %s4134_s1, %s4134_s1 }
 0x3c0   :  { %4070 = vst.msk [vmem:[#allocation9 + $0x278] sm:$0xff] %vm3990_vm3, %v3944_v42  ;;  %v3947_v39 = vsub.f32 %v3697_v38, %v3822_v8  ;;  %v3699_v16 = vadd.f32 %v3534_v32, %v10011_v20  ;;  %5421 = vlog2.f32 %v8286_v44  ;;  %v3700_v3 = vadd.f32 %v3536_v14, %v10012_v62  ;;  %v10013_v42 = vld [vmem:[#allocation212_spill] sm:$0xff]  ;;  %v10014_v32 = vld [vmem:[#allocation217_spill] sm:$0xff]  ;;  %p5605_p4 = scmp.ne.s32.totalorder %s4134_s1, %s5604_s13  ;;  %p5610_p6 = scmp.lt.s32.totalorder %s5604_s13, %s5604_s13 }
 0x3c1   :  { %v3946_v13 = vsub.f32 %v3696_v58, %v3821_v59  ;;  %v3244_v47 = vpop.xlane.xlu0 %3243  ;;  %5423 = vlog2.f32 %v8312_v45  ;;  %v3701_v21 = vadd.f32 %v3538_v51, %v10013_v42  ;;  %v10015_v30 = vld [vmem:[#allocation220_spill] sm:$0xff]  ;;  %v10019_v62 = vld [vmem:[#allocation233_spill] sm:$0xff] }
 0x3c2   :  { %v3241_v37 = vpop.xlane.xlu1 %3240  ;;  %4073 = vst.msk [vmem:[#allocation9 + $0x290] sm:$0xff] %vm3990_vm3, %v3947_v39  ;;  %v3824_v12 = vmul.f32 0.5, %v3244_v47  ;;  %5425 = vlog2.f32 %v8310_v43  ;;  %v10020_v42 = vld [vmem:[#allocation236_spill] sm:$0xff]  ;;  %p5611_p7 = por %p5610_p6, %p5609_p5 }
 0x3c3   :  { %4072 = vst.msk [vmem:[#allocation9 + $0x288] sm:$0xff] %vm3990_vm3, %v3946_v13  ;;  %v3823_v46 = vmul.f32 0.5, %v3241_v37  ;;  %5427 = vlog2.f32 %v8336_v54 }
 0x3c4   :  { %v5410_v36 = vpop.eup %5409  ;;  %v3949_v6 = vsub.f32 %v3699_v16, %v3824_v12  ;;  %5429 = vlog2.f32 %v8334_v61  ;;  %v10017_v16 = vld [vmem:[#allocation228_spill] sm:$0xff]  ;;  %p5612_p8 = pnand %p5611_p7, %p5605_p4 }
 0x3c5   :  { %v5412_v60 = vpop.eup %5411  ;;  %v3948_v25 = vsub.f32 %v3698_v7, %v3823_v46  ;;  %v3540_v40 = vmul.f32 0.6931472, %v5410_v36  ;;  %v3250_v11 = vpop.xlane.xlu0 %3249  ;;  %5431 = vlog2.f32 %v8363_v63  ;;  %v10016_v7 = vld [vmem:[#allocation224_spill] sm:$0xff] }
 0x3c6   :  { %v3247_v26 = vpop.xlane.xlu1 %3246  ;;  %v5414_v0 = vpop.eup %5413  ;;  %v3542_v17 = vmul.f32 0.6931472, %v5412_v60  ;;  %4075 = vst.msk [vmem:[#allocation9 + $0x2a0] sm:$0xff] %vm3990_vm3, %v3949_v6  ;;  %v3826_v10 = vmul.f32 0.5, %v3250_v11  ;;  %v10018_v6 = vld [vmem:[#allocation184_spill] sm:$0xff] }
 0x3c7   :  { %4074 = vst.msk [vmem:[#allocation9 + $0x298] sm:$0xff] %vm3990_vm3, %v3948_v25  ;;  %v3825_v35 = vmul.f32 0.5, %v3247_v26  ;;  %v5416_v44 = vpop.eup %5415  ;;  %v3544_v45 = vmul.f32 0.6931472, %v5414_v0  ;;  %v3702_v41 = vadd.f32 %v3540_v40, %v10014_v32  ;;  %5433 = vlog2.f32 %v10018_v6 }
 0x3c8   :  { %v3951_v48 = vsub.f32 %v3701_v21, %v3826_v10  ;;  %v5418_v8 = vpop.eup %5417  ;;  %v3546_v59 = vmul.f32 0.6931472, %v5416_v44  ;;  %v3703_v15 = vadd.f32 %v3542_v17, %v10015_v30  ;;  %5435 = vlog2.f32 %v8391_v50 }
 0x3c9   :  { %v3950_v58 = vsub.f32 %v3700_v3, %v3825_v35  ;;  %v3256_v4 = vpop.xlane.xlu0 %3255  ;;  %v5420_v43 = vpop.eup %5419  ;;  %v3548_v54 = vmul.f32 0.6931472, %v5418_v8  ;;  %v3704_v37 = vadd.f32 %v3544_v45, %v10016_v7 }
 0x3ca   :  { %v3253_v38 = vpop.xlane.xlu1 %3252  ;;  %4077 = vst.msk [vmem:[#allocation9 + $0x2b0] sm:$0xff] %vm3990_vm3, %v3951_v48  ;;  %v3828_v39 = vmul.f32 0.5, %v3256_v4  ;;  %v5422_v51 = vpop.eup %5421  ;;  %v3550_v20 = vmul.f32 0.6931472, %v5420_v43  ;;  %v3705_v12 = vadd.f32 %v3546_v59, %v10017_v16  ;;  %v10021_v48 = vld [vmem:[#allocation194_spill] sm:$0xff]  ;;  %v10022_v4 = vld [vmem:[#allocation199_spill] sm:$0xff] }
 0x3cb   :  { %4076 = vst.msk [vmem:[#allocation9 + $0x2a8] sm:$0xff] %vm3990_vm3, %v3950_v58  ;;  %v3827_v13 = vmul.f32 0.5, %v3253_v38  ;;  %v5424_v61 = vpop.eup %5423  ;;  %v3552_v63 = vmul.f32 0.6931472, %v5422_v51  ;;  %v3706_v3 = vadd.f32 %v3548_v54, %v10019_v62  ;;  %5437 = vlog2.f32 %v10021_v48 }
 0x3cc   :  { %v3953_v14 = vsub.f32 %v3703_v15, %v3828_v39  ;;  %v5426_v0 = vpop.eup %5425  ;;  %v3554_v17 = vmul.f32 0.6931472, %v5424_v61  ;;  %v3707_v21 = vadd.f32 %v3550_v20, %v10020_v42  ;;  %5439 = vlog2.f32 %v10022_v4  ;;  %v10024_v15 = vld [vmem:[#allocation244_spill] sm:$0xff] }
 0x3cd   :  { %v3952_v47 = vsub.f32 %v3702_v41, %v3827_v13  ;;  %v3262_v1 = vpop.xlane.xlu0 %3261  ;;  %v5428_v44 = vpop.eup %5427  ;;  %v3556_v50 = vmul.f32 0.6931472, %v5426_v0  ;;  %v10023_v41 = vld [vmem:[#allocation240_spill] sm:$0xff] }
 0x3ce   :  { %v3259_v36 = vpop.xlane.xlu1 %3258  ;;  %4079 = vst.msk [vmem:[#allocation9 + $0x2c0] sm:$0xff] %vm3990_vm3, %v3953_v14  ;;  %v3830_v46 = vmul.f32 0.5, %v3262_v1  ;;  %v3708_v38 = vadd.f32 %v3552_v63, %v10023_v41  ;;  %v5430_v59 = vpop.eup %5429  ;;  %v3558_v30 = vmul.f32 0.6931472, %v5428_v44  ;;  %v3709_v39 = vadd.f32 %v3554_v17, %v10024_v15  ;;  %v10031_v4 = vld [vmem:[#allocation264_spill] sm:$0xff] }
 0x3cf   :  { %4078 = vst.msk [vmem:[#allocation9 + $0x2b8] sm:$0xff] %vm3990_vm3, %v3952_v47  ;;  %v3829_v60 = vmul.f32 0.5, %v3259_v36  ;;  %v5432_v14 = vpop.eup %5431  ;;  %v10025_v47 = vld [vmem:[#allocation235_spill] sm:$0xff]  ;;  %v3560_v7 = vmul.f32 0.6931472, %v5430_v59  ;;  %v10026_v36 = vld [vmem:[#allocation249_spill] sm:$0xff] }
 0x3d0   :  { %v3955_v25 = vsub.f32 %v3705_v12, %v3830_v46  ;;  %5441 = vlog2.f32 %v10025_v47  ;;  %v3710_v51 = vadd.f32 %v3556_v50, %v10026_v36  ;;  %v3562_v12 = vmul.f32 0.6931472, %v5432_v14  ;;  %v10027_v46 = vld [vmem:[#allocation252_spill] sm:$0xff]  ;;  %v10034_v36 = vld [vmem:[#allocation271_spill] sm:$0xff] }
 0x3d1   :  { %v3954_v40 = vsub.f32 %v3704_v37, %v3829_v60  ;;  %v3268_v11 = vpop.xlane.xlu0 %3267  ;;  %5443 = vlog2.f32 %v8447_v9  ;;  %v5434_v16 = vpop.eup %5433  ;;  %v3711_v60 = vadd.f32 %v3558_v30, %v10027_v46  ;;  %v10032_v59 = vld [vmem:[#allocation68_spill] sm:$0xff] }
 0x3d2   :  { %v3265_v26 = vpop.xlane.xlu1 %3264  ;;  %4081 = vst.msk [vmem:[#allocation9 + $0x2d0] sm:$0xff] %vm3990_vm3, %v3955_v25  ;;  %v3832_v10 = vmul.f32 0.5, %v3268_v11  ;;  %v5436_v25 = vpop.eup %5435  ;;  %v3564_v9 = vmul.f32 0.6931472, %v5434_v16  ;;  %v10033_v47 = vld [vmem:[#allocation268_spill] sm:$0xff] }
 0x3d3   :  { %4080 = vst.msk [vmem:[#allocation9 + $0x2c8] sm:$0xff] %vm3990_vm3, %v3954_v40  ;;  %v3831_v35 = vmul.f32 0.5, %v3265_v26  ;;  %v10028_v40 = vld [vmem:[#allocation27_spill] sm:$0xff]  ;;  %v3566_v42 = vmul.f32 0.6931472, %v5436_v25 }
 0x3d4   :  { %v3957_v58 = vsub.f32 %v3707_v21, %v3832_v10  ;;  %5445 = vlog2.f32 %v10028_v40  ;;  %v10030_v21 = vld [vmem:[#allocation259_spill] sm:$0xff] }
 0x3d5   :  { %v3956_v45 = vsub.f32 %v3706_v3, %v3831_v35  ;;  %v3274_v32 = vpop.xlane.xlu0 %3273  ;;  %5447 = vlog2.f32 %v8475_v31  ;;  %v10029_v3 = vld [vmem:[#allocation256_spill] sm:$0xff]  ;;  %v5438_v17 = vpop.eup %5437  ;;  %v3713_v10 = vadd.f32 %v3562_v12, %v10030_v21  ;;  %v3715_v30 = vadd.f32 %v3566_v42, %v10032_v59  ;;  %v10037_v42 = vld [vmem:[#allocation281_spill] sm:$0xff] }
 0x3d6   :  { %v3271_v8 = vpop.xlane.xlu1 %3270  ;;  %4083 = vst.msk [vmem:[#allocation9 + $0x2e0] sm:$0xff] %vm3990_vm3, %v3957_v58  ;;  %v3834_v13 = vmul.f32 0.5, %v3274_v32  ;;  %v3712_v26 = vadd.f32 %v3560_v7, %v10029_v3  ;;  %v5440_v48 = vpop.eup %5439  ;;  %5449 = vlog2.f32 %v8473_v49  ;;  %v3568_v31 = vmul.f32 0.6931472, %v5438_v17 }
 0x3d7   :  { %4082 = vst.msk [vmem:[#allocation9 + $0x2d8] sm:$0xff] %vm3990_vm3, %v3956_v45  ;;  %v3833_v43 = vmul.f32 0.5, %v3271_v8  ;;  %5451 = vlog2.f32 %v8503_v27  ;;  %v3714_v32 = vadd.f32 %v3564_v9, %v10031_v4  ;;  %v3570_v8 = vmul.f32 0.6931472, %v5440_v48  ;;  %v10038_v48 = vld [vmem:[#allocation82_spill] sm:$0xff] }
 0x3d8   :  { %v3959_v54 = vsub.f32 %v3709_v39, %v3834_v13  ;;  %5453 = vlog2.f32 %v8501_v55 }
 0x3d9   :  { %v3958_v1 = vsub.f32 %v3708_v38, %v3833_v43  ;;  %v3280_v37 = vpop.xlane.xlu0 %3279  ;;  %5455 = vlog2.f32 %v8531_v18 }
 0x3da   :  { %v3277_v20 = vpop.xlane.xlu1 %3276  ;;  %4085 = vst.msk [vmem:[#allocation9 + $0x2f0] sm:$0xff] %vm3990_vm3, %v3959_v54  ;;  %v3836_v61 = vmul.f32 0.5, %v3280_v37  ;;  %v5442_v38 = vpop.eup %5441  ;;  %v3716_v54 = vadd.f32 %v3568_v31, %v10033_v47  ;;  %5457 = vlog2.f32 %v8529_v29  ;;  %v10041_v47 = vld [vmem:[#allocation125_spill] sm:$0xff] }
 0x3db   :  { %4084 = vst.msk [vmem:[#allocation9 + $0x2e8] sm:$0xff] %vm3990_vm3, %v3958_v1  ;;  %v3835_v6 = vmul.f32 0.5, %v3277_v20  ;;  %v5444_v49 = vpop.eup %5443  ;;  %v3572_v27 = vmul.f32 0.6931472, %v5442_v38  ;;  %5459 = vlog2.f32 %v8559_v23 }
 0x3dc   :  { %v3961_v63 = vsub.f32 %v3711_v60, %v3836_v61  ;;  %v3574_v37 = vmul.f32 0.6931472, %v5444_v49  ;;  %v10035_v61 = vld [vmem:[#allocation274_spill] sm:$0xff]  ;;  %5461 = vlog2.f32 %v8557_v56 }
 0x3dd   :  { %v3960_v11 = vsub.f32 %v3710_v51, %v3835_v6  ;;  %v3286_v62 = vpop.xlane.xlu0 %3285  ;;  %v3717_v51 = vadd.f32 %v3570_v8, %v10034_v36  ;;  %v3718_v6 = vadd.f32 %v3572_v27, %v10035_v61  ;;  %5463 = vlog2.f32 %v8587_v52  ;;  %v10042_v36 = vld [vmem:[#allocation147_spill] sm:$0xff] }
 0x3de   :  { %v3283_v0 = vpop.xlane.xlu1 %3282  ;;  %4087 = vst.msk [vmem:[#allocation9 + $0x300] sm:$0xff] %vm3990_vm3, %v3961_v63  ;;  %v3838_v35 = vmul.f32 0.5, %v3286_v62  ;;  %v5446_v7 = vpop.eup %5445  ;;  %5465 = vlog2.f32 %v8585_v2 }
 0x3df   :  { %4086 = vst.msk [vmem:[#allocation9 + $0x2f8] sm:$0xff] %vm3990_vm3, %v3960_v11  ;;  %v3837_v44 = vmul.f32 0.5, %v3283_v0  ;;  %v5448_v55 = vpop.eup %5447  ;;  %v3576_v18 = vmul.f32 0.6931472, %v5446_v7  ;;  %v10036_v11 = vld [vmem:[#allocation276_spill] sm:$0xff]  ;;  %5467 = vlog2.f32 %v8612_v53 }
 0x3e0   :  { %v3963_v58 = vsub.f32 %v3713_v10, %v3838_v35  ;;  %v5450_v40 = vpop.eup %5449  ;;  %v3578_v63 = vmul.f32 0.6931472, %v5448_v55  ;;  %v3719_v9 = vadd.f32 %v3574_v37, %v10036_v11  ;;  %5469 = vlog2.f32 %v8610_v57 }
 0x3e1   :  { %v3962_v45 = vsub.f32 %v3712_v26, %v3837_v44  ;;  %v3292_v50 = vpop.xlane.xlu0 %3291  ;;  %v5452_v29 = vpop.eup %5451  ;;  %v3580_v23 = vmul.f32 0.6931472, %v5450_v40  ;;  %v3720_v21 = vadd.f32 %v3576_v18, %v10037_v42  ;;  %5471 = vlog2.f32 %v8636_v28  ;;  %v10043_v18 = vld [vmem:[#allocation93_spill] sm:$0xff]  ;;  %v10044_v40 = vld [vmem:[#allocation18_spill] sm:$0xff] }
 0x3e2   :  { %v3289_v41 = vpop.xlane.xlu1 %3288  ;;  %4089 = vst.msk [vmem:[#allocation9 + $0x310] sm:$0xff] %vm3990_vm3, %v3963_v58  ;;  %v3840_v15 = vmul.f32 0.5, %v3292_v50  ;;  %v5454_v35 = vpop.eup %5453  ;;  %v3582_v44 = vmul.f32 0.6931472, %v5452_v29  ;;  %v3721_v58 = vadd.f32 %v3578_v63, %v10038_v48  ;;  %5473 = vlog2.f32 %v8634_v24 }
 0x3e3   :  { %4088 = vst.msk [vmem:[#allocation9 + $0x308] sm:$0xff] %vm3990_vm3, %v3962_v45  ;;  %v3839_v39 = vmul.f32 0.5, %v3289_v41  ;;  %v5456_v56 = vpop.eup %5455  ;;  %v3584_v52 = vmul.f32 0.6931472, %v5454_v35  ;;  %v10039_v41 = vld [vmem:[#allocation16_spill] sm:$0xff]  ;;  %5475 = vlog2.f32 %v8658_v33 }
 0x3e4   :  { %v3965_v13 = vsub.f32 %v3715_v30, %v3840_v15  ;;  %v3722_v38 = vadd.f32 %v3580_v23, %v10039_v41  ;;  %v5458_v59 = vpop.eup %5457  ;;  %v3586_v30 = vmul.f32 0.6931472, %v5456_v56  ;;  %v10040_v15 = vld [vmem:[#allocation113_spill] sm:$0xff]  ;;  %5477 = vlog2.f32 %v8656_v34 }
 0x3e5   :  { %v3964_v43 = vsub.f32 %v3714_v32, %v3839_v39  ;;  %v3298_v14 = vpop.xlane.xlu0 %3297  ;;  %v3723_v39 = vadd.f32 %v3582_v44, %v10040_v15  ;;  %v5460_v2 = vpop.eup %5459  ;;  %v3588_v53 = vmul.f32 0.6931472, %v5458_v59  ;;  %5479 = vlog2.f32 %v8680_v5 }
 0x3e6   :  { %v3295_v1 = vpop.xlane.xlu1 %3294  ;;  %4091 = vst.msk [vmem:[#allocation9 + $0x320] sm:$0xff] %vm3990_vm3, %v3965_v13  ;;  %v3842_v20 = vmul.f32 0.5, %v3298_v14  ;;  %v5462_v7 = vpop.eup %5461  ;;  %v3590_v37 = vmul.f32 0.6931472, %v5460_v2  ;;  %5481 = vlog2.f32 %v8678_v19 }
 0x3e7   :  { %4090 = vst.msk [vmem:[#allocation9 + $0x318] sm:$0xff] %vm3990_vm3, %v3964_v43  ;;  %v3841_v16 = vmul.f32 0.5, %v3295_v1  ;;  %v5464_v57 = vpop.eup %5463  ;;  %v3592_v28 = vmul.f32 0.6931472, %v5462_v7  ;;  %5483 = vlog2.f32 %v8702_v22  ;;  %v10049_v22 = vld [vmem:[#allocation116_spill] sm:$0xff] }
 0x3e8   :  { %v3967_v12 = vsub.f32 %v3717_v51, %v3842_v20  ;;  %v3725_v51 = vadd.f32 %v3586_v30, %v10042_v36  ;;  %v3727_v63 = vadd.f32 %v3590_v37, %v10044_v40 }
 0x3e9   :  { %v3966_v46 = vsub.f32 %v3716_v54, %v3841_v16  ;;  %v3304_v60 = vpop.xlane.xlu0 %3303  ;;  %v3724_v54 = vadd.f32 %v3584_v52, %v10041_v47 }
 0x3ea   :  { %v3301_v25 = vpop.xlane.xlu1 %3300  ;;  %4093 = vst.msk [vmem:[#allocation9 + $0x330] sm:$0xff] %vm3990_vm3, %v3967_v12  ;;  %v3844_v62 = vmul.f32 0.5, %v3304_v60  ;;  %v3726_v60 = vadd.f32 %v3588_v53, %v10043_v18 }
 0x3eb   :  { %4092 = vst.msk [vmem:[#allocation9 + $0x328] sm:$0xff] %vm3990_vm3, %v3966_v46  ;;  %v3843_v3 = vmul.f32 0.5, %v3301_v25  ;;  %v3594_v25 = vmul.f32 0.6931472, %v5464_v57 }
 0x3ec   :  { %v3969_v26 = vsub.f32 %v3719_v9, %v3844_v62 }
 0x3ed   :  { %v3968_v0 = vsub.f32 %v3718_v6, %v3843_v3  ;;  %v3310_v17 = vpop.xlane.xlu0 %3309  ;;  %v5466_v6 = vpop.eup %5465 }
 0x3ee   :  { %v3307_v10 = vpop.xlane.xlu1 %3306  ;;  %4095 = vst.msk [vmem:[#allocation9 + $0x340] sm:$0xff] %vm3990_vm3, %v3969_v26  ;;  %v3846_v45 = vmul.f32 0.5, %v3310_v17  ;;  %v5468_v24 = vpop.eup %5467  ;;  %v3596_v33 = vmul.f32 0.6931472, %v5466_v6  ;;  %v10045_v26 = vld [vmem:[#allocation163_spill] sm:$0xff] }
 0x3ef   :  { %4094 = vst.msk [vmem:[#allocation9 + $0x338] sm:$0xff] %vm3990_vm3, %v3968_v0  ;;  %v3845_v31 = vmul.f32 0.5, %v3307_v10  ;;  %v3728_v0 = vadd.f32 %v3592_v28, %v10045_v26  ;;  %v5470_v17 = vpop.eup %5469  ;;  %v3598_v42 = vmul.f32 0.6931472, %v5468_v24 }
 0x3f0   :  { %v3971_v50 = vsub.f32 %v3721_v58, %v3846_v45  ;;  %v5472_v34 = vpop.eup %5471  ;;  %v3600_v5 = vmul.f32 0.6931472, %v5470_v17 }
 0x3f1   :  { %v3970_v4 = vsub.f32 %v3720_v21, %v3845_v31  ;;  %v3316_v32 = vpop.xlane.xlu0 %3315  ;;  %v10046_v21 = vld [vmem:[#allocation98_spill] sm:$0xff]  ;;  %v3602_v52 = vmul.f32 0.6931472, %v5472_v34 }
 0x3f2   :  { %v3313_v8 = vpop.xlane.xlu1 %3312  ;;  %4097 = vst.msk [vmem:[#allocation9 + $0x350] sm:$0xff] %vm3990_vm3, %v3971_v50  ;;  %v3848_v49 = vmul.f32 0.5, %v3316_v32  ;;  %v3729_v10 = vadd.f32 %v3594_v25, %v10046_v21  ;;  %v10047_v31 = vld [vmem:[#allocation174_spill] sm:$0xff]  ;;  %v10048_v32 = vld [vmem:[#allocation20_spill] sm:$0xff] }
 0x3f3   :  { %4096 = vst.msk [vmem:[#allocation9 + $0x348] sm:$0xff] %vm3990_vm3, %v3970_v4  ;;  %v3847_v13 = vmul.f32 0.5, %v3313_v8  ;;  %v3730_v56 = vadd.f32 %v3596_v33, %v10047_v31  ;;  %v5474_v4 = vpop.eup %5473  ;;  %v3731_v41 = vadd.f32 %v3598_v42, %v10048_v32  ;;  %v10055_v42 = vld [vmem:[#allocation150_spill] sm:$0xff] }
 0x3f4   :  { %v3973_v43 = vsub.f32 %v3723_v39, %v3848_v49  ;;  %v5476_v19 = vpop.eup %5475  ;;  %v3604_v15 = vmul.f32 0.6931472, %v5474_v4  ;;  %v3732_v49 = vadd.f32 %v3600_v5, %v10049_v22 }
 0x3f5   :  { %v3972_v27 = vsub.f32 %v3722_v38, %v3847_v13  ;;  %v3322_v14 = vpop.xlane.xlu0 %3321  ;;  %v5478_v2 = vpop.eup %5477 }
 0x3f6   :  { %v3319_v1 = vpop.xlane.xlu1 %3318  ;;  %4099 = vst.msk [vmem:[#allocation9 + $0x360] sm:$0xff] %vm3990_vm3, %v3973_v43  ;;  %v3850_v20 = vmul.f32 0.5, %v3322_v14  ;;  %v3606_v43 = vmul.f32 0.6931472, %v5476_v19  ;;  %v3608_v37 = vmul.f32 0.6931472, %v5478_v2 }
 0x3f7   :  { %4098 = vst.msk [vmem:[#allocation9 + $0x358] sm:$0xff] %vm3990_vm3, %v3972_v27  ;;  %v3849_v16 = vmul.f32 0.5, %v3319_v1  ;;  %v10050_v27 = vld [vmem:[#allocation118_spill] sm:$0xff] }
 0x3f8   :  { %v3975_v55 = vsub.f32 %v3725_v51, %v3850_v20  ;;  %v3733_v53 = vadd.f32 %v3602_v52, %v10050_v27  ;;  %v10051_v51 = vld [vmem:[#allocation123_spill] sm:$0xff] }
 0x3f9   :  { %v3974_v12 = vsub.f32 %v3724_v54, %v3849_v16  ;;  %v3328_v46 = vpop.xlane.xlu0 %3327  ;;  %v5480_v54 = vpop.eup %5479  ;;  %v3734_v20 = vadd.f32 %v3604_v15, %v10051_v51 }
 0x3fa   :  { %v3325_v61 = vpop.xlane.xlu1 %3324  ;;  %4101 = vst.msk [vmem:[#allocation9 + $0x370] sm:$0xff] %vm3990_vm3, %v3975_v55  ;;  %v3852_v11 = vmul.f32 0.5, %v3328_v46  ;;  %v5482_v57 = vpop.eup %5481  ;;  %v3610_v55 = vmul.f32 0.6931472, %v5480_v54 }
 0x3fb   :  { %4100 = vst.msk [vmem:[#allocation9 + $0x368] sm:$0xff] %vm3990_vm3, %v3974_v12  ;;  %v3851_v9 = vmul.f32 0.5, %v3325_v61  ;;  %v10052_v12 = vld [vmem:[#allocation121_spill] sm:$0xff]  ;;  %v3612_v25 = vmul.f32 0.6931472, %v5482_v57 }
 0x3fc   :  { %v3977_v62 = vsub.f32 %v3727_v63, %v3852_v11  ;;  %v3735_v28 = vadd.f32 %v3606_v43, %v10052_v12  ;;  %v10053_v63 = vld [vmem:[#allocation23_spill] sm:$0xff] }
 0x3fd   :  { %v3976_v3 = vsub.f32 %v3726_v60, %v3851_v9  ;;  %v3334_v29 = vpop.xlane.xlu0 %3333  ;;  %v5484_v60 = vpop.eup %5483  ;;  %v3736_v11 = vadd.f32 %v3608_v37, %v10053_v63 }
 0x3fe   :  { %v3331_v23 = vpop.xlane.xlu1 %3330  ;;  %4103 = vst.msk [vmem:[#allocation9 + $0x380] sm:$0xff] %vm3990_vm3, %v3977_v62  ;;  %v3854_v35 = vmul.f32 0.5, %v3334_v29  ;;  %v3614_v24 = vmul.f32 0.6931472, %v5484_v60  ;;  %v10054_v62 = vld [vmem:[#allocation207_spill] sm:$0xff] }
 0x3ff   :  { %4102 = vst.msk [vmem:[#allocation9 + $0x378] sm:$0xff] %vm3990_vm3, %v3976_v3  ;;  %v3853_v44 = vmul.f32 0.5, %v3331_v23  ;;  %v3737_v3 = vadd.f32 %v3610_v55, %v10054_v62 }
 0x400   :  { %v3979_v48 = vsub.f32 %v3729_v10, %v3854_v35  ;;  %v3739_v21 = vadd.f32 %v3614_v24, %v10055_v42  ;;  %v10056_v35 = vld [vmem:[#allocation136_spill] sm:$0xff] }
 0x401   :  { %v3978_v58 = vsub.f32 %v3728_v0, %v3853_v44  ;;  %v3340_v45 = vpop.xlane.xlu0 %3339  ;;  %v3738_v44 = vadd.f32 %v3612_v25, %v10056_v35 }
 0x402   :  { %v3337_v50 = vpop.xlane.xlu1 %3336  ;;  %4105 = vst.msk [vmem:[#allocation9 + $0x390] sm:$0xff] %vm3990_vm3, %v3979_v48  ;;  %v3856_v38 = vmul.f32 0.5, %v3340_v45 }
 0x403   :  { %4104 = vst.msk [vmem:[#allocation9 + $0x388] sm:$0xff] %vm3990_vm3, %v3978_v58  ;;  %v3855_v8 = vmul.f32 0.5, %v3337_v50 }
 0x404   :  { %v3981_v59 = vsub.f32 %v3731_v41, %v3856_v38 }
 0x405   :  { %v3980_v30 = vsub.f32 %v3730_v56, %v3855_v8  ;;  %v3346_v39 = vpop.xlane.xlu0 %3345 }
 0x406   :  { %v3343_v13 = vpop.xlane.xlu1 %3342  ;;  %4107 = vst.msk [vmem:[#allocation9 + $0x3a0] sm:$0xff] %vm3990_vm3, %v3981_v59  ;;  %v3858_v14 = vmul.f32 0.5, %v3346_v39 }
 0x407   :  { %4106 = vst.msk [vmem:[#allocation9 + $0x398] sm:$0xff] %vm3990_vm3, %v3980_v30  ;;  %v3857_v47 = vmul.f32 0.5, %v3343_v13 }
 0x408   :  { %v3983_v1 = vsub.f32 %v3733_v53, %v3858_v14 }
 0x409   :  { %v3982_v7 = vsub.f32 %v3732_v49, %v3857_v47  ;;  %v3352_v36 = vpop.xlane.xlu0 %3351 }
 0x40a   :  { %v3349_v16 = vpop.xlane.xlu1 %3348  ;;  %4109 = vst.msk [vmem:[#allocation9 + $0x3b0] sm:$0xff] %vm3990_vm3, %v3983_v1  ;;  %v3860_v46 = vmul.f32 0.5, %v3352_v36 }
 0x40b   :  { %4108 = vst.msk [vmem:[#allocation9 + $0x3a8] sm:$0xff] %vm3990_vm3, %v3982_v7  ;;  %v3859_v18 = vmul.f32 0.5, %v3349_v16 }
 0x40c   :  { %v3985_v61 = vsub.f32 %v3735_v28, %v3860_v46 }
 0x40d   :  { %v3984_v6 = vsub.f32 %v3734_v20, %v3859_v18  ;;  %v3358_v40 = vpop.xlane.xlu0 %3357 }
 0x40e   :  { %v3355_v9 = vpop.xlane.xlu1 %3354  ;;  %4111 = vst.msk [vmem:[#allocation9 + $0x3c0] sm:$0xff] %vm3990_vm3, %v3985_v61  ;;  %v3862_v33 = vmul.f32 0.5, %v3358_v40 }
 0x40f   :  { %4110 = vst.msk [vmem:[#allocation9 + $0x3b8] sm:$0xff] %vm3990_vm3, %v3984_v6  ;;  %v3861_v29 = vmul.f32 0.5, %v3355_v9 }
 0x410   :  { %v3987_v26 = vsub.f32 %v3737_v3, %v3862_v33 }
 0x411   :  { %v3986_v0 = vsub.f32 %v3736_v11, %v3861_v29  ;;  %v3364_v23 = vpop.xlane.xlu0 %3363 }
 0x412   :  { %v3361_v17 = vpop.xlane.xlu1 %3360  ;;  %4113 = vst.msk [vmem:[#allocation9 + $0x3d0] sm:$0xff] %vm3990_vm3, %v3987_v26  ;;  %v3864_v10 = vmul.f32 0.5, %v3364_v23 }
 0x413   :  { %4112 = vst.msk [vmem:[#allocation9 + $0x3c8] sm:$0xff] %vm3990_vm3, %v3986_v0  ;;  %v3863_v34 = vmul.f32 0.5, %v3361_v17 }
 0x414   :  { %v3989_v48 = vsub.f32 %v3739_v21, %v3864_v10 }
 0x415   :  { %v3988_v58 = vsub.f32 %v3738_v44, %v3863_v34 }
 0x416   :  { %4115 = vst.msk [vmem:[#allocation9 + $0x3e0] sm:$0xff] %vm3990_vm3, %v3989_v48 }
 0x417   :  { %4114 = vst.msk [vmem:[#allocation9 + $0x3d8] sm:$0xff] %vm3990_vm3, %v3988_v58 }
 0x418   :  { %5615 = shalt.err (!%p5612_p8)
}
 0x419   :  { %s5616_s16 = scalar_lea.hbm %s8949_s4, 16000 }
 0x41a   :  { %p5617_p9 = scmp.ne.s32.totalorder %s8949_s4, %s5616_s16  ;;  %p5620_p10 = scmp.lt.u32.totalorder %s5616_s16, %s8949_s4 }
 0x41c   :  { %p5622_p11 = pnand %p5620_p10, %p5617_p9 }
 0x41e   :  { %5625 = shalt.err (!%p5622_p11)
}
 0x41f   :  { %4139 = dma.vmem_to_hbm [thread:$0]  %s4134_s1, 16000, %s8949_s4, [#allocation10], %s5642_s9, %s5642_s9, %s5643_s10  }
 0x420   :  { %5630 = dma.done.wait [#allocation4], 16000  }
 0x421   :  { %5631 = vsyncadd [#allocation4], 4294951296 }
 0x422   :  { %5632 = dma.done.wait [#allocation10], 16000  }
 0x423   :  { %5633 = vsyncadd [#allocation10], 4294951296 }
 0x424   :  { %4146 = vsyncpa [#allocation3], 1 }
 0x425   :  { %4147 = vsyncpa [#allocation6], 1 }
 0x426   :  { %4148 = vsyncpa [#allocation4], 1 }
 0x427   :  { %4149 = vsyncpa [#allocation10], 1 }

</bundles_post_ra>
